<compile_context>
chip_gen: v6e
topology: v6e:2x2x1
jax: 0.10.0
libtpu: 0.0.40
codegen_flags: <defaults>
</compile_context>

<pallas_src>
import math

import numpy as np
import jax
import jax.numpy as jnp
from jax.experimental import pallas as pl
from jax.experimental.pallas import tpu as pltpu


# ----------------------------- fused block kernel -----------------------------

def _make_block_kernel(H, W, Cin, Cout, relu1_in, downsample, head):
    """One residual block fused into a single kernel. One grid step = one
    batch element / RoI box.  head in {None, "im", "obj"}."""
    Ho, Wo = (H // 2, W // 2) if downsample else (H, W)

    def conv3x3(a3d, pad_ref, col_ref, w_ref, b_ref, C):
        # Zero-pad into VMEM scratch (padding fused in-kernel, no HBM round trip).
        pad_ref[...] = jnp.zeros((H + 2, W + 2, C), jnp.bfloat16)
        pad_ref[1:H + 1, 1:W + 1, :] = a3d
        # im2col: pack the 9 taps along the contraction dim -> K = 9*C.
        for dy in range(3):
            for dx in range(3):
                t = dy * 3 + dx
                col_ref[:, t * C:(t + 1) * C] = (
                    pad_ref[dy:dy + H, dx:dx + W, :].reshape(H * W, C))
        # Single MXU matmul, bf16 inputs, f32 accumulation.
        out = jax.lax.dot_general(
            col_ref[...], w_ref[...],
            dimension_numbers=(((1,), (0,)), ((), ())),
            preferred_element_type=jnp.float32)
        return out + b_ref[...]

    def kernel(*refs):
        it = iter(refs)
        x_ref = next(it)
        w1_ref, b1_ref = next(it), next(it)
        w2_ref, b2_ref = next(it), next(it)
        wsc_ref, bsc_ref = next(it), next(it)
        pool_ref = next(it) if downsample else None
        emb_ref = next(it) if head == "obj" else None
        wh_ref = next(it) if head is not None else None
        bh_ref = next(it) if head is not None else None
        o_ref = next(it)
        pad1_ref, col1_ref, pad2_ref, col2_ref = (next(it), next(it),
                                                  next(it), next(it))

        x2d = x_ref[0]                                   # (H*W, Cin) bf16
        x3d = x2d.reshape(H, W, Cin)

        # Residual branch.  ResBlock: relu before conv1; OptimizedBlock: not.
        a1 = jnp.maximum(x3d, 0) if relu1_in else x3d
        h = conv3x3(a1, pad1_ref, col1_ref, w1_ref, b1_ref, Cin)   # (H*W, Cout) f32
        # relu before conv2 in both block types.
        a2 = jnp.maximum(h, 0.0).astype(jnp.bfloat16).reshape(H, W, Cout)
        h = conv3x3(a2, pad2_ref, col2_ref, w2_ref, b2_ref, Cout)

        # Learnable 1x1 shortcut on the raw input (no relu), fused in.
        sc = jax.lax.dot_general(
            x2d, wsc_ref[...],
            dimension_numbers=(((1,), (0,)), ((), ())),
            preferred_element_type=jnp.float32) + bsc_ref[...]

        s = h + sc                                       # (H*W, Cout) f32

        if downsample:
            # avg_pool2d(residual) + avg_pool2d(shortcut) == avg_pool2d(sum):
            # one MXU matmul against a 0/1 pooling matrix, then * 0.25.
            s = jax.lax.dot_general(
                pool_ref[...], s,
                dimension_numbers=(((1,), (0,)), ((), ())),
                preferred_element_type=jnp.float32) * 0.25   # (Ho*Wo, Cout)

        if head is None:
            # Contiguous (Ho*Wo, Cout) slab, straight from the matmul output.
            o_ref[0] = s.astype(o_ref.dtype)
        else:
            r = jnp.maximum(s, 0.0)
            red = jnp.sum(r, axis=0, keepdims=True)      # (1, Cout) spatial sum
            if head == "im":
                red = red * (1.0 / float(Ho * Wo))       # spatial mean
            out = jnp.sum(red * wh_ref[...], axis=1, keepdims=True) + bh_ref[...]
            if head == "obj":
                out = out + jnp.sum(emb_ref[0] * red, axis=1, keepdims=True)
            o_ref[0] = out.astype(o_ref.dtype)

    return kernel


def _pool_matrix(H, W):
    # 0/1 matrix P with P[pooled_pixel, source_pixel]=1; pooled = 0.25 * P @ x.
    Ho, Wo = H // 2, W // 2
    P = np.zeros((Ho * Wo, H * W), np.float32)
    for i in range(Ho):
        for j in range(Wo):
            r = i * Wo + j
            for di in (0, 1):
                for dj in (0, 1):
                    P[r, (2 * i + di) * W + (2 * j + dj)] = 1.0
    return jnp.asarray(P)


def fused_block(x, p, *, H, W, relu1_in, downsample,
                head=None, head_params=None, emb=None):
    """x: (N, H*W, Cin) bf16. Returns (N, Ho*Wo, Cout) bf16, or (N, 1, 1) f32
    when a head is fused in."""
    N = x.shape[0]
    Cin, Cout = p['wsc'].shape
    Ho, Wo = (H // 2, W // 2) if downsample else (H, W)
    kern = _make_block_kernel(H, W, Cin, Cout, relu1_in, downsample, head)

    inputs = [x, p['w1'], p['b1'], p['w2'], p['b2'], p['wsc'], p['bsc']]
    in_specs = [
        pl.BlockSpec((1, H * W, Cin), lambda n: (n, 0, 0)),
        pl.BlockSpec((9 * Cin, Cout), lambda n: (0, 0)),
        pl.BlockSpec((1, Cout), lambda n: (0, 0)),
        pl.BlockSpec((9 * Cout, Cout), lambda n: (0, 0)),
        pl.BlockSpec((1, Cout), lambda n: (0, 0)),
        pl.BlockSpec((Cin, Cout), lambda n: (0, 0)),
        pl.BlockSpec((1, Cout), lambda n: (0, 0)),
    ]
    if downsample:
        inputs.append(_pool_matrix(H, W))
        in_specs.append(pl.BlockSpec((Ho * Wo, H * W), lambda n: (0, 0)))
    if head == "obj":
        inputs.append(emb.reshape(N, 1, Cout))
        in_specs.append(pl.BlockSpec((1, 1, Cout), lambda n: (n, 0, 0)))
    if head is not None:
        wh, bh = head_params
        inputs += [wh, bh]
        in_specs += [pl.BlockSpec((1, Cout), lambda n: (0, 0)),
                     pl.BlockSpec((1, 1), lambda n: (0, 0))]
        out_shape = jax.ShapeDtypeStruct((N, 1, 1), jnp.float32)
        out_spec = pl.BlockSpec((1, 1, 1), lambda n: (n, 0, 0))
    else:
        out_shape = jax.ShapeDtypeStruct((N, Ho * Wo, Cout), jnp.bfloat16)
        out_spec = pl.BlockSpec((1, Ho * Wo, Cout), lambda n: (n, 0, 0))

    scratch_shapes = [
        pltpu.VMEM((H + 2, W + 2, Cin), jnp.bfloat16),    # padded conv1 input
        pltpu.VMEM((H * W, 9 * Cin), jnp.bfloat16),       # conv1 im2col
        pltpu.VMEM((H + 2, W + 2, Cout), jnp.bfloat16),   # padded conv2 input
        pltpu.VMEM((H * W, 9 * Cout), jnp.bfloat16),      # conv2 im2col
    ]

    return pl.pallas_call(
        kern,
        out_shape=out_shape,
        grid=(N,),
        in_specs=in_specs,
        out_specs=out_spec,
        scratch_shapes=scratch_shapes,
        compiler_params=pltpu.CompilerParams(
            dimension_semantics=("parallel",)),
    )(*inputs)


# ------------------------------- RoIAlign glue --------------------------------

def _bilinear_coords(v, size):
    # torchvision bilinear_interpolate boundary handling (aligned=False).
    valid = (v >= -1.0) & (v <= float(size))
    v = np.clip(v, 0.0, None)
    low = v.astype(np.int64)
    high = low + 1
    at_edge = low >= size - 1
    low = np.where(at_edge, size - 1, low)
    high = np.where(at_edge, size - 1, high)
    v = np.where(at_edge, float(size - 1), v)
    frac = (v - low).astype(np.float32)
    return valid, low, high, frac


def roi_align_nhwc(feat, boxes_np, out_size=8, spatial_scale=0.5):
    # torchvision RoIAlign((8,8), 0.5, sampling_ratio=0, aligned=False), NHWC feat.
    # TODO(synk): data-dependent adaptive sampling grid keeps the coordinate /
    # weight tables on host; the gathers and weighted sums run on device in JAX.
    N, H, W, C = feat.shape
    outs = []
    for k in range(boxes_np.shape[0]):
        bidx = int(boxes_np[k, 0])
        x1 = float(boxes_np[k, 1]) * spatial_scale
        y1 = float(boxes_np[k, 2]) * spatial_scale
        x2 = float(boxes_np[k, 3]) * spatial_scale
        y2 = float(boxes_np[k, 4]) * spatial_scale
        roi_w = max(x2 - x1, 1.0)
        roi_h = max(y2 - y1, 1.0)
        bin_w = roi_w / out_size
        bin_h = roi_h / out_size
        grid_w = int(math.ceil(roi_w / out_size))
        grid_h = int(math.ceil(roi_h / out_size))
        iy = (np.arange(grid_h) + 0.5) * bin_h / grid_h
        ix = (np.arange(grid_w) + 0.5) * bin_w / grid_w
        ys = (y1 + np.arange(out_size)[:, None] * bin_h + iy[None, :]).reshape(-1)
        xs = (x1 + np.arange(out_size)[:, None] * bin_w + ix[None, :]).reshape(-1)

        vy, ylo, yhi, ly = _bilinear_coords(ys, H)
        vx, xlo, xhi, lx = _bilinear_coords(xs, W)
        hy, hx = (1.0 - ly).astype(np.float32), (1.0 - lx).astype(np.float32)

        fm = feat[bidx]                              # (H, W, C) device array
        fm_lo = fm[ylo]                              # gathers stay on device
        fm_hi = fm[yhi]
        val = (hy[:, None, None] * hx[None, :, None] * fm_lo[:, xlo]
               + hy[:, None, None] * lx[None, :, None] * fm_lo[:, xhi]
               + ly[:, None, None] * hx[None, :, None] * fm_hi[:, xlo]
               + ly[:, None, None] * lx[None, :, None] * fm_hi[:, xhi])
        mask = (vy[:, None] & vx[None, :]).astype(np.float32)
        val = val * jnp.asarray(mask)[:, :, None]
        val = val.reshape(out_size, grid_h, out_size, grid_w, C).mean(axis=(1, 3))
        outs.append(val)
    return jnp.stack(outs, axis=0)                   # (K, out, out, C)


# ----------------------------- parameter setup ---------------------------------

def _orthogonal(key, shape):
    flat = (shape[0], int(np.prod(shape[1:])))
    w = jax.nn.initializers.orthogonal()(key, flat, jnp.float32)
    return np.asarray(w).reshape(shape)


def _spectral_norm(w):
    w2d = w.reshape(w.shape[0], -1)
    sigma = np.linalg.svd(w2d, compute_uv=False)[0]
    return w / sigma


def _conv3x3_packed(key, cin, cout):
    w = _spectral_norm(_orthogonal(key, (cout, cin, 3, 3)))        # PyTorch layout
    wk = np.transpose(w, (2, 3, 1, 0)).reshape(9 * cin, cout)      # (9*cin, cout)
    return jnp.asarray(wk, jnp.bfloat16), jnp.zeros((1, cout), jnp.float32)


def _conv1x1_packed(key, cin, cout):
    w = _spectral_norm(_orthogonal(key, (cout, cin, 1, 1)))
    wk = np.ascontiguousarray(w[:, :, 0, 0].T)                      # (cin, cout)
    return jnp.asarray(wk, jnp.bfloat16), jnp.zeros((1, cout), jnp.float32)


def _resblock_params(key, cin, cout):
    k1, k2, k3 = jax.random.split(key, 3)
    w1, b1 = _conv3x3_packed(k1, cin, cout)
    w2, b2 = _conv3x3_packed(k2, cout, cout)
    wsc, bsc = _conv1x1_packed(k3, cin, cout)
    return dict(w1=w1, b1=b1, w2=w2, b2=b2, wsc=wsc, bsc=bsc)


def init_params(key, ch=8, input_dim=3, num_classes=10):
    ks = jax.random.split(key, 9)
    params = {
        'block1':     _resblock_params(ks[0], input_dim, ch),
        'block2':     _resblock_params(ks[1], ch,        ch * 2),
        'block3':     _resblock_params(ks[2], ch * 2,    ch * 4),
        'block4':     _resblock_params(ks[3], ch * 4,    ch * 8),
        'block5':     _resblock_params(ks[4], ch * 8,    ch * 16),
        'block_obj4': _resblock_params(ks[5], ch * 4,    ch * 8),
    }
    w_im = _spectral_norm(_orthogonal(ks[6], (1, ch * 16)))
    params['w_im'] = jnp.asarray(w_im, jnp.float32)                # (1, ch*16)
    params['b_im'] = jnp.zeros((1, 1), jnp.float32)
    w_obj = _spectral_norm(_orthogonal(ks[7], (1, ch * 8)))
    params['w_obj'] = jnp.asarray(w_obj, jnp.float32)              # (1, ch*8)
    params['b_obj'] = jnp.zeros((1, 1), jnp.float32)
    params['emb'] = jnp.asarray(
        _spectral_norm(_orthogonal(ks[8], (num_classes, ch * 8))), jnp.float32)
    return params


# ------------------------------ forward pass -----------------------------------

def discriminator_forward(params, x_nchw, y, bbox_np):
    N, Cimg, Hin, Win = x_nchw.shape
    # NCHW -> contiguous (N, H*W, C) bf16 slabs.
    x = jnp.transpose(x_nchw, (0, 2, 3, 1)).reshape(N, Hin * Win, Cimg)
    x = x.astype(jnp.bfloat16)

    # block1 = OptimizedBlock(downsample=False): conv1 -> relu -> conv2, + c_sc(x)
    x = fused_block(x, params['block1'], H=Hin, W=Win,
                    relu1_in=False, downsample=False)
    x = fused_block(x, params['block2'], H=Hin, W=Win,
                    relu1_in=True, downsample=False)
    x1 = fused_block(x, params['block3'], H=Hin, W=Win,
                     relu1_in=True, downsample=True)         # (N, (H/2)*(W/2), 4ch)
    H2, W2 = Hin // 2, Win // 2
    x = fused_block(x1, params['block4'], H=H2, W=W2,
                    relu1_in=True, downsample=True)          # (N, (H/4)*(W/4), 8ch)
    # block5 with the image head fused in: relu -> spatial mean -> Linear(ch*16,1)
    out_im = fused_block(x, params['block5'], H=H2 // 2, W=W2 // 2,
                         relu1_in=True, downsample=True,
                         head="im",
                         head_params=(params['w_im'], params['b_im']))
    out_im = out_im.reshape(N, 1)

    # Object branch: RoIAlign on the block3 feature map (glue), then one fused
    # block_obj4 + object head kernel over the boxes.
    C3 = params['block3']['wsc'].shape[1]
    x1_4d = x1.reshape(N, H2, W2, C3).astype(jnp.float32)
    obj_feat = roi_align_nhwc(x1_4d, bbox_np, out_size=8, spatial_scale=0.5)
    K = bbox_np.shape[0]
    obj_feat = obj_feat.reshape(K, 8 * 8, C3).astype(jnp.bfloat16)
    emb = params['emb'][y]                                   # (K, ch*8) gather
    out_obj = fused_block(obj_feat, params['block_obj4'], H=8, W=8,
                          relu1_in=True, downsample=True,
                          head="obj",
                          head_params=(params['w_obj'], params['b_obj']),
                          emb=emb)
    out_obj = out_obj.reshape(K, 1)
    return out_im, out_obj


# ---------------------------------- main ----------------------------------------

if __name__ == "__main__":
    ch = 8              # scaled-down from 64
    num_classes = 10
    input_dim = 3
    N, Hin, Win = 2, 16, 16

    root = jax.random.PRNGKey(0)
    k_params, k_x = jax.random.split(root)
    params = init_params(k_params, ch=ch, input_dim=input_dim,
                         num_classes=num_classes)

    x = jax.random.normal(k_x, (N, input_dim, Hin, Win), jnp.float32)  # NCHW
    y = jnp.array([1, 3], dtype=jnp.int32)
    bbox = np.array([[0, 0.0, 0.0, 16.0, 16.0],
                     [1, 2.0, 3.0, 15.0, 13.0]], dtype=np.float32)     # (K,5)

    out_im, out_obj = discriminator_forward(params, x, y, bbox)
    jax.block_until_ready((out_im, out_obj))
    assert out_im.shape == (N, 1)
    assert out_obj.shape == (bbox.shape[0], 1)
    assert np.all(np.isfinite(np.asarray(out_im)))
    assert np.all(np.isfinite(np.asarray(out_obj)))
    print("KERNEL_OK")
</pallas_src>

<mosaic_0001>
module attributes {stable_mosaic.version = 11 : i64} {
  func.func @kernel(%arg0: i32, %arg1: memref<1x256x3xbf16, #tpu.memory_space<vmem>>, %arg2: memref<27x8xbf16, #tpu.memory_space<vmem>>, %arg3: memref<1x8xf32, #tpu.memory_space<vmem>>, %arg4: memref<72x8xbf16, #tpu.memory_space<vmem>>, %arg5: memref<1x8xf32, #tpu.memory_space<vmem>>, %arg6: memref<3x8xbf16, #tpu.memory_space<vmem>>, %arg7: memref<1x8xf32, #tpu.memory_space<vmem>>, %arg8: memref<1x256x8xbf16, #tpu.memory_space<vmem>>, %arg9: memref<18x18x3xbf16, #tpu.memory_space<vmem>>, %arg10: memref<256x27xbf16, #tpu.memory_space<vmem>>, %arg11: memref<18x18x8xbf16, #tpu.memory_space<vmem>>, %arg12: memref<256x72xbf16, #tpu.memory_space<vmem>>) attributes {dimension_semantics = [#tpu.dimension_semantics<parallel>], iteration_bounds = array<i64: 2>, scalar_prefetch = 0 : i64, scratch_operands = 4 : i64, tpu.core_type = #tpu.core_type<tc>, window_params = [{transform_indices = @transform_0, window_bounds = array<i64: 1, 256, 3>}, {pipeline_mode = #tpu.pipeline_mode<synchronous>, transform_indices = @transform_1, window_bounds = array<i64: 27, 8>}, {pipeline_mode = #tpu.pipeline_mode<synchronous>, transform_indices = @transform_2, window_bounds = array<i64: 1, 8>}, {pipeline_mode = #tpu.pipeline_mode<synchronous>, transform_indices = @transform_3, window_bounds = array<i64: 72, 8>}, {pipeline_mode = #tpu.pipeline_mode<synchronous>, transform_indices = @transform_4, window_bounds = array<i64: 1, 8>}, {pipeline_mode = #tpu.pipeline_mode<synchronous>, transform_indices = @transform_5, window_bounds = array<i64: 3, 8>}, {pipeline_mode = #tpu.pipeline_mode<synchronous>, transform_indices = @transform_6, window_bounds = array<i64: 1, 8>}, {transform_indices = @transform_7, window_bounds = array<i64: 1, 256, 8>}]} {
    %c0 = arith.constant 0 : index
    %c0_0 = arith.constant 0 : index
    %c0_1 = arith.constant 0 : index
    %0 = vector.load %arg1[%c0, %c0_0, %c0_1] : memref<1x256x3xbf16, #tpu.memory_space<vmem>>, vector<1x256x3xbf16>
    %1 = vector.shape_cast %0 : vector<1x256x3xbf16> to vector<256x3xbf16>
    %2 = vector.shape_cast %1 : vector<256x3xbf16> to vector<16x16x3xbf16>
    %cst = arith.constant 0.000000e+00 : bf16
    %3 = vector.broadcast %cst : bf16 to vector<18x18x3xbf16>
    %c0_2 = arith.constant 0 : index
    %c0_3 = arith.constant 0 : index
    %c0_4 = arith.constant 0 : index
    %4 = vector.load %arg9[%c0_2, %c0_3, %c0_4] : memref<18x18x3xbf16, #tpu.memory_space<vmem>>, vector<18x18x3xbf16>
    tpu.vector_store %arg9[%c0_2, %c0_3, %c0_4], %3 {strides = array<i32>} : memref<18x18x3xbf16, #tpu.memory_space<vmem>>, vector<18x18x3xbf16>,
    %c1 = arith.constant 1 : index
    %c1_5 = arith.constant 1 : index
    %c0_6 = arith.constant 0 : index
    %5 = vector.load %arg9[%c1, %c1_5, %c0_6] : memref<18x18x3xbf16, #tpu.memory_space<vmem>>, vector<16x16x3xbf16>
    tpu.vector_store %arg9[%c1, %c1_5, %c0_6], %2 {strides = array<i32>} : memref<18x18x3xbf16, #tpu.memory_space<vmem>>, vector<16x16x3xbf16>,
    %c0_7 = arith.constant 0 : index
    %c0_8 = arith.constant 0 : index
    %c0_9 = arith.constant 0 : index
    %6 = vector.load %arg9[%c0_7, %c0_8, %c0_9] : memref<18x18x3xbf16, #tpu.memory_space<vmem>>, vector<16x16x3xbf16>
    %7 = vector.shape_cast %6 : vector<16x16x3xbf16> to vector<256x3xbf16>
    %c0_10 = arith.constant 0 : index
    %c0_11 = arith.constant 0 : index
    %8 = vector.load %arg10[%c0_10, %c0_11] : memref<256x27xbf16, #tpu.memory_space<vmem>>, vector<256x3xbf16>
    tpu.vector_store %arg10[%c0_10, %c0_11], %7 {strides = array<i32>} : memref<256x27xbf16, #tpu.memory_space<vmem>>, vector<256x3xbf16>,
    %c0_12 = arith.constant 0 : index
    %c1_13 = arith.constant 1 : index
    %c0_14 = arith.constant 0 : index
    %9 = vector.load %arg9[%c0_12, %c1_13, %c0_14] : memref<18x18x3xbf16, #tpu.memory_space<vmem>>, vector<16x16x3xbf16>
    %10 = vector.shape_cast %9 : vector<16x16x3xbf16> to vector<256x3xbf16>
    %c0_15 = arith.constant 0 : index
    %c3 = arith.constant 3 : index
    %11 = vector.load %arg10[%c0_15, %c3] : memref<256x27xbf16, #tpu.memory_space<vmem>>, vector<256x3xbf16>
    tpu.vector_store %arg10[%c0_15, %c3], %10 {strides = array<i32>} : memref<256x27xbf16, #tpu.memory_space<vmem>>, vector<256x3xbf16>,
    %c0_16 = arith.constant 0 : index
    %c2 = arith.constant 2 : index
    %c0_17 = arith.constant 0 : index
    %12 = vector.load %arg9[%c0_16, %c2, %c0_17] : memref<18x18x3xbf16, #tpu.memory_space<vmem>>, vector<16x16x3xbf16>
    %13 = vector.shape_cast %12 : vector<16x16x3xbf16> to vector<256x3xbf16>
    %c0_18 = arith.constant 0 : index
    %c6 = arith.constant 6 : index
    %14 = vector.load %arg10[%c0_18, %c6] : memref<256x27xbf16, #tpu.memory_space<vmem>>, vector<256x3xbf16>
    tpu.vector_store %arg10[%c0_18, %c6], %13 {strides = array<i32>} : memref<256x27xbf16, #tpu.memory_space<vmem>>, vector<256x3xbf16>,
    %c1_19 = arith.constant 1 : index
    %c0_20 = arith.constant 0 : index
    %c0_21 = arith.constant 0 : index
    %15 = vector.load %arg9[%c1_19, %c0_20, %c0_21] : memref<18x18x3xbf16, #tpu.memory_space<vmem>>, vector<16x16x3xbf16>
    %16 = vector.shape_cast %15 : vector<16x16x3xbf16> to vector<256x3xbf16>
    %c0_22 = arith.constant 0 : index
    %c9 = arith.constant 9 : index
    %17 = vector.load %arg10[%c0_22, %c9] : memref<256x27xbf16, #tpu.memory_space<vmem>>, vector<256x3xbf16>
    tpu.vector_store %arg10[%c0_22, %c9], %16 {strides = array<i32>} : memref<256x27xbf16, #tpu.memory_space<vmem>>, vector<256x3xbf16>,
    %c1_23 = arith.constant 1 : index
    %c1_24 = arith.constant 1 : index
    %c0_25 = arith.constant 0 : index
    %18 = vector.load %arg9[%c1_23, %c1_24, %c0_25] : memref<18x18x3xbf16, #tpu.memory_space<vmem>>, vector<16x16x3xbf16>
    %19 = vector.shape_cast %18 : vector<16x16x3xbf16> to vector<256x3xbf16>
    %c0_26 = arith.constant 0 : index
    %c12 = arith.constant 12 : index
    %20 = vector.load %arg10[%c0_26, %c12] : memref<256x27xbf16, #tpu.memory_space<vmem>>, vector<256x3xbf16>
    tpu.vector_store %arg10[%c0_26, %c12], %19 {strides = array<i32>} : memref<256x27xbf16, #tpu.memory_space<vmem>>, vector<256x3xbf16>,
    %c1_27 = arith.constant 1 : index
    %c2_28 = arith.constant 2 : index
    %c0_29 = arith.constant 0 : index
    %21 = vector.load %arg9[%c1_27, %c2_28, %c0_29] : memref<18x18x3xbf16, #tpu.memory_space<vmem>>, vector<16x16x3xbf16>
    %22 = vector.shape_cast %21 : vector<16x16x3xbf16> to vector<256x3xbf16>
    %c0_30 = arith.constant 0 : index
    %c15 = arith.constant 15 : index
    %23 = vector.load %arg10[%c0_30, %c15] : memref<256x27xbf16, #tpu.memory_space<vmem>>, vector<256x3xbf16>
    tpu.vector_store %arg10[%c0_30, %c15], %22 {strides = array<i32>} : memref<256x27xbf16, #tpu.memory_space<vmem>>, vector<256x3xbf16>,
    %c2_31 = arith.constant 2 : index
    %c0_32 = arith.constant 0 : index
    %c0_33 = arith.constant 0 : index
    %24 = vector.load %arg9[%c2_31, %c0_32, %c0_33] : memref<18x18x3xbf16, #tpu.memory_space<vmem>>, vector<16x16x3xbf16>
    %25 = vector.shape_cast %24 : vector<16x16x3xbf16> to vector<256x3xbf16>
    %c0_34 = arith.constant 0 : index
    %c18 = arith.constant 18 : index
    %26 = vector.load %arg10[%c0_34, %c18] : memref<256x27xbf16, #tpu.memory_space<vmem>>, vector<256x3xbf16>
    tpu.vector_store %arg10[%c0_34, %c18], %25 {strides = array<i32>} : memref<256x27xbf16, #tpu.memory_space<vmem>>, vector<256x3xbf16>,
    %c2_35 = arith.constant 2 : index
    %c1_36 = arith.constant 1 : index
    %c0_37 = arith.constant 0 : index
    %27 = vector.load %arg9[%c2_35, %c1_36, %c0_37] : memref<18x18x3xbf16, #tpu.memory_space<vmem>>, vector<16x16x3xbf16>
    %28 = vector.shape_cast %27 : vector<16x16x3xbf16> to vector<256x3xbf16>
    %c0_38 = arith.constant 0 : index
    %c21 = arith.constant 21 : index
    %29 = vector.load %arg10[%c0_38, %c21] : memref<256x27xbf16, #tpu.memory_space<vmem>>, vector<256x3xbf16>
    tpu.vector_store %arg10[%c0_38, %c21], %28 {strides = array<i32>} : memref<256x27xbf16, #tpu.memory_space<vmem>>, vector<256x3xbf16>,
    %c2_39 = arith.constant 2 : index
    %c2_40 = arith.constant 2 : index
    %c0_41 = arith.constant 0 : index
    %30 = vector.load %arg9[%c2_39, %c2_40, %c0_41] : memref<18x18x3xbf16, #tpu.memory_space<vmem>>, vector<16x16x3xbf16>
    %31 = vector.shape_cast %30 : vector<16x16x3xbf16> to vector<256x3xbf16>
    %c0_42 = arith.constant 0 : index
    %c24 = arith.constant 24 : index
    %32 = vector.load %arg10[%c0_42, %c24] : memref<256x27xbf16, #tpu.memory_space<vmem>>, vector<256x3xbf16>
    tpu.vector_store %arg10[%c0_42, %c24], %31 {strides = array<i32>} : memref<256x27xbf16, #tpu.memory_space<vmem>>, vector<256x3xbf16>,
    %c0_43 = arith.constant 0 : index
    %c0_44 = arith.constant 0 : index
    %33 = vector.load %arg10[%c0_43, %c0_44] : memref<256x27xbf16, #tpu.memory_space<vmem>>, vector<256x27xbf16>
    %c0_45 = arith.constant 0 : index
    %c0_46 = arith.constant 0 : index
    %34 = vector.load %arg2[%c0_45, %c0_46] : memref<27x8xbf16, #tpu.memory_space<vmem>>, vector<27x8xbf16>
    %cst_47 = arith.constant dense<0.000000e+00> : vector<256x8xf32>
    %35 = tpu.matmul %33, %34, %cst_47 {dimension_numbers = #tpu.dot_dimension_numbers<[1], [0], [0], [1], [0, 0, 1, 1], [], []>} : vector<256x27xbf16>, vector<27x8xbf16>, vector<256x8xf32> -> vector<256x8xf32>
    %c0_48 = arith.constant 0 : index
    %c0_49 = arith.constant 0 : index
    %36 = vector.load %arg3[%c0_48, %c0_49] : memref<1x8xf32, #tpu.memory_space<vmem>>, vector<1x8xf32>
    %37 = vector.broadcast %36 : vector<1x8xf32> to vector<256x8xf32>
    %38 = arith.addf %35, %37 : vector<256x8xf32>
    %cst_50 = arith.constant 0.000000e+00 : f32
    %39 = vector.broadcast %cst_50 : f32 to vector<256x8xf32>
    %40 = arith.maximumf %38, %39 : vector<256x8xf32>
    %41 = arith.truncf %40 : vector<256x8xf32> to vector<256x8xbf16>
    %42 = vector.shape_cast %41 : vector<256x8xbf16> to vector<16x16x8xbf16>
    %cst_51 = arith.constant 0.000000e+00 : bf16
    %43 = vector.broadcast %cst_51 : bf16 to vector<18x18x8xbf16>
    %c0_52 = arith.constant 0 : index
    %c0_53 = arith.constant 0 : index
    %c0_54 = arith.constant 0 : index
    %44 = vector.load %arg11[%c0_52, %c0_53, %c0_54] : memref<18x18x8xbf16, #tpu.memory_space<vmem>>, vector<18x18x8xbf16>
    tpu.vector_store %arg11[%c0_52, %c0_53, %c0_54], %43 {strides = array<i32>} : memref<18x18x8xbf16, #tpu.memory_space<vmem>>, vector<18x18x8xbf16>,
    %c1_55 = arith.constant 1 : index
    %c1_56 = arith.constant 1 : index
    %c0_57 = arith.constant 0 : index
    %45 = vector.load %arg11[%c1_55, %c1_56, %c0_57] : memref<18x18x8xbf16, #tpu.memory_space<vmem>>, vector<16x16x8xbf16>
    tpu.vector_store %arg11[%c1_55, %c1_56, %c0_57], %42 {strides = array<i32>} : memref<18x18x8xbf16, #tpu.memory_space<vmem>>, vector<16x16x8xbf16>,
    %c0_58 = arith.constant 0 : index
    %c0_59 = arith.constant 0 : index
    %c0_60 = arith.constant 0 : index
    %46 = vector.load %arg11[%c0_58, %c0_59, %c0_60] : memref<18x18x8xbf16, #tpu.memory_space<vmem>>, vector<16x16x8xbf16>
    %47 = vector.shape_cast %46 : vector<16x16x8xbf16> to vector<256x8xbf16>
    %c0_61 = arith.constant 0 : index
    %c0_62 = arith.constant 0 : index
    %48 = vector.load %arg12[%c0_61, %c0_62] : memref<256x72xbf16, #tpu.memory_space<vmem>>, vector<256x8xbf16>
    tpu.vector_store %arg12[%c0_61, %c0_62], %47 {strides = array<i32>} : memref<256x72xbf16, #tpu.memory_space<vmem>>, vector<256x8xbf16>,
    %c0_63 = arith.constant 0 : index
    %c1_64 = arith.constant 1 : index
    %c0_65 = arith.constant 0 : index
    %49 = vector.load %arg11[%c0_63, %c1_64, %c0_65] : memref<18x18x8xbf16, #tpu.memory_space<vmem>>, vector<16x16x8xbf16>
    %50 = vector.shape_cast %49 : vector<16x16x8xbf16> to vector<256x8xbf16>
    %c0_66 = arith.constant 0 : index
    %c8 = arith.constant 8 : index
    %51 = vector.load %arg12[%c0_66, %c8] : memref<256x72xbf16, #tpu.memory_space<vmem>>, vector<256x8xbf16>
    tpu.vector_store %arg12[%c0_66, %c8], %50 {strides = array<i32>} : memref<256x72xbf16, #tpu.memory_space<vmem>>, vector<256x8xbf16>,
    %c0_67 = arith.constant 0 : index
    %c2_68 = arith.constant 2 : index
    %c0_69 = arith.constant 0 : index
    %52 = vector.load %arg11[%c0_67, %c2_68, %c0_69] : memref<18x18x8xbf16, #tpu.memory_space<vmem>>, vector<16x16x8xbf16>
    %53 = vector.shape_cast %52 : vector<16x16x8xbf16> to vector<256x8xbf16>
    %c0_70 = arith.constant 0 : index
    %c16 = arith.constant 16 : index
    %54 = vector.load %arg12[%c0_70, %c16] : memref<256x72xbf16, #tpu.memory_space<vmem>>, vector<256x8xbf16>
    tpu.vector_store %arg12[%c0_70, %c16], %53 {strides = array<i32>} : memref<256x72xbf16, #tpu.memory_space<vmem>>, vector<256x8xbf16>,
    %c1_71 = arith.constant 1 : index
    %c0_72 = arith.constant 0 : index
    %c0_73 = arith.constant 0 : index
    %55 = vector.load %arg11[%c1_71, %c0_72, %c0_73] : memref<18x18x8xbf16, #tpu.memory_space<vmem>>, vector<16x16x8xbf16>
    %56 = vector.shape_cast %55 : vector<16x16x8xbf16> to vector<256x8xbf16>
    %c0_74 = arith.constant 0 : index
    %c24_75 = arith.constant 24 : index
    %57 = vector.load %arg12[%c0_74, %c24_75] : memref<256x72xbf16, #tpu.memory_space<vmem>>, vector<256x8xbf16>
    tpu.vector_store %arg12[%c0_74, %c24_75], %56 {strides = array<i32>} : memref<256x72xbf16, #tpu.memory_space<vmem>>, vector<256x8xbf16>,
    %c1_76 = arith.constant 1 : index
    %c1_77 = arith.constant 1 : index
    %c0_78 = arith.constant 0 : index
    %58 = vector.load %arg11[%c1_76, %c1_77, %c0_78] : memref<18x18x8xbf16, #tpu.memory_space<vmem>>, vector<16x16x8xbf16>
    %59 = vector.shape_cast %58 : vector<16x16x8xbf16> to vector<256x8xbf16>
    %c0_79 = arith.constant 0 : index
    %c32 = arith.constant 32 : index
    %60 = vector.load %arg12[%c0_79, %c32] : memref<256x72xbf16, #tpu.memory_space<vmem>>, vector<256x8xbf16>
    tpu.vector_store %arg12[%c0_79, %c32], %59 {strides = array<i32>} : memref<256x72xbf16, #tpu.memory_space<vmem>>, vector<256x8xbf16>,
    %c1_80 = arith.constant 1 : index
    %c2_81 = arith.constant 2 : index
    %c0_82 = arith.constant 0 : index
    %61 = vector.load %arg11[%c1_80, %c2_81, %c0_82] : memref<18x18x8xbf16, #tpu.memory_space<vmem>>, vector<16x16x8xbf16>
    %62 = vector.shape_cast %61 : vector<16x16x8xbf16> to vector<256x8xbf16>
    %c0_83 = arith.constant 0 : index
    %c40 = arith.constant 40 : index
    %63 = vector.load %arg12[%c0_83, %c40] : memref<256x72xbf16, #tpu.memory_space<vmem>>, vector<256x8xbf16>
    tpu.vector_store %arg12[%c0_83, %c40], %62 {strides = array<i32>} : memref<256x72xbf16, #tpu.memory_space<vmem>>, vector<256x8xbf16>,
    %c2_84 = arith.constant 2 : index
    %c0_85 = arith.constant 0 : index
    %c0_86 = arith.constant 0 : index
    %64 = vector.load %arg11[%c2_84, %c0_85, %c0_86] : memref<18x18x8xbf16, #tpu.memory_space<vmem>>, vector<16x16x8xbf16>
    %65 = vector.shape_cast %64 : vector<16x16x8xbf16> to vector<256x8xbf16>
    %c0_87 = arith.constant 0 : index
    %c48 = arith.constant 48 : index
    %66 = vector.load %arg12[%c0_87, %c48] : memref<256x72xbf16, #tpu.memory_space<vmem>>, vector<256x8xbf16>
    tpu.vector_store %arg12[%c0_87, %c48], %65 {strides = array<i32>} : memref<256x72xbf16, #tpu.memory_space<vmem>>, vector<256x8xbf16>,
    %c2_88 = arith.constant 2 : index
    %c1_89 = arith.constant 1 : index
    %c0_90 = arith.constant 0 : index
    %67 = vector.load %arg11[%c2_88, %c1_89, %c0_90] : memref<18x18x8xbf16, #tpu.memory_space<vmem>>, vector<16x16x8xbf16>
    %68 = vector.shape_cast %67 : vector<16x16x8xbf16> to vector<256x8xbf16>
    %c0_91 = arith.constant 0 : index
    %c56 = arith.constant 56 : index
    %69 = vector.load %arg12[%c0_91, %c56] : memref<256x72xbf16, #tpu.memory_space<vmem>>, vector<256x8xbf16>
    tpu.vector_store %arg12[%c0_91, %c56], %68 {strides = array<i32>} : memref<256x72xbf16, #tpu.memory_space<vmem>>, vector<256x8xbf16>,
    %c2_92 = arith.constant 2 : index
    %c2_93 = arith.constant 2 : index
    %c0_94 = arith.constant 0 : index
    %70 = vector.load %arg11[%c2_92, %c2_93, %c0_94] : memref<18x18x8xbf16, #tpu.memory_space<vmem>>, vector<16x16x8xbf16>
    %71 = vector.shape_cast %70 : vector<16x16x8xbf16> to vector<256x8xbf16>
    %c0_95 = arith.constant 0 : index
    %c64 = arith.constant 64 : index
    %72 = vector.load %arg12[%c0_95, %c64] : memref<256x72xbf16, #tpu.memory_space<vmem>>, vector<256x8xbf16>
    tpu.vector_store %arg12[%c0_95, %c64], %71 {strides = array<i32>} : memref<256x72xbf16, #tpu.memory_space<vmem>>, vector<256x8xbf16>,
    %c0_96 = arith.constant 0 : index
    %c0_97 = arith.constant 0 : index
    %73 = vector.load %arg12[%c0_96, %c0_97] : memref<256x72xbf16, #tpu.memory_space<vmem>>, vector<256x72xbf16>
    %c0_98 = arith.constant 0 : index
    %c0_99 = arith.constant 0 : index
    %74 = vector.load %arg4[%c0_98, %c0_99] : memref<72x8xbf16, #tpu.memory_space<vmem>>, vector<72x8xbf16>
    %cst_100 = arith.constant dense<0.000000e+00> : vector<256x8xf32>
    %75 = tpu.matmul %73, %74, %cst_100 {dimension_numbers = #tpu.dot_dimension_numbers<[1], [0], [0], [1], [0, 0, 1, 1], [], []>} : vector<256x72xbf16>, vector<72x8xbf16>, vector<256x8xf32> -> vector<256x8xf32>
    %c0_101 = arith.constant 0 : index
    %c0_102 = arith.constant 0 : index
    %76 = vector.load %arg5[%c0_101, %c0_102] : memref<1x8xf32, #tpu.memory_space<vmem>>, vector<1x8xf32>
    %77 = vector.broadcast %76 : vector<1x8xf32> to vector<256x8xf32>
    %78 = arith.addf %75, %77 : vector<256x8xf32>
    %c0_103 = arith.constant 0 : index
    %c0_104 = arith.constant 0 : index
    %79 = vector.load %arg6[%c0_103, %c0_104] : memref<3x8xbf16, #tpu.memory_space<vmem>>, vector<3x8xbf16>
    %cst_105 = arith.constant dense<0.000000e+00> : vector<256x8xf32>
    %80 = tpu.matmul %1, %79, %cst_105 {dimension_numbers = #tpu.dot_dimension_numbers<[1], [0], [0], [1], [0, 0, 1, 1], [], []>} : vector<256x3xbf16>, vector<3x8xbf16>, vector<256x8xf32> -> vector<256x8xf32>
    %c0_106 = arith.constant 0 : index
    %c0_107 = arith.constant 0 : index
    %81 = vector.load %arg7[%c0_106, %c0_107] : memref<1x8xf32, #tpu.memory_space<vmem>>, vector<1x8xf32>
    %82 = vector.broadcast %81 : vector<1x8xf32> to vector<256x8xf32>
    %83 = arith.addf %80, %82 : vector<256x8xf32>
    %84 = arith.addf %78, %83 : vector<256x8xf32>
    %85 = arith.truncf %84 : vector<256x8xf32> to vector<256x8xbf16>
    %c0_108 = arith.constant 0 : index
    %c0_109 = arith.constant 0 : index
    %c0_110 = arith.constant 0 : index
    %86 = vector.load %arg8[%c0_108, %c0_109, %c0_110] : memref<1x256x8xbf16, #tpu.memory_space<vmem>>, vector<1x256x8xbf16>
    %87 = vector.shape_cast %86 : vector<1x256x8xbf16> to vector<256x8xbf16>
    %88 = vector.shape_cast %85 : vector<256x8xbf16> to vector<1x256x8xbf16>
    tpu.vector_store %arg8[%c0_108, %c0_109, %c0_110], %88 {strides = array<i32>} : memref<1x256x8xbf16, #tpu.memory_space<vmem>>, vector<1x256x8xbf16>,
    return
  }
  func.func @transform_0(%arg0: i32) -> (i32, i32, i32) {
    %c0_i32 = arith.constant 0 : i32
    %c0_i32_0 = arith.constant 0 : i32
    %c0_i32_1 = arith.constant 0 : i32
    return %arg0, %c0_i32, %c0_i32_0 : i32, i32, i32
  }
  func.func @transform_1(%arg0: i32) -> (i32, i32) {
    %c0_i32 = arith.constant 0 : i32
    %c0_i32_0 = arith.constant 0 : i32
    %c0_i32_1 = arith.constant 0 : i32
    return %c0_i32, %c0_i32_0 : i32, i32
  }
  func.func @transform_2(%arg0: i32) -> (i32, i32) {
    %c0_i32 = arith.constant 0 : i32
    %c0_i32_0 = arith.constant 0 : i32
    %c0_i32_1 = arith.constant 0 : i32
    return %c0_i32, %c0_i32_0 : i32, i32
  }
  func.func @transform_3(%arg0: i32) -> (i32, i32) {
    %c0_i32 = arith.constant 0 : i32
    %c0_i32_0 = arith.constant 0 : i32
    %c0_i32_1 = arith.constant 0 : i32
    return %c0_i32, %c0_i32_0 : i32, i32
  }
  func.func @transform_4(%arg0: i32) -> (i32, i32) {
    %c0_i32 = arith.constant 0 : i32
    %c0_i32_0 = arith.constant 0 : i32
    %c0_i32_1 = arith.constant 0 : i32
    return %c0_i32, %c0_i32_0 : i32, i32
  }
  func.func @transform_5(%arg0: i32) -> (i32, i32) {
    %c0_i32 = arith.constant 0 : i32
    %c0_i32_0 = arith.constant 0 : i32
    %c0_i32_1 = arith.constant 0 : i32
    return %c0_i32, %c0_i32_0 : i32, i32
  }
  func.func @transform_6(%arg0: i32) -> (i32, i32) {
    %c0_i32 = arith.constant 0 : i32
    %c0_i32_0 = arith.constant 0 : i32
    %c0_i32_1 = arith.constant 0 : i32
    return %c0_i32, %c0_i32_0 : i32, i32
  }
  func.func @transform_7(%arg0: i32) -> (i32, i32, i32) {
    %c0_i32 = arith.constant 0 : i32
    %c0_i32_0 = arith.constant 0 : i32
    %c0_i32_1 = arith.constant 0 : i32
    return %arg0, %c0_i32, %c0_i32_0 : i32, i32, i32
  }
}

</mosaic_0001>

<bundles_post_ra>
// kernel: tpu_custom_call.1
= control target key start
LH: loop header
LB: loop body
LE: loop exit
PB: predicated region body
PF: predicated region fallthrough
CT: control target
= control target key end

     0   :  { %s9676_s24 = smov 0   ;;  %s12642_s0 = inlined_call_operand.vmem [shape: bf16[2,256,3], index: 0, kind: input, shape index: {}]   ;;  %s12643_s1 = inlined_call_operand.vmem [shape: bf16[27,8], index: 1, kind: input, shape index: {}]   ;;  %s12644_s2 = inlined_call_operand.vmem [shape: f32[1,8], index: 2, kind: input, shape index: {}]   ;;  %s12645_s3 = inlined_call_operand.vmem [shape: bf16[72,8], index: 3, kind: input, shape index: {}]   ;;  %s12646_s4 = inlined_call_operand.vmem [shape: f32[1,8], index: 4, kind: input, shape index: {}]   ;;  %s12647_s5 = inlined_call_operand.vmem [shape: bf16[3,8], index: 5, kind: input, shape index: {}]   ;;  %s12648_s6 = inlined_call_operand.vmem [shape: f32[1,8], index: 6, kind: input, shape index: {}]   ;;  %s12649_s7 = inlined_call_operand.vmem [shape: bf16[2,256,8], index: 7, kind: output, shape index: {}]  }
   0x1 LB: > { %s8998_s25 = sadd.s32 4294967295, %s9617_s24   ;;  %p9002_p0 = scmp.ge.s32.totalorder %s9617_s24, 1  ;;  %s9617_s24 = sphi %s9676_s24, %s17_s24  }
   0x2   : > { %p237_p1 = scmp.lt.s32.totalorder %s9617_s24, 3 }
   0x4   : > { %p238_p2 = pnand %p9002_p0, %p237_p1 }
   0x5   : > { %p269_p3 = scmp.lt.s32.totalorder (!%p238_p2), %s8998_s25, 1  ;;  %s9620_s30 = smov (!%p238_p2), 3  }
   0x6   : > { %241 = sbr.rel (%p238_p2) target bundleno = 1746 (0x6d2), region = 48  ;;  %s9621_s8 = smov (!%p238_p2), 6  }
   0x7   : > { %s9622_s9 = smov (!%p238_p2), 9   ;;  %s9623_s10 = smov (!%p238_p2), 12  }
   0x8   : > { %s9624_s11 = smov (!%p238_p2), 15   ;;  %s9625_s12 = smov (!%p238_p2), 18  }
   0x9   : > { %s9627_s15 = smov (!%p238_p2), 21   ;;  %s9628_s18 = smov (!%p238_p2), 24  }
   0xa   : > { %s9629_s19 = smov (!%p238_p2), 8   ;;  %s9630_s27 = smov (!%p238_p2), 16  }
   0xb   : > { %vm312_vm0 = vcmask 19456   ;;  %v9619_v0 = vmov 0   ;;  %vm368_vm1 = vsmask.f32 256  ;;  %vm369_vm2 = vsmask.f32 4368 }
   0xc   : > { %313 = vst.msk [vmem:[#allocation2] sm:$0xf] %vm312_vm0, %v9619_v0  ;;  %314 = vst.msk [vmem:[#allocation2 + $0x4] sm:$0xf] %vm312_vm0, %v9619_v0  ;;  %vm315_vm3 = vcmask 16384   ;;  %s12665_s25 = smov (!%p269_p3, %s8998_s25), 1 }
   0xd   : > { %317 = vst.msk [vmem:[#allocation2 + $0xc] sm:$0xf] %vm312_vm0, %v9619_v0  ;;  %318 = vst.msk [vmem:[#allocation2 + $0x10] sm:$0xf] %vm312_vm0, %v9619_v0  ;;  %vm921_vm4 = vsmask.f32 3328 }
   0xe   : > { %320 = vst.msk [vmem:[#allocation2 + $0x18] sm:$0xf] %vm312_vm0, %v9619_v0  ;;  %321 = vst.msk [vmem:[#allocation2 + $0x1c] sm:$0xf] %vm312_vm0, %v9619_v0  ;;  %vm922_vm5 = vsmask.f32 7440 }
   0xf   : > { %323 = vst.msk [vmem:[#allocation2 + $0x24] sm:$0xf] %vm312_vm0, %v9619_v0  ;;  %324 = vst.msk [vmem:[#allocation2 + $0x28] sm:$0xf] %vm312_vm0, %v9619_v0  ;;  %vm693_vm6 = vsmask.f32 7938 }
  0x10   : > { %326 = vst.msk [vmem:[#allocation2 + $0x30] sm:$0xf] %vm312_vm0, %v9619_v0  ;;  %327 = vst.msk [vmem:[#allocation2 + $0x34] sm:$0xf] %vm312_vm0, %v9619_v0  ;;  %s9275_s26 = sshll.u32 %s12665_s25, 7  ;;  %vm1533_vm11 = vcmask 1042432  }
  0x11   : > { %329 = vst.msk [vmem:[#allocation2 + $0x3c] sm:$0xf] %vm312_vm0, %v9619_v0  ;;  %330 = vst.msk [vmem:[#allocation2 + $0x40] sm:$0xf] %vm312_vm0, %v9619_v0  ;;  %s9804_s29 = scalar_lea.vmem %s12642_s0, %s9275_s26  ;;  %vm1534_vm12 = vcmask 1046532   ;;  %vm1404_vm14 = vcmask 44056  }
  0x12   : > { %332 = vst.msk [vmem:[#allocation2 + $0x48] sm:$0xf] %vm312_vm0, %v9619_v0  ;;  %333 = vst.msk [vmem:[#allocation2 + $0x4c] sm:$0xf] %vm312_vm0, %v9619_v0  ;;  %v280_v1 = vld [vmem:[%s9804_s29] sm:$0xf] }
  0x13   : > { %335 = vst.msk [vmem:[#allocation2 + $0x54] sm:$0xf] %vm312_vm0, %v9619_v0  ;;  %336 = vst.msk [vmem:[#allocation2 + $0x58] sm:$0xf] %vm312_vm0, %v9619_v0  ;;  %v281_v2 = vld [vmem:[%s9804_s29 + $0x4] sm:$0xf] }
  0x14   : > { %338 = vst.msk [vmem:[#allocation2 + $0x60] sm:$0xf] %vm312_vm0, %v9619_v0  ;;  %339 = vst.msk [vmem:[#allocation2 + $0x64] sm:$0xf] %vm312_vm0, %v9619_v0  ;;  %v282_v3 = vld [vmem:[%s9804_s29 + $0x8] sm:$0xf] }
  0x15   : > { %341 = vst.msk [vmem:[#allocation2 + $0x6c] sm:$0xf] %vm312_vm0, %v9619_v0  ;;  %342 = vst.msk [vmem:[#allocation2 + $0x70] sm:$0xf] %vm312_vm0, %v9619_v0  ;;  %v873_v4 = vld [vmem:[#allocation2] sm:$0xf] }
  0x16   : > { %344 = vst.msk [vmem:[#allocation2 + $0x78] sm:$0xf] %vm312_vm0, %v9619_v0  ;;  %345 = vst.msk [vmem:[#allocation2 + $0x7c] sm:$0xf] %vm312_vm0, %v9619_v0  ;;  %v874_v5 = vld [vmem:[#allocation2 + $0x4] sm:$0xf] }
  0x17   : > { %347 = vst.msk [vmem:[#allocation2 + $0x84] sm:$0xf] %vm312_vm0, %v9619_v0  ;;  %348 = vst.msk [vmem:[#allocation2 + $0x88] sm:$0xf] %vm312_vm0, %v9619_v0  ;;  %v372_v6 = vshrl.u32 %v280_v1, 16  ;;  %v375_v7 = vshll.u32 %v280_v1, 16 }
  0x18   : > { %350 = vst.msk [vmem:[#allocation2 + $0x90] sm:$0xf] %vm312_vm0, %v9619_v0  ;;  %351 = vst.msk [vmem:[#allocation2 + $0x94] sm:$0xf] %vm312_vm0, %v9619_v0  ;;  %v925_v8 = vshrl.u32 %v873_v4, 16  ;;  %v928_v9 = vshll.u32 %v873_v4, 16 }
  0x19   : > { %353 = vst.msk [vmem:[#allocation2 + $0x9c] sm:$0xf] %vm312_vm0, %v9619_v0  ;;  %354 = vst.msk [vmem:[#allocation2 + $0xa0] sm:$0xf] %vm312_vm0, %v9619_v0  ;;  %v934_v10 = vshll.u32 %v874_v5, 16  ;;  %v938_v11 = vshrl.u32 %v874_v5, 16 }
  0x1a   : > { %356 = vst.msk [vmem:[#allocation2 + $0xa8] sm:$0xf] %vm312_vm0, %v9619_v0  ;;  %357 = vst.msk [vmem:[#allocation2 + $0xac] sm:$0xf] %vm312_vm0, %v9619_v0  ;;  %v374_v12 = vrot.slane %v372_v6, 7  ;;  %v380_v13 = vshrl.u32 %v281_v2, 16 }
  0x1b   : > { %359 = vst.msk [vmem:[#allocation2 + $0xb4] sm:$0xf] %vm312_vm0, %v9619_v0  ;;  %360 = vst.msk [vmem:[#allocation2 + $0xb8] sm:$0xf] %vm312_vm0, %v9619_v0  ;;  %v383_v14 = vshll.u32 %v281_v2, 16  ;;  %v389_v16 = vshrl.u32 %v282_v3, 16 }
  0x1c   : > { %362 = vst.msk [vmem:[#allocation2 + $0xc0] sm:$0xf] %vm312_vm0, %v9619_v0  ;;  %363 = vst.msk [vmem:[#allocation2 + $0xc4] sm:$0xf] %vm312_vm0, %v9619_v0  ;;  %v927_v17 = vrot.slane %v925_v8, 4  ;;  %v930_v18 = vrot.slane %v928_v9, 5  ;;  %v377_v24 = vor.u32 %v375_v7, %v374_v12 }
  0x1d   : > { %365 = vst.msk [vmem:[#allocation2 + $0xcc] sm:$0xf] %vm312_vm0, %v9619_v0  ;;  %366 = vst.msk [vmem:[#allocation2 + $0xd0] sm:$0xf] %vm312_vm0, %v9619_v0  ;;  %v936_v19 = vrot.slane %v934_v10, 5  ;;  %v940_v20 = vrot.slane %v938_v11, 4 }
  0x1e   : > { %316 = vst.msk [vmem:[#allocation2 + $0x8] sm:$0x1] %vm315_vm3, %v9619_v0  ;;  %319 = vst.msk [vmem:[#allocation2 + $0x14] sm:$0x1] %vm315_vm3, %v9619_v0  ;;  %v695_v22 = vld [vmem:[#allocation2 + $0xc] sm:$0xf]  ;;  %v931_v28 = vor.u32 %v930_v18, %v927_v17 }
  0x1f   : > { %322 = vst.msk [vmem:[#allocation2 + $0x20] sm:$0x1] %vm315_vm3, %v9619_v0  ;;  %325 = vst.msk [vmem:[#allocation2 + $0x2c] sm:$0x1] %vm315_vm3, %v9619_v0  ;;  %v378_v25 = vrot.slane %v374_v12, 4  ;;  %v382_v26 = vrot.slane %v380_v13, 7  ;;  %v941_v29 = vor.u32 %v940_v20, %v936_v19 }
  0x20   : > { %328 = vst.msk [vmem:[#allocation2 + $0x38] sm:$0x1] %vm315_vm3, %v9619_v0  ;;  %331 = vst.msk [vmem:[#allocation2 + $0x44] sm:$0x1] %vm315_vm3, %v9619_v0  ;;  %v283_v32 = vld [vmem:[%s9804_s29 + $0xc] sm:$0xf] }
  0x21   : > { %334 = vst.msk [vmem:[#allocation2 + $0x50] sm:$0x1] %vm315_vm3, %v9619_v0  ;;  %337 = vst.msk [vmem:[#allocation2 + $0x5c] sm:$0x1] %vm315_vm3, %v9619_v0  ;;  %v391_v33 = vrot.slane %v389_v16, 7  ;;  %v392_v34 = vshll.u32 %v282_v3, 16  ;;  %v385_v36 = vor.u32 %v383_v14, %v382_v26 }
  0x22   : > { %340 = vst.msk [vmem:[#allocation2 + $0x68] sm:$0x1] %vm315_vm3, %v9619_v0  ;;  %343 = vst.msk [vmem:[#allocation2 + $0x74] sm:$0x1] %vm315_vm3, %v9619_v0  ;;  %v387_v39 = vrot.slane %v382_v26, 4  ;;  %v932_v42 = vrot.slane %v931_v28, 4 }
  0x23   : > { %346 = vst.msk [vmem:[#allocation2 + $0x80] sm:$0x1] %vm315_vm3, %v9619_v0  ;;  %349 = vst.msk [vmem:[#allocation2 + $0x8c] sm:$0x1] %vm315_vm3, %v9619_v0  ;;  %v704_v40 = vld [vmem:[#allocation2 + $0x18] sm:$0xf]  ;;  %v394_v44 = vor.u32 %v392_v34, %v391_v33 }
  0x24   : > { %352 = vst.msk [vmem:[#allocation2 + $0x98] sm:$0x1] %vm315_vm3, %v9619_v0  ;;  %355 = vst.msk [vmem:[#allocation2 + $0xa4] sm:$0x1] %vm315_vm3, %v9619_v0  ;;  %v284_v41 = vld [vmem:[%s9804_s29 + $0x10] sm:$0xf] }
  0x25   : > { %358 = vst.msk [vmem:[#allocation2 + $0xb0] sm:$0x1] %vm315_vm3, %v9619_v0  ;;  %361 = vst.msk [vmem:[#allocation2 + $0xbc] sm:$0x1] %vm315_vm3, %v9619_v0  ;;  %v875_v15 = vld [vmem:[#allocation2 + $0x8] sm:$0x1] }
  0x26   : > { %364 = vst.msk [vmem:[#allocation2 + $0xc8] sm:$0x1] %vm315_vm3, %v9619_v0  ;;  %367 = vst.msk [vmem:[#allocation2 + $0xd4] sm:$0x1] %vm315_vm3, %v9619_v0  ;;  %v944_v27 = vshll.u32 %v875_v15, 16  ;;  %v942_v43 = vrot.slane %v941_v29, 4 }
  0x27   : > { %vm9811_vm7 = vmand %vm312_vm0, %vm693_vm6  ;;  %v701_v31 = vld [vmem:[#allocation2 + $0x14] sm:$0x1]  ;;  %v395_v45 = vrot.slane %v391_v33, 4  ;;  %v397_v49 = vshrl.u32 %v283_v32, 16  ;;  %v400_v50 = vshll.u32 %v283_v32, 16  ;;  %v406_v55 = vshrl.u32 %v284_v41, 16 }
  0x28   : > { %vm9817_vm8 = vmor %vm368_vm1, %vm369_vm2  ;;  %v696_v37 = vsel %vm9811_vm7, %v377_v24, %v695_v22  ;;  %v946_v38 = vrot.slane %v944_v27, 5  ;;  %v285_v46 = vld [vmem:[%s9804_s29 + $0x14] sm:$0xf]  ;;  %v286_v51 = vld [vmem:[%s9804_s29 + $0x18] sm:$0xf]  ;;  %v705_v54 = vsel %vm9811_vm7, %v394_v44, %v704_v40  ;;  %v409_v58 = vshll.u32 %v284_v41, 16 }
  0x29   : > { %vm9823_vm9 = vmand %vm315_vm3, %vm368_vm1  ;;  %697 = vst [vmem:[#allocation2 + $0xc] sm:$0xf] %v696_v37  ;;  %v386_v47 = vsel %vm9817_vm8, %v378_v25, %v385_v36  ;;  %v287_v56 = vld [vmem:[%s9804_s29 + $0x1c] sm:$0xf]  ;;  %v399_v57 = vrot.slane %v397_v49, 7  ;;  %v414_v59 = vshrl.u32 %v285_v46, 16 }
  0x2a   : > { %vm9830_vm10 = vmor %vm921_vm4, %vm922_vm5  ;;  %v702_v48 = vsel %vm9823_vm9, %v387_v39, %v701_v31  ;;  %698 = vst.msk [vmem:[#allocation2 + $0x10] sm:$0xf] %vm312_vm0, %v386_v47  ;;  %v417_v60 = vshll.u32 %v285_v46, 16  ;;  %v708_v61 = vld [vmem:[#allocation2 + $0x20] sm:$0x1]  ;;  %v408_v62 = vrot.slane %v406_v55, 7 }
  0x2b   : > { %v937_v52 = vsel %vm9830_vm10, %v932_v42, %v936_v19  ;;  %v947_v53 = vsel %vm9830_vm10, %v942_v43, %v946_v38  ;;  %703 = vst [vmem:[#allocation2 + $0x14] sm:$0x1] %v702_v48  ;;  %706 = vst [vmem:[#allocation2 + $0x18] sm:$0xf] %v705_v54  ;;  %v423_v63 = vshrl.u32 %v286_v51, 16  ;;  %v426_v1 = vshll.u32 %v286_v51, 16 }
  0x2c   : > { %1308 = vrot.lane.b32.xlu0 %v937_v52, %s9620_s30  ;;  %v431_v2 = vshrl.u32 %v287_v56, 16  ;;  %v402_v3 = vor.u32 %v400_v50, %v399_v57  ;;  %v404_v4 = vrot.slane %v399_v57, 4  ;;  %v416_v5 = vrot.slane %v414_v59, 7  ;;  %v711_v6 = vld [vmem:[#allocation2 + $0x24] sm:$0xf]  ;;  %vm10094_vm13 = vmor %vm1533_vm11, %vm1534_vm12  ;;  %s9631_s28 = smov 32  }
  0x2d   : > { %v434_v7 = vshll.u32 %v287_v56, 16  ;;  %v411_v8 = vor.u32 %v409_v58, %v408_v62  ;;  %v412_v9 = vrot.slane %v408_v62, 4  ;;  %v715_v10 = vld [vmem:[#allocation2 + $0x2c] sm:$0x1]  ;;  %v425_v11 = vrot.slane %v423_v63, 7  ;;  %s9635_s23 = smov 64  }
  0x2e   : > { %v433_v12 = vrot.slane %v431_v2, 7  ;;  %v403_v14 = vsel %vm9817_vm8, %v395_v45, %v402_v3  ;;  %v709_v15 = vsel %vm9823_vm9, %v404_v4, %v708_v61  ;;  %v419_v16 = vor.u32 %v417_v60, %v416_v5  ;;  %v718_v24 = vld [vmem:[#allocation2 + $0x30] sm:$0xf]  ;;  %v9868_v42 = vld [vmem:[%s9804_s29 + $0x20] sm:$0xf] }
  0x2f   : > { %v421_v17 = vrot.slane %v416_v5, 4  ;;  %707 = vst.msk [vmem:[#allocation2 + $0x1c] sm:$0xf] %vm312_vm0, %v403_v14  ;;  %710 = vst [vmem:[#allocation2 + $0x20] sm:$0x1] %v709_v15  ;;  %v712_v20 = vsel %vm9811_vm7, %v411_v8, %v711_v6  ;;  %v428_v22 = vor.u32 %v426_v1, %v425_v11  ;;  %v429_v29 = vrot.slane %v425_v11, 4 }
  0x30   : > { %v876_v13 = vld [vmem:[#allocation2 + $0xc] sm:$0xf]  ;;  %1310 = vrot.lane.b32.xlu0 %v947_v53, %s9620_s30  ;;  %v420_v27 = vsel %vm9817_vm8, %v412_v9, %v419_v16  ;;  %713 = vst [vmem:[#allocation2 + $0x24] sm:$0xf] %v712_v20  ;;  %v436_v31 = vor.u32 %v434_v7, %v433_v12  ;;  %v722_v47 = vld [vmem:[#allocation2 + $0x38] sm:$0x1] }
  0x31   : > { %v949_v18 = vshrl.u32 %v876_v13, 16  ;;  %v952_v19 = vshll.u32 %v876_v13, 16  ;;  %v877_v25 = vld [vmem:[#allocation2 + $0x10] sm:$0xf]  ;;  %v716_v28 = vsel %vm9823_vm9, %v421_v17, %v715_v10  ;;  %714 = vst.msk [vmem:[#allocation2 + $0x28] sm:$0xf] %vm312_vm0, %v420_v27  ;;  %v719_v46 = vsel %vm9811_vm7, %v428_v22, %v718_v24 }
  0x32   : > { %v878_v26 = vld [vmem:[#allocation2 + $0x14] sm:$0x1]  ;;  %v958_v34 = vshll.u32 %v877_v25, 16  ;;  %v962_v36 = vshrl.u32 %v877_v25, 16  ;;  %v879_v37 = vld [vmem:[#allocation2 + $0x18] sm:$0xf]  ;;  %v437_v41 = vsel %vm9817_vm8, %v429_v29, %v436_v31 }
  0x33   : > { %v951_v32 = vrot.slane %v949_v18, 4  ;;  %v954_v33 = vrot.slane %v952_v19, 5  ;;  %717 = vst [vmem:[#allocation2 + $0x2c] sm:$0x1] %v716_v28  ;;  %v968_v38 = vshll.u32 %v878_v26, 16  ;;  %v973_v39 = vshrl.u32 %v879_v37, 16 }
  0x34   : > { %v976_v40 = vshll.u32 %v879_v37, 16  ;;  %v960_v44 = vrot.slane %v958_v34, 5  ;;  %v964_v45 = vrot.slane %v962_v36, 4  ;;  %721 = vst.msk [vmem:[#allocation2 + $0x34] sm:$0xf] %vm312_vm0, %v437_v41  ;;  %v438_v52 = vrot.slane %v433_v12, 4 }
  0x35   : > { %v955_v43 = vor.u32 %v954_v33, %v951_v32  ;;  %v9874_v48 = vld [vmem:[%s9804_s29 + $0x24] sm:$0xf]  ;;  %v970_v49 = vrot.slane %v968_v38, 5  ;;  %v975_v50 = vrot.slane %v973_v39, 4  ;;  %720 = vst [vmem:[#allocation2 + $0x30] sm:$0xf] %v719_v46 }
  0x36   : > { %v978_v51 = vrot.slane %v976_v40, 5  ;;  %v965_v54 = vor.u32 %v964_v45, %v960_v44  ;;  %v440_v55 = vshrl.u32 %v9868_v42, 16  ;;  %v443_v56 = vshll.u32 %v9868_v42, 16  ;;  %v880_v57 = vld [vmem:[#allocation2 + $0x1c] sm:$0xf] }
  0x37   : > { %v956_v53 = vrot.slane %v955_v43, 4  ;;  %v881_v59 = vld [vmem:[#allocation2 + $0x20] sm:$0x1]  ;;  %v723_v60 = vsel %vm9823_vm9, %v438_v52, %v722_v47  ;;  %v448_v61 = vshrl.u32 %v9874_v48, 16  ;;  %v451_v62 = vshll.u32 %v9874_v48, 16 }
  0x38   : > { %v979_v58 = vor.u32 %v978_v51, %v975_v50  ;;  %v966_v1 = vrot.slane %v965_v54, 4  ;;  %v982_v2 = vshll.u32 %v880_v57, 16  ;;  %v986_v3 = vshrl.u32 %v880_v57, 16  ;;  %v882_v4 = vld [vmem:[#allocation2 + $0x24] sm:$0xf] }
  0x39   : > { %v961_v63 = vsel %vm9830_vm10, %v956_v53, %v960_v44  ;;  %724 = vst [vmem:[#allocation2 + $0x38] sm:$0x1] %v723_v60  ;;  %v992_v6 = vshll.u32 %v881_v59, 16  ;;  %v883_v7 = vld [vmem:[#allocation2 + $0x28] sm:$0xf]  ;;  %v997_v8 = vshrl.u32 %v882_v4, 16 }
  0x3a   : > { %1312 = vrot.lane.b32.xlu1 %v961_v63, %s9620_s30  ;;  %v980_v5 = vrot.slane %v979_v58, 4  ;;  %v1000_v9 = vshll.u32 %v882_v4, 16  ;;  %v971_v10 = vsel %vm9830_vm10, %v966_v1, %v970_v49  ;;  %v984_v11 = vrot.slane %v982_v2, 5  ;;  %v884_v14 = vld [vmem:[#allocation2 + $0x2c] sm:$0x1] }
  0x3b   : > { %v988_v12 = vrot.slane %v986_v3, 4  ;;  %v1006_v13 = vshll.u32 %v883_v7, 16  ;;  %v994_v15 = vrot.slane %v992_v6, 5  ;;  %v999_v16 = vrot.slane %v997_v8, 4  ;;  %v886_v19 = vld [vmem:[#allocation2 + $0x34] sm:$0xf] }
  0x3c   : > { %v1002_v17 = vrot.slane %v1000_v9, 5  ;;  %v1010_v18 = vshrl.u32 %v883_v7, 16  ;;  %v985_v20 = vsel %vm9830_vm10, %v980_v5, %v984_v11  ;;  %v1016_v25 = vshll.u32 %v884_v14, 16  ;;  %v885_v26 = vld [vmem:[#allocation2 + $0x30] sm:$0xf] }
  0x3d   : > { %v989_v22 = vor.u32 %v988_v12, %v984_v11  ;;  %v1008_v24 = vrot.slane %v1006_v13, 5  ;;  %1316 = vrot.lane.b32.xlu0 %v985_v20, %s9620_s30  ;;  %v1021_v29 = vshrl.u32 %v885_v26, 16  ;;  %v1024_v31 = vshll.u32 %v885_v26, 16  ;;  %v290_v37 = vld [vmem:[%s9804_s29 + $0x28] sm:$0xf] }
  0x3e   : > { %1314 = vrot.lane.b32.xlu1 %v971_v10, %s9620_s30  ;;  %v1003_v27 = vor.u32 %v1002_v17, %v999_v16  ;;  %v1012_v28 = vrot.slane %v1010_v18, 4  ;;  %v1018_v33 = vrot.slane %v1016_v25, 5  ;;  %v1030_v34 = vshll.u32 %v886_v19, 16  ;;  %v725_v53 = vld [vmem:[#allocation2 + $0x3c] sm:$0xf] }
  0x3f   : > { %v990_v32 = vrot.slane %v989_v22, 4  ;;  %v1034_v36 = vshrl.u32 %v886_v19, 16  ;;  %v1023_v40 = vrot.slane %v1021_v29, 4  ;;  %v1026_v41 = vrot.slane %v1024_v31, 5  ;;  %v291_v59 = vld [vmem:[%s9804_s29 + $0x2c] sm:$0xf] }
  0x40   : > { %v1004_v38 = vrot.slane %v1003_v27, 4  ;;  %v1013_v39 = vor.u32 %v1012_v28, %v1008_v24  ;;  %v887_v43 = vld [vmem:[#allocation2 + $0x38] sm:$0x1]  ;;  %v1032_v45 = vrot.slane %v1030_v34, 5  ;;  %v442_v52 = vrot.slane %v440_v55, 7 }
  0x41   : > { %v995_v44 = vsel %vm9830_vm10, %v990_v32, %v994_v15  ;;  %v1036_v46 = vrot.slane %v1034_v36, 4  ;;  %v1040_v47 = vshll.u32 %v887_v43, 16  ;;  %v1027_v51 = vor.u32 %v1026_v41, %v1023_v40  ;;  %v729_v55 = vld [vmem:[#allocation2 + $0x44] sm:$0x1]  ;;  %v294_v11 = vld [vmem:[%s9804_s29 + $0x38] sm:$0xf] }
  0x42   : > { %1318 = vrot.lane.b32.xlu1 %v995_v44, %s9620_s30  ;;  %v1009_v49 = vsel %vm9830_vm10, %v1004_v38, %v1008_v24  ;;  %v1014_v50 = vrot.slane %v1013_v39, 4  ;;  %v450_v58 = vrot.slane %v448_v61, 7  ;;  %v457_v60 = vshrl.u32 %v290_v37, 16  ;;  %v292_v61 = vld [vmem:[%s9804_s29 + $0x30] sm:$0xf] }
  0x43   : > { %1320 = vrot.lane.b32.xlu0 %v1009_v49, %s9620_s30  ;;  %v1037_v54 = vor.u32 %v1036_v46, %v1032_v45  ;;  %v1042_v57 = vrot.slane %v1040_v47, 5  ;;  %v1028_v1 = vrot.slane %v1027_v51, 4  ;;  %v445_v2 = vor.u32 %v443_v56, %v442_v52  ;;  %v293_v56 = vld [vmem:[%s9804_s29 + $0x34] sm:$0xf]  ;;  %v732_v14 = vld [vmem:[#allocation2 + $0x48] sm:$0xf] }
  0x44   : > { %v1019_v63 = vsel %vm9830_vm10, %v1014_v50, %v1018_v33  ;;  %v446_v3 = vrot.slane %v442_v52, 4  ;;  %v453_v5 = vor.u32 %v451_v62, %v450_v58  ;;  %v455_v6 = vrot.slane %v450_v58, 4  ;;  %v295_v19 = vld [vmem:[%s9804_s29 + $0x3c] sm:$0xf]  ;;  %v736_v20 = vld [vmem:[#allocation2 + $0x50] sm:$0x1] }
  0x45   : > { %v1038_v4 = vrot.slane %v1037_v54, 4  ;;  %v459_v7 = vrot.slane %v457_v60, 7  ;;  %v1033_v8 = vsel %vm9830_vm10, %v1028_v1, %v1032_v45  ;;  %v726_v9 = vsel %vm9811_vm7, %v445_v2, %v725_v53  ;;  %v739_v32 = vld [vmem:[#allocation2 + $0x54] sm:$0xf]  ;;  %v296_v38 = vld [vmem:[%s9804_s29 + $0x40] sm:$0xf] }
  0x46   : > { %1322 = vrot.lane.b32.xlu1 %v1019_v63, %s9620_s30  ;;  %v460_v10 = vshll.u32 %v290_v37, 16  ;;  %v465_v42 = vshrl.u32 %v291_v59, 16  ;;  %v454_v62 = vsel %vm9817_vm8, %v446_v3, %v453_v5  ;;  %727 = vst [vmem:[#allocation2 + $0x3c] sm:$0xf] %v726_v9  ;;  %v730_v12 = vsel %vm9823_vm9, %v455_v6, %v729_v55  ;;  %v743_v44 = vld [vmem:[#allocation2 + $0x5c] sm:$0x1] }
  0x47   : > { %1324 = vrot.lane.b32.xlu0 %v1033_v8, %s9620_s30  ;;  %v1043_v48 = vsel %vm9830_vm10, %v1038_v4, %v1042_v57  ;;  %v463_v13 = vrot.slane %v459_v7, 4  ;;  %728 = vst.msk [vmem:[#allocation2 + $0x40] sm:$0xf] %vm312_vm0, %v454_v62  ;;  %731 = vst [vmem:[#allocation2 + $0x44] sm:$0x1] %v730_v12  ;;  %v468_v17 = vshll.u32 %v291_v59, 16 }
  0x48   : > { %v462_v15 = vor.u32 %v460_v10, %v459_v7  ;;  %v467_v16 = vrot.slane %v465_v42, 7  ;;  %v474_v18 = vshrl.u32 %v292_v61, 16  ;;  %v477_v22 = vshll.u32 %v292_v61, 16  ;;  %v746_v50 = vld [vmem:[#allocation2 + $0x60] sm:$0xf] }
  0x49   : > { %v482_v24 = vshrl.u32 %v293_v56, 16  ;;  %v485_v25 = vshll.u32 %v293_v56, 16  ;;  %v491_v26 = vshrl.u32 %v294_v11, 16  ;;  %v494_v36 = vshll.u32 %v294_v11, 16  ;;  %v750_v6 = vld [vmem:[#allocation2 + $0x68] sm:$0x1] }
  0x4a   : > { %1326 = vrot.lane.b32.xlu1 %v1043_v48, %s9620_s30  ;;  %v470_v27 = vor.u32 %v468_v17, %v467_v16  ;;  %v733_v28 = vsel %vm9811_vm7, %v462_v15, %v732_v14  ;;  %v472_v29 = vrot.slane %v467_v16, 4  ;;  %v476_v31 = vrot.slane %v474_v18, 7 }
  0x4b   : > { %734 = vst [vmem:[#allocation2 + $0x48] sm:$0xf] %v733_v28  ;;  %v484_v33 = vrot.slane %v482_v24, 7  ;;  %v493_v34 = vrot.slane %v491_v26, 7  ;;  %v499_v37 = vshrl.u32 %v295_v19, 16  ;;  %v502_v54 = vshll.u32 %v295_v19, 16 }
  0x4c   : > { %v471_v39 = vsel %vm9817_vm8, %v463_v13, %v470_v27  ;;  %v737_v40 = vsel %vm9823_vm9, %v472_v29, %v736_v20  ;;  %v479_v41 = vor.u32 %v477_v22, %v476_v31  ;;  %v480_v43 = vrot.slane %v476_v31, 4 }
  0x4d   : > { %735 = vst.msk [vmem:[#allocation2 + $0x4c] sm:$0xf] %vm312_vm0, %v471_v39  ;;  %738 = vst [vmem:[#allocation2 + $0x50] sm:$0x1] %v737_v40  ;;  %v487_v45 = vor.u32 %v485_v25, %v484_v33  ;;  %v489_v46 = vrot.slane %v484_v33, 4  ;;  %v496_v47 = vor.u32 %v494_v36, %v493_v34  ;;  %v497_v49 = vrot.slane %v493_v34, 4 }
  0x4e   : > { %v888_v51 = vld [vmem:[#allocation2 + $0x3c] sm:$0xf]  ;;  %v740_v52 = vsel %vm9811_vm7, %v479_v41, %v739_v32  ;;  %v501_v53 = vrot.slane %v499_v37, 7  ;;  %v508_v57 = vshrl.u32 %v296_v38, 16  ;;  %v889_v58 = vld [vmem:[#allocation2 + $0x40] sm:$0xf] }
  0x4f   : > { %v1045_v59 = vshrl.u32 %v888_v51, 16  ;;  %v1048_v60 = vshll.u32 %v888_v51, 16  ;;  %v890_v63 = vld [vmem:[#allocation2 + $0x44] sm:$0x1]  ;;  %v488_v1 = vsel %vm9817_vm8, %v480_v43, %v487_v45  ;;  %741 = vst [vmem:[#allocation2 + $0x54] sm:$0xf] %v740_v52  ;;  %v744_v2 = vsel %vm9823_vm9, %v489_v46, %v743_v44 }
  0x50   : > { %v1054_v3 = vshll.u32 %v889_v58, 16  ;;  %v1058_v55 = vshrl.u32 %v889_v58, 16  ;;  %v1064_v4 = vshll.u32 %v890_v63, 16  ;;  %742 = vst.msk [vmem:[#allocation2 + $0x58] sm:$0xf] %vm312_vm0, %v488_v1  ;;  %v504_v5 = vor.u32 %v502_v54, %v501_v53 }
  0x51   : > { %745 = vst [vmem:[#allocation2 + $0x5c] sm:$0x1] %v744_v2  ;;  %v1047_v7 = vrot.slane %v1045_v59, 4  ;;  %v1050_v61 = vrot.slane %v1048_v60, 5  ;;  %v747_v8 = vsel %vm9811_vm7, %v496_v47, %v746_v50  ;;  %v506_v9 = vrot.slane %v501_v53, 4 }
  0x52   : > { %v1056_v10 = vrot.slane %v1054_v3, 5  ;;  %v1060_v42 = vrot.slane %v1058_v55, 4  ;;  %v1066_v56 = vrot.slane %v1064_v4, 5  ;;  %v891_v11 = vld [vmem:[#allocation2 + $0x48] sm:$0xf]  ;;  %v505_v48 = vsel %vm9817_vm8, %v497_v49, %v504_v5 }
  0x53   : > { %748 = vst [vmem:[#allocation2 + $0x60] sm:$0xf] %v747_v8  ;;  %v1051_v62 = vor.u32 %v1050_v61, %v1047_v7  ;;  %v1069_v12 = vshrl.u32 %v891_v11, 16  ;;  %v1072_v13 = vshll.u32 %v891_v11, 16  ;;  %749 = vst.msk [vmem:[#allocation2 + $0x64] sm:$0xf] %vm312_vm0, %v505_v48  ;;  %v751_v14 = vsel %vm9823_vm9, %v506_v9, %v750_v6 }
  0x54   : > { %v1061_v15 = vor.u32 %v1060_v42, %v1056_v10  ;;  %v892_v16 = vld [vmem:[#allocation2 + $0x4c] sm:$0xf]  ;;  %v893_v17 = vld [vmem:[#allocation2 + $0x50] sm:$0x1]  ;;  %752 = vst [vmem:[#allocation2 + $0x68] sm:$0x1] %v751_v14 }
  0x55   : > { %v9945_v18 = vrot.slane %v508_v57, 7  ;;  %v511_v19 = vshll.u32 %v296_v38, 16  ;;  %v1052_v20 = vrot.slane %v1051_v62, 4  ;;  %v1071_v22 = vrot.slane %v1069_v12, 4  ;;  %v297_v4 = vld [vmem:[%s9804_s29 + $0x44] sm:$0xf] }
  0x56   : > { %v1074_v24 = vrot.slane %v1072_v13, 5  ;;  %v1078_v25 = vshll.u32 %v892_v16, 16  ;;  %v1062_v26 = vrot.slane %v1061_v15, 4  ;;  %v1082_v27 = vshrl.u32 %v892_v16, 16  ;;  %v894_v29 = vld [vmem:[#allocation2 + $0x54] sm:$0xf] }
  0x57   : > { %v1088_v28 = vshll.u32 %v893_v17, 16  ;;  %v513_v31 = vor.u32 %v511_v19, %v9945_v18  ;;  %v1057_v32 = vsel %vm9830_vm10, %v1052_v20, %v1056_v10  ;;  %v895_v36 = vld [vmem:[#allocation2 + $0x58] sm:$0xf]  ;;  %v1093_v37 = vshrl.u32 %v894_v29, 16  ;;  %v753_v8 = vld [vmem:[#allocation2 + $0x6c] sm:$0xf] }
  0x58   : > { %v1075_v33 = vor.u32 %v1074_v24, %v1071_v22  ;;  %v1080_v34 = vrot.slane %v1078_v25, 5  ;;  %v896_v39 = vld [vmem:[#allocation2 + $0x5c] sm:$0x1]  ;;  %1328 = vrot.lane.b32.xlu0 %v1057_v32, %s9620_s30  ;;  %v1067_v38 = vsel %vm9830_vm10, %v1062_v26, %v1066_v56  ;;  %v1084_v40 = vrot.slane %v1082_v27, 4  ;;  %v298_v11 = vld [vmem:[%s9804_s29 + $0x48] sm:$0xf] }
  0x59   : > { %v1090_v41 = vrot.slane %v1088_v28, 5  ;;  %v1096_v43 = vshll.u32 %v894_v29, 16  ;;  %1330 = vrot.lane.b32.xlu1 %v1067_v38, %s9620_s30  ;;  %v1095_v45 = vrot.slane %v1093_v37, 4  ;;  %v1102_v46 = vshll.u32 %v895_v36, 16  ;;  %v299_v14 = vld [vmem:[%s9804_s29 + $0x4c] sm:$0xf] }
  0x5a   : > { %v1076_v44 = vrot.slane %v1075_v33, 4  ;;  %v1106_v47 = vshrl.u32 %v895_v36, 16  ;;  %v897_v49 = vld [vmem:[#allocation2 + $0x60] sm:$0xf]  ;;  %v1085_v50 = vor.u32 %v1084_v40, %v1080_v34  ;;  %v1112_v52 = vshll.u32 %v896_v39, 16 }
  0x5b   : > { %v1098_v51 = vrot.slane %v1096_v43, 5  ;;  %v898_v53 = vld [vmem:[#allocation2 + $0x64] sm:$0xf]  ;;  %v1117_v54 = vshrl.u32 %v897_v49, 16  ;;  %v1104_v58 = vrot.slane %v1102_v46, 5  ;;  %v1120_v60 = vshll.u32 %v897_v49, 16 }
  0x5c   : > { %v1081_v57 = vsel %vm9830_vm10, %v1076_v44, %v1080_v34  ;;  %v1108_v59 = vrot.slane %v1106_v47, 4  ;;  %v899_v63 = vld [vmem:[#allocation2 + $0x68] sm:$0x1]  ;;  %v1086_v1 = vrot.slane %v1085_v50, 4  ;;  %v1114_v3 = vrot.slane %v1112_v52, 5 }
  0x5d   : > { %1332 = vrot.lane.b32.xlu0 %v1081_v57, %s9620_s30  ;;  %v1099_v2 = vor.u32 %v1098_v51, %v1095_v45  ;;  %v1119_v55 = vrot.slane %v1117_v54, 4  ;;  %v1122_v6 = vrot.slane %v1120_v60, 5  ;;  %v1126_v7 = vshll.u32 %v898_v53, 16  ;;  %v300_v20 = vld [vmem:[%s9804_s29 + $0x50] sm:$0xf] }
  0x5e   : > { %v1109_v5 = vor.u32 %v1108_v59, %v1104_v58  ;;  %v1130_v61 = vshrl.u32 %v898_v53, 16  ;;  %v1091_v9 = vsel %vm9830_vm10, %v1086_v1, %v1090_v41  ;;  %v1136_v42 = vshll.u32 %v899_v63, 16  ;;  %v301_v32 = vld [vmem:[%s9804_s29 + $0x54] sm:$0xf]  ;;  %v760_v43 = vld [vmem:[#allocation2 + $0x78] sm:$0xf] }
  0x5f   : > { %v1100_v10 = vrot.slane %v1099_v2, 4  ;;  %v514_v56 = vrot.slane %v9945_v18, 4  ;;  %1334 = vrot.lane.b32.xlu1 %v1091_v9, %s9620_s30  ;;  %v1123_v62 = vor.u32 %v1122_v6, %v1119_v55  ;;  %v1128_v12 = vrot.slane %v1126_v7, 5  ;;  %v757_v36 = vld [vmem:[#allocation2 + $0x74] sm:$0x1] }
  0x60   : > { %v1110_v48 = vrot.slane %v1109_v5, 4  ;;  %v1132_v13 = vrot.slane %v1130_v61, 4  ;;  %v1138_v16 = vrot.slane %v1136_v42, 5  ;;  %v516_v17 = vshrl.u32 %v297_v4, 16  ;;  %v302_v49 = vld [vmem:[%s9804_s29 + $0x58] sm:$0xf] }
  0x61   : > { %v1105_v15 = vsel %vm9830_vm10, %v1100_v10, %v1104_v58  ;;  %v519_v19 = vshll.u32 %v297_v4, 16  ;;  %v1124_v22 = vrot.slane %v1123_v62, 4  ;;  %v754_v25 = vsel %vm9811_vm7, %v513_v31, %v753_v8  ;;  %v764_v54 = vld [vmem:[#allocation2 + $0x80] sm:$0x1]  ;;  %v767_v57 = vld [vmem:[#allocation2 + $0x84] sm:$0xf] }
  0x62   : > { %1336 = vrot.lane.b32.xlu0 %v1105_v15, %s9620_s30  ;;  %v1115_v18 = vsel %vm9830_vm10, %v1110_v48, %v1114_v3  ;;  %v1133_v24 = vor.u32 %v1132_v13, %v1128_v12  ;;  %v518_v26 = vrot.slane %v516_v17, 7  ;;  %755 = vst [vmem:[#allocation2 + $0x6c] sm:$0xf] %v754_v25  ;;  %v525_v27 = vshrl.u32 %v298_v11, 16  ;;  %v303_v1 = vld [vmem:[%s9804_s29 + $0x5c] sm:$0xf] }
  0x63   : > { %v528_v28 = vshll.u32 %v298_v11, 16  ;;  %v533_v29 = vshrl.u32 %v299_v14, 16  ;;  %1338 = vrot.lane.b32.xlu1 %v1115_v18, %s9620_s30  ;;  %v1129_v33 = vsel %vm9830_vm10, %v1124_v22, %v1128_v12  ;;  %v536_v37 = vshll.u32 %v299_v14, 16  ;;  %v304_v5 = vld [vmem:[%s9804_s29 + $0x60] sm:$0xf] }
  0x64   : > { %v1134_v34 = vrot.slane %v1133_v24, 4  ;;  %v542_v39 = vshrl.u32 %v300_v20, 16  ;;  %v521_v38 = vor.u32 %v519_v19, %v518_v26  ;;  %v523_v40 = vrot.slane %v518_v26, 4  ;;  %v771_v9 = vld [vmem:[#allocation2 + $0x8c] sm:$0x1] }
  0x65   : > { %v527_v41 = vrot.slane %v525_v27, 7  ;;  %v535_v31 = vrot.slane %v533_v29, 7  ;;  %v545_v46 = vshll.u32 %v300_v20, 16  ;;  %v550_v47 = vshrl.u32 %v301_v32, 16  ;;  %v9998_v14 = vld [vmem:[%s9804_s29 + $0x64] sm:$0xf] }
  0x66   : > { %1340 = vrot.lane.b32.xlu0 %v1129_v33, %s9620_s30  ;;  %v1139_v44 = vsel %vm9830_vm10, %v1134_v34, %v1138_v16  ;;  %v544_v45 = vrot.slane %v542_v39, 7  ;;  %v522_v50 = vsel %vm9817_vm8, %v514_v56, %v521_v38  ;;  %v758_v51 = vsel %vm9823_vm9, %v523_v40, %v757_v36  ;;  %v774_v25 = vld [vmem:[#allocation2 + $0x90] sm:$0xf] }
  0x67   : > { %v530_v52 = vor.u32 %v528_v28, %v527_v41  ;;  %v531_v53 = vrot.slane %v527_v41, 4  ;;  %1342 = vrot.lane.b32.xlu1 %v1139_v44, %s9620_s30  ;;  %756 = vst.msk [vmem:[#allocation2 + $0x70] sm:$0xf] %vm312_vm0, %v522_v50  ;;  %759 = vst [vmem:[#allocation2 + $0x74] sm:$0x1] %v758_v51  ;;  %v538_v58 = vor.u32 %v536_v37, %v535_v31  ;;  %v540_v59 = vrot.slane %v535_v31, 4 }
  0x68   : > { %v547_v60 = vor.u32 %v545_v46, %v544_v45  ;;  %v548_v63 = vrot.slane %v544_v45, 4  ;;  %v552_v3 = vrot.slane %v550_v47, 7  ;;  %v553_v55 = vshll.u32 %v301_v32, 16 }
  0x69   : > { %v761_v2 = vsel %vm9811_vm7, %v530_v52, %v760_v43  ;;  %v559_v4 = vshrl.u32 %v302_v49, 16  ;;  %v900_v6 = vld [vmem:[#allocation2 + $0x6c] sm:$0xf]  ;;  %v539_v7 = vsel %vm9817_vm8, %v531_v53, %v538_v58  ;;  %v765_v61 = vsel %vm9823_vm9, %v540_v59, %v764_v54 }
  0x6a   : > { %762 = vst [vmem:[#allocation2 + $0x78] sm:$0xf] %v761_v2  ;;  %v768_v8 = vsel %vm9811_vm7, %v547_v60, %v767_v57  ;;  %v562_v10 = vshll.u32 %v302_v49, 16  ;;  %v1141_v42 = vshrl.u32 %v900_v6, 16  ;;  %v1144_v56 = vshll.u32 %v900_v6, 16 }
  0x6b   : > { %763 = vst.msk [vmem:[#allocation2 + $0x7c] sm:$0xf] %vm312_vm0, %v539_v7  ;;  %766 = vst [vmem:[#allocation2 + $0x80] sm:$0x1] %v765_v61  ;;  %v555_v11 = vor.u32 %v553_v55, %v552_v3  ;;  %v557_v48 = vrot.slane %v552_v3, 4  ;;  %v561_v62 = vrot.slane %v559_v4, 7 }
  0x6c   : > { %769 = vst [vmem:[#allocation2 + $0x84] sm:$0xf] %v768_v8  ;;  %v567_v12 = vshrl.u32 %v303_v1, 16  ;;  %v570_v13 = vshll.u32 %v303_v1, 16  ;;  %v576_v15 = vshrl.u32 %v304_v5, 16  ;;  %v1143_v16 = vrot.slane %v1141_v42, 4 }
  0x6d   : > { %v1146_v17 = vrot.slane %v1144_v56, 5  ;;  %v556_v19 = vsel %vm9817_vm8, %v548_v63, %v555_v11  ;;  %v772_v20 = vsel %vm9823_vm9, %v557_v48, %v771_v9  ;;  %v564_v18 = vor.u32 %v562_v10, %v561_v62  ;;  %v778_v1 = vld [vmem:[#allocation2 + $0x98] sm:$0x1] }
  0x6e   : > { %770 = vst.msk [vmem:[#allocation2 + $0x88] sm:$0xf] %vm312_vm0, %v556_v19  ;;  %773 = vst [vmem:[#allocation2 + $0x8c] sm:$0x1] %v772_v20  ;;  %v565_v22 = vrot.slane %v561_v62, 4  ;;  %v569_v24 = vrot.slane %v567_v12, 7 }
  0x6f   : > { %v10005_v26 = vrot.slane %v576_v15, 7  ;;  %v901_v27 = vld [vmem:[#allocation2 + $0x70] sm:$0xf]  ;;  %v1147_v28 = vor.u32 %v1146_v17, %v1143_v16  ;;  %v902_v29 = vld [vmem:[#allocation2 + $0x74] sm:$0x1]  ;;  %v579_v32 = vshll.u32 %v304_v5, 16  ;;  %v775_v41 = vsel %vm9811_vm7, %v564_v18, %v774_v25 }
  0x70   : > { %v584_v33 = vshrl.u32 %v9998_v14, 16  ;;  %v1150_v34 = vshll.u32 %v901_v27, 16  ;;  %v1154_v36 = vshrl.u32 %v901_v27, 16  ;;  %v1160_v37 = vshll.u32 %v902_v29, 16  ;;  %776 = vst [vmem:[#allocation2 + $0x90] sm:$0xf] %v775_v41 }
  0x71   : > { %v572_v39 = vor.u32 %v570_v13, %v569_v24  ;;  %v1148_v38 = vrot.slane %v1147_v28, 4  ;;  %v903_v40 = vld [vmem:[#allocation2 + $0x78] sm:$0xf]  ;;  %v574_v31 = vrot.slane %v569_v24, 4  ;;  %v10011_v43 = vor.u32 %v579_v32, %v10005_v26  ;;  %v306_v41 = vld [vmem:[%s9804_s29 + $0x68] sm:$0xf] }
  0x72   : > { %v1152_v44 = vrot.slane %v1150_v34, 5  ;;  %v1156_v45 = vrot.slane %v1154_v36, 4  ;;  %v1162_v46 = vrot.slane %v1160_v37, 5  ;;  %v904_v47 = vld [vmem:[#allocation2 + $0x7c] sm:$0xf]  ;;  %v1165_v49 = vshrl.u32 %v903_v40, 16 }
  0x73   : > { %v1168_v50 = vshll.u32 %v903_v40, 16  ;;  %v1174_v51 = vshll.u32 %v904_v47, 16  ;;  %v1178_v52 = vshrl.u32 %v904_v47, 16  ;;  %v905_v53 = vld [vmem:[#allocation2 + $0x80] sm:$0x1]  ;;  %v573_v54 = vsel %vm9817_vm8, %v565_v22, %v572_v39 }
  0x74   : > { %v1153_v57 = vsel %vm9830_vm10, %v1148_v38, %v1152_v44  ;;  %v1157_v58 = vor.u32 %v1156_v45, %v1152_v44  ;;  %v1167_v59 = vrot.slane %v1165_v49, 4  ;;  %v1184_v60 = vshll.u32 %v905_v53, 16  ;;  %v906_v63 = vld [vmem:[#allocation2 + $0x84] sm:$0xf]  ;;  %777 = vst.msk [vmem:[#allocation2 + $0x94] sm:$0xf] %vm312_vm0, %v573_v54 }
  0x75   : > { %1344 = vrot.lane.b32.xlu0 %v1153_v57, %s9620_s30  ;;  %v1170_v2 = vrot.slane %v1168_v50, 5  ;;  %v1176_v3 = vrot.slane %v1174_v51, 5  ;;  %v1180_v55 = vrot.slane %v1178_v52, 4  ;;  %v907_v4 = vld [vmem:[#allocation2 + $0x88] sm:$0xf]  ;;  %v1189_v5 = vshrl.u32 %v906_v63, 16 }
  0x76   : > { %v1158_v6 = vrot.slane %v1157_v58, 4  ;;  %v1186_v7 = vrot.slane %v1184_v60, 5  ;;  %v1192_v61 = vshll.u32 %v906_v63, 16  ;;  %v1198_v8 = vshll.u32 %v907_v4, 16  ;;  %v908_v9 = vld [vmem:[#allocation2 + $0x8c] sm:$0x1] }
  0x77   : > { %v1171_v10 = vor.u32 %v1170_v2, %v1167_v59  ;;  %v1181_v42 = vor.u32 %v1180_v55, %v1176_v3  ;;  %v1191_v56 = vrot.slane %v1189_v5, 4  ;;  %v1202_v11 = vshrl.u32 %v907_v4, 16  ;;  %v909_v19 = vld [vmem:[#allocation2 + $0x90] sm:$0xf]  ;;  %v781_v36 = vld [vmem:[#allocation2 + $0x9c] sm:$0xf] }
  0x78   : > { %v1163_v48 = vsel %vm9830_vm10, %v1158_v6, %v1162_v46  ;;  %v1194_v62 = vrot.slane %v1192_v61, 5  ;;  %v1200_v12 = vrot.slane %v1198_v8, 5  ;;  %v1208_v13 = vshll.u32 %v908_v9, 16  ;;  %v307_v47 = vld [vmem:[%s9804_s29 + $0x6c] sm:$0xf] }
  0x79   : > { %1346 = vrot.lane.b32.xlu1 %v1163_v48, %s9620_s30  ;;  %v1172_v15 = vrot.slane %v1171_v10, 4  ;;  %v1182_v16 = vrot.slane %v1181_v42, 4  ;;  %v1204_v17 = vrot.slane %v1202_v11, 4  ;;  %v779_v20 = vsel %vm9823_vm9, %v574_v31, %v778_v1  ;;  %v785_v52 = vld [vmem:[#allocation2 + $0xa4] sm:$0x1] }
  0x7a   : > { %v1195_v18 = vor.u32 %v1194_v62, %v1191_v56  ;;  %v1210_v22 = vrot.slane %v1208_v13, 5  ;;  %v1213_v24 = vshrl.u32 %v909_v19, 16  ;;  %v1216_v25 = vshll.u32 %v909_v19, 16  ;;  %780 = vst [vmem:[#allocation2 + $0x98] sm:$0x1] %v779_v20 }
  0x7b   : > { %v1177_v27 = vsel %vm9830_vm10, %v1172_v15, %v1176_v3  ;;  %v1187_v28 = vsel %vm9830_vm10, %v1182_v16, %v1186_v7  ;;  %v1205_v29 = vor.u32 %v1204_v17, %v1200_v12  ;;  %v910_v32 = vld [vmem:[#allocation2 + $0x94] sm:$0xf]  ;;  %v582_v34 = vrot.slane %v10005_v26, 4  ;;  %v788_v9 = vld [vmem:[#allocation2 + $0xa8] sm:$0xf] }
  0x7c   : > { %1348 = vrot.lane.b32.xlu0 %v1177_v27, %s9620_s30  ;;  %v1196_v37 = vrot.slane %v1195_v18, 4  ;;  %v1215_v39 = vrot.slane %v1213_v24, 4  ;;  %v1218_v38 = vrot.slane %v1216_v25, 5  ;;  %v1222_v40 = vshll.u32 %v910_v32, 16  ;;  %v309_v1 = vld [vmem:[%s9804_s29 + $0x74] sm:$0xf] }
  0x7d   : > { %1350 = vrot.lane.b32.xlu1 %v1187_v28, %s9620_s30  ;;  %v1206_v31 = vrot.slane %v1205_v29, 4  ;;  %v1226_v44 = vshrl.u32 %v910_v32, 16  ;;  %v586_v45 = vrot.slane %v584_v33, 7  ;;  %v587_v46 = vshll.u32 %v9998_v14, 16  ;;  %v308_v14 = vld [vmem:[%s9804_s29 + $0x70] sm:$0xf] }
  0x7e   : > { %v1201_v26 = vsel %vm9830_vm10, %v1196_v37, %v1200_v12  ;;  %v1219_v49 = vor.u32 %v1218_v38, %v1215_v39  ;;  %v1224_v50 = vrot.slane %v1222_v40, 5  ;;  %v782_v51 = vsel %vm9811_vm7, %v10011_v43, %v781_v36  ;;  %v792_v13 = vld [vmem:[#allocation2 + $0xb0] sm:$0x1]  ;;  %v795_v25 = vld [vmem:[#allocation2 + $0xb4] sm:$0xf] }
  0x7f   : > { %v1211_v53 = vsel %vm9830_vm10, %v1206_v31, %v1210_v22  ;;  %v1228_v54 = vrot.slane %v1226_v44, 4  ;;  %v589_v57 = vor.u32 %v587_v46, %v586_v45  ;;  %783 = vst [vmem:[#allocation2 + $0x9c] sm:$0xf] %v782_v51  ;;  %v591_v33 = vrot.slane %v586_v45, 4  ;;  %v809_v27 = vld [vmem:[#allocation2] sm:$0xf] }
  0x80   : > { %1352 = vrot.lane.b32.xlu0 %v1201_v26, %s9620_s30  ;;  %v1220_v58 = vrot.slane %v1219_v49, 4  ;;  %v593_v59 = vshrl.u32 %v306_v41, 16  ;;  %v596_v60 = vshll.u32 %v306_v41, 16  ;;  %v601_v63 = vshrl.u32 %v307_v47, 16  ;;  %841 = vst.msk [vmem:[#allocation3] sm:$0xf] %vm312_vm0, %v809_v27 }
  0x81   : > { %1354 = vrot.lane.b32.xlu1 %v1211_v53, %s9620_s30  ;;  %v911_v2 = vld [vmem:[#allocation2 + $0x98] sm:$0x1]  ;;  %v1229_v43 = vor.u32 %v1228_v54, %v1224_v50  ;;  %v590_v3 = vsel %vm9817_vm8, %v582_v34, %v589_v57  ;;  %v786_v55 = vsel %vm9823_vm9, %v591_v33, %v785_v52  ;;  %v604_v4 = vshll.u32 %v307_v47, 16  ;;  %v811_v36 = vld [vmem:[#allocation2 + $0xc] sm:$0xf] }
  0x82   : > { %v1225_v5 = vsel %vm9830_vm10, %v1220_v58, %v1224_v50  ;;  %v1232_v6 = vshll.u32 %v911_v2, 16  ;;  %784 = vst.msk [vmem:[#allocation2 + $0xa0] sm:$0xf] %vm312_vm0, %v590_v3  ;;  %787 = vst [vmem:[#allocation2 + $0xa4] sm:$0x1] %v786_v55  ;;  %v595_v7 = vrot.slane %v593_v59, 7 }
  0x83   : > { %v603_v61 = vrot.slane %v601_v63, 7  ;;  %v1230_v8 = vrot.slane %v1229_v43, 4  ;;  %v610_v10 = vshrl.u32 %v308_v14, 16  ;;  %v613_v42 = vshll.u32 %v308_v14, 16  ;;  %v799_v40 = vld [vmem:[#allocation2 + $0xbc] sm:$0x1] }
  0x84   : > { %v618_v56 = vshrl.u32 %v309_v1, 16  ;;  %1356 = vrot.lane.b32.xlu0 %v1225_v5, %s9620_s30  ;;  %v1234_v11 = vrot.slane %v1232_v6, 5  ;;  %v598_v48 = vor.u32 %v596_v60, %v595_v7  ;;  %v599_v62 = vrot.slane %v595_v7, 4  ;;  %843 = vst.msk [vmem:[#allocation3 + $0x8] sm:$0xf] %vm312_vm0, %v811_v36 }
  0x85   : > { %v606_v12 = vor.u32 %v604_v4, %v603_v61  ;;  %v608_v15 = vrot.slane %v603_v61, 4  ;;  %v612_v16 = vrot.slane %v610_v10, 7  ;;  %v621_v19 = vshll.u32 %v309_v1, 16  ;;  %v810_v41 = vld [vmem:[#allocation2 + $0x4] sm:$0xf] }
  0x86   : > { %v620_v17 = vrot.slane %v618_v56, 7  ;;  %v1235_v20 = vsel %vm9830_vm10, %v1230_v8, %v1234_v11  ;;  %v912_v18 = vld [vmem:[#allocation2 + $0x9c] sm:$0xf]  ;;  %v789_v24 = vsel %vm9811_vm7, %v598_v48, %v788_v9  ;;  %842 = vst.msk [vmem:[#allocation3 + $0x4] sm:$0xf] %vm312_vm0, %v810_v41  ;;  %vm1744_vm15 = vcmask 68656  }
  0x87   : > { %v607_v22 = vsel %vm9817_vm8, %v599_v62, %v606_v12  ;;  %1358 = vrot.lane.b32.xlu1 %v1235_v20, %s9620_s30  ;;  %v1237_v28 = vshrl.u32 %v912_v18, 16  ;;  %v1240_v29 = vshll.u32 %v912_v18, 16  ;;  %790 = vst [vmem:[#allocation2 + $0xa8] sm:$0xf] %v789_v24  ;;  %v793_v32 = vsel %vm9823_vm9, %v608_v15, %v792_v13  ;;  %v812_v54 = vld [vmem:[#allocation2 + $0x10] sm:$0xf] }
  0x88   : > { %791 = vst.msk [vmem:[#allocation2 + $0xac] sm:$0xf] %vm312_vm0, %v607_v22  ;;  %v615_v34 = vor.u32 %v613_v42, %v612_v16  ;;  %794 = vst [vmem:[#allocation2 + $0xb0] sm:$0x1] %v793_v32  ;;  %v616_v37 = vrot.slane %v612_v16, 4  ;;  %v623_v39 = vor.u32 %v621_v19, %v620_v17  ;;  %v625_v38 = vrot.slane %v620_v17, 4 }
  0x89   : > { %v913_v31 = vld [vmem:[#allocation2 + $0xa0] sm:$0xf]  ;;  %v1239_v44 = vrot.slane %v1237_v28, 4  ;;  %v1242_v45 = vrot.slane %v1240_v29, 5  ;;  %v914_v46 = vld [vmem:[#allocation2 + $0xa4] sm:$0x1] }
  0x8a   : > { %v796_v47 = vsel %vm9811_vm7, %v615_v34, %v795_v25  ;;  %v1246_v26 = vshll.u32 %v913_v31, 16  ;;  %v1250_v49 = vshrl.u32 %v913_v31, 16  ;;  %v1256_v50 = vshll.u32 %v914_v46, 16  ;;  %844 = vst.msk [vmem:[#allocation3 + $0xc] sm:$0xf] %vm312_vm0, %v812_v54 }
  0x8b   : > { %v624_v51 = vsel %vm9817_vm8, %v616_v37, %v623_v39  ;;  %797 = vst [vmem:[#allocation2 + $0xb4] sm:$0xf] %v796_v47  ;;  %v1243_v52 = vor.u32 %v1242_v45, %v1239_v44  ;;  %v800_v53 = vsel %vm9823_vm9, %v625_v38, %v799_v40  ;;  %v813_v14 = vld [vmem:[#allocation2 + $0x18] sm:$0xf]  ;;  %v814_v59 = vld [vmem:[#allocation2 + $0x1c] sm:$0xf] }
  0x8c   : > { %798 = vst.msk [vmem:[#allocation2 + $0xb8] sm:$0xf] %vm312_vm0, %v624_v51  ;;  %v1248_v57 = vrot.slane %v1246_v26, 5  ;;  %v1252_v33 = vrot.slane %v1250_v49, 4  ;;  %801 = vst [vmem:[#allocation2 + $0xbc] sm:$0x1] %v800_v53 }
  0x8d   : > { %v1244_v58 = vrot.slane %v1243_v52, 4  ;;  %845 = vst.msk [vmem:[#allocation3 + $0x10] sm:$0xf] %vm312_vm0, %v813_v14  ;;  %v1258_v63 = vrot.slane %v1256_v50, 5  ;;  %846 = vst.msk [vmem:[#allocation3 + $0x14] sm:$0xf] %vm312_vm0, %v814_v59 }
  0x8e   : > { %v1253_v60 = vor.u32 %v1252_v33, %v1248_v57  ;;  %v915_v1 = vld [vmem:[#allocation2 + $0xa8] sm:$0xf]  ;;  %v1438_v12 = vld [vmem:[#allocation2 + $0x4] sm:$0xf]  ;;  %v1437_v34 = vld [vmem:[#allocation2] sm:$0xe] }
  0x8f   : > { %v916_v2 = vld [vmem:[#allocation2 + $0xac] sm:$0xf]  ;;  %v1249_v43 = vsel %vm9830_vm10, %v1244_v58, %v1248_v57  ;;  %v1261_v3 = vshrl.u32 %v915_v1, 16  ;;  %v1264_v55 = vshll.u32 %v915_v1, 16  ;;  %v917_v5 = vld [vmem:[#allocation2 + $0xb0] sm:$0x1] }
  0x90   : > { %v1270_v4 = vshll.u32 %v916_v2, 16  ;;  %1360 = vrot.lane.b32.xlu0 %v1249_v43, %s9620_s30  ;;  %v1254_v6 = vrot.slane %v1253_v60, 4  ;;  %v1274_v7 = vshrl.u32 %v916_v2, 16  ;;  %v1280_v61 = vshll.u32 %v917_v5, 16  ;;  %v1439_v37 = vld [vmem:[#allocation2 + $0x8] sm:$0x1] }
  0x91   : > { %v1263_v8 = vrot.slane %v1261_v3, 4  ;;  %v1266_v9 = vrot.slane %v1264_v55, 5  ;;  %v1538_v36 = vrot.slane %v1438_v12, 5  ;;  %v1441_v31 = vld [vmem:[#allocation2 + $0x10] sm:$0xf]  ;;  %v9007_v49 = vrot.slane %v1437_v34, 9 }
  0x92   : > { %v1272_v10 = vrot.slane %v1270_v4, 5  ;;  %v918_v42 = vld [vmem:[#allocation2 + $0xb4] sm:$0xf]  ;;  %v1259_v56 = vsel %vm9830_vm10, %v1254_v6, %v1258_v63  ;;  %v1276_v11 = vrot.slane %v1274_v7, 4  ;;  %v1282_v18 = vrot.slane %v1280_v61, 5 }
  0x93   : > { %v919_v48 = vld [vmem:[#allocation2 + $0xb8] sm:$0xf]  ;;  %v1285_v62 = vshrl.u32 %v918_v42, 16  ;;  %1362 = vrot.lane.b32.xlu1 %v1259_v56, %s9620_s30  ;;  %v1267_v13 = vor.u32 %v1266_v9, %v1263_v8  ;;  %v1288_v15 = vshll.u32 %v918_v42, 16  ;;  %v920_v19 = vld [vmem:[#allocation2 + $0xbc] sm:$0x1]  ;;  %v1539_v63 = vsel %vm10094_vm13, %v9007_v49, %v1538_v36 }
  0x94   : > { %v1294_v16 = vshll.u32 %v919_v48, 16  ;;  %v1298_v17 = vshrl.u32 %v919_v48, 16  ;;  %v1277_v20 = vor.u32 %v1276_v11, %v1272_v10  ;;  %v1304_v24 = vshll.u32 %v920_v19, 16  ;;  %v815_v44 = vld [vmem:[#allocation2 + $0x24] sm:$0xf] }
  0x95   : > { %v1287_v22 = vrot.slane %v1285_v62, 4  ;;  %v1268_v25 = vrot.slane %v1267_v13, 4  ;;  %v1290_v27 = vrot.slane %v1288_v15, 5  ;;  %847 = vst.msk [vmem:[#allocation3 + $0x18] sm:$0xf] %vm312_vm0, %v815_v44  ;;  %v1540_v52 = vrot.slane %v1538_v36, 4 }
  0x96   : > { %v1296_v28 = vrot.slane %v1294_v16, 5  ;;  %v1300_v29 = vrot.slane %v1298_v17, 4  ;;  %v1278_v32 = vrot.slane %v1277_v20, 4  ;;  %v1306_v41 = vrot.slane %v1304_v24, 5  ;;  %v816_v46 = vld [vmem:[#allocation2 + $0x28] sm:$0xf] }
  0x97   : > { %v1273_v39 = vsel %vm9830_vm10, %v1268_v25, %v1272_v10  ;;  %v1291_v38 = vor.u32 %v1290_v27, %v1287_v22  ;;  %v1440_v50 = vld [vmem:[#allocation2 + $0xc] sm:$0xe]  ;;  %848 = vst.msk [vmem:[#allocation3 + $0x1c] sm:$0xf] %vm312_vm0, %v816_v46  ;;  %v1541_v53 = vrot.slane %v1439_v37, 5  ;;  %v1545_v54 = vrot.slane %v1441_v31, 5 }
  0x98   : > { %v1301_v40 = vor.u32 %v1300_v29, %v1296_v28  ;;  %1364 = vrot.lane.b32.xlu0 %v1273_v39, %s9620_s30  ;;  %v1283_v45 = vsel %vm9830_vm10, %v1278_v32, %v1282_v18  ;;  %v1442_v57 = vld [vmem:[#allocation2 + $0x14] sm:$0x1]  ;;  %v1444_v58 = vld [vmem:[#allocation2 + $0x1c] sm:$0xf]  ;;  %v817_v59 = vld [vmem:[#allocation2 + $0x30] sm:$0xf] }
  0x99   : > { %1366 = vrot.lane.b32.xlu1 %v1283_v45, %s9620_s30  ;;  %v1292_v47 = vrot.slane %v1291_v38, 4  ;;  %v818_v60 = vld [vmem:[#allocation2 + $0x34] sm:$0xf]  ;;  %849 = vst.msk [vmem:[#allocation3 + $0x20] sm:$0xf] %vm312_vm0, %v817_v59  ;;  %v9008_v1 = vrot.slane %v1440_v50, 9  ;;  %v1542_v3 = vsel %vm10094_vm13, %v1540_v52, %v1541_v53 }
  0x9a   : > { %v1302_v26 = vrot.slane %v1301_v40, 4  ;;  %850 = vst.msk [vmem:[#allocation3 + $0x24] sm:$0xf] %vm312_vm0, %v818_v60  ;;  %v1443_v2 = vld [vmem:[#allocation2 + $0x18] sm:$0xe]  ;;  %v1547_v55 = vrot.slane %v1545_v54, 4 }
  0x9b   : > { %v1297_v33 = vsel %vm9830_vm10, %v1292_v47, %v1296_v28  ;;  %v819_v43 = vld [vmem:[#allocation2 + $0x3c] sm:$0xf]  ;;  %v1548_v4 = vrot.slane %v1442_v57, 5  ;;  %v1552_v5 = vrot.slane %v1444_v58, 5  ;;  %v820_v6 = vld [vmem:[#allocation2 + $0x40] sm:$0xf]  ;;  %v1546_v10 = vsel %vm10094_vm13, %v9008_v1, %v1545_v54 }
  0x9c   : > { %v1307_v14 = vsel %vm9830_vm10, %v1302_v26, %v1306_v41  ;;  %1368 = vrot.lane.b32.xlu0 %v1297_v33, %s9620_s30  ;;  %851 = vst.msk [vmem:[#allocation3 + $0x28] sm:$0xf] %vm312_vm0, %v819_v43  ;;  %v1445_v7 = vld [vmem:[#allocation2 + $0x20] sm:$0x1]  ;;  %v1447_v61 = vld [vmem:[#allocation2 + $0x28] sm:$0xf] }
  0x9d   : > { %1370 = vrot.lane.b32.xlu1 %v1307_v14, %s9620_s30  ;;  %852 = vst.msk [vmem:[#allocation3 + $0x2c] sm:$0xf] %vm312_vm0, %v820_v6  ;;  %v821_v9 = vld [vmem:[#allocation2 + $0x48] sm:$0xf]  ;;  %v9009_v42 = vrot.slane %v1443_v2, 9  ;;  %v1549_v11 = vsel %vm10094_vm13, %v1547_v55, %v1548_v4  ;;  %v1554_v48 = vrot.slane %v1552_v5, 4 }
  0x9e   : > { %v1309_v8 = vpop.permute.xlu0 %1308  ;;  %853 = vst.msk [vmem:[#allocation3 + $0x30] sm:$0xf] %vm312_vm0, %v821_v9  ;;  %v822_v56 = vld [vmem:[#allocation2 + $0x4c] sm:$0xf]  ;;  %v1555_v62 = vrot.slane %v1445_v7, 5  ;;  %v1559_v13 = vrot.slane %v1447_v61, 5 }
  0x9f   : > { %v1446_v12 = vld [vmem:[#allocation2 + $0x24] sm:$0xe]  ;;  %854 = vst.msk [vmem:[#allocation3 + $0x34] sm:$0xf] %vm312_vm0, %v822_v56  ;;  %v1448_v15 = vld [vmem:[#allocation2 + $0x2c] sm:$0x1]  ;;  %v1553_v20 = vsel %vm10094_vm13, %v9009_v42, %v1552_v5 }
  0xa0   : > { %1648 = vrot.lane.b32.xlu0 %v1539_v63, %s9621_s8  ;;  %v1450_v16 = vld [vmem:[#allocation2 + $0x34] sm:$0xf]  ;;  %v824_v19 = vld [vmem:[#allocation2 + $0x58] sm:$0xf]  ;;  %v9010_v18 = vrot.slane %v1446_v12, 9  ;;  %v1556_v27 = vsel %vm10094_vm13, %v1554_v48, %v1555_v62  ;;  %v1561_v28 = vrot.slane %v1559_v13, 4 }
  0xa1   : > { %1650 = vrot.lane.b32.xlu1 %v1542_v3, %s9621_s8  ;;  %v823_v17 = vld [vmem:[#allocation2 + $0x54] sm:$0xf]  ;;  %v1449_v22 = vld [vmem:[#allocation2 + $0x30] sm:$0xe]  ;;  %v1451_v24 = vld [vmem:[#allocation2 + $0x38] sm:$0x1] }
  0xa2   : > { %855 = vst.msk [vmem:[#allocation3 + $0x38] sm:$0xf] %vm312_vm0, %v823_v17  ;;  %v1311_v25 = vpop.permute.xlu0 %1310  ;;  %856 = vst.msk [vmem:[#allocation3 + $0x3c] sm:$0xf] %vm312_vm0, %v824_v19  ;;  %v1562_v29 = vrot.slane %v1448_v15, 5  ;;  %v1566_v32 = vrot.slane %v1450_v16, 5  ;;  %v1560_v39 = vsel %vm10094_vm13, %v9010_v18, %v1559_v13 }
  0xa3   : > { %v825_v34 = vld [vmem:[#allocation2 + $0x60] sm:$0xf]  ;;  %v826_v37 = vld [vmem:[#allocation2 + $0x64] sm:$0xf]  ;;  %1405 = vst.msk [vmem:[#allocation3] sm:$0xf] %vm1404_vm14, %v1309_v8 }
  0xa4   : > { %1652 = vrot.lane.b32.xlu0 %v1546_v10, %s9621_s8  ;;  %v1453_v36 = vld [vmem:[#allocation2 + $0x40] sm:$0xf]  ;;  %857 = vst.msk [vmem:[#allocation3 + $0x40] sm:$0xf] %vm312_vm0, %v825_v34  ;;  %858 = vst.msk [vmem:[#allocation3 + $0x44] sm:$0xf] %vm312_vm0, %v826_v37  ;;  %v1563_v31 = vsel %vm10094_vm13, %v1561_v28, %v1562_v29 }
  0xa5   : > { %1654 = vrot.lane.b32.xlu1 %v1549_v11, %s9621_s8  ;;  %1406 = vst.msk [vmem:[#allocation3 + $0x4] sm:$0xf] %vm1404_vm14, %v1311_v25  ;;  %v9011_v38 = vrot.slane %v1449_v22, 9  ;;  %v1452_v40 = vld [vmem:[#allocation2 + $0x3c] sm:$0xe]  ;;  %v1568_v44 = vrot.slane %v1566_v32, 4 }
  0xa6   : > { %v827_v41 = vld [vmem:[#allocation2 + $0x6c] sm:$0xf]  ;;  %v1569_v45 = vrot.slane %v1451_v24, 5  ;;  %v1573_v46 = vrot.slane %v1453_v36, 5  ;;  %v828_v47 = vld [vmem:[#allocation2 + $0x70] sm:$0xf] }
  0xa7   : > { %859 = vst.msk [vmem:[#allocation3 + $0x48] sm:$0xf] %vm312_vm0, %v827_v41  ;;  %v1454_v26 = vld [vmem:[#allocation2 + $0x44] sm:$0x1]  ;;  %v1456_v49 = vld [vmem:[#allocation2 + $0x4c] sm:$0xf]  ;;  %v1567_v54 = vsel %vm10094_vm13, %v9011_v38, %v1566_v32 }
  0xa8   : > { %1656 = vrot.lane.b32.xlu0 %v1553_v20, %s9621_s8  ;;  %860 = vst.msk [vmem:[#allocation3 + $0x4c] sm:$0xf] %vm312_vm0, %v828_v47  ;;  %v1455_v50 = vld [vmem:[#allocation2 + $0x48] sm:$0xe]  ;;  %v829_v52 = vld [vmem:[#allocation2 + $0x78] sm:$0xf]  ;;  %v1570_v59 = vsel %vm10094_vm13, %v1568_v44, %v1569_v45 }
  0xa9   : > { %1658 = vrot.lane.b32.xlu1 %v1556_v27, %s9621_s8  ;;  %v830_v53 = vld [vmem:[#allocation2 + $0x7c] sm:$0xf]  ;;  %v9012_v57 = vrot.slane %v1452_v40, 9  ;;  %v10144_v33 = vld [vmem:[#allocation2 + $0x58] sm:$0xf]  ;;  %v1575_v60 = vrot.slane %v1573_v46, 4 }
  0xaa   : > { %861 = vst.msk [vmem:[#allocation3 + $0x50] sm:$0xf] %vm312_vm0, %v829_v52  ;;  %862 = vst.msk [vmem:[#allocation3 + $0x54] sm:$0xf] %vm312_vm0, %v830_v53  ;;  %v831_v58 = vld [vmem:[#allocation2 + $0x84] sm:$0xf] }
  0xab   : > { %v1576_v63 = vrot.slane %v1454_v26, 5  ;;  %v1580_v1 = vrot.slane %v1456_v49, 5  ;;  %863 = vst.msk [vmem:[#allocation3 + $0x58] sm:$0xf] %vm312_vm0, %v831_v58  ;;  %v832_v2 = vld [vmem:[#allocation2 + $0x88] sm:$0xf]  ;;  %v1574_v6 = vsel %vm10094_vm13, %v9012_v57, %v1573_v46 }
  0xac   : > { %1660 = vrot.lane.b32.xlu0 %v1560_v39, %s9621_s8  ;;  %v1313_v14 = vpop.permute.xlu1 %1312  ;;  %v1457_v43 = vld [vmem:[#allocation2 + $0x50] sm:$0x1]  ;;  %864 = vst.msk [vmem:[#allocation3 + $0x5c] sm:$0xf] %vm312_vm0, %v832_v2  ;;  %v834_v55 = vld [vmem:[#allocation2 + $0x94] sm:$0xf] }
  0xad   : > { %1662 = vrot.lane.b32.xlu1 %v1563_v31, %s9621_s8  ;;  %1407 = vst.msk [vmem:[#allocation3 + $0x8] sm:$0xf] %vm1404_vm14, %v1313_v14  ;;  %v833_v3 = vld [vmem:[#allocation2 + $0x90] sm:$0xf]  ;;  %v835_v4 = vld [vmem:[#allocation2 + $0x9c] sm:$0xf]  ;;  %v1577_v56 = vsel %vm10094_vm13, %v1575_v60, %v1576_v63 }
  0xae   : > { %865 = vst.msk [vmem:[#allocation3 + $0x60] sm:$0xf] %vm312_vm0, %v833_v3  ;;  %866 = vst.msk [vmem:[#allocation3 + $0x64] sm:$0xf] %vm312_vm0, %v834_v55  ;;  %v836_v5 = vld [vmem:[#allocation2 + $0xa0] sm:$0xf] }
  0xaf   : > { %v9013_v7 = vrot.slane %v1455_v50, 9  ;;  %v1458_v61 = vld [vmem:[#allocation2 + $0x54] sm:$0xe]  ;;  %v1587_v8 = vrot.slane %v10144_v33, 5  ;;  %v1317_v10 = vpop.permute.xlu0 %1316  ;;  %867 = vst.msk [vmem:[#allocation3 + $0x68] sm:$0xf] %vm312_vm0, %v835_v4 }
  0xb0   : > { %1664 = vrot.lane.b32.xlu0 %v1567_v54, %s9621_s8  ;;  %v1315_v9 = vpop.permute.xlu1 %1314  ;;  %868 = vst.msk [vmem:[#allocation3 + $0x6c] sm:$0xf] %vm312_vm0, %v836_v5  ;;  %v837_v42 = vld [vmem:[#allocation2 + $0xa8] sm:$0xf]  ;;  %v1582_v11 = vrot.slane %v1580_v1, 4  ;;  %v1583_v48 = vrot.slane %v1457_v43, 5 }
  0xb1   : > { %1666 = vrot.lane.b32.xlu1 %v1570_v59, %s9621_s8  ;;  %v1460_v62 = vld [vmem:[#allocation2 + $0x5c] sm:$0x1]  ;;  %1408 = vst.msk [vmem:[#allocation3 + $0xc] sm:$0xf] %vm1404_vm14, %v1315_v9  ;;  %1409 = vst.msk [vmem:[#allocation3 + $0x10] sm:$0xf] %vm1404_vm14, %v1317_v10  ;;  %v1581_v18 = vsel %vm10094_vm13, %v9013_v7, %v1580_v1 }
  0xb2   : > { %869 = vst.msk [vmem:[#allocation3 + $0x70] sm:$0xf] %vm312_vm0, %v837_v42  ;;  %v838_v12 = vld [vmem:[#allocation2 + $0xac] sm:$0xf]  ;;  %v1462_v13 = vld [vmem:[#allocation2 + $0x64] sm:$0xf]  ;;  %v1584_v29 = vsel %vm10094_vm13, %v1582_v11, %v1583_v48 }
  0xb3   : > { %870 = vst.msk [vmem:[#allocation3 + $0x74] sm:$0xf] %vm312_vm0, %v838_v12  ;;  %v839_v15 = vld [vmem:[#allocation2 + $0xb4] sm:$0xf]  ;;  %v840_v16 = vld [vmem:[#allocation2 + $0xb8] sm:$0xf] }
  0xb4   : > { %1668 = vrot.lane.b32.xlu0 %v1574_v6, %s9621_s8  ;;  %v9014_v17 = vrot.slane %v1458_v61, 9  ;;  %v1461_v19 = vld [vmem:[#allocation2 + $0x60] sm:$0xe]  ;;  %v1463_v20 = vld [vmem:[#allocation2 + $0x68] sm:$0x1]  ;;  %v1589_v22 = vrot.slane %v1587_v8, 4  ;;  %v1319_v27 = vpop.permute.xlu1 %1318 }
  0xb5   : > { %871 = vst.msk [vmem:[#allocation3 + $0x78] sm:$0xf] %vm312_vm0, %v839_v15  ;;  %872 = vst.msk [vmem:[#allocation3 + $0x7c] sm:$0xf] %vm312_vm0, %v840_v16  ;;  %1670 = vrot.lane.b32.xlu1 %v1577_v56, %s9621_s8  ;;  %v1590_v24 = vrot.slane %v1460_v62, 5  ;;  %v1594_v32 = vrot.slane %v1462_v13, 5  ;;  %v1321_v34 = vpop.permute.xlu0 %1320 }
  0xb6   : > { %v1465_v25 = vld [vmem:[#allocation2 + $0x70] sm:$0xf]  ;;  %v310_v28 = vld [vmem:[%s9804_s29 + $0x78] sm:$0xf]  ;;  %1410 = vst.msk [vmem:[#allocation3 + $0x14] sm:$0xf] %vm1404_vm14, %v1319_v27  ;;  %v1588_v41 = vsel %vm10094_vm13, %v9014_v17, %v1587_v8 }
  0xb7   : > { %v627_v36 = vshrl.u32 %v310_v28, 16  ;;  %v630_v37 = vshll.u32 %v310_v28, 16  ;;  %v311_v39 = vld [vmem:[%s9804_s29 + $0x7c] sm:$0xf]  ;;  %1411 = vst.msk [vmem:[#allocation3 + $0x18] sm:$0xf] %vm1404_vm14, %v1321_v34  ;;  %v1591_v50 = vsel %vm10094_vm13, %v1589_v22, %v1590_v24 }
  0xb8   : > { %v635_v38 = vshrl.u32 %v311_v39, 16  ;;  %v638_v40 = vshll.u32 %v311_v39, 16  ;;  %1672 = vrot.lane.b32.xlu0 %v1581_v18, %s9621_s8  ;;  %v9015_v44 = vrot.slane %v1461_v19, 9  ;;  %v1597_v45 = vrot.slane %v1463_v20, 5  ;;  %v1323_v47 = vpop.permute.xlu1 %1322  ;;  %v802_v26 = vld [vmem:[#allocation2 + $0xc0] sm:$0xf] }
  0xb9   : > { %v629_v31 = vrot.slane %v627_v36, 7  ;;  %1674 = vrot.lane.b32.xlu1 %v1584_v29, %s9621_s8  ;;  %v1601_v46 = vrot.slane %v1465_v25, 5  ;;  %v1596_v52 = vrot.slane %v1594_v32, 4  ;;  %v1464_v53 = vld [vmem:[#allocation2 + $0x6c] sm:$0xe]  ;;  %v1325_v54 = vpop.permute.xlu0 %1324  ;;  %vm2498_vm2 = vcmask 117856  }
  0xba   : > { %v10184_v49 = vrot.slane %v635_v38, 7  ;;  %1412 = vst.msk [vmem:[#allocation3 + $0x1c] sm:$0xf] %vm1404_vm14, %v1323_v47  ;;  %v1466_v14 = vld [vmem:[#allocation2 + $0x74] sm:$0x1]  ;;  %v1595_v63 = vsel %vm10094_vm13, %v9015_v44, %v1594_v32  ;;  %v9016_v1 = vrot.slane %v1464_v53, 9 }
  0xbb   : > { %v632_v57 = vor.u32 %v630_v37, %v629_v31  ;;  %v633_v33 = vrot.slane %v629_v31, 4  ;;  %v1468_v58 = vld [vmem:[#allocation2 + $0x7c] sm:$0xf]  ;;  %1413 = vst.msk [vmem:[#allocation3 + $0x20] sm:$0xf] %vm1404_vm14, %v1325_v54  ;;  %v1598_v3 = vsel %vm10094_vm13, %v1596_v52, %v1597_v45  ;;  %v1603_v55 = vrot.slane %v1601_v46, 4 }
  0xbc   : > { %v640_v59 = vor.u32 %v638_v40, %v10184_v49  ;;  %1676 = vrot.lane.b32.xlu0 %v1588_v41, %s9621_s8  ;;  %v1327_v2 = vpop.permute.xlu1 %1326  ;;  %v1604_v4 = vrot.slane %v1466_v14, 5  ;;  %v1467_v5 = vld [vmem:[#allocation2 + $0x78] sm:$0xe]  ;;  %v1608_v6 = vrot.slane %v1468_v58, 5  ;;  %v1469_v21 = vld [vmem:[#allocation2 + $0x80] sm:$0x1]  ;;  %v1602_v61 = vsel %vm10094_vm13, %v9016_v1, %v1601_v46 }
  0xbd   : > { %v803_v60 = vsel %vm9811_vm7, %v632_v57, %v802_v26  ;;  %1678 = vrot.lane.b32.xlu1 %v1591_v50, %s9621_s8  ;;  %1414 = vst.msk [vmem:[#allocation3 + $0x24] sm:$0xf] %vm1404_vm14, %v1327_v2  ;;  %v1471_v7 = vld [vmem:[#allocation2 + $0x88] sm:$0xf]  ;;  %v9017_v8 = vrot.slane %v1467_v5, 9  ;;  %v1611_v42 = vrot.slane %v1469_v21, 5 }
  0xbe   : > { %804 = vst [vmem:[#allocation2 + $0xc0] sm:$0xf] %v803_v60  ;;  %v641_v43 = vsel %vm9817_vm8, %v633_v33, %v640_v59  ;;  %v1605_v9 = vsel %vm10094_vm13, %v1603_v55, %v1604_v4  ;;  %v1610_v10 = vrot.slane %v1608_v6, 4  ;;  %v1470_v56 = vld [vmem:[#allocation2 + $0x84] sm:$0xe]  ;;  %v1615_v11 = vrot.slane %v1471_v7, 5 }
  0xbf   : > { %805 = vst.msk [vmem:[#allocation2 + $0xc4] sm:$0xf] %vm312_vm0, %v641_v43  ;;  %v1472_v48 = vld [vmem:[#allocation2 + $0x8c] sm:$0x1]  ;;  %v1474_v62 = vld [vmem:[#allocation2 + $0x94] sm:$0xf]  ;;  %v1609_v12 = vsel %vm10094_vm13, %v9017_v8, %v1608_v6 }
  0xc0   : > { %1680 = vrot.lane.b32.xlu0 %v1595_v63, %s9621_s8  ;;  %v9018_v13 = vrot.slane %v1470_v56, 9  ;;  %v1612_v15 = vsel %vm10094_vm13, %v1610_v10, %v1611_v42  ;;  %v1617_v16 = vrot.slane %v1615_v11, 4  ;;  %v1618_v17 = vrot.slane %v1472_v48, 5  ;;  %v1473_v19 = vld [vmem:[#allocation2 + $0x90] sm:$0xe]  ;;  %s9632_s30 = smov 40  }
  0xc1   : > { %1682 = vrot.lane.b32.xlu1 %v1598_v3, %s9621_s8  ;;  %v1622_v20 = vrot.slane %v1474_v62, 5  ;;  %v1475_v18 = vld [vmem:[#allocation2 + $0x98] sm:$0x1]  ;;  %v1477_v22 = vld [vmem:[#allocation2 + $0xa0] sm:$0xf]  ;;  %v9019_v25 = vrot.slane %v1473_v19, 9 }
  0xc2   : > { %v1616_v24 = vsel %vm10094_vm13, %v9018_v13, %v1615_v11  ;;  %v1619_v27 = vsel %vm10094_vm13, %v1617_v16, %v1618_v17  ;;  %v1625_v29 = vrot.slane %v1475_v18, 5  ;;  %v1476_v32 = vld [vmem:[#allocation2 + $0x9c] sm:$0xe]  ;;  %v1629_v34 = vrot.slane %v1477_v22, 5  ;;  %v1478_v36 = vld [vmem:[#allocation2 + $0xa4] sm:$0x1] }
  0xc3   : > { %v1624_v28 = vrot.slane %v1622_v20, 4  ;;  %v1480_v37 = vld [vmem:[#allocation2 + $0xac] sm:$0xf]  ;;  %v1623_v40 = vsel %vm10094_vm13, %v9019_v25, %v1622_v20  ;;  %v9020_v41 = vrot.slane %v1476_v32, 9  ;;  %v1632_v45 = vrot.slane %v1478_v36, 5 }
  0xc4   : > { %1684 = vrot.lane.b32.xlu0 %v1602_v61, %s9621_s8  ;;  %v1631_v44 = vrot.slane %v1629_v34, 4  ;;  %v1479_v46 = vld [vmem:[#allocation2 + $0xa8] sm:$0xe]  ;;  %v1636_v47 = vrot.slane %v1480_v37, 5  ;;  %v1481_v26 = vld [vmem:[#allocation2 + $0xb0] sm:$0x1] }
  0xc5   : > { %1686 = vrot.lane.b32.xlu1 %v1605_v9, %s9621_s8  ;;  %v1626_v31 = vsel %vm10094_vm13, %v1624_v28, %v1625_v29  ;;  %v1483_v50 = vld [vmem:[#allocation2 + $0xb8] sm:$0xf]  ;;  %v1630_v53 = vsel %vm10094_vm13, %v9020_v41, %v1629_v34  ;;  %v9021_v54 = vrot.slane %v1479_v46, 9  ;;  %v1639_v14 = vrot.slane %v1481_v26, 5  ;;  %v1482_v58 = vld [vmem:[#allocation2 + $0xb4] sm:$0xe] }
  0xc6   : > { %v1633_v57 = vsel %vm10094_vm13, %v1631_v44, %v1632_v45  ;;  %v1638_v33 = vrot.slane %v1636_v47, 4  ;;  %v1643_v59 = vrot.slane %v1483_v50, 5  ;;  %v1484_v63 = vld [vmem:[#allocation2 + $0xbc] sm:$0x1]  ;;  %v9022_v43 = vrot.slane %v1482_v58, 9 }
  0xc7   : > { %v1637_v2 = vsel %vm10094_vm13, %v9021_v54, %v1636_v47  ;;  %v1646_v4 = vrot.slane %v1484_v63, 5  ;;  %v1777_v8 = vld [vmem:[#allocation2 + $0xc] sm:$0xf]  ;;  %v1778_v9 = vld [vmem:[#allocation2 + $0x10] sm:$0xf]  ;;  %v642_v25 = vrot.slane %v10184_v49, 4 }
  0xc8   : > { %1688 = vrot.lane.b32.xlu0 %v1609_v12, %s9621_s8  ;;  %v1640_v3 = vsel %vm10094_vm13, %v1638_v33, %v1639_v14  ;;  %v1645_v55 = vrot.slane %v1643_v59, 4  ;;  %v1644_v21 = vsel %vm10094_vm13, %v9022_v43, %v1643_v59  ;;  %v1779_v10 = vld [vmem:[#allocation2 + $0x18] sm:$0xf]  ;;  %v1780_v42 = vld [vmem:[#allocation2 + $0x1c] sm:$0xf]  ;;  %vm1937_vm0 = vcmask 93256  }
  0xc9   : > { %1690 = vrot.lane.b32.xlu1 %v1612_v15, %s9621_s8  ;;  %v1781_v56 = vld [vmem:[#allocation2 + $0x24] sm:$0xf]  ;;  %v1782_v11 = vld [vmem:[#allocation2 + $0x28] sm:$0xf]  ;;  %v1783_v62 = vld [vmem:[#allocation2 + $0x30] sm:$0xf] }
  0xca   : > { %v1329_v39 = vpop.permute.xlu0 %1328  ;;  %v1647_v7 = vsel %vm10094_vm13, %v1645_v55, %v1646_v4  ;;  %v1784_v12 = vld [vmem:[#allocation2 + $0x34] sm:$0xf]  ;;  %v1785_v15 = vld [vmem:[#allocation2 + $0x3c] sm:$0xf]  ;;  %v1786_v16 = vld [vmem:[#allocation2 + $0x40] sm:$0xf] }
  0xcb   : > { %1415 = vst.msk [vmem:[#allocation3 + $0x28] sm:$0xf] %vm1404_vm14, %v1329_v39  ;;  %v1331_v38 = vpop.permute.xlu1 %1330  ;;  %v1787_v20 = vld [vmem:[#allocation2 + $0x48] sm:$0xf]  ;;  %v1788_v18 = vld [vmem:[#allocation2 + $0x4c] sm:$0xf] }
  0xcc   : > { %1692 = vrot.lane.b32.xlu0 %v1616_v24, %s9621_s8  ;;  %1416 = vst.msk [vmem:[#allocation3 + $0x2c] sm:$0xf] %vm1404_vm14, %v1331_v38  ;;  %v1789_v28 = vld [vmem:[#allocation2 + $0x54] sm:$0xf]  ;;  %v1790_v29 = vld [vmem:[#allocation2 + $0x58] sm:$0xf] }
  0xcd   : > { %1694 = vrot.lane.b32.xlu1 %v1619_v27, %s9621_s8  ;;  %v806_v27 = vld [vmem:[#allocation2 + $0xc8] sm:$0x1]  ;;  %v1791_v49 = vld [vmem:[#allocation2 + $0x60] sm:$0xf]  ;;  %v1792_v37 = vld [vmem:[#allocation2 + $0x64] sm:$0xf] }
  0xce   : > { %v807_v34 = vsel %vm9823_vm9, %v642_v25, %v806_v27  ;;  %v1793_v39 = vld [vmem:[#allocation2 + $0x6c] sm:$0xf]  ;;  %v1794_v38 = vld [vmem:[#allocation2 + $0x70] sm:$0xf]  ;;  %v1795_v30 = vld [vmem:[#allocation2 + $0x78] sm:$0xf] }
  0xcf   : > { %v1333_v52 = vpop.permute.xlu0 %1332  ;;  %808 = vst [vmem:[#allocation2 + $0xc8] sm:$0x1] %v807_v34  ;;  %v1797_v44 = vld [vmem:[#allocation2 + $0x84] sm:$0xf]  ;;  %v1798_v45 = vld [vmem:[#allocation2 + $0x88] sm:$0xf] }
  0xd0   : > { %1696 = vrot.lane.b32.xlu0 %v1623_v40, %s9621_s8  ;;  %1417 = vst.msk [vmem:[#allocation3 + $0x30] sm:$0xf] %vm1404_vm14, %v1333_v52  ;;  %v1796_v40 = vld [vmem:[#allocation2 + $0x7c] sm:$0xf]  ;;  %v1970_v46 = vld [vmem:[#allocation2 + $0xc] sm:$0xf] }
  0xd1   : > { %1698 = vrot.lane.b32.xlu1 %v1626_v31, %s9621_s8  ;;  %v1335_v60 = vpop.permute.xlu1 %1334  ;;  %v1799_v47 = vld [vmem:[#allocation2 + $0x90] sm:$0xf]  ;;  %v1973_v50 = vld [vmem:[#allocation2 + $0x18] sm:$0xf]  ;;  %v1974_v54 = vld [vmem:[#allocation2 + $0x1c] sm:$0xf] }
  0xd2   : > { %1418 = vst.msk [vmem:[#allocation3 + $0x34] sm:$0xf] %vm1404_vm14, %v1335_v60  ;;  %v1971_v26 = vld [vmem:[#allocation2 + $0x10] sm:$0xf]  ;;  %v2019_v33 = vshrl.u32 %v1970_v46, 16  ;;  %v2022_v14 = vshll.u32 %v1970_v46, 16 }
  0xd3   : > { %v2028_v58 = vshll.u32 %v1971_v26, 16  ;;  %v2032_v59 = vshrl.u32 %v1971_v26, 16  ;;  %v2043_v60 = vshrl.u32 %v1973_v50, 16  ;;  %v2046_v63 = vshll.u32 %v1973_v50, 16  ;;  %v1802_v55 = vld [vmem:[#allocation2 + $0xa0] sm:$0xf] }
  0xd4   : > { %1700 = vrot.lane.b32.xlu0 %v1630_v53, %s9621_s8  ;;  %v1337_v1 = vpop.permute.xlu0 %1336  ;;  %v1800_v53 = vld [vmem:[#allocation2 + $0x94] sm:$0xf]  ;;  %v2056_v43 = vshrl.u32 %v1974_v54, 16  ;;  %v1976_v4 = vld [vmem:[#allocation2 + $0x24] sm:$0xf]  ;;  %vm2835_vm3 = vcmask 142456  }
  0xd5   : > { %1702 = vrot.lane.b32.xlu1 %v1633_v57, %s9621_s8  ;;  %1419 = vst.msk [vmem:[#allocation3 + $0x38] sm:$0xf] %vm1404_vm14, %v1337_v1  ;;  %v1339_v5 = vpop.permute.xlu1 %1338  ;;  %v1801_v1 = vld [vmem:[#allocation2 + $0x9c] sm:$0xf]  ;;  %vm4143_vm4 = vcmask 1044480   ;;  %vm4144_vm5 = vcmask 1045504  }
  0xd6   : > { %1420 = vst.msk [vmem:[#allocation3 + $0x3c] sm:$0xf] %vm1404_vm14, %v1339_v5  ;;  %vm3029_vm7 = vcmask 167056   ;;  %vm3590_vm9 = vcmask 191656   ;;  %vm3927_vm11 = vcmask 216256   ;;  %vm4094_vm12 = vcmask 220160  }
  0xd8   : > { %1704 = vrot.lane.b32.xlu0 %v1637_v2, %s9621_s8  ;;  %v1341_v6 = vpop.permute.xlu0 %1340  ;;  %v2052_v2 = vshll.u32 %v1974_v54, 16  ;;  %v1807_v54 = vld [vmem:[#allocation2 + $0xc0] sm:$0xf] }
  0xd9   : > { %1706 = vrot.lane.b32.xlu1 %v1640_v3, %s9621_s8  ;;  %1421 = vst.msk [vmem:[#allocation3 + $0x40] sm:$0xf] %vm1404_vm14, %v1341_v6  ;;  %v1343_v61 = vpop.permute.xlu1 %1342  ;;  %v1803_v6 = vld [vmem:[#allocation2 + $0xa8] sm:$0xf] }
  0xda   : > { %1422 = vst.msk [vmem:[#allocation3 + $0x44] sm:$0xf] %vm1404_vm14, %v1343_v61  ;;  %v1977_v61 = vld [vmem:[#allocation2 + $0x28] sm:$0xf] }
  0xdc   : > { %1708 = vrot.lane.b32.xlu0 %v1644_v21, %s9621_s8  ;;  %v2021_v21 = vrot.slane %v2019_v33, 4 }
  0xdd   : > { %1710 = vrot.lane.b32.xlu1 %v1647_v7, %s9621_s8  ;;  %v2024_v7 = vrot.slane %v2022_v14, 5 }
  0xe0   : > { %1841 = vrot.lane.b32.xlu0 %v1777_v8, %s9622_s9  ;;  %v10297_v8 = vrot.slane %v2028_v58, 5 }
  0xe1   : > { %1843 = vrot.lane.b32.xlu1 %v1778_v9, %s9622_s9  ;;  %v1972_v9 = vld [vmem:[#allocation2 + $0x14] sm:$0x1] }
  0xe4   : > { %1845 = vrot.lane.b32.xlu0 %v1779_v10, %s9622_s9  ;;  %v2034_v10 = vrot.slane %v2032_v59, 4 }
  0xe5   : > { %1847 = vrot.lane.b32.xlu1 %v1780_v42, %s9622_s9  ;;  %v2045_v42 = vrot.slane %v2043_v60, 4  ;;  %v1808_v60 = vld [vmem:[#allocation2 + $0xc4] sm:$0xf] }
  0xe6   : > { %v2035_v25 = vor.u32 %v2034_v10, %v10297_v8 }
  0xe7   : > { %v1345_v48 = vpop.permute.xlu0 %1344 }
  0xe8   : > { %1849 = vrot.lane.b32.xlu0 %v1781_v56, %s9622_s9  ;;  %1423 = vst.msk [vmem:[#allocation3 + $0x48] sm:$0xf] %vm1404_vm14, %v1345_v48  ;;  %v2048_v56 = vrot.slane %v2046_v63, 5  ;;  %v1975_v48 = vld [vmem:[#allocation2 + $0x20] sm:$0x1]  ;;  %v2036_v50 = vrot.slane %v2035_v25, 4 }
  0xe9   : > { %1851 = vrot.lane.b32.xlu1 %v1782_v11, %s9622_s9  ;;  %v10300_v11 = vrot.slane %v2052_v2, 5  ;;  %v2062_v27 = vshll.u32 %v1975_v48, 16  ;;  %v1985_v48 = vld [vmem:[#allocation2 + $0x48] sm:$0xf] }
  0xea   : > { %v2049_v34 = vor.u32 %v2048_v56, %v2045_v42 }
  0xeb   : > { %v1347_v13 = vpop.permute.xlu1 %1346  ;;  %v10318_v14 = vrot.slane %v2062_v27, 5  ;;  %v1984_v27 = vld [vmem:[#allocation2 + $0x44] sm:$0x1] }
  0xec   : > { %1853 = vrot.lane.b32.xlu0 %v1783_v62, %s9622_s9  ;;  %1424 = vst.msk [vmem:[#allocation3 + $0x4c] sm:$0xf] %vm1404_vm14, %v1347_v13  ;;  %v2058_v62 = vrot.slane %v2056_v43, 4  ;;  %v2070_v13 = vshll.u32 %v1976_v4, 16 }
  0xed   : > { %1855 = vrot.lane.b32.xlu1 %v1784_v12, %s9622_s9  ;;  %v2067_v12 = vshrl.u32 %v1976_v4, 16  ;;  %v1981_v4 = vld [vmem:[#allocation2 + $0x38] sm:$0x1] }
  0xee   : > { %v1349_v17 = vpop.permute.xlu0 %1348 }
  0xef   : > { %1425 = vst.msk [vmem:[#allocation3 + $0x50] sm:$0xf] %vm1404_vm14, %v1349_v17  ;;  %v1351_v19 = vpop.permute.xlu1 %1350  ;;  %v2076_v17 = vshll.u32 %v1977_v61, 16 }
  0xf0   : > { %1857 = vrot.lane.b32.xlu0 %v1785_v15, %s9622_s9  ;;  %1426 = vst.msk [vmem:[#allocation3 + $0x54] sm:$0xf] %vm1404_vm14, %v1351_v19  ;;  %v2080_v19 = vshrl.u32 %v1977_v61, 16 }
  0xf1   : > { %1859 = vrot.lane.b32.xlu1 %v1786_v16, %s9622_s9  ;;  %v1804_v16 = vld [vmem:[#allocation2 + $0xac] sm:$0xf] }
  0xf2   : > { %v1353_v22 = vpop.permute.xlu0 %1352 }
  0xf3   : > { %1427 = vst.msk [vmem:[#allocation3 + $0x58] sm:$0xf] %vm1404_vm14, %v1353_v22  ;;  %v1355_v24 = vpop.permute.xlu1 %1354  ;;  %v1979_v22 = vld [vmem:[#allocation2 + $0x30] sm:$0xf] }
  0xf4   : > { %1861 = vrot.lane.b32.xlu0 %v1787_v20, %s9622_s9  ;;  %1428 = vst.msk [vmem:[#allocation3 + $0x5c] sm:$0xf] %vm1404_vm14, %v1355_v24  ;;  %v2025_v24 = vor.u32 %v2024_v7, %v2021_v21 }
  0xf5   : > { %1863 = vrot.lane.b32.xlu1 %v1788_v18, %s9622_s9  ;;  %v2038_v18 = vshll.u32 %v1972_v9, 16 }
  0xf6   : > { %v1357_v32 = vpop.permute.xlu0 %1356  ;;  %v2026_v26 = vrot.slane %v2025_v24, 4  ;;  %v1989_v24 = vld [vmem:[#allocation2 + $0x58] sm:$0xf] }
  0xf7   : > { %1429 = vst.msk [vmem:[#allocation3 + $0x60] sm:$0xf] %vm1404_vm14, %v1357_v32  ;;  %v1806_v32 = vld [vmem:[#allocation2 + $0xb8] sm:$0xf] }
  0xf8   : > { %1865 = vrot.lane.b32.xlu0 %v1789_v28, %s9622_s9  ;;  %v1980_v28 = vld [vmem:[#allocation2 + $0x34] sm:$0xf]  ;;  %v2031_v9 = vsel %vm9830_vm10, %v2026_v26, %v10297_v8  ;;  %v2110_v8 = vshll.u32 %v1981_v4, 16  ;;  %v2134_v26 = vshll.u32 %v1984_v27, 16 }
  0xf9   : > { %1867 = vrot.lane.b32.xlu1 %v1790_v29, %s9622_s9  ;;  %v1359_v36 = vpop.permute.xlu1 %1358  ;;  %v1805_v29 = vld [vmem:[#allocation2 + $0xb4] sm:$0xf]  ;;  %v2100_v46 = vshll.u32 %v1980_v28, 16 }
  0xfa   : > { %1430 = vst.msk [vmem:[#allocation3 + $0x64] sm:$0xf] %vm1404_vm14, %v1359_v36  ;;  %v2069_v36 = vrot.slane %v2067_v12, 4 }
  0xfc   : > { %1869 = vrot.lane.b32.xlu0 %v1791_v49, %s9622_s9  ;;  %v2059_v49 = vor.u32 %v2058_v62, %v10300_v11 }
  0xfd   : > { %1871 = vrot.lane.b32.xlu1 %v1792_v37, %s9622_s9  ;;  %v2072_v37 = vrot.slane %v2070_v13, 5 }
  0xfe   : > { %v10316_v33 = vrot.slane %v2059_v49, 4 }
  0xff   : > { %v2073_v63 = vor.u32 %v2072_v37, %v2069_v36 }
 0x100   : > { %1873 = vrot.lane.b32.xlu0 %v1793_v39, %s9622_s9  ;;  %v2065_v12 = vsel %vm9830_vm10, %v10316_v33, %v10318_v14  ;;  %v1987_v14 = vld [vmem:[#allocation2 + $0x50] sm:$0x1] }
 0x101   : > { %1875 = vrot.lane.b32.xlu1 %v1794_v38, %s9622_s9  ;;  %v10308_v38 = vrot.slane %v2076_v17, 5  ;;  %v2074_v13 = vrot.slane %v2073_v63, 4  ;;  %v1988_v17 = vld [vmem:[#allocation2 + $0x54] sm:$0xf] }
 0x102   : > { %v1361_v41 = vpop.permute.xlu0 %1360  ;;  %v2163_v36 = vshrl.u32 %v1988_v17, 16  ;;  %v2166_v37 = vshll.u32 %v1988_v17, 16 }
 0x103   : > { %1431 = vst.msk [vmem:[#allocation3 + $0x68] sm:$0xf] %vm1404_vm14, %v1361_v41  ;;  %v2091_v41 = vshrl.u32 %v1979_v22, 16 }
 0x104   : > { %1877 = vrot.lane.b32.xlu0 %v1795_v30, %s9622_s9  ;;  %v1978_v30 = vld [vmem:[#allocation2 + $0x2c] sm:$0x1] }
 0x105   : > { %1879 = vrot.lane.b32.xlu1 %v1796_v40, %s9622_s9  ;;  %v1363_v31 = vpop.permute.xlu1 %1362  ;;  %v2082_v40 = vrot.slane %v2080_v19, 4  ;;  %v2086_v58 = vshll.u32 %v1978_v30, 16  ;;  %v2093_v2 = vrot.slane %v2091_v41, 4  ;;  %v2079_v30 = vsel %vm9830_vm10, %v2074_v13, %v10308_v38  ;;  %v1995_v13 = vld [vmem:[#allocation2 + $0x70] sm:$0xf] }
 0x106   : > { %1432 = vst.msk [vmem:[#allocation3 + $0x6c] sm:$0xf] %vm1404_vm14, %v1363_v31  ;;  %v2094_v31 = vshll.u32 %v1979_v22, 16  ;;  %v2172_v41 = vshll.u32 %v1989_v24, 16 }
 0x107   : > { %v10336_v56 = vrot.slane %v2086_v58, 5 }
 0x108   : > { %1881 = vrot.lane.b32.xlu0 %v1797_v44, %s9622_s9  ;;  %v2096_v43 = vrot.slane %v2094_v31, 5  ;;  %v2176_v31 = vshrl.u32 %v1989_v24, 16 }
 0x109   : > { %1883 = vrot.lane.b32.xlu1 %v1798_v45, %s9622_s9  ;;  %v2040_v45 = vrot.slane %v2038_v18, 5 }
 0x10a   : > { %v1365_v52 = vpop.permute.xlu0 %1364 }
 0x10b   : > { %1433 = vst.msk [vmem:[#allocation3 + $0x70] sm:$0xf] %vm1404_vm14, %v1365_v52  ;;  %v1367_v57 = vpop.permute.xlu1 %1366  ;;  %v1982_v52 = vld [vmem:[#allocation2 + $0x3c] sm:$0xf]  ;;  %v2041_v10 = vsel %vm9830_vm10, %v2036_v50, %v2040_v45  ;;  %v1991_v50 = vld [vmem:[#allocation2 + $0x60] sm:$0xf] }
 0x10c   : > { %1434 = vst.msk [vmem:[#allocation3 + $0x74] sm:$0xf] %vm1404_vm14, %v1367_v57  ;;  %1885 = vrot.lane.b32.xlu0 %v1799_v47, %s9622_s9  ;;  %v2104_v47 = vshrl.u32 %v1980_v28, 16  ;;  %v10314_v57 = vrot.slane %v2049_v34, 4  ;;  %v2118_v21 = vshll.u32 %v1982_v52, 16  ;;  %v2190_v4 = vshll.u32 %v1991_v50, 16 }
 0x10d   : > { %1887 = vrot.lane.b32.xlu1 %v1800_v53, %s9622_s9  ;;  %v1983_v53 = vld [vmem:[#allocation2 + $0x40] sm:$0xf] }
 0x10e   : > { %v1369_v3 = vpop.permute.xlu0 %1368  ;;  %v2124_v7 = vshll.u32 %v1983_v53, 16  ;;  %v2128_v61 = vshrl.u32 %v1983_v53, 16  ;;  %v2055_v42 = vsel %vm9830_vm10, %v10314_v57, %v10300_v11  ;;  %v2120_v22 = vrot.slane %v2118_v21, 5  ;;  %v1992_v57 = vld [vmem:[#allocation2 + $0x64] sm:$0xf] }
 0x10f   : > { %1435 = vst.msk [vmem:[#allocation3 + $0x78] sm:$0xf] %vm1404_vm14, %v1369_v3  ;;  %v1371_v5 = vpop.permute.xlu1 %1370  ;;  %v2196_v21 = vshll.u32 %v1992_v57, 16 }
 0x110   : > { %1436 = vst.msk [vmem:[#allocation3 + $0x7c] sm:$0xf] %vm1404_vm14, %v1371_v5  ;;  %1889 = vrot.lane.b32.xlu0 %v1801_v1, %s9622_s9  ;;  %v2083_v1 = vor.u32 %v2082_v40, %v10308_v38  ;;  %v2106_v5 = vrot.slane %v2104_v47, 4  ;;  %v10346_v25 = vrot.slane %v2124_v7, 5  ;;  %v2130_v28 = vrot.slane %v2128_v61, 4 }
 0x111   : > { %1891 = vrot.lane.b32.xlu1 %v1802_v55, %s9622_s9  ;;  %v10322_v55 = vrot.slane %v2100_v46, 5  ;;  %v2112_v47 = vrot.slane %v2110_v8, 5  ;;  %v2200_v7 = vshrl.u32 %v1992_v57, 16  ;;  %vm4359_vm14 = vcmask 60416  }
 0x112   : > { %v1649_v15 = vpop.permute.xlu0 %1648  ;;  %v2131_v38 = vor.u32 %v2130_v28, %v10346_v25  ;;  %4367 = vst.msk [vmem:[#allocation4 + $0x18] sm:$0xf] %vm4359_vm14, %v9619_v0  ;;  %4360 = vst.msk [vmem:[#allocation4] sm:$0xf] %vm4359_vm14, %v9619_v0 }
 0x113   : > { %1745 = vst.msk [vmem:[#allocation3] sm:$0xf] %vm1744_vm15, %v1649_v15  ;;  %v1651_v20 = vpop.permute.xlu1 %1650  ;;  %v2097_v15 = vor.u32 %v2096_v43, %v2093_v2  ;;  %v2107_v11 = vor.u32 %v2106_v5, %v10322_v55  ;;  %v1990_v2 = vld [vmem:[#allocation2 + $0x5c] sm:$0x1]  ;;  %v2178_v43 = vrot.slane %v2176_v31, 4 }
 0x114   : > { %1746 = vst.msk [vmem:[#allocation3 + $0x4] sm:$0xf] %vm1744_vm15, %v1651_v20  ;;  %1893 = vrot.lane.b32.xlu0 %v1803_v6, %s9622_s9  ;;  %v2115_v6 = vshrl.u32 %v1982_v52, 16  ;;  %v2084_v20 = vrot.slane %v2083_v1, 4  ;;  %v10362_v1 = vrot.slane %v2172_v41, 5 }
 0x115   : > { %1895 = vrot.lane.b32.xlu1 %v1804_v16, %s9622_s9  ;;  %v1986_v16 = vld [vmem:[#allocation2 + $0x4c] sm:$0xf]  ;;  %v2098_v40 = vrot.slane %v2097_v15, 4  ;;  %v2108_v46 = vrot.slane %v2107_v11, 4  ;;  %v10376_v11 = vrot.slane %v2196_v21, 5 }
 0x116   : > { %v1653_v39 = vpop.permute.xlu0 %1652  ;;  %v2117_v18 = vrot.slane %v2115_v6, 4  ;;  %v2148_v34 = vshll.u32 %v1986_v16, 16  ;;  %v2152_v49 = vshrl.u32 %v1986_v16, 16  ;;  %v2089_v45 = vsel %vm9830_vm10, %v2084_v20, %v10336_v56  ;;  %v1994_v56 = vld [vmem:[#allocation2 + $0x6c] sm:$0xf] }
 0x117   : > { %1747 = vst.msk [vmem:[#allocation3 + $0x8] sm:$0xf] %vm1744_vm15, %v1653_v39  ;;  %v1655_v44 = vpop.permute.xlu1 %1654  ;;  %v2103_v6 = vsel %vm9830_vm10, %v2098_v40, %v10322_v55  ;;  %v2113_v61 = vsel %vm9830_vm10, %v2108_v46, %v2112_v47  ;;  %v2182_v55 = vshll.u32 %v1990_v2, 16  ;;  %v2179_v16 = vor.u32 %v2178_v43, %v10362_v1 }
 0x118   : > { %1748 = vst.msk [vmem:[#allocation3 + $0xc] sm:$0xf] %vm1744_vm15, %v1655_v44  ;;  %1897 = vrot.lane.b32.xlu0 %v1805_v29, %s9622_s9  ;;  %v2139_v29 = vshrl.u32 %v1985_v48, 16  ;;  %v2121_v52 = vor.u32 %v2120_v22, %v2117_v18  ;;  %v10360_v33 = vrot.slane %v2148_v34, 5  ;;  %v2154_v58 = vrot.slane %v2152_v49, 4 }
 0x119   : > { %1899 = vrot.lane.b32.xlu1 %v1806_v32, %s9622_s9  ;;  %v2142_v32 = vshll.u32 %v1985_v48, 16  ;;  %v2132_v48 = vrot.slane %v2131_v38, 4  ;;  %v1993_v18 = vld [vmem:[#allocation2 + $0x68] sm:$0x1]  ;;  %v2202_v22 = vrot.slane %v2200_v7, 4  ;;  %v2211_v24 = vshrl.u32 %v1994_v56, 16 }
 0x11a   : > { %v1657_v59 = vpop.permute.xlu0 %1656  ;;  %v2141_v53 = vrot.slane %v2139_v29, 4  ;;  %v2214_v27 = vshll.u32 %v1994_v56, 16  ;;  %v2220_v29 = vshll.u32 %v1995_v13, 16  ;;  %v10386_v41 = vrot.slane %v2179_v16, 4  ;;  %v1996_v38 = vld [vmem:[#allocation2 + $0x74] sm:$0x1] }
 0x11b   : > { %1749 = vst.msk [vmem:[#allocation3 + $0x10] sm:$0xf] %vm1744_vm15, %v1657_v59  ;;  %v1659_v3 = vpop.permute.xlu1 %1658  ;;  %v2165_v59 = vrot.slane %v2163_v36, 4  ;;  %v10388_v31 = vrot.slane %v2182_v55, 5  ;;  %v2203_v47 = vor.u32 %v2202_v22, %v10376_v11  ;;  %v2230_v21 = vshll.u32 %v1996_v38, 16 }
 0x11c   : > { %1750 = vst.msk [vmem:[#allocation3 + $0x14] sm:$0xf] %vm1744_vm15, %v1659_v3  ;;  %1901 = vrot.lane.b32.xlu0 %v1807_v54, %s9622_s9  ;;  %v2144_v54 = vrot.slane %v2142_v32, 5  ;;  %v2187_v3 = vshrl.u32 %v1991_v50, 16  ;;  %v2224_v32 = vshrl.u32 %v1995_v13, 16  ;;  %v2216_v50 = vrot.slane %v2214_v27, 5 }
 0x11d   : > { %1903 = vrot.lane.b32.xlu1 %v1808_v60, %s9622_s9  ;;  %v2168_v60 = vrot.slane %v2166_v37, 5  ;;  %v2001_v7 = vld [vmem:[#allocation2 + $0x88] sm:$0xf]  ;;  %v2004_v56 = vld [vmem:[#allocation2 + $0x94] sm:$0xf]  ;;  %s12464_s9 = scalar_lea.vmem %s12649_s7, %s9275_s26 }
 0x11e   : > { %v1661_v62 = vpop.permute.xlu0 %1660  ;;  %v2189_v17 = vrot.slane %v2187_v3, 4  ;;  %v2000_v3 = vld [vmem:[#allocation2 + $0x84] sm:$0xf]  ;;  %v2272_v16 = vshrl.u32 %v2001_v7, 16  ;;  %v2296_v27 = vshrl.u32 %v2004_v56, 16 }
 0x11f   : > { %1751 = vst.msk [vmem:[#allocation3 + $0x18] sm:$0xf] %vm1744_vm15, %v1661_v62  ;;  %v1663_v19 = vpop.permute.xlu1 %1662  ;;  %v2145_v62 = vor.u32 %v2144_v54, %v2141_v53  ;;  %v2169_v8 = vor.u32 %v2168_v60, %v2165_v59  ;;  %v2226_v53 = vrot.slane %v2224_v32, 4  ;;  %v2259_v55 = vshrl.u32 %v2000_v3, 16 }
 0x120   : > { %1752 = vst.msk [vmem:[#allocation3 + $0x1c] sm:$0xf] %vm1744_vm15, %v1663_v19  ;;  %2402 = vrot.lane.b32.xlu0 %v2031_v9, %s9623_s10  ;;  %v2122_v9 = vrot.slane %v2121_v52, 4  ;;  %v2192_v19 = vrot.slane %v2190_v4, 5  ;;  %v10394_v52 = vrot.slane %v2220_v29, 5  ;;  %v2262_v13 = vshll.u32 %v2000_v3, 16 }
 0x121   : > { %2404 = vrot.lane.b32.xlu1 %v2041_v10, %s9623_s10  ;;  %v2136_v10 = vrot.slane %v2134_v26, 5  ;;  %v2146_v49 = vrot.slane %v2145_v62, 4  ;;  %v2170_v40 = vrot.slane %v2169_v8, 4  ;;  %v2213_v26 = vrot.slane %v2211_v24, 4  ;;  %v1999_v62 = vld [vmem:[#allocation2 + $0x80] sm:$0x1] }
 0x122   : > { %v1665_v39 = vpop.permute.xlu0 %1664  ;;  %v2127_v28 = vsel %vm9830_vm10, %v2122_v9, %v10346_v25  ;;  %v2193_v46 = vor.u32 %v2192_v19, %v2189_v17  ;;  %v2227_v9 = vor.u32 %v2226_v53, %v10394_v52  ;;  %v2268_v8 = vshll.u32 %v2001_v7, 16  ;;  %4361 = vst.msk [vmem:[#allocation4 + $0x4] sm:$0xf] %vm4359_vm14, %v9619_v0  ;;  %4364 = vst.msk [vmem:[#allocation4 + $0xc] sm:$0xf] %vm4359_vm14, %v9619_v0 }
 0x123   : > { %1753 = vst.msk [vmem:[#allocation3 + $0x20] sm:$0xf] %vm1744_vm15, %v1665_v39  ;;  %v1667_v44 = vpop.permute.xlu1 %1666  ;;  %v2137_v34 = vsel %vm9830_vm10, %v2132_v48, %v2136_v10  ;;  %v1997_v39 = vld [vmem:[#allocation2 + $0x78] sm:$0xf]  ;;  %v2175_v2 = vsel %vm9830_vm10, %v2170_v40, %v10362_v1  ;;  %v2204_v1 = vrot.slane %v2203_v47, 4  ;;  %v2292_v24 = vshll.u32 %v2004_v56, 16 }
 0x124   : > { %1754 = vst.msk [vmem:[#allocation3 + $0x24] sm:$0xf] %vm1744_vm15, %v1667_v44  ;;  %2406 = vrot.lane.b32.xlu0 %v2055_v42, %s9623_s10  ;;  %v2158_v42 = vshll.u32 %v1987_v14, 16  ;;  %v2206_v44 = vshll.u32 %v1993_v18, 16  ;;  %v2235_v54 = vshrl.u32 %v1997_v39, 16  ;;  %v2238_v57 = vshll.u32 %v1997_v39, 16 }
 0x125   : > { %2408 = vrot.lane.b32.xlu1 %v2065_v12, %s9623_s10  ;;  %v2155_v12 = vor.u32 %v2154_v58, %v10360_v33  ;;  %v2151_v14 = vsel %vm9830_vm10, %v2146_v49, %v10360_v33  ;;  %v2185_v33 = vsel %vm9830_vm10, %v10386_v41, %v10388_v31  ;;  %v2228_v29 = vrot.slane %v2227_v9, 4  ;;  %v2006_v49 = vld [vmem:[#allocation2 + $0x9c] sm:$0xf]  ;;  %v2002_v31 = vld [vmem:[#allocation2 + $0x8c] sm:$0x1] }
 0x126   : > { %v1669_v63 = vpop.permute.xlu0 %1668  ;;  %v2160_v37 = vrot.slane %v2158_v42, 5  ;;  %v10405_v43 = vrot.slane %v2206_v44, 5  ;;  %v2237_v10 = vrot.slane %v2235_v54, 4  ;;  %v2240_v42 = vrot.slane %v2238_v57, 5  ;;  %4365 = vst.msk [vmem:[#allocation4 + $0x10] sm:$0xf] %vm4359_vm14, %v9619_v0 }
 0x127   : > { %1755 = vst.msk [vmem:[#allocation3 + $0x28] sm:$0xf] %vm1744_vm15, %v1669_v63  ;;  %v1671_v5 = vpop.permute.xlu1 %1670  ;;  %v2156_v36 = vrot.slane %v2155_v12, 4  ;;  %v2232_v32 = vrot.slane %v2230_v21, 5  ;;  %v2264_v39 = vrot.slane %v2262_v13, 5  ;;  %v10429_v41 = vrot.slane %v2268_v8, 5 }
 0x128   : > { %1756 = vst.msk [vmem:[#allocation3 + $0x2c] sm:$0xf] %vm1744_vm15, %v1671_v5  ;;  %2410 = vrot.lane.b32.xlu0 %v2079_v30, %s9623_s10  ;;  %v2194_v5 = vrot.slane %v2193_v46, 4  ;;  %v2274_v44 = vrot.slane %v2272_v16, 4  ;;  %v10432_v47 = vrot.slane %v2292_v24, 5  ;;  %v2307_v38 = vshrl.u32 %v2006_v49, 16 }
 0x129   : > { %2412 = vrot.lane.b32.xlu1 %v2089_v45, %s9623_s10  ;;  %v1998_v45 = vld [vmem:[#allocation2 + $0x7c] sm:$0xf]  ;;  %v2161_v63 = vsel %vm9830_vm10, %v2156_v36, %v2160_v37  ;;  %v2241_v36 = vor.u32 %v2240_v42, %v2237_v10  ;;  %v2261_v37 = vrot.slane %v2259_v55, 4  ;;  %v2310_v53 = vshll.u32 %v2006_v49, 16  ;;  %v2008_v10 = vld [vmem:[#allocation2 + $0xa4] sm:$0x1] }
 0x12a   : > { %v1673_v15 = vpop.permute.xlu0 %1672  ;;  %v2244_v58 = vshll.u32 %v1998_v45, 16  ;;  %v2248_v59 = vshrl.u32 %v1998_v45, 16  ;;  %v2199_v18 = vsel %vm9830_vm10, %v2194_v5, %v10376_v11  ;;  %v2012_v8 = vld [vmem:[#allocation2 + $0xb4] sm:$0xf]  ;;  %4368 = vst.msk [vmem:[#allocation4 + $0x1c] sm:$0xf] %vm4359_vm14, %v9619_v0 }
 0x12b   : > { %1757 = vst.msk [vmem:[#allocation3 + $0x30] sm:$0xf] %vm1744_vm15, %v1673_v15  ;;  %v1675_v20 = vpop.permute.xlu1 %1674 }
 0x12c   : > { %1758 = vst.msk [vmem:[#allocation3 + $0x34] sm:$0xf] %vm1744_vm15, %v1675_v20  ;;  %2414 = vrot.lane.b32.xlu0 %v2103_v6, %s9623_s10  ;;  %v2217_v6 = vor.u32 %v2216_v50, %v2213_v26  ;;  %v10416_v48 = vrot.slane %v2244_v58, 5  ;;  %v2250_v12 = vrot.slane %v2248_v59, 4  ;;  %v2005_v26 = vld [vmem:[#allocation2 + $0x98] sm:$0x1]  ;;  %v2233_v58 = vsel %vm9830_vm10, %v2228_v29, %v2232_v32 }
 0x12d   : > { %2416 = vrot.lane.b32.xlu1 %v2113_v61, %s9623_s10  ;;  %v2003_v61 = vld [vmem:[#allocation2 + $0x90] sm:$0xf]  ;;  %v2298_v50 = vrot.slane %v2296_v27, 4  ;;  %v2242_v59 = vrot.slane %v2241_v36, 4  ;;  %v2302_v5 = vshll.u32 %v2005_v26, 16  ;;  %v2326_v29 = vshll.u32 %v2008_v10, 16 }
 0x12e   : > { %v1677_v30 = vpop.permute.xlu0 %1676  ;;  %v2283_v17 = vshrl.u32 %v2003_v61, 16  ;;  %v2286_v19 = vshll.u32 %v2003_v61, 16  ;;  %v2218_v22 = vrot.slane %v2217_v6, 4  ;;  %v2251_v11 = vor.u32 %v2250_v12, %v10416_v48  ;;  %v2010_v6 = vld [vmem:[#allocation2 + $0xac] sm:$0xf] }
 0x12f   : > { %1759 = vst.msk [vmem:[#allocation3 + $0x38] sm:$0xf] %vm1744_vm15, %v1677_v30  ;;  %v1679_v25 = vpop.permute.xlu1 %1678  ;;  %v2007_v30 = vld [vmem:[#allocation2 + $0xa0] sm:$0xf]  ;;  %v2299_v7 = vor.u32 %v2298_v50, %v10432_v47  ;;  %v2309_v61 = vrot.slane %v2307_v38, 4  ;;  %v2247_v12 = vsel %vm9830_vm10, %v2242_v59, %v10416_v48  ;;  %v2340_v13 = vshll.u32 %v2010_v6, 16 }
 0x130   : > { %1760 = vst.msk [vmem:[#allocation3 + $0x3c] sm:$0xf] %vm1744_vm15, %v1679_v25  ;;  %2418 = vrot.lane.b32.xlu0 %v2127_v28, %s9623_s10  ;;  %v2209_v28 = vsel %vm9830_vm10, %v2204_v1, %v10405_v43  ;;  %v2285_v45 = vrot.slane %v2283_v17, 4  ;;  %v2288_v25 = vrot.slane %v2286_v19, 5  ;;  %v2223_v54 = vsel %vm9830_vm10, %v2218_v22, %v10394_v52  ;;  %v2013_v32 = vld [vmem:[#allocation2 + $0xb8] sm:$0xf] }
 0x131   : > { %2420 = vrot.lane.b32.xlu1 %v2137_v34, %s9623_s10  ;;  %v2254_v34 = vshll.u32 %v1999_v62, 16  ;;  %v2316_v57 = vshll.u32 %v2007_v30, 16  ;;  %v2252_v3 = vrot.slane %v2251_v11, 4  ;;  %v2312_v1 = vrot.slane %v2310_v53, 5  ;;  %4370 = vst.msk [vmem:[#allocation4 + $0x24] sm:$0xf] %vm4359_vm14, %v9619_v0 }
 0x132   : > { %v1681_v60 = vpop.permute.xlu0 %1680  ;;  %v2289_v21 = vor.u32 %v2288_v25, %v2285_v45  ;;  %v2300_v27 = vrot.slane %v2299_v7, 4  ;;  %v2355_v36 = vshrl.u32 %v2012_v8, 16  ;;  %v2364_v45 = vshll.u32 %v2013_v32, 16  ;;  %4371 = vst.msk [vmem:[#allocation4 + $0x28] sm:$0xf] %vm4359_vm14, %v9619_v0 }
 0x133   : > { %1761 = vst.msk [vmem:[#allocation3 + $0x40] sm:$0xf] %vm1744_vm15, %v1681_v60  ;;  %v1683_v4 = vpop.permute.xlu1 %1682  ;;  %v2256_v60 = vrot.slane %v2254_v34, 5  ;;  %v10447_v9 = vrot.slane %v2316_v57, 5  ;;  %v2368_v25 = vshrl.u32 %v2013_v32, 16  ;;  %v2328_v53 = vrot.slane %v2326_v29, 5 }
 0x134   : > { %1762 = vst.msk [vmem:[#allocation3 + $0x44] sm:$0xf] %vm1744_vm15, %v1683_v4  ;;  %2422 = vrot.lane.b32.xlu0 %v2151_v14, %s9623_s10  ;;  %v2320_v14 = vshrl.u32 %v2007_v30, 16  ;;  %v2275_v4 = vor.u32 %v2274_v44, %v10429_v41  ;;  %v2290_v24 = vrot.slane %v2289_v21, 4  ;;  %v2357_v59 = vrot.slane %v2355_v36, 4 }
 0x135   : > { %2424 = vrot.lane.b32.xlu1 %v2161_v63, %s9623_s10  ;;  %v2265_v63 = vor.u32 %v2264_v39, %v2261_v37  ;;  %v2257_v17 = vsel %vm9830_vm10, %v2252_v3, %v2256_v60  ;;  %v10463_v37 = vrot.slane %v2340_v13, 5  ;;  %v2011_v39 = vld [vmem:[#allocation2 + $0xb0] sm:$0x1]  ;;  %v2366_v3 = vrot.slane %v2364_v45, 5  ;;  %v2535_v45 = vld [vmem:[#allocation2 + $0x1c] sm:$0xf] }
 0x136   : > { %v1685_v15 = vpop.permute.xlu0 %1684  ;;  %v2322_v42 = vrot.slane %v2320_v14, 4  ;;  %v2276_v19 = vrot.slane %v2275_v4, 4  ;;  %v2295_v50 = vsel %vm9830_vm10, %v2290_v24, %v10432_v47  ;;  %v2014_v4 = vld [vmem:[#allocation2 + $0xbc] sm:$0x1]  ;;  %4373 = vst.msk [vmem:[#allocation4 + $0x30] sm:$0xf] %vm4359_vm14, %v9619_v0 }
 0x137   : > { %1763 = vst.msk [vmem:[#allocation3 + $0x48] sm:$0xf] %vm1744_vm15, %v1685_v15  ;;  %v1687_v20 = vpop.permute.xlu1 %1686  ;;  %v2266_v55 = vrot.slane %v2265_v63, 4  ;;  %v2344_v15 = vshrl.u32 %v2010_v6, 16 }
 0x138   : > { %1764 = vst.msk [vmem:[#allocation3 + $0x4c] sm:$0xf] %vm1744_vm15, %v1687_v20  ;;  %2426 = vrot.lane.b32.xlu0 %v2175_v2, %s9623_s10  ;;  %v2009_v2 = vld [vmem:[#allocation2 + $0xa8] sm:$0xf]  ;;  %v2323_v48 = vor.u32 %v2322_v42, %v10447_v9  ;;  %v2374_v42 = vshll.u32 %v2014_v4, 16 }
 0x139   : > { %2428 = vrot.lane.b32.xlu1 %v2185_v33, %s9623_s10  ;;  %v2278_v33 = vshll.u32 %v2002_v31, 16  ;;  %v2331_v56 = vshrl.u32 %v2009_v2, 16  ;;  %v2334_v62 = vshll.u32 %v2009_v2, 16  ;;  %v2271_v11 = vsel %vm9830_vm10, %v2266_v55, %v10429_v41  ;;  %4374 = vst.msk [vmem:[#allocation4 + $0x34] sm:$0xf] %vm4359_vm14, %v9619_v0 }
 0x13a   : > { %v1689_v40 = vpop.permute.xlu0 %1688  ;;  %v2346_v30 = vrot.slane %v2344_v15, 4  ;;  %v2324_v57 = vrot.slane %v2323_v48, 4  ;;  %v2532_v48 = vld [vmem:[#allocation2 + $0x10] sm:$0xf]  ;;  %4376 = vst.msk [vmem:[#allocation4 + $0x3c] sm:$0xf] %vm4359_vm14, %v9619_v0 }
 0x13b   : > { %1765 = vst.msk [vmem:[#allocation3 + $0x50] sm:$0xf] %vm1744_vm15, %v1689_v40  ;;  %v1691_v46 = vpop.permute.xlu1 %1690  ;;  %v2280_v20 = vrot.slane %v2278_v33, 5  ;;  %v2333_v34 = vrot.slane %v2331_v56, 4  ;;  %v2336_v49 = vrot.slane %v2334_v62, 5  ;;  %v2358_v40 = vshll.u32 %v2012_v8, 16 }
 0x13c   : > { %1766 = vst.msk [vmem:[#allocation3 + $0x54] sm:$0xf] %vm1744_vm15, %v1691_v46  ;;  %2430 = vrot.lane.b32.xlu0 %v2199_v18, %s9623_s10  ;;  %v2304_v18 = vrot.slane %v2302_v5, 5  ;;  %v2015_v46 = vld [vmem:[#allocation2 + $0xc0] sm:$0xf]  ;;  %v2347_v60 = vor.u32 %v2346_v30, %v10463_v37  ;;  %v2370_v33 = vrot.slane %v2368_v25, 4  ;;  %v2329_v7 = vsel %vm9830_vm10, %v2324_v57, %v2328_v53 }
 0x13d   : > { %2432 = vrot.lane.b32.xlu1 %v2209_v28, %s9623_s10  ;;  %v2313_v28 = vor.u32 %v2312_v1, %v2309_v61  ;;  %v2281_v44 = vsel %vm9830_vm10, %v2276_v19, %v2280_v20  ;;  %v2337_v14 = vor.u32 %v2336_v49, %v2333_v34  ;;  %v2360_v63 = vrot.slane %v2358_v40, 5  ;;  %v2531_v30 = vld [vmem:[#allocation2 + $0xc] sm:$0xe]  ;;  %v2534_v53 = vld [vmem:[#allocation2 + $0x18] sm:$0xe] }
 0x13e   : > { %v1693_v43 = vpop.permute.xlu0 %1692  ;;  %v2305_v41 = vsel %vm9830_vm10, %v2300_v27, %v2304_v18  ;;  %v2379_v47 = vshrl.u32 %v2015_v46, 16  ;;  %v2382_v2 = vshll.u32 %v2015_v46, 16  ;;  %v2348_v55 = vrot.slane %v2347_v60, 4  ;;  %4377 = vst.msk [vmem:[#allocation4 + $0x40] sm:$0xf] %vm4359_vm14, %v9619_v0 }
 0x13f   : > { %1767 = vst.msk [vmem:[#allocation3 + $0x58] sm:$0xf] %vm1744_vm15, %v1693_v43  ;;  %v1695_v52 = vpop.permute.xlu1 %1694  ;;  %v2314_v38 = vrot.slane %v2313_v28, 4  ;;  %v2338_v61 = vrot.slane %v2337_v14, 4  ;;  %v2361_v10 = vor.u32 %v2360_v63, %v2357_v59  ;;  %v2371_v13 = vor.u32 %v2370_v33, %v2366_v3  ;;  %v2536_v14 = vld [vmem:[#allocation2 + $0x20] sm:$0x1] }
 0x140   : > { %1768 = vst.msk [vmem:[#allocation3 + $0x5c] sm:$0xf] %vm1744_vm15, %v1695_v52  ;;  %2434 = vrot.lane.b32.xlu0 %v2223_v54, %s9623_s10  ;;  %v2016_v54 = vld [vmem:[#allocation2 + $0xc4] sm:$0xf]  ;;  %v2381_v56 = vrot.slane %v2379_v47, 4  ;;  %v2384_v62 = vrot.slane %v2382_v2, 5 }
 0x141   : > { %2436 = vrot.lane.b32.xlu1 %v2233_v58, %s9623_s10  ;;  %v2350_v58 = vshll.u32 %v2011_v39, 16  ;;  %v2388_v5 = vshll.u32 %v2016_v54, 16  ;;  %v2392_v6 = vshrl.u32 %v2016_v54, 16  ;;  %v2319_v21 = vsel %vm9830_vm10, %v2314_v38, %v10447_v9  ;;  %v2017_v9 = vld [vmem:[#allocation2 + $0xc8] sm:$0x1] }
 0x142   : > { %v1697_v16 = vpop.permute.xlu0 %1696  ;;  %v2362_v19 = vrot.slane %v2361_v10, 4  ;;  %v2376_v20 = vrot.slane %v2374_v42, 5  ;;  %v2385_v18 = vor.u32 %v2384_v62, %v2381_v56  ;;  %v2372_v27 = vrot.slane %v2371_v13, 4  ;;  %v2540_v42 = vld [vmem:[#allocation2 + $0x30] sm:$0xe] }
 0x143   : > { %1769 = vst.msk [vmem:[#allocation3 + $0x60] sm:$0xf] %vm1744_vm15, %v1697_v16  ;;  %v1699_v22 = vpop.permute.xlu1 %1698  ;;  %v2352_v1 = vrot.slane %v2350_v58, 5  ;;  %v2390_v15 = vrot.slane %v2388_v5, 5  ;;  %v2394_v8 = vrot.slane %v2392_v6, 4  ;;  %v2398_v29 = vshll.u32 %v2017_v9, 16 }
 0x144   : > { %1770 = vst.msk [vmem:[#allocation3 + $0x64] sm:$0xf] %vm1744_vm15, %v1699_v22  ;;  %2438 = vrot.lane.b32.xlu0 %v2247_v12, %s9623_s10  ;;  %v2367_v34 = vsel %vm9830_vm10, %v2362_v19, %v2366_v3  ;;  %v2386_v49 = vrot.slane %v2385_v18, 4  ;;  %v2629_v40 = vrot.slane %v2532_v48, 5  ;;  %v9023_v46 = vrot.slane %v2531_v30, 9 }
 0x145   : > { %2440 = vrot.lane.b32.xlu1 %v2257_v17, %s9623_s10  ;;  %v2343_v17 = vsel %vm9830_vm10, %v2338_v61, %v10463_v37  ;;  %v2353_v24 = vsel %vm9830_vm10, %v2348_v55, %v2352_v1  ;;  %v2395_v28 = vor.u32 %v2394_v8, %v2390_v15  ;;  %v2400_v39 = vrot.slane %v2398_v29, 5  ;;  %v2538_v58 = vld [vmem:[#allocation2 + $0x28] sm:$0xf]  ;;  %v2537_v3 = vld [vmem:[#allocation2 + $0x24] sm:$0xe] }
 0x146   : > { %v1701_v31 = vpop.permute.xlu0 %1700  ;;  %v2391_v25 = vsel %vm9830_vm10, %v2386_v49, %v2390_v15  ;;  %v2636_v54 = vrot.slane %v2535_v45, 5  ;;  %v2630_v59 = vsel %vm10094_vm13, %v9023_v46, %v2629_v40  ;;  %v9024_v60 = vrot.slane %v2534_v53, 9  ;;  %v2539_v5 = vld [vmem:[#allocation2 + $0x2c] sm:$0x1]  ;;  %v2541_v6 = vld [vmem:[#allocation2 + $0x34] sm:$0xf] }
 0x147   : > { %1771 = vst.msk [vmem:[#allocation3 + $0x68] sm:$0xf] %vm1744_vm15, %v1701_v31  ;;  %v1703_v26 = vpop.permute.xlu1 %1702  ;;  %v2396_v37 = vrot.slane %v2395_v28, 4  ;;  %v2643_v4 = vrot.slane %v2538_v58, 5  ;;  %v2646_v10 = vrot.slane %v2539_v5, 5  ;;  %v2650_v56 = vrot.slane %v2541_v6, 5 }
 0x148   : > { %1772 = vst.msk [vmem:[#allocation3 + $0x6c] sm:$0xf] %vm1744_vm15, %v1703_v26  ;;  %2442 = vrot.lane.b32.xlu0 %v2271_v11, %s9623_s10  ;;  %v2377_v11 = vsel %vm9830_vm10, %v2372_v27, %v2376_v20  ;;  %v2638_v2 = vrot.slane %v2636_v54, 4  ;;  %v2544_v55 = vld [vmem:[#allocation2 + $0x40] sm:$0xf]  ;;  %v9026_v15 = vrot.slane %v2540_v42, 9 }
 0x149   : > { %2444 = vrot.lane.b32.xlu1 %v2281_v44, %s9623_s10  ;;  %v2533_v44 = vld [vmem:[#allocation2 + $0x14] sm:$0x1]  ;;  %v2645_v1 = vrot.slane %v2643_v4, 4  ;;  %v2652_v9 = vrot.slane %v2650_v56, 4  ;;  %v2543_v19 = vld [vmem:[#allocation2 + $0x3c] sm:$0xe] }
 0x14a   : > { %v1705_v43 = vpop.permute.xlu0 %1704  ;;  %v2632_v38 = vrot.slane %v2533_v44, 5  ;;  %v2657_v20 = vrot.slane %v2544_v55, 5  ;;  %v2651_v27 = vsel %vm10094_vm13, %v9026_v15, %v2650_v56  ;;  %v9027_v28 = vrot.slane %v2543_v19, 9  ;;  %v2546_v49 = vld [vmem:[#allocation2 + $0x48] sm:$0xe] }
 0x14b   : > { %1773 = vst.msk [vmem:[#allocation3 + $0x70] sm:$0xf] %vm1744_vm15, %v1705_v43  ;;  %v1707_v52 = vpop.permute.xlu1 %1706  ;;  %v2639_v43 = vrot.slane %v2536_v14, 5  ;;  %v2549_v46 = vld [vmem:[#allocation2 + $0x54] sm:$0xe] }
 0x14c   : > { %1774 = vst.msk [vmem:[#allocation3 + $0x74] sm:$0xf] %vm1744_vm15, %v1707_v52  ;;  %2446 = vrot.lane.b32.xlu0 %v2295_v50, %s9623_s10  ;;  %v2401_v50 = vsel %vm9830_vm10, %v2396_v37, %v2400_v39  ;;  %v2637_v52 = vsel %vm10094_vm13, %v9024_v60, %v2636_v54  ;;  %v2659_v48 = vrot.slane %v2657_v20, 4  ;;  %v2548_v37 = vld [vmem:[#allocation2 + $0x50] sm:$0x1]  ;;  %v2658_v30 = vsel %vm10094_vm13, %v9027_v28, %v2657_v20 }
 0x14d   : > { %2448 = vrot.lane.b32.xlu1 %v2305_v41, %s9623_s10  ;;  %v2631_v41 = vrot.slane %v2629_v40, 4  ;;  %v2640_v61 = vsel %vm10094_vm13, %v2638_v2, %v2639_v43  ;;  %v2550_v39 = vld [vmem:[#allocation2 + $0x58] sm:$0xf]  ;;  %v9028_v40 = vrot.slane %v2546_v49, 9  ;;  %v9029_v54 = vrot.slane %v2549_v46, 9 }
 0x14e   : > { %v1709_v12 = vpop.permute.xlu0 %1708  ;;  %v2552_v60 = vld [vmem:[#allocation2 + $0x60] sm:$0xe]  ;;  %v2554_v2 = vld [vmem:[#allocation2 + $0x68] sm:$0x1]  ;;  %v2556_v43 = vld [vmem:[#allocation2 + $0x70] sm:$0xf] }
 0x14f   : > { %1775 = vst.msk [vmem:[#allocation3 + $0x78] sm:$0xf] %vm1744_vm15, %v1709_v12  ;;  %v1711_v16 = vpop.permute.xlu1 %1710  ;;  %v2633_v47 = vsel %vm10094_vm13, %v2631_v41, %v2632_v38  ;;  %v2542_v12 = vld [vmem:[#allocation2 + $0x38] sm:$0x1]  ;;  %v2551_v41 = vld [vmem:[#allocation2 + $0x5c] sm:$0x1] }
 0x150   : > { %1776 = vst.msk [vmem:[#allocation3 + $0x7c] sm:$0xf] %vm1744_vm15, %v1711_v16  ;;  %2450 = vrot.lane.b32.xlu0 %v2319_v21, %s9623_s10  ;;  %v9025_v21 = vrot.slane %v2537_v3, 9  ;;  %v2647_v16 = vsel %vm10094_vm13, %v2645_v1, %v2646_v10  ;;  %v2553_v38 = vld [vmem:[#allocation2 + $0x64] sm:$0xf]  ;;  %vm4362_vm15 = vcmask 57344  }
 0x151   : > { %2452 = vrot.lane.b32.xlu1 %v2329_v7, %s9623_s10  ;;  %v2557_v1 = vld [vmem:[#allocation2 + $0x74] sm:$0x1]  ;;  %v2559_v10 = vld [vmem:[#allocation2 + $0x7c] sm:$0xf]  ;;  %v2558_v15 = vld [vmem:[#allocation2 + $0x78] sm:$0xe] }
 0x152   : > { %v1842_v22 = vpop.permute.xlu0 %1841  ;;  %v2644_v13 = vsel %vm10094_vm13, %v9025_v21, %v2643_v4  ;;  %v9030_v4 = vrot.slane %v2552_v60, 9  ;;  %v2555_v21 = vld [vmem:[#allocation2 + $0x6c] sm:$0xe]  ;;  %v9032_v20 = vrot.slane %v2558_v15, 9  ;;  %v2561_v28 = vld [vmem:[#allocation2 + $0x84] sm:$0xe] }
 0x153   : > { %1938 = vst.msk [vmem:[#allocation3] sm:$0xf] %vm1937_vm0, %v1842_v22  ;;  %v1844_v32 = vpop.permute.xlu1 %1843  ;;  %v2545_v22 = vld [vmem:[#allocation2 + $0x44] sm:$0x1]  ;;  %v9031_v56 = vrot.slane %v2555_v21, 9 }
 0x154   : > { %1939 = vst.msk [vmem:[#allocation3 + $0x4] sm:$0xf] %vm1937_vm0, %v1844_v32  ;;  %2454 = vrot.lane.b32.xlu0 %v2343_v17, %s9623_s10  ;;  %v2653_v17 = vrot.slane %v2542_v12, 5 }
 0x155   : > { %2456 = vrot.lane.b32.xlu1 %v2353_v24, %s9623_s10  ;;  %v2547_v24 = vld [vmem:[#allocation2 + $0x4c] sm:$0xf]  ;;  %4379 = vst.msk [vmem:[#allocation4 + $0x48] sm:$0xf] %vm4359_vm14, %v9619_v0  ;;  %4380 = vst.msk [vmem:[#allocation4 + $0x4c] sm:$0xf] %vm4359_vm14, %v9619_v0 }
 0x156   : > { %v1846_v36 = vpop.permute.xlu0 %1845  ;;  %v2654_v32 = vsel %vm10094_vm13, %v2652_v9, %v2653_v17  ;;  %v2560_v9 = vld [vmem:[#allocation2 + $0x80] sm:$0x1]  ;;  %v2562_v17 = vld [vmem:[#allocation2 + $0x88] sm:$0xf]  ;;  %4382 = vst.msk [vmem:[#allocation4 + $0x54] sm:$0xf] %vm4359_vm14, %v9619_v0 }
 0x157   : > { %1940 = vst.msk [vmem:[#allocation3 + $0x8] sm:$0xf] %vm1937_vm0, %v1846_v36  ;;  %v1848_v31 = vpop.permute.xlu1 %1847  ;;  %v2664_v36 = vrot.slane %v2547_v24, 5 }
 0x158   : > { %1941 = vst.msk [vmem:[#allocation3 + $0xc] sm:$0xf] %vm1937_vm0, %v1848_v31  ;;  %2458 = vrot.lane.b32.xlu0 %v2367_v34, %s9623_s10  ;;  %v2660_v34 = vrot.slane %v2545_v22, 5 }
 0x159   : > { %2460 = vrot.lane.b32.xlu1 %v2377_v11, %s9623_s10  ;;  %v2666_v45 = vrot.slane %v2664_v36, 4  ;;  %v2665_v53 = vsel %vm10094_vm13, %v9028_v40, %v2664_v36  ;;  %v9033_v36 = vrot.slane %v2561_v28, 9  ;;  %v2564_v40 = vld [vmem:[#allocation2 + $0x90] sm:$0xe]  ;;  %4383 = vst.msk [vmem:[#allocation4 + $0x58] sm:$0xf] %vm4359_vm14, %v9619_v0 }
 0x15a   : > { %v1850_v26 = vpop.permute.xlu0 %1849  ;;  %v2661_v44 = vsel %vm10094_vm13, %v2659_v48, %v2660_v34  ;;  %v2563_v48 = vld [vmem:[#allocation2 + $0x8c] sm:$0x1]  ;;  %v2565_v34 = vld [vmem:[#allocation2 + $0x94] sm:$0xf]  ;;  %4385 = vst.msk [vmem:[#allocation4 + $0x60] sm:$0xf] %vm4359_vm14, %v9619_v0 }
 0x15b   : > { %1942 = vst.msk [vmem:[#allocation3 + $0x10] sm:$0xf] %vm1937_vm0, %v1850_v26  ;;  %v1852_v57 = vpop.permute.xlu1 %1851  ;;  %v2671_v26 = vrot.slane %v2550_v39, 5 }
 0x15c   : > { %1943 = vst.msk [vmem:[#allocation3 + $0x14] sm:$0xf] %vm1937_vm0, %v1852_v57  ;;  %2462 = vrot.lane.b32.xlu0 %v2391_v25, %s9623_s10  ;;  %v2667_v25 = vrot.slane %v2548_v37, 5 }
 0x15d   : > { %2464 = vrot.lane.b32.xlu1 %v2401_v50, %s9623_s10  ;;  %v2673_v58 = vrot.slane %v2671_v26, 4  ;;  %v2672_v3 = vsel %vm10094_vm13, %v9029_v54, %v2671_v26  ;;  %v9034_v26 = vrot.slane %v2564_v40, 9  ;;  %v2567_v54 = vld [vmem:[#allocation2 + $0x9c] sm:$0xe]  ;;  %4386 = vst.msk [vmem:[#allocation4 + $0x64] sm:$0xf] %vm4359_vm14, %v9619_v0 }
 0x15e   : > { %v1854_v63 = vpop.permute.xlu0 %1853  ;;  %v2668_v14 = vsel %vm10094_vm13, %v2666_v45, %v2667_v25  ;;  %v2566_v45 = vld [vmem:[#allocation2 + $0x98] sm:$0x1]  ;;  %v2568_v25 = vld [vmem:[#allocation2 + $0xa0] sm:$0xf]  ;;  %4388 = vst.msk [vmem:[#allocation4 + $0x6c] sm:$0xf] %vm4359_vm14, %v9619_v0 }
 0x15f   : > { %1944 = vst.msk [vmem:[#allocation3 + $0x18] sm:$0xf] %vm1937_vm0, %v1854_v63  ;;  %v1856_v33 = vpop.permute.xlu1 %1855  ;;  %v2678_v63 = vrot.slane %v2553_v38, 5  ;;  %s9633_s10 = smov 48  }
 0x160   : > { %1945 = vst.msk [vmem:[#allocation3 + $0x1c] sm:$0xf] %vm1937_vm0, %v1856_v33  ;;  %2739 = vrot.lane.b32.xlu0 %v2630_v59, %s9624_s11  ;;  %v2674_v59 = vrot.slane %v2551_v41, 5 }
 0x161   : > { %2741 = vrot.lane.b32.xlu1 %v2633_v47, %s9624_s11  ;;  %v2680_v6 = vrot.slane %v2678_v63, 4  ;;  %v2679_v42 = vsel %vm10094_vm13, %v9030_v4, %v2678_v63  ;;  %v9035_v63 = vrot.slane %v2567_v54, 9  ;;  %v2570_v4 = vld [vmem:[#allocation2 + $0xa8] sm:$0xe]  ;;  %v2875_v54 = vld [vmem:[#allocation2 + $0x3c] sm:$0xf] }
 0x162   : > { %v1858_v7 = vpop.permute.xlu0 %1857  ;;  %v2675_v5 = vsel %vm10094_vm13, %v2673_v58, %v2674_v59  ;;  %v2569_v58 = vld [vmem:[#allocation2 + $0xa4] sm:$0x1]  ;;  %v2571_v59 = vld [vmem:[#allocation2 + $0xac] sm:$0xf]  ;;  %4389 = vst.msk [vmem:[#allocation4 + $0x70] sm:$0xf] %vm4359_vm14, %v9619_v0 }
 0x163   : > { %1946 = vst.msk [vmem:[#allocation3 + $0x20] sm:$0xf] %vm1937_vm0, %v1858_v7  ;;  %v1860_v62 = vpop.permute.xlu1 %1859  ;;  %v2685_v7 = vrot.slane %v2556_v43, 5 }
 0x164   : > { %1947 = vst.msk [vmem:[#allocation3 + $0x24] sm:$0xf] %vm1937_vm0, %v1860_v62  ;;  %2743 = vrot.lane.b32.xlu0 %v2637_v52, %s9624_s11  ;;  %v2681_v52 = vrot.slane %v2554_v2, 5 }
 0x165   : > { %2745 = vrot.lane.b32.xlu1 %v2640_v61, %s9624_s11  ;;  %v2687_v55 = vrot.slane %v2685_v7, 4  ;;  %v2686_v19 = vsel %vm10094_vm13, %v9031_v56, %v2685_v7  ;;  %v9036_v7 = vrot.slane %v2570_v4, 9  ;;  %v2573_v56 = vld [vmem:[#allocation2 + $0xb4] sm:$0xe]  ;;  %4391 = vst.msk [vmem:[#allocation4 + $0x78] sm:$0xf] %vm4359_vm14, %v9619_v0 }
 0x166   : > { %v1862_v8 = vpop.permute.xlu0 %1861  ;;  %v2682_v12 = vsel %vm10094_vm13, %v2680_v6, %v2681_v52  ;;  %v2572_v6 = vld [vmem:[#allocation2 + $0xb0] sm:$0x1]  ;;  %v2574_v52 = vld [vmem:[#allocation2 + $0xb8] sm:$0xf]  ;;  %4392 = vst.msk [vmem:[#allocation4 + $0x7c] sm:$0xf] %vm4359_vm14, %v9619_v0 }
 0x167   : > { %1948 = vst.msk [vmem:[#allocation3 + $0x28] sm:$0xf] %vm1937_vm0, %v1862_v8  ;;  %v1864_v18 = vpop.permute.xlu1 %1863  ;;  %v2692_v8 = vrot.slane %v2559_v10, 5 }
 0x168   : > { %1949 = vst.msk [vmem:[#allocation3 + $0x2c] sm:$0xf] %vm1937_vm0, %v1864_v18  ;;  %2747 = vrot.lane.b32.xlu0 %v2644_v13, %s9624_s11  ;;  %v2688_v13 = vrot.slane %v2557_v1, 5 }
 0x169   : > { %2749 = vrot.lane.b32.xlu1 %v2647_v16, %s9624_s11  ;;  %v2694_v24 = vrot.slane %v2692_v8, 4  ;;  %v2693_v49 = vsel %vm10094_vm13, %v9032_v20, %v2692_v8  ;;  %v9037_v8 = vrot.slane %v2573_v56, 9  ;;  %v2576_v20 = vld [vmem:[#allocation2 + $0xc0] sm:$0xe]  ;;  %v2886_v56 = vld [vmem:[#allocation2 + $0x7c] sm:$0xf] }
 0x16a   : > { %v1866_v29 = vpop.permute.xlu0 %1865  ;;  %v2689_v22 = vsel %vm10094_vm13, %v2687_v55, %v2688_v13  ;;  %v2575_v55 = vld [vmem:[#allocation2 + $0xbc] sm:$0x1]  ;;  %v2577_v13 = vld [vmem:[#allocation2 + $0xc4] sm:$0xf]  ;;  %v9038_v28 = vrot.slane %v2576_v20, 9 }
 0x16b   : > { %1950 = vst.msk [vmem:[#allocation3 + $0x30] sm:$0xf] %vm1937_vm0, %v1866_v29  ;;  %v1868_v11 = vpop.permute.xlu1 %1867  ;;  %v2699_v29 = vrot.slane %v2562_v17, 5 }
 0x16c   : > { %1951 = vst.msk [vmem:[#allocation3 + $0x34] sm:$0xf] %vm1937_vm0, %v1868_v11  ;;  %2751 = vrot.lane.b32.xlu0 %v2651_v27, %s9624_s11  ;;  %v2695_v27 = vrot.slane %v2560_v9, 5 }
 0x16d   : > { %2753 = vrot.lane.b32.xlu1 %v2654_v32, %s9624_s11  ;;  %v2701_v39 = vrot.slane %v2699_v29, 4  ;;  %v2700_v46 = vsel %vm10094_vm13, %v9033_v36, %v2699_v29  ;;  %4394 = vst.msk [vmem:[#allocation4 + $0x84] sm:$0xf] %vm4359_vm14, %v9619_v0  ;;  %4395 = vst.msk [vmem:[#allocation4 + $0x88] sm:$0xf] %vm4359_vm14, %v9619_v0 }
 0x16e   : > { %v1870_v31 = vpop.permute.xlu0 %1869  ;;  %v2696_v37 = vsel %vm10094_vm13, %v2694_v24, %v2695_v27  ;;  %v2578_v24 = vld [vmem:[#allocation2 + $0xc8] sm:$0x1]  ;;  %4397 = vst.msk [vmem:[#allocation4 + $0x90] sm:$0xf] %vm4359_vm14, %v9619_v0  ;;  %4398 = vst.msk [vmem:[#allocation4 + $0x94] sm:$0xf] %vm4359_vm14, %v9619_v0 }
 0x16f   : > { %1952 = vst.msk [vmem:[#allocation3 + $0x38] sm:$0xf] %vm1937_vm0, %v1870_v31  ;;  %v1872_v50 = vpop.permute.xlu1 %1871  ;;  %v2706_v31 = vrot.slane %v2565_v34, 5  ;;  %v2737_v34 = vrot.slane %v2578_v24, 5 }
 0x170   : > { %1953 = vst.msk [vmem:[#allocation3 + $0x3c] sm:$0xf] %vm1937_vm0, %v1872_v50  ;;  %2755 = vrot.lane.b32.xlu0 %v2658_v30, %s9624_s11  ;;  %v2702_v30 = vrot.slane %v2563_v48, 5 }
 0x171   : > { %2757 = vrot.lane.b32.xlu1 %v2661_v44, %s9624_s11  ;;  %v2708_v38 = vrot.slane %v2706_v31, 4  ;;  %v2707_v60 = vsel %vm10094_vm13, %v9034_v26, %v2706_v31  ;;  %v2870_v31 = vld [vmem:[#allocation2 + $0x1c] sm:$0xf]  ;;  %4400 = vst.msk [vmem:[#allocation4 + $0x9c] sm:$0xf] %vm4359_vm14, %v9619_v0 }
 0x172   : > { %v1874_v57 = vpop.permute.xlu0 %1873  ;;  %v2703_v41 = vsel %vm10094_vm13, %v2701_v39, %v2702_v30  ;;  %v2869_v30 = vld [vmem:[#allocation2 + $0x18] sm:$0xf]  ;;  %4401 = vst.msk [vmem:[#allocation4 + $0xa0] sm:$0xf] %vm4359_vm14, %v9619_v0  ;;  %4403 = vst.msk [vmem:[#allocation4 + $0xa8] sm:$0xf] %vm4359_vm14, %v9619_v0 }
 0x173   : > { %1954 = vst.msk [vmem:[#allocation3 + $0x40] sm:$0xf] %vm1937_vm0, %v1874_v57  ;;  %v1876_v47 = vpop.permute.xlu1 %1875  ;;  %v2713_v57 = vrot.slane %v2568_v25, 5 }
 0x174   : > { %1955 = vst.msk [vmem:[#allocation3 + $0x44] sm:$0xf] %vm1937_vm0, %v1876_v47  ;;  %2759 = vrot.lane.b32.xlu0 %v2665_v53, %s9624_s11  ;;  %v2709_v53 = vrot.slane %v2566_v45, 5  ;;  %v2871_v45 = vld [vmem:[#allocation2 + $0x24] sm:$0xf] }
 0x175   : > { %2761 = vrot.lane.b32.xlu1 %v2668_v14, %s9624_s11  ;;  %v2715_v43 = vrot.slane %v2713_v57, 4  ;;  %v2714_v21 = vsel %vm10094_vm13, %v9035_v63, %v2713_v57  ;;  %v2878_v63 = vld [vmem:[#allocation2 + $0x4c] sm:$0xf]  ;;  %4404 = vst.msk [vmem:[#allocation4 + $0xac] sm:$0xf] %vm4359_vm14, %v9619_v0 }
 0x176   : > { %v1878_v33 = vpop.permute.xlu0 %1877  ;;  %v2710_v2 = vsel %vm10094_vm13, %v2708_v38, %v2709_v53  ;;  %v2874_v38 = vld [vmem:[#allocation2 + $0x34] sm:$0xf]  ;;  %4406 = vst.msk [vmem:[#allocation4 + $0xb4] sm:$0xf] %vm4359_vm14, %v9619_v0  ;;  %4407 = vst.msk [vmem:[#allocation4 + $0xb8] sm:$0xf] %vm4359_vm14, %v9619_v0 }
 0x177   : > { %1956 = vst.msk [vmem:[#allocation3 + $0x48] sm:$0xf] %vm1937_vm0, %v1878_v33  ;;  %v1880_v61 = vpop.permute.xlu1 %1879  ;;  %v2720_v33 = vrot.slane %v2571_v59, 5  ;;  %v2877_v59 = vld [vmem:[#allocation2 + $0x48] sm:$0xf] }
 0x178   : > { %1957 = vst.msk [vmem:[#allocation3 + $0x4c] sm:$0xf] %vm1937_vm0, %v1880_v61  ;;  %2763 = vrot.lane.b32.xlu0 %v2672_v3, %s9624_s11  ;;  %v2716_v3 = vrot.slane %v2569_v58, 5 }
 0x179   : > { %2765 = vrot.lane.b32.xlu1 %v2675_v5, %s9624_s11  ;;  %v2722_v10 = vrot.slane %v2720_v33, 4  ;;  %v2721_v15 = vsel %vm10094_vm13, %v9036_v7, %v2720_v33  ;;  %v2881_v33 = vld [vmem:[#allocation2 + $0x60] sm:$0xf]  ;;  %4409 = vst.msk [vmem:[#allocation4 + $0xc0] sm:$0xf] %vm4359_vm14, %v9619_v0 }
 0x17a   : > { %v1882_v62 = vpop.permute.xlu0 %1881  ;;  %v2717_v1 = vsel %vm10094_vm13, %v2715_v43, %v2716_v3  ;;  %v2880_v3 = vld [vmem:[#allocation2 + $0x58] sm:$0xf]  ;;  %4410 = vst.msk [vmem:[#allocation4 + $0xc4] sm:$0xf] %vm4359_vm14, %v9619_v0  ;;  %4412 = vst.msk [vmem:[#allocation4 + $0xcc] sm:$0xf] %vm4359_vm14, %v9619_v0 }
 0x17b   : > { %1958 = vst.msk [vmem:[#allocation3 + $0x50] sm:$0xf] %vm1937_vm0, %v1882_v62  ;;  %v1884_v16 = vpop.permute.xlu1 %1883  ;;  %v2727_v62 = vrot.slane %v2574_v52, 5 }
 0x17c   : > { %1959 = vst.msk [vmem:[#allocation3 + $0x54] sm:$0xf] %vm1937_vm0, %v1884_v16  ;;  %2767 = vrot.lane.b32.xlu0 %v2679_v42, %s9624_s11  ;;  %v2723_v42 = vrot.slane %v2572_v6, 5  ;;  %v2882_v6 = vld [vmem:[#allocation2 + $0x64] sm:$0xf] }
 0x17d   : > { %2769 = vrot.lane.b32.xlu1 %v2682_v12, %s9624_s11  ;;  %v2729_v17 = vrot.slane %v2727_v62, 4  ;;  %v2728_v27 = vsel %vm10094_vm13, %v9037_v8, %v2727_v62  ;;  %v2889_v8 = vld [vmem:[#allocation2 + $0x90] sm:$0xf]  ;;  %4413 = vst.msk [vmem:[#allocation4 + $0xd0] sm:$0xf] %vm4359_vm14, %v9619_v0 }
 0x17e   : > { %v1886_v18 = vpop.permute.xlu0 %1885  ;;  %v2724_v9 = vsel %vm10094_vm13, %v2722_v10, %v2723_v42  ;;  %v2885_v10 = vld [vmem:[#allocation2 + $0x78] sm:$0xf]  ;;  %4369 = vst.msk [vmem:[#allocation4 + $0x20] sm:$0x1] %vm4362_vm15, %v9619_v0  ;;  %4363 = vst.msk [vmem:[#allocation4 + $0x8] sm:$0x1] %vm4362_vm15, %v9619_v0 }
 0x17f   : > { %1960 = vst.msk [vmem:[#allocation3 + $0x58] sm:$0xf] %vm1937_vm0, %v1886_v18  ;;  %v1888_v32 = vpop.permute.xlu1 %1887  ;;  %v2734_v18 = vrot.slane %v2577_v13, 5  ;;  %v2888_v13 = vld [vmem:[#allocation2 + $0x88] sm:$0xf] }
 0x180   : > { %1961 = vst.msk [vmem:[#allocation3 + $0x5c] sm:$0xf] %vm1937_vm0, %v1888_v32  ;;  %2771 = vrot.lane.b32.xlu0 %v2686_v19, %s9624_s11  ;;  %v2730_v19 = vrot.slane %v2575_v55, 5 }
 0x181   : > { %2773 = vrot.lane.b32.xlu1 %v2689_v22, %s9624_s11  ;;  %v2736_v48 = vrot.slane %v2734_v18, 4  ;;  %v2735_v36 = vsel %vm10094_vm13, %v9038_v28, %v2734_v18  ;;  %v2892_v18 = vld [vmem:[#allocation2 + $0xa0] sm:$0xf]  ;;  %v3065_v28 = vld [vmem:[#allocation2 + $0x24] sm:$0xf] }
 0x182   : > { %v1890_v11 = vpop.permute.xlu0 %1889  ;;  %v2731_v32 = vsel %vm10094_vm13, %v2729_v17, %v2730_v19  ;;  %v2891_v19 = vld [vmem:[#allocation2 + $0x9c] sm:$0xf]  ;;  %4366 = vst.msk [vmem:[#allocation4 + $0x14] sm:$0x1] %vm4362_vm15, %v9619_v0  ;;  %4372 = vst.msk [vmem:[#allocation4 + $0x2c] sm:$0x1] %vm4362_vm15, %v9619_v0 }
 0x183   : > { %1962 = vst.msk [vmem:[#allocation3 + $0x60] sm:$0xf] %vm1937_vm0, %v1890_v11  ;;  %v1892_v44 = vpop.permute.xlu1 %1891 }
 0x184   : > { %1963 = vst.msk [vmem:[#allocation3 + $0x64] sm:$0xf] %vm1937_vm0, %v1892_v44  ;;  %2775 = vrot.lane.b32.xlu0 %v2693_v49, %s9624_s11 }
 0x185   : > { %2777 = vrot.lane.b32.xlu1 %v2696_v37, %s9624_s11  ;;  %v2738_v37 = vsel %vm10094_vm13, %v2736_v48, %v2737_v34  ;;  %4375 = vst.msk [vmem:[#allocation4 + $0x38] sm:$0x1] %vm4362_vm15, %v9619_v0  ;;  %4378 = vst.msk [vmem:[#allocation4 + $0x44] sm:$0x1] %vm4362_vm15, %v9619_v0 }
 0x186   : > { %v1894_v50 = vpop.permute.xlu0 %1893  ;;  %4381 = vst.msk [vmem:[#allocation4 + $0x50] sm:$0x1] %vm4362_vm15, %v9619_v0  ;;  %4384 = vst.msk [vmem:[#allocation4 + $0x5c] sm:$0x1] %vm4362_vm15, %v9619_v0 }
 0x187   : > { %1964 = vst.msk [vmem:[#allocation3 + $0x68] sm:$0xf] %vm1937_vm0, %v1894_v50  ;;  %v1896_v14 = vpop.permute.xlu1 %1895  ;;  %v2873_v50 = vld [vmem:[#allocation2 + $0x30] sm:$0xf] }
 0x188   : > { %1965 = vst.msk [vmem:[#allocation3 + $0x6c] sm:$0xf] %vm1937_vm0, %v1896_v14  ;;  %2779 = vrot.lane.b32.xlu0 %v2700_v46, %s9624_s11  ;;  %v2872_v46 = vld [vmem:[#allocation2 + $0x28] sm:$0xf]  ;;  %v2876_v14 = vld [vmem:[#allocation2 + $0x40] sm:$0xf] }
 0x189   : > { %2781 = vrot.lane.b32.xlu1 %v2703_v41, %s9624_s11  ;;  %4387 = vst.msk [vmem:[#allocation4 + $0x68] sm:$0x1] %vm4362_vm15, %v9619_v0  ;;  %4390 = vst.msk [vmem:[#allocation4 + $0x74] sm:$0x1] %vm4362_vm15, %v9619_v0 }
 0x18a   : > { %v1898_v47 = vpop.permute.xlu0 %1897  ;;  %4393 = vst.msk [vmem:[#allocation4 + $0x80] sm:$0x1] %vm4362_vm15, %v9619_v0  ;;  %4396 = vst.msk [vmem:[#allocation4 + $0x8c] sm:$0x1] %vm4362_vm15, %v9619_v0 }
 0x18b   : > { %1966 = vst.msk [vmem:[#allocation3 + $0x70] sm:$0xf] %vm1937_vm0, %v1898_v47  ;;  %v1900_v5 = vpop.permute.xlu1 %1899 }
 0x18c   : > { %1967 = vst.msk [vmem:[#allocation3 + $0x74] sm:$0xf] %vm1937_vm0, %v1900_v5  ;;  %2783 = vrot.lane.b32.xlu0 %v2707_v60, %s9624_s11 }
 0x18d   : > { %2785 = vrot.lane.b32.xlu1 %v2710_v2, %s9624_s11  ;;  %v2879_v2 = vld [vmem:[#allocation2 + $0x54] sm:$0xf]  ;;  %4399 = vst.msk [vmem:[#allocation4 + $0x98] sm:$0x1] %vm4362_vm15, %v9619_v0  ;;  %4402 = vst.msk [vmem:[#allocation4 + $0xa4] sm:$0x1] %vm4362_vm15, %v9619_v0 }
 0x18e   : > { %v1902_v61 = vpop.permute.xlu0 %1901  ;;  %4405 = vst.msk [vmem:[#allocation4 + $0xb0] sm:$0x1] %vm4362_vm15, %v9619_v0  ;;  %4408 = vst.msk [vmem:[#allocation4 + $0xbc] sm:$0x1] %vm4362_vm15, %v9619_v0 }
 0x18f   : > { %1968 = vst.msk [vmem:[#allocation3 + $0x78] sm:$0xf] %vm1937_vm0, %v1902_v61  ;;  %v1904_v12 = vpop.permute.xlu1 %1903  ;;  %v2884_v61 = vld [vmem:[#allocation2 + $0x70] sm:$0xf] }
 0x190   : > { %1969 = vst.msk [vmem:[#allocation3 + $0x7c] sm:$0xf] %vm1937_vm0, %v1904_v12  ;;  %2787 = vrot.lane.b32.xlu0 %v2714_v21, %s9624_s11  ;;  %v2883_v21 = vld [vmem:[#allocation2 + $0x6c] sm:$0xf]  ;;  %v2887_v12 = vld [vmem:[#allocation2 + $0x84] sm:$0xf]  ;;  %vm11240_vm0 = vmand %vm4359_vm14, %vm693_vm6 }
 0x191   : > { %2789 = vrot.lane.b32.xlu1 %v2717_v1, %s9624_s11  ;;  %4411 = vst.msk [vmem:[#allocation4 + $0xc8] sm:$0x1] %vm4362_vm15, %v9619_v0  ;;  %4414 = vst.msk [vmem:[#allocation4 + $0xd4] sm:$0x1] %vm4362_vm15, %v9619_v0 }
 0x192   : > { %v2403_v16 = vpop.permute.xlu0 %2402  ;;  %vm11248_vm6 = vmand %vm4362_vm15, %vm368_vm1  ;;  %vm5524_vm1 = vcmask 126016   ;;  %vm7707_vm15 = vcmask 519616  }
 0x193   : > { %2499 = vst.msk [vmem:[#allocation3] sm:$0xf] %vm2498_vm2, %v2403_v16  ;;  %v2405_v22 = vpop.permute.xlu1 %2404 }
 0x194   : > { %2500 = vst.msk [vmem:[#allocation3 + $0x4] sm:$0xf] %vm2498_vm2, %v2405_v22  ;;  %2791 = vrot.lane.b32.xlu0 %v2721_v15, %s9624_s11  ;;  %v3062_v22 = vld [vmem:[#allocation2 + $0x18] sm:$0xf] }
 0x195   : > { %2793 = vrot.lane.b32.xlu1 %v2724_v9, %s9624_s11  ;;  %v2890_v9 = vld [vmem:[#allocation2 + $0x94] sm:$0xf]  ;;  %v3111_v48 = vshrl.u32 %v3062_v22, 16  ;;  %v3114_v34 = vshll.u32 %v3062_v22, 16  ;;  %v3071_v22 = vld [vmem:[#allocation2 + $0x3c] sm:$0xf] }
 0x196   : > { %v2407_v29 = vpop.permute.xlu0 %2406 }
 0x197   : > { %2501 = vst.msk [vmem:[#allocation3 + $0x8] sm:$0xf] %vm2498_vm2, %v2407_v29  ;;  %v2409_v49 = vpop.permute.xlu1 %2408  ;;  %v3066_v29 = vld [vmem:[#allocation2 + $0x28] sm:$0xf] }
 0x198   : > { %2502 = vst.msk [vmem:[#allocation3 + $0xc] sm:$0xf] %vm2498_vm2, %v2409_v49  ;;  %2795 = vrot.lane.b32.xlu0 %v2728_v27, %s9624_s11  ;;  %v3063_v27 = vld [vmem:[#allocation2 + $0x1c] sm:$0xf] }
 0x199   : > { %2797 = vrot.lane.b32.xlu1 %v2731_v32, %s9624_s11  ;;  %v2893_v32 = vld [vmem:[#allocation2 + $0xa8] sm:$0xf] }
 0x19a   : > { %v2411_v11 = vpop.permute.xlu0 %2410 }
 0x19b   : > { %2503 = vst.msk [vmem:[#allocation3 + $0x10] sm:$0xf] %vm2498_vm2, %v2411_v11  ;;  %v2413_v39 = vpop.permute.xlu1 %2412  ;;  %v3120_v11 = vshll.u32 %v3063_v27, 16 }
 0x19c   : > { %2504 = vst.msk [vmem:[#allocation3 + $0x14] sm:$0xf] %vm2498_vm2, %v2413_v39  ;;  %2799 = vrot.lane.b32.xlu0 %v2735_v36, %s9624_s11  ;;  %v2894_v36 = vld [vmem:[#allocation2 + $0xac] sm:$0xf]  ;;  %v3135_v39 = vshrl.u32 %v3065_v28, 16 }
 0x19d   : > { %2801 = vrot.lane.b32.xlu1 %v2738_v37, %s9624_s11  ;;  %v3124_v37 = vshrl.u32 %v3063_v27, 16  ;;  %v9626_v27 = vmov 65535  }
 0x19e   : > { %v2415_v40 = vpop.permute.xlu0 %2414 }
 0x19f   : > { %2505 = vst.msk [vmem:[#allocation3 + $0x18] sm:$0xf] %vm2498_vm2, %v2415_v40  ;;  %v2417_v44 = vpop.permute.xlu1 %2416 }
 0x1a0   : > { %2506 = vst.msk [vmem:[#allocation3 + $0x1c] sm:$0xf] %vm2498_vm2, %v2417_v44  ;;  %2933 = vrot.lane.b32.xlu0 %v2869_v30, %s9625_s12  ;;  %v3138_v30 = vshll.u32 %v3065_v28, 16  ;;  %v3148_v44 = vshrl.u32 %v3066_v29, 16  ;;  %v4145_v28 = vsel %vm4143_vm4, 4294967295, %v9626_v27  ;;  %vm8584_vm4 = vcmask 1041408  }
 0x1a1   : > { %2935 = vrot.lane.b32.xlu1 %v2870_v31, %s9625_s12  ;;  %v3144_v31 = vshll.u32 %v3066_v29, 16 }
 0x1a2   : > { %v2419_v25 = vpop.permute.xlu0 %2418 }
 0x1a3   : > { %2507 = vst.msk [vmem:[#allocation3 + $0x20] sm:$0xf] %vm2498_vm2, %v2419_v25  ;;  %v2421_v26 = vpop.permute.xlu1 %2420  ;;  %v3113_v25 = vrot.slane %v3111_v48, 4  ;;  %v10727_v48 = vld [vmem:[#allocation2 + $0x28] sm:$0xf] }
 0x1a4   : > { %2508 = vst.msk [vmem:[#allocation3 + $0x24] sm:$0xf] %vm2498_vm2, %v2421_v26  ;;  %2937 = vrot.lane.b32.xlu0 %v2871_v45, %s9625_s12  ;;  %v2895_v45 = vld [vmem:[#allocation2 + $0xb4] sm:$0xf] }
 0x1a5   : > { %2939 = vrot.lane.b32.xlu1 %v2872_v46, %s9625_s12  ;;  %v3116_v46 = vrot.slane %v3114_v34, 5 }
 0x1a6   : > { %v2423_v41 = vpop.permute.xlu0 %2422 }
 0x1a7   : > { %2509 = vst.msk [vmem:[#allocation3 + $0x28] sm:$0xf] %vm2498_vm2, %v2423_v41  ;;  %v2425_v53 = vpop.permute.xlu1 %2424  ;;  %v10695_v41 = vrot.slane %v3120_v11, 5 }
 0x1a8   : > { %2510 = vst.msk [vmem:[#allocation3 + $0x2c] sm:$0xf] %vm2498_vm2, %v2425_v53  ;;  %2941 = vrot.lane.b32.xlu0 %v2873_v50, %s9625_s12  ;;  %v2896_v50 = vld [vmem:[#allocation2 + $0xb8] sm:$0xf]  ;;  %v3137_v53 = vrot.slane %v3135_v39, 4 }
 0x1a9   : > { %2943 = vrot.lane.b32.xlu1 %v2874_v38, %s9625_s12  ;;  %v3126_v38 = vrot.slane %v3124_v37, 4 }
 0x1aa   : > { %v2427_v57 = vpop.permute.xlu0 %2426 }
 0x1ab   : > { %2511 = vst.msk [vmem:[#allocation3 + $0x30] sm:$0xf] %vm2498_vm2, %v2427_v57  ;;  %v2429_v58 = vpop.permute.xlu1 %2428 }
 0x1ac   : > { %2512 = vst.msk [vmem:[#allocation3 + $0x34] sm:$0xf] %vm2498_vm2, %v2429_v58  ;;  %2945 = vrot.lane.b32.xlu0 %v2875_v54, %s9625_s12  ;;  %v3140_v54 = vrot.slane %v3138_v30, 5  ;;  %v10698_v58 = vrot.slane %v3144_v31, 5  ;;  %v3072_v30 = vld [vmem:[#allocation2 + $0x40] sm:$0xf] }
 0x1ad   : > { %2947 = vrot.lane.b32.xlu1 %v2876_v14, %s9625_s12  ;;  %v3064_v14 = vld [vmem:[#allocation2 + $0x20] sm:$0x1] }
 0x1ae   : > { %v2431_v60 = vpop.permute.xlu0 %2430 }
 0x1af   : > { %2513 = vst.msk [vmem:[#allocation3 + $0x38] sm:$0xf] %vm2498_vm2, %v2431_v60  ;;  %v2433_v47 = vpop.permute.xlu1 %2432  ;;  %v3150_v60 = vrot.slane %v3148_v44, 4 }
 0x1b0   : > { %2514 = vst.msk [vmem:[#allocation3 + $0x3c] sm:$0xf] %vm2498_vm2, %v2433_v47  ;;  %2949 = vrot.lane.b32.xlu0 %v2877_v59, %s9625_s12  ;;  %v3067_v59 = vld [vmem:[#allocation2 + $0x2c] sm:$0x1]  ;;  %v3117_v47 = vor.u32 %v3116_v46, %v3113_v25  ;;  %v3186_v25 = vshll.u32 %v3071_v22, 16 }
 0x1b1   : > { %2951 = vrot.lane.b32.xlu1 %v2878_v63, %s9625_s12  ;;  %v2897_v63 = vld [vmem:[#allocation2 + $0xc0] sm:$0xf] }
 0x1b2   : > { %v2435_v43 = vpop.permute.xlu0 %2434 }
 0x1b3   : > { %2515 = vst.msk [vmem:[#allocation3 + $0x40] sm:$0xf] %vm2498_vm2, %v2435_v43  ;;  %v2437_v4 = vpop.permute.xlu1 %2436  ;;  %v2898_v43 = vld [vmem:[#allocation2 + $0xc4] sm:$0xf] }
 0x1b4   : > { %2516 = vst.msk [vmem:[#allocation3 + $0x44] sm:$0xf] %vm2498_vm2, %v2437_v4  ;;  %2953 = vrot.lane.b32.xlu0 %v2879_v2, %s9625_s12  ;;  %v3130_v4 = vshll.u32 %v3064_v14, 16 }
 0x1b5   : > { %2955 = vrot.lane.b32.xlu1 %v2880_v3, %s9625_s12  ;;  %v3127_v3 = vor.u32 %v3126_v38, %v10695_v41 }
 0x1b6   : > { %v2439_v5 = vpop.permute.xlu0 %2438 }
 0x1b7   : > { %2517 = vst.msk [vmem:[#allocation3 + $0x48] sm:$0xf] %vm2498_vm2, %v2439_v5  ;;  %v2441_v52 = vpop.permute.xlu1 %2440  ;;  %v3154_v5 = vshll.u32 %v3067_v59, 16  ;;  %v3196_v59 = vshrl.u32 %v3072_v30, 16 }
 0x1b8   : > { %2518 = vst.msk [vmem:[#allocation3 + $0x4c] sm:$0xf] %vm2498_vm2, %v2441_v52  ;;  %2957 = vrot.lane.b32.xlu0 %v2881_v33, %s9625_s12  ;;  %v3141_v33 = vor.u32 %v3140_v54, %v3137_v53  ;;  %v3151_v52 = vor.u32 %v3150_v60, %v10698_v58  ;;  %v3628_v54 = vld [vmem:[#allocation2 + $0x2c] sm:$0x1] }
 0x1b9   : > { %2959 = vrot.lane.b32.xlu1 %v2882_v6, %s9625_s12 }
 0x1ba   : > { %v2443_v7 = vpop.permute.xlu0 %2442 }
 0x1bb   : > { %2519 = vst.msk [vmem:[#allocation3 + $0x50] sm:$0xf] %vm2498_vm2, %v2443_v7  ;;  %v2445_v1 = vpop.permute.xlu1 %2444  ;;  %v10708_v7 = vld [vmem:[#allocation2 + $0x1c] sm:$0xf] }
 0x1bc   : > { %2520 = vst.msk [vmem:[#allocation3 + $0x54] sm:$0xf] %vm2498_vm2, %v2445_v1  ;;  %2961 = vrot.lane.b32.xlu0 %v2883_v21, %s9625_s12  ;;  %v2899_v21 = vld [vmem:[#allocation2 + $0xcc] sm:$0xf]  ;;  %v3118_v1 = vrot.slane %v3117_v47, 4  ;;  %v9540_v47 = vld [vmem:[%s12643_s1] sm:$0xff]  }
 0x1bd   : > { %2963 = vrot.lane.b32.xlu1 %v2884_v61, %s9625_s12  ;;  %v2900_v61 = vld [vmem:[#allocation2 + $0xd0] sm:$0xf] }
 0x1be   : > { %v2447_v42 = vpop.permute.xlu0 %2446 }
 0x1bf   : > { %2521 = vst.msk [vmem:[#allocation3 + $0x58] sm:$0xf] %vm2498_vm2, %v2447_v42  ;;  %v2449_v62 = vpop.permute.xlu1 %2448 }
 0x1c0   : > { %2522 = vst.msk [vmem:[#allocation3 + $0x5c] sm:$0xf] %vm2498_vm2, %v2449_v62  ;;  %2965 = vrot.lane.b32.xlu0 %v2885_v10, %s9625_s12  ;;  %v3068_v10 = vld [vmem:[#allocation2 + $0x30] sm:$0xf]  ;;  %v3132_v62 = vrot.slane %v3130_v4, 5  ;;  %v3188_v4 = vrot.slane %v3186_v25, 5 }
 0x1c1   : > { %2967 = vrot.lane.b32.xlu1 %v2886_v56, %s9625_s12  ;;  %v3128_v56 = vrot.slane %v3127_v3, 4  ;;  %v3633_v25 = vld [vmem:[#allocation2 + $0x40] sm:$0xf] }
 0x1c2   : > { %v2451_v55 = vpop.permute.xlu0 %2450 }
 0x1c3   : > { %2523 = vst.msk [vmem:[#allocation3 + $0x60] sm:$0xf] %vm2498_vm2, %v2451_v55  ;;  %v2453_v15 = vpop.permute.xlu1 %2452  ;;  %v10711_v55 = vrot.slane %v3154_v5, 5 }
 0x1c4   : > { %2524 = vst.msk [vmem:[#allocation3 + $0x64] sm:$0xf] %vm2498_vm2, %v2453_v15  ;;  %2969 = vrot.lane.b32.xlu0 %v2887_v12, %s9625_s12  ;;  %v3142_v12 = vrot.slane %v3141_v33, 4  ;;  %v3152_v15 = vrot.slane %v3151_v52, 4 }
 0x1c5   : > { %2971 = vrot.lane.b32.xlu1 %v2888_v13, %s9625_s12 }
 0x1c6   : > { %v2455_v16 = vpop.permute.xlu0 %2454  ;;  %v3147_v37 = vsel %vm9830_vm10, %v3142_v12, %v10698_v58  ;;  %v3157_v46 = vsel %vm9830_vm10, %v3152_v15, %v10711_v55  ;;  %v3192_v58 = vshll.u32 %v3072_v30, 16  ;;  %v10762_v15 = vld [vmem:[#allocation2 + $0x34] sm:$0xf] }
 0x1c7   : > { %2525 = vst.msk [vmem:[#allocation3 + $0x68] sm:$0xf] %vm2498_vm2, %v2455_v16  ;;  %v2457_v17 = vpop.permute.xlu1 %2456  ;;  %v3721_v16 = vrot.slane %v10708_v7, 5 }
 0x1c8   : > { %2526 = vst.msk [vmem:[#allocation3 + $0x6c] sm:$0xf] %vm2498_vm2, %v2457_v17  ;;  %2973 = vrot.lane.b32.xlu0 %v2889_v8, %s9625_s12  ;;  %v3623_v8 = vld [vmem:[#allocation2 + $0x18] sm:$0xe]  ;;  %v3625_v17 = vld [vmem:[#allocation2 + $0x20] sm:$0x1] }
 0x1c9   : > { %2975 = vrot.lane.b32.xlu1 %v2890_v9, %s9625_s12  ;;  %v3069_v9 = vld [vmem:[#allocation2 + $0x34] sm:$0xf]  ;;  %v9039_v39 = vrot.slane %v3623_v8, 9  ;;  %v3723_v31 = vrot.slane %v3721_v16, 4  ;;  %v3724_v44 = vrot.slane %v3625_v17, 5 }
 0x1ca   : > { %v2459_v20 = vpop.permute.xlu0 %2458  ;;  %v3168_v34 = vshll.u32 %v3069_v9, 16 }
 0x1cb   : > { %2527 = vst.msk [vmem:[#allocation3 + $0x70] sm:$0xf] %vm2498_vm2, %v2459_v20  ;;  %v2461_v24 = vpop.permute.xlu1 %2460  ;;  %v3162_v20 = vshll.u32 %v3068_v10, 16 }
 0x1cc   : > { %2528 = vst.msk [vmem:[#allocation3 + $0x74] sm:$0xf] %vm2498_vm2, %v2461_v24  ;;  %2977 = vrot.lane.b32.xlu0 %v2891_v19, %s9625_s12  ;;  %v3159_v19 = vshrl.u32 %v3068_v10, 16  ;;  %v9539_v24 = vld [vmem:[%s12643_s1 + $0x8] sm:$0x3f]   ;;  %v10754_v10 = vrot.slane %v3192_v58, 5 }
 0x1cd   : > { %2979 = vrot.lane.b32.xlu1 %v2892_v18, %s9625_s12  ;;  %v3123_v18 = vsel %vm9830_vm10, %v3118_v1, %v10695_v41  ;;  %v3164_v38 = vrot.slane %v3162_v20, 5  ;;  %v3074_v20 = vld [vmem:[#allocation2 + $0x48] sm:$0xf] }
 0x1ce   : > { %v2463_v49 = vpop.permute.xlu0 %2462  ;;  %v3161_v41 = vrot.slane %v3159_v19, 4 }
 0x1cf   : > { %2529 = vst.msk [vmem:[#allocation3 + $0x78] sm:$0xf] %vm2498_vm2, %v2463_v49  ;;  %v2465_v40 = vpop.permute.xlu1 %2464  ;;  %v3172_v49 = vshrl.u32 %v3069_v9, 16 }
 0x1d0   : > { %2530 = vst.msk [vmem:[#allocation3 + $0x7c] sm:$0xf] %vm2498_vm2, %v2465_v40  ;;  %2981 = vrot.lane.b32.xlu0 %v2893_v32, %s9625_s12  ;;  %v3133_v32 = vsel %vm9830_vm10, %v3128_v56, %v3132_v62  ;;  %v3165_v52 = vor.u32 %v3164_v38, %v3161_v41  ;;  %vm8281_vm2 = vcmask 1043456  }
 0x1d1   : > { %2983 = vrot.lane.b32.xlu1 %v2894_v36, %s9625_s12  ;;  %v4146_v36 = vsel %vm4144_vm5, %v4145_v28, 0  ;;  %v3174_v14 = vrot.slane %v3172_v49, 4  ;;  %v3207_v49 = vshrl.u32 %v3074_v20, 16  ;;  %vm8534_vm5 = vcmask 23552  }
 0x1d2   : > { %v2740_v26 = vpop.permute.xlu0 %2739  ;;  %v4148_v40 = vand.u32 %v9539_v24, %v4146_v36  ;;  %v3210_v36 = vshll.u32 %v3074_v20, 16  ;;  %v3636_v20 = vld [vmem:[#allocation2 + $0x4c] sm:$0xf] }
 0x1d3   : > { %2836 = vst.msk [vmem:[#allocation3] sm:$0xf] %vm2835_vm3, %v2740_v26  ;;  %v2742_v57 = vpop.permute.xlu1 %2741  ;;  %v3626_v26 = vld [vmem:[#allocation2 + $0x24] sm:$0xe] }
 0x1d4   : > { %2837 = vst.msk [vmem:[#allocation3 + $0x4] sm:$0xf] %vm2835_vm3, %v2742_v57  ;;  %2985 = vrot.lane.b32.xlu0 %v2895_v45, %s9625_s12  ;;  %v3183_v45 = vshrl.u32 %v3071_v22, 16  ;;  %9397 = vmatprep.subr.bf16.mxu0 %v4148_v40  ;;  %v10740_v57 = vrot.slane %v3168_v34, 5  ;;  %v9040_v33 = vrot.slane %v3626_v26, 9  ;;  %v3212_v58 = vrot.slane %v3210_v36, 5 }
 0x1d5   : > { %2987 = vrot.lane.b32.xlu1 %v2896_v50, %s9625_s12  ;;  %v3728_v50 = vrot.slane %v10727_v48, 5  ;;  %9398 = vmatpush3.bf16.msra.mxu0 %v4148_v40  ;;  %v3075_v22 = vld [vmem:[#allocation2 + $0x4c] sm:$0xf]  ;;  %v3629_v34 = vld [vmem:[#allocation2 + $0x30] sm:$0xe] }
 0x1d6   : > { %v2744_v2 = vpop.permute.xlu0 %2743  ;;  %9509 = vmatprep.subr.bf16.mxu1 %v4148_v40  ;;  %v3185_v3 = vrot.slane %v3183_v45, 4  ;;  %9399 = vmatprep.subr.bf16.mxu0 %v9540_v47  ;;  %v9041_v41 = vrot.slane %v3629_v34, 9  ;;  %v3081_v34 = vld [vmem:[#allocation2 + $0x64] sm:$0xf] }
 0x1d7   : > { %2838 = vst.msk [vmem:[#allocation3 + $0x8] sm:$0xf] %vm2835_vm3, %v2744_v2  ;;  %v2746_v6 = vpop.permute.xlu1 %2745  ;;  %9511 = vmatpush3.bf16.msra.mxu1 %v4148_v40  ;;  %v3722_v2 = vsel %vm10094_vm13, %v9039_v39, %v3721_v16  ;;  %v3730_v5 = vrot.slane %v3728_v50, 4  ;;  %v3729_v55 = vsel %vm10094_vm13, %v9040_v33, %v3728_v50  ;;  %v3631_v40 = vld [vmem:[#allocation2 + $0x38] sm:$0x1] }
 0x1d8   : > { %2839 = vst.msk [vmem:[#allocation3 + $0xc] sm:$0xf] %vm2835_vm3, %v2746_v6  ;;  %2989 = vrot.lane.b32.xlu0 %v2897_v63, %s9625_s12  ;;  %v3070_v63 = vld [vmem:[#allocation2 + $0x38] sm:$0x1]  ;;  %v3731_v6 = vrot.slane %v3628_v54, 5  ;;  %9510 = vmatprep.subr.bf16.mxu1 %v9540_v47  ;;  %v3189_v62 = vor.u32 %v3188_v4, %v3185_v3 }
 0x1d9   : > { %2991 = vrot.lane.b32.xlu1 %v2898_v43, %s9625_s12  ;;  %v3725_v43 = vsel %vm10094_vm13, %v3723_v31, %v3724_v44  ;;  %v3178_v1 = vshll.u32 %v3070_v63, 16  ;;  %9400 = vmatpush3.bf16.msra.mxu0 %v9540_v47  ;;  %v3216_v31 = vshll.u32 %v3075_v22, 16  ;;  %v3220_v44 = vshrl.u32 %v3075_v22, 16  ;;  %v3632_v63 = vld [vmem:[#allocation2 + $0x3c] sm:$0xe] }
 0x1da   : > { %v2748_v42 = vpop.permute.xlu0 %2747  ;;  %v3732_v16 = vsel %vm10094_vm13, %v3730_v5, %v3731_v6  ;;  %v3190_v24 = vrot.slane %v3189_v62, 4  ;;  %v3634_v4 = vld [vmem:[#allocation2 + $0x44] sm:$0x1]  ;;  %v3076_v33 = vld [vmem:[#allocation2 + $0x50] sm:$0x1] }
 0x1db   : > { %2840 = vst.msk [vmem:[#allocation3 + $0x10] sm:$0xf] %vm2835_vm3, %v2748_v42  ;;  %v2750_v13 = vpop.permute.xlu1 %2749  ;;  %v3198_v42 = vrot.slane %v3196_v59, 4  ;;  %9512 = vmatpush3.bf16.msra.mxu1 %v9540_v47  ;;  %v3180_v17 = vrot.slane %v3178_v1, 5  ;;  %v3742_v47 = vrot.slane %v3633_v25, 5  ;;  %v9042_v1 = vrot.slane %v3632_v63, 9 }
 0x1dc   : > { %2841 = vst.msk [vmem:[#allocation3 + $0x14] sm:$0xf] %vm2835_vm3, %v2750_v13  ;;  %2993 = vrot.lane.b32.xlu0 %v2899_v21, %s9625_s12  ;;  %v3073_v21 = vld [vmem:[#allocation2 + $0x44] sm:$0x1]  ;;  %v3166_v13 = vrot.slane %v3165_v52, 4  ;;  %v3195_v50 = vsel %vm9830_vm10, %v3190_v24, %v10754_v10 }
 0x1dd   : > { %2995 = vrot.lane.b32.xlu1 %v2900_v61, %s9625_s12  ;;  %v3175_v61 = vor.u32 %v3174_v14, %v10740_v57  ;;  %v3202_v12 = vshll.u32 %v3073_v21, 16  ;;  %v3199_v19 = vor.u32 %v3198_v42, %v10754_v10  ;;  %v3209_v14 = vrot.slane %v3207_v49, 4  ;;  %v3079_v42 = vld [vmem:[#allocation2 + $0x5c] sm:$0x1]  ;;  %v3638_v63 = vld [vmem:[#allocation2 + $0x54] sm:$0xe] }
 0x1de   : > { %v2752_v29 = vpop.permute.xlu0 %2751  ;;  %v3171_v48 = vsel %vm9830_vm10, %v3166_v13, %v10740_v57  ;;  %v3738_v57 = vrot.slane %v3631_v40, 5  ;;  %v3744_v62 = vrot.slane %v3742_v47, 4  ;;  %v3226_v13 = vshll.u32 %v3076_v33, 16 }
 0x1df   : > { %2842 = vst.msk [vmem:[#allocation3 + $0x18] sm:$0xf] %vm2835_vm3, %v2752_v29  ;;  %v2754_v11 = vpop.permute.xlu1 %2753  ;;  %v3176_v9 = vrot.slane %v3175_v61, 4  ;;  %v3204_v28 = vrot.slane %v3202_v12, 5  ;;  %v3735_v29 = vrot.slane %v10762_v15, 5  ;;  %v3200_v30 = vrot.slane %v3199_v19, 4 }
 0x1e0   : > { %2843 = vst.msk [vmem:[#allocation3 + $0x1c] sm:$0xf] %vm2835_vm3, %v2754_v11  ;;  %3494 = vrot.lane.b32.xlu0 %v3123_v18, %s9627_s15  ;;  %v3078_v11 = vld [vmem:[#allocation2 + $0x58] sm:$0xf]  ;;  %v3213_v10 = vor.u32 %v3212_v58, %v3209_v14  ;;  %v3745_v12 = vrot.slane %v3634_v4, 5 }
 0x1e1   : > { %3496 = vrot.lane.b32.xlu1 %v3133_v32, %s9627_s15  ;;  %v3077_v32 = vld [vmem:[#allocation2 + $0x54] sm:$0xf]  ;;  %v3181_v39 = vsel %vm9830_vm10, %v3176_v9, %v3180_v17  ;;  %v3240_v38 = vshll.u32 %v3078_v11, 16  ;;  %v3737_v54 = vrot.slane %v3735_v29, 4  ;;  %v3250_v9 = vshll.u32 %v3079_v42, 16 }
 0x1e2   : > { %v2756_v53 = vpop.permute.xlu0 %2755  ;;  %v3234_v26 = vshll.u32 %v3077_v32, 16  ;;  %v3743_v17 = vsel %vm10094_vm13, %v9042_v1, %v3742_v47  ;;  %v3214_v19 = vrot.slane %v3213_v10, 4  ;;  %v3746_v22 = vsel %vm10094_vm13, %v3744_v62, %v3745_v12  ;;  %v3640_v4 = vld [vmem:[#allocation2 + $0x5c] sm:$0x1] }
 0x1e3   : > { %2844 = vst.msk [vmem:[#allocation3 + $0x20] sm:$0xf] %vm2835_vm3, %v2756_v53  ;;  %v2758_v60 = vpop.permute.xlu1 %2757  ;;  %v3244_v53 = vshrl.u32 %v3078_v11, 16  ;;  %v10791_v52 = vrot.slane %v3240_v38, 5  ;;  %v3739_v61 = vsel %vm10094_vm13, %v3737_v54, %v3738_v57  ;;  %v3252_v36 = vrot.slane %v3250_v9, 5 }
 0x1e4   : > { %2845 = vst.msk [vmem:[#allocation3 + $0x24] sm:$0xf] %vm2835_vm3, %v2758_v60  ;;  %3498 = vrot.lane.b32.xlu0 %v3147_v37, %s9627_s15  ;;  %v3205_v60 = vsel %vm9830_vm10, %v3200_v30, %v3204_v28  ;;  %v3236_v6 = vrot.slane %v3234_v26, 5  ;;  %v3228_v28 = vrot.slane %v3226_v13, 5  ;;  %v3635_v11 = vld [vmem:[#allocation2 + $0x48] sm:$0xe] }
 0x1e5   : > { %3500 = vrot.lane.b32.xlu1 %v3157_v46, %s9627_s15  ;;  %v3231_v46 = vshrl.u32 %v3077_v32, 16  ;;  %v3246_v21 = vrot.slane %v3244_v53, 4  ;;  %v3637_v30 = vld [vmem:[#allocation2 + $0x50] sm:$0x1]  ;;  %v3264_v26 = vshll.u32 %v3081_v34, 16  ;;  %v9043_v53 = vrot.slane %v3635_v11, 9 }
 0x1e6   : > { %v2760_v7 = vpop.permute.xlu0 %2759  ;;  %v3084_v54 = vld [vmem:[#allocation2 + $0x70] sm:$0xf]  ;;  %v3752_v14 = vrot.slane %v3637_v30, 5  ;;  %v3759_v12 = vrot.slane %v3640_v4, 5  ;;  %v3085_v13 = vld [vmem:[#allocation2 + $0x74] sm:$0x1] }
 0x1e7   : > { %2846 = vst.msk [vmem:[#allocation3 + $0x28] sm:$0xf] %vm2835_vm3, %v2760_v7  ;;  %v2762_v56 = vpop.permute.xlu1 %2761  ;;  %v3233_v5 = vrot.slane %v3231_v46, 4  ;;  %v3736_v7 = vsel %vm10094_vm13, %v9041_v41, %v3735_v29  ;;  %v3080_v29 = vld [vmem:[#allocation2 + $0x60] sm:$0xf]  ;;  %v10826_v33 = vrot.slane %v3264_v26, 5 }
 0x1e8   : > { %2847 = vst.msk [vmem:[#allocation3 + $0x2c] sm:$0xf] %vm2835_vm3, %v2762_v56  ;;  %3831 = vrot.lane.b32.xlu0 %v3722_v2, %s9628_s18  ;;  %v10786_v2 = vrot.slane %v3216_v31, 5  ;;  %v3255_v40 = vshrl.u32 %v3080_v29, 16  ;;  %v3258_v31 = vshll.u32 %v3080_v29, 16 }
 0x1e9   : > { %3833 = vrot.lane.b32.xlu1 %v3725_v43, %s9628_s18  ;;  %v3222_v43 = vrot.slane %v3220_v44, 4  ;;  %v3083_v44 = vld [vmem:[#allocation2 + $0x6c] sm:$0xf]  ;;  %v3639_v46 = vld [vmem:[#allocation2 + $0x58] sm:$0xf] }
 0x1ea   : > { %v2764_v8 = vpop.permute.xlu0 %2763  ;;  %v3279_v58 = vshrl.u32 %v3083_v44, 16  ;;  %v3756_v47 = vrot.slane %v3639_v46, 5 }
 0x1eb   : > { %2848 = vst.msk [vmem:[#allocation3 + $0x30] sm:$0xf] %vm2835_vm3, %v2764_v8  ;;  %v2766_v18 = vpop.permute.xlu1 %2765  ;;  %v3237_v8 = vor.u32 %v3236_v6, %v3233_v5  ;;  %v3288_v6 = vshll.u32 %v3084_v54, 16 }
 0x1ec   : > { %2849 = vst.msk [vmem:[#allocation3 + $0x34] sm:$0xf] %vm2835_vm3, %v2766_v18  ;;  %3835 = vrot.lane.b32.xlu0 %v3729_v55, %s9628_s18  ;;  %v3223_v55 = vor.u32 %v3222_v43, %v10786_v2  ;;  %v3260_v43 = vrot.slane %v3258_v31, 5  ;;  %v3281_v10 = vrot.slane %v3279_v58, 4  ;;  %v3758_v62 = vrot.slane %v3756_v47, 4 }
 0x1ed   : > { %3837 = vrot.lane.b32.xlu1 %v3732_v16, %s9628_s18  ;;  %v3247_v16 = vor.u32 %v3246_v21, %v10791_v52  ;;  %v10837_v9 = vrot.slane %v3288_v6, 5  ;;  %v3089_v31 = vld [vmem:[#allocation2 + $0x84] sm:$0xf]  ;;  %v3645_v58 = vld [vmem:[#allocation2 + $0x70] sm:$0xf] }
 0x1ee   : > { %v2768_v37 = vpop.permute.xlu0 %2767  ;;  %v3224_v24 = vrot.slane %v3223_v55, 4 }
 0x1ef   : > { %2850 = vst.msk [vmem:[#allocation3 + $0x38] sm:$0xf] %vm2835_vm3, %v2768_v37  ;;  %v2770_v45 = vpop.permute.xlu1 %2769  ;;  %v3248_v49 = vrot.slane %v3247_v16, 4  ;;  %v3749_v37 = vrot.slane %v3636_v20, 5 }
 0x1f0   : > { %2851 = vst.msk [vmem:[#allocation3 + $0x3c] sm:$0xf] %vm2835_vm3, %v2770_v45  ;;  %3502 = vrot.lane.b32.xlu0 %v3171_v48, %s9627_s15  ;;  %v3238_v48 = vrot.slane %v3237_v8, 4  ;;  %v3229_v25 = vsel %vm9830_vm10, %v3224_v24, %v3228_v28  ;;  %v3642_v28 = vld [vmem:[#allocation2 + $0x64] sm:$0xf] }
 0x1f1   : > { %3504 = vrot.lane.b32.xlu1 %v3181_v39, %s9627_s15  ;;  %v3219_v39 = vsel %vm9830_vm10, %v3214_v19, %v10786_v2  ;;  %v3751_v57 = vrot.slane %v3749_v37, 4  ;;  %v3257_v2 = vrot.slane %v3255_v40, 4  ;;  %v3763_v40 = vrot.slane %v3642_v28, 5 }
 0x1f2   : > { %v2772_v59 = vpop.permute.xlu0 %2771  ;;  %v3243_v38 = vsel %vm9830_vm10, %v3238_v48, %v10791_v52  ;;  %v3292_v52 = vshrl.u32 %v3084_v54, 16 }
 0x1f3   : > { %2852 = vst.msk [vmem:[#allocation3 + $0x40] sm:$0xf] %vm2835_vm3, %v2772_v59  ;;  %v2774_v3 = vpop.permute.xlu1 %2773  ;;  %v3282_v59 = vshll.u32 %v3083_v44, 16  ;;  %v3753_v1 = vsel %vm10094_vm13, %v3751_v57, %v3752_v14  ;;  %v3261_v55 = vor.u32 %v3260_v43, %v3257_v2  ;;  %v3090_v57 = vld [vmem:[#allocation2 + $0x88] sm:$0xf]  ;;  %v3765_v2 = vrot.slane %v3763_v40, 4 }
 0x1f4   : > { %2853 = vst.msk [vmem:[#allocation3 + $0x44] sm:$0xf] %vm2835_vm3, %v2774_v3  ;;  %3506 = vrot.lane.b32.xlu0 %v3195_v50, %s9627_s15  ;;  %v3268_v50 = vshrl.u32 %v3081_v34, 16 }
 0x1f5   : > { %3508 = vrot.lane.b32.xlu1 %v3205_v60, %s9627_s15  ;;  %v3253_v60 = vsel %vm9830_vm10, %v3248_v49, %v3252_v36  ;;  %v3284_v42 = vrot.slane %v3282_v59, 5  ;;  %v3262_v24 = vrot.slane %v3261_v55, 4  ;;  %v3086_v36 = vld [vmem:[#allocation2 + $0x78] sm:$0xf]  ;;  %v3327_v59 = vshrl.u32 %v3089_v31, 16 }
 0x1f6   : > { %v2776_v56 = vpop.permute.xlu0 %2775  ;;  %v3270_v5 = vrot.slane %v3268_v50, 4  ;;  %v3303_v46 = vshrl.u32 %v3086_v36, 16  ;;  %v3306_v26 = vshll.u32 %v3086_v36, 16  ;;  %v3092_v36 = vld [vmem:[#allocation2 + $0x90] sm:$0xf] }
 0x1f7   : > { %2854 = vst.msk [vmem:[#allocation3 + $0x48] sm:$0xf] %vm2835_vm3, %v2776_v56  ;;  %v2778_v15 = vpop.permute.xlu1 %2777  ;;  %v9044_v56 = vrot.slane %v3638_v63, 9  ;;  %v3285_v20 = vor.u32 %v3284_v42, %v3281_v10  ;;  %v3267_v44 = vsel %vm9830_vm10, %v3262_v24, %v10826_v33  ;;  %v3646_v42 = vld [vmem:[#allocation2 + $0x74] sm:$0x1] }
 0x1f8   : > { %2855 = vst.msk [vmem:[#allocation3 + $0x4c] sm:$0xf] %vm2835_vm3, %v2778_v15  ;;  %3839 = vrot.lane.b32.xlu0 %v3736_v7, %s9628_s18  ;;  %v3082_v7 = vld [vmem:[#allocation2 + $0x68] sm:$0x1]  ;;  %v3271_v8 = vor.u32 %v3270_v5, %v10826_v33  ;;  %v3308_v4 = vrot.slane %v3306_v26, 5  ;;  %v3336_v33 = vshll.u32 %v3090_v57, 16 }
 0x1f9   : > { %3841 = vrot.lane.b32.xlu1 %v3739_v61, %s9628_s18  ;;  %v3750_v61 = vsel %vm10094_vm13, %v9043_v53, %v3749_v37  ;;  %v3274_v16 = vshll.u32 %v3082_v7, 16  ;;  %v3087_v37 = vld [vmem:[#allocation2 + $0x7c] sm:$0xf]  ;;  %v3340_v5 = vshrl.u32 %v3090_v57, 16  ;;  %v3770_v7 = vrot.slane %v3645_v58, 5 }
 0x1fa   : > { %v2780_v18 = vpop.permute.xlu0 %2779  ;;  %v3272_v48 = vrot.slane %v3271_v8, 4  ;;  %v3312_v53 = vshll.u32 %v3087_v37, 16  ;;  %v3316_v54 = vshrl.u32 %v3087_v37, 16  ;;  %v3091_v24 = vld [vmem:[#allocation2 + $0x8c] sm:$0x1]  ;;  %v3354_v26 = vshll.u32 %v3092_v36, 16 }
 0x1fb   : > { %2856 = vst.msk [vmem:[#allocation3 + $0x50] sm:$0xf] %vm2835_vm3, %v2780_v18  ;;  %v2782_v32 = vpop.permute.xlu1 %2781  ;;  %v3298_v18 = vshll.u32 %v3085_v13, 16  ;;  %v3276_v34 = vrot.slane %v3274_v16, 5  ;;  %v10876_v16 = vrot.slane %v3336_v33, 5 }
 0x1fc   : > { %2857 = vst.msk [vmem:[#allocation3 + $0x54] sm:$0xf] %vm2835_vm3, %v2782_v32  ;;  %3843 = vrot.lane.b32.xlu0 %v3743_v17, %s9628_s18  ;;  %v3294_v17 = vrot.slane %v3292_v52, 4  ;;  %v3760_v32 = vsel %vm10094_vm13, %v3758_v62, %v3759_v12  ;;  %v3329_v62 = vrot.slane %v3327_v59, 4  ;;  %v3649_v58 = vld [vmem:[#allocation2 + $0x80] sm:$0x1] }
 0x1fd   : > { %3845 = vrot.lane.b32.xlu1 %v3746_v22, %s9628_s18  ;;  %v3757_v22 = vsel %vm10094_vm13, %v9044_v56, %v3756_v47  ;;  %v3300_v30 = vrot.slane %v3298_v18, 5  ;;  %v3088_v56 = vld [vmem:[#allocation2 + $0x80] sm:$0x1]  ;;  %v3356_v33 = vrot.slane %v3354_v26, 5 }
 0x1fe   : > { %v2784_v45 = vpop.permute.xlu0 %2783  ;;  %v3295_v49 = vor.u32 %v3294_v17, %v10837_v9 }
 0x1ff   : > { %2858 = vst.msk [vmem:[#allocation3 + $0x58] sm:$0xf] %vm2835_vm3, %v2784_v45  ;;  %v2786_v41 = vpop.permute.xlu1 %2785  ;;  %v3641_v45 = vld [vmem:[#allocation2 + $0x60] sm:$0xe] }
 0x200   : > { %2859 = vst.msk [vmem:[#allocation3 + $0x5c] sm:$0xf] %vm2835_vm3, %v2786_v41  ;;  %3510 = vrot.lane.b32.xlu0 %v3219_v39, %s9627_s15  ;;  %v3286_v39 = vrot.slane %v3285_v20, 4  ;;  %v3277_v41 = vsel %vm9830_vm10, %v3272_v48, %v3276_v34  ;;  %v9045_v47 = vrot.slane %v3641_v45, 9  ;;  %v3773_v20 = vrot.slane %v3646_v42, 5 }
 0x201   : > { %3512 = vrot.lane.b32.xlu1 %v3229_v25, %s9627_s15  ;;  %v3643_v25 = vld [vmem:[#allocation2 + $0x68] sm:$0x1]  ;;  %v3093_v45 = vld [vmem:[#allocation2 + $0x94] sm:$0xf]  ;;  %v3650_v42 = vld [vmem:[#allocation2 + $0x84] sm:$0xe] }
 0x202   : > { %v2788_v3 = vpop.permute.xlu0 %2787  ;;  %v3291_v63 = vsel %vm9830_vm10, %v3286_v39, %v10837_v9  ;;  %v3766_v43 = vrot.slane %v3643_v25, 5  ;;  %v3764_v55 = vsel %vm10094_vm13, %v9045_v47, %v3763_v40  ;;  %v3342_v9 = vrot.slane %v3340_v5, 4  ;;  %v3648_v40 = vld [vmem:[#allocation2 + $0x7c] sm:$0xf]  ;;  %v3647_v25 = vld [vmem:[#allocation2 + $0x78] sm:$0xe] }
 0x203   : > { %2860 = vst.msk [vmem:[#allocation3 + $0x60] sm:$0xf] %vm2835_vm3, %v2788_v3  ;;  %v2790_v21 = vpop.permute.xlu1 %2789  ;;  %v3305_v3 = vrot.slane %v3303_v46, 4  ;;  %v3351_v46 = vshrl.u32 %v3092_v36, 16  ;;  %v3360_v59 = vshll.u32 %v3093_v45, 16 }
 0x204   : > { %2861 = vst.msk [vmem:[#allocation3 + $0x64] sm:$0xf] %vm2835_vm3, %v2790_v21  ;;  %3514 = vrot.lane.b32.xlu0 %v3243_v38, %s9627_s15  ;;  %v3296_v38 = vrot.slane %v3295_v49, 4  ;;  %v3644_v21 = vld [vmem:[#allocation2 + $0x6c] sm:$0xe]  ;;  %v3767_v13 = vsel %vm10094_vm13, %v3765_v2, %v3766_v43  ;;  %v3343_v34 = vor.u32 %v3342_v9, %v10876_v16  ;;  %v3346_v49 = vshll.u32 %v3091_v24, 16 }
 0x205   : > { %3516 = vrot.lane.b32.xlu1 %v3253_v60, %s9627_s15  ;;  %v3330_v60 = vshll.u32 %v3089_v31, 16  ;;  %v3309_v8 = vor.u32 %v3308_v4, %v3305_v3  ;;  %v9047_v43 = vrot.slane %v3647_v25, 9  ;;  %v3651_v3 = vld [vmem:[#allocation2 + $0x88] sm:$0xf]  ;;  %v3353_v4 = vrot.slane %v3351_v46, 4 }
 0x206   : > { %v2792_v15 = vpop.permute.xlu0 %2791  ;;  %v3301_v52 = vsel %vm9830_vm10, %v3296_v38, %v3300_v30  ;;  %v3348_v38 = vrot.slane %v3346_v49, 5  ;;  %v3098_v46 = vld [vmem:[#allocation2 + $0xa8] sm:$0xf] }
 0x207   : > { %2862 = vst.msk [vmem:[#allocation3 + $0x68] sm:$0xf] %vm2835_vm3, %v2792_v15  ;;  %v2794_v19 = vpop.permute.xlu1 %2793  ;;  %v3332_v12 = vrot.slane %v3330_v60, 5  ;;  %v9046_v15 = vrot.slane %v3644_v21, 9  ;;  %v3310_v48 = vrot.slane %v3309_v8, 4  ;;  %v3364_v60 = vshrl.u32 %v3093_v45, 16 }
 0x208   : > { %2863 = vst.msk [vmem:[#allocation3 + $0x6c] sm:$0xf] %vm2835_vm3, %v2794_v19  ;;  %3847 = vrot.lane.b32.xlu0 %v3750_v61, %s9628_s18  ;;  %v10866_v61 = vrot.slane %v3312_v53, 5  ;;  %v3772_v19 = vrot.slane %v3770_v7, 4  ;;  %v3777_v53 = vrot.slane %v3648_v40, 5  ;;  %v3780_v21 = vrot.slane %v3649_v58, 5 }
 0x209   : > { %3849 = vrot.lane.b32.xlu1 %v3753_v1, %s9628_s18  ;;  %v3318_v1 = vrot.slane %v3316_v54, 4  ;;  %v3095_v54 = vld [vmem:[#allocation2 + $0x9c] sm:$0xf]  ;;  %v10926_v40 = vld [vmem:[#allocation2 + $0x94] sm:$0xf] }
 0x20a   : > { %v2796_v29 = vpop.permute.xlu0 %2795  ;;  %v3774_v37 = vsel %vm10094_vm13, %v3772_v19, %v3773_v20  ;;  %v3375_v5 = vshrl.u32 %v3095_v54, 16  ;;  %v3778_v8 = vsel %vm10094_vm13, %v9047_v43, %v3777_v53  ;;  %v9048_v20 = vrot.slane %v3650_v42, 9  ;;  %v3655_v43 = vld [vmem:[#allocation2 + $0x98] sm:$0x1] }
 0x20b   : > { %2864 = vst.msk [vmem:[#allocation3 + $0x70] sm:$0xf] %vm2835_vm3, %v2796_v29  ;;  %v2798_v11 = vpop.permute.xlu1 %2797  ;;  %v3319_v18 = vor.u32 %v3318_v1, %v10866_v61  ;;  %v3333_v29 = vor.u32 %v3332_v12, %v3329_v62  ;;  %v10906_v62 = vrot.slane %v3360_v59, 5  ;;  %v3366_v12 = vrot.slane %v3364_v60, 4  ;;  %v3653_v59 = vld [vmem:[#allocation2 + $0x90] sm:$0xe] }
 0x20c   : > { %2865 = vst.msk [vmem:[#allocation3 + $0x74] sm:$0xf] %vm2835_vm3, %v2798_v11  ;;  %3851 = vrot.lane.b32.xlu0 %v3757_v22, %s9628_s18  ;;  %v3322_v22 = vshll.u32 %v3088_v56, 16  ;;  %v3784_v56 = vrot.slane %v3651_v3, 5  ;;  %v3377_v9 = vrot.slane %v3375_v5, 4  ;;  %v3399_v60 = vshrl.u32 %v3098_v46, 16 }
 0x20d   : > { %3853 = vrot.lane.b32.xlu1 %v3760_v32, %s9628_s18  ;;  %v3771_v32 = vsel %vm10094_vm13, %v9046_v15, %v3770_v7  ;;  %v3320_v39 = vrot.slane %v3319_v18, 4  ;;  %v3094_v15 = vld [vmem:[#allocation2 + $0x98] sm:$0x1]  ;;  %v3657_v3 = vld [vmem:[#allocation2 + $0xa0] sm:$0xf]  ;;  %v3794_v42 = vrot.slane %v3655_v43, 5 }
 0x20e   : > { %v2800_v50 = vpop.permute.xlu0 %2799  ;;  %v3324_v30 = vrot.slane %v3322_v22, 5  ;;  %v3663_v43 = vld [vmem:[#allocation2 + $0xb8] sm:$0xf] }
 0x20f   : > { %2866 = vst.msk [vmem:[#allocation3 + $0x78] sm:$0xf] %vm2835_vm3, %v2800_v50  ;;  %v2802_v14 = vpop.permute.xlu1 %2801  ;;  %v3315_v50 = vsel %vm9830_vm10, %v3310_v48, %v10866_v61  ;;  %v3370_v48 = vshll.u32 %v3094_v15, 16  ;;  %v3656_v15 = vld [vmem:[#allocation2 + $0x9c] sm:$0xe] }
 0x210   : > { %2867 = vst.msk [vmem:[#allocation3 + $0x7c] sm:$0xf] %vm2835_vm3, %v2802_v14  ;;  %3518 = vrot.lane.b32.xlu0 %v3267_v44, %s9627_s15  ;;  %v3334_v44 = vrot.slane %v3333_v29, 4  ;;  %v3325_v14 = vsel %vm9830_vm10, %v3320_v39, %v3324_v30  ;;  %vm8583_vm3 = vcmask 1040384  }
 0x211   : > { %3520 = vrot.lane.b32.xlu1 %v3277_v41, %s9627_s15  ;;  %v3344_v41 = vrot.slane %v3343_v34, 4  ;;  %v3097_v34 = vld [vmem:[#allocation2 + $0xa4] sm:$0x1]  ;;  %v3372_v25 = vrot.slane %v3370_v48, 5  ;;  %v9050_v48 = vrot.slane %v3656_v15, 9 }
 0x212   : > { %v2934_v6 = vpop.permute.xlu0 %2933  ;;  %v3339_v2 = vsel %vm9830_vm10, %v3334_v44, %v10876_v16  ;;  %v3357_v16 = vor.u32 %v3356_v33, %v3353_v4  ;;  %v3394_v30 = vshll.u32 %v3097_v34, 16 }
 0x213   : > { %3030 = vst.msk [vmem:[#allocation3] sm:$0xf] %vm3029_vm7, %v2934_v6  ;;  %v2936_v10 = vpop.permute.xlu1 %2935  ;;  %v3378_v6 = vshll.u32 %v3095_v54, 16  ;;  %v3101_v54 = vld [vmem:[#allocation2 + $0xb4] sm:$0xf] }
 0x214   : > { %3031 = vst.msk [vmem:[#allocation3 + $0x4] sm:$0xf] %vm3029_vm7, %v2936_v10  ;;  %3522 = vrot.lane.b32.xlu0 %v3291_v63, %s9627_s15  ;;  %v3096_v63 = vld [vmem:[#allocation2 + $0xa0] sm:$0xf]  ;;  %v3349_v10 = vsel %vm9830_vm10, %v3344_v41, %v3348_v38  ;;  %v3358_v36 = vrot.slane %v3357_v16, 4  ;;  %v3396_v58 = vrot.slane %v3394_v30, 5 }
 0x215   : > { %3524 = vrot.lane.b32.xlu1 %v3301_v52, %s9627_s15  ;;  %v3779_v52 = vrot.slane %v3777_v53, 4  ;;  %v3384_v7 = vshll.u32 %v3096_v63, 16  ;;  %v3388_v61 = vshrl.u32 %v3096_v63, 16  ;;  %v3791_v53 = vrot.slane %v10926_v40, 5 }
 0x216   : > { %v2938_v17 = vpop.permute.xlu0 %2937  ;;  %v3363_v41 = vsel %vm9830_vm10, %v3358_v36, %v10906_v62  ;;  %v3402_v63 = vshll.u32 %v3098_v46, 16  ;;  %v3660_v46 = vld [vmem:[#allocation2 + $0xac] sm:$0xf] }
 0x217   : > { %3032 = vst.msk [vmem:[#allocation3 + $0x8] sm:$0xf] %vm3029_vm7, %v2938_v17  ;;  %v2940_v28 = vpop.permute.xlu1 %2939  ;;  %v3380_v17 = vrot.slane %v3378_v6, 5  ;;  %v3781_v19 = vsel %vm10094_vm13, %v3779_v52, %v3780_v21  ;;  %v10916_v18 = vrot.slane %v3384_v7, 5  ;;  %v3390_v22 = vrot.slane %v3388_v61, 4 }
 0x218   : > { %3033 = vst.msk [vmem:[#allocation3 + $0xc] sm:$0xf] %vm3029_vm7, %v2940_v28  ;;  %3855 = vrot.lane.b32.xlu0 %v3764_v55, %s9628_s18  ;;  %v3786_v28 = vrot.slane %v3784_v56, 4  ;;  %v3423_v6 = vshrl.u32 %v3101_v54, 16  ;;  %v3426_v52 = vshll.u32 %v3101_v54, 16 }
 0x219   : > { %3857 = vrot.lane.b32.xlu1 %v3767_v13, %s9628_s18  ;;  %v3652_v13 = vld [vmem:[#allocation2 + $0x8c] sm:$0x1]  ;;  %v3391_v39 = vor.u32 %v3390_v22, %v10916_v18 }
 0x21a   : > { %v2942_v11 = vpop.permute.xlu0 %2941  ;;  %v3787_v29 = vrot.slane %v3652_v13, 5 }
 0x21b   : > { %3034 = vst.msk [vmem:[#allocation3 + $0x10] sm:$0xf] %vm3029_vm7, %v2942_v11  ;;  %v2944_v31 = vpop.permute.xlu1 %2943  ;;  %v3381_v11 = vor.u32 %v3380_v17, %v3377_v9 }
 0x21c   : > { %3035 = vst.msk [vmem:[#allocation3 + $0x14] sm:$0xf] %vm3029_vm7, %v2944_v31  ;;  %3859 = vrot.lane.b32.xlu0 %v3771_v32, %s9628_s18  ;;  %v3367_v32 = vor.u32 %v3366_v12, %v10906_v62  ;;  %v3788_v44 = vsel %vm10094_vm13, %v3786_v28, %v3787_v29  ;;  %v3401_v62 = vrot.slane %v3399_v60, 4  ;;  %v3404_v12 = vrot.slane %v3402_v63, 5  ;;  %v3103_v28 = vld [vmem:[#allocation2 + $0xbc] sm:$0x1] }
 0x21d   : > { %3861 = vrot.lane.b32.xlu1 %v3774_v37, %s9628_s18  ;;  %v3785_v37 = vsel %vm10094_vm13, %v9048_v20, %v3784_v56  ;;  %v3382_v38 = vrot.slane %v3381_v11, 4  ;;  %v3798_v56 = vrot.slane %v3657_v3, 5  ;;  %v3425_v20 = vrot.slane %v3423_v6, 4  ;;  %v3659_v60 = vld [vmem:[#allocation2 + $0xa8] sm:$0xe] }
 0x21e   : > { %v2946_v57 = vpop.permute.xlu0 %2945  ;;  %v3368_v45 = vrot.slane %v3367_v32, 4  ;;  %v3405_v34 = vor.u32 %v3404_v12, %v3401_v62  ;;  %v3805_v63 = vrot.slane %v3660_v46, 5  ;;  %v3812_v12 = vrot.slane %v3663_v43, 5 }
 0x21f   : > { %3036 = vst.msk [vmem:[#allocation3 + $0x18] sm:$0xf] %vm3029_vm7, %v2946_v57  ;;  %v2948_v47 = vpop.permute.xlu1 %2947  ;;  %v3102_v57 = vld [vmem:[#allocation2 + $0xb8] sm:$0xf]  ;;  %v3387_v61 = vsel %vm9830_vm10, %v3382_v38, %v10916_v18  ;;  %v3428_v18 = vrot.slane %v3426_v52, 5  ;;  %v3800_v36 = vrot.slane %v3798_v56, 4 }
 0x220   : > { %3037 = vst.msk [vmem:[#allocation3 + $0x1c] sm:$0xf] %vm3029_vm7, %v2948_v47  ;;  %3526 = vrot.lane.b32.xlu0 %v3315_v50, %s9627_s15  ;;  %v3099_v50 = vld [vmem:[#allocation2 + $0xac] sm:$0xf]  ;;  %v3432_v21 = vshll.u32 %v3102_v57, 16  ;;  %v3436_v7 = vshrl.u32 %v3102_v57, 16 }
 0x221   : > { %3528 = vrot.lane.b32.xlu1 %v3325_v14, %s9627_s15  ;;  %v3392_v14 = vrot.slane %v3391_v39, 4  ;;  %v3408_v4 = vshll.u32 %v3099_v50, 16  ;;  %v3412_v33 = vshrl.u32 %v3099_v50, 16  ;;  %v3429_v40 = vor.u32 %v3428_v18, %v3425_v20 }
 0x222   : > { %v2950_v1 = vpop.permute.xlu0 %2949  ;;  %v10952_v22 = vrot.slane %v3432_v21, 5  ;;  %v3107_v21 = vld [vmem:[#allocation2 + $0xcc] sm:$0xf] }
 0x223   : > { %3038 = vst.msk [vmem:[#allocation3 + $0x20] sm:$0xf] %vm3029_vm7, %v2950_v1  ;;  %v2952_v55 = vpop.permute.xlu1 %2951  ;;  %v9049_v1 = vrot.slane %v3653_v59, 9  ;;  %v3397_v13 = vsel %vm9830_vm10, %v3392_v14, %v3396_v58  ;;  %v10949_v16 = vrot.slane %v3408_v4, 5  ;;  %v3414_v9 = vrot.slane %v3412_v33, 4 }
 0x224   : > { %3039 = vst.msk [vmem:[#allocation3 + $0x24] sm:$0xf] %vm3029_vm7, %v2952_v55  ;;  %3530 = vrot.lane.b32.xlu0 %v3339_v2, %s9627_s15  ;;  %v3373_v2 = vsel %vm9830_vm10, %v3368_v45, %v3372_v25  ;;  %v3799_v45 = vsel %vm10094_vm13, %v9050_v48, %v3798_v56  ;;  %v3406_v25 = vrot.slane %v3405_v34, 4  ;;  %v3430_v57 = vrot.slane %v3429_v40, 4  ;;  %v3105_v59 = vld [vmem:[#allocation2 + $0xc4] sm:$0xf] }
 0x225   : > { %3532 = vrot.lane.b32.xlu1 %v3349_v10, %s9627_s15  ;;  %v3793_v10 = vrot.slane %v3791_v53, 4  ;;  %v3792_v29 = vsel %vm10094_vm13, %v9049_v1, %v3791_v53  ;;  %v3104_v53 = vld [vmem:[#allocation2 + $0xc0] sm:$0xf]  ;;  %v3456_v6 = vshll.u32 %v3105_v59, 16  ;;  %v3460_v52 = vshrl.u32 %v3105_v59, 16 }
 0x226   : > { %v2954_v24 = vpop.permute.xlu0 %2953  ;;  %v3447_v3 = vshrl.u32 %v3104_v53, 16  ;;  %v3450_v4 = vshll.u32 %v3104_v53, 16  ;;  %v3807_v56 = vrot.slane %v3805_v63, 4  ;;  %v3814_v34 = vrot.slane %v3812_v12, 4  ;;  %v3666_v59 = vld [vmem:[#allocation2 + $0xc4] sm:$0xf] }
 0x227   : > { %3040 = vst.msk [vmem:[#allocation3 + $0x28] sm:$0xf] %vm3029_vm7, %v2954_v24  ;;  %v2956_v49 = vpop.permute.xlu1 %2955  ;;  %v3438_v24 = vrot.slane %v3436_v7, 4  ;;  %v3795_v32 = vsel %vm10094_vm13, %v3793_v10, %v3794_v42  ;;  %v3108_v10 = vld [vmem:[#allocation2 + $0xd0] sm:$0xf]  ;;  %v9051_v42 = vrot.slane %v3659_v60, 9 }
 0x228   : > { %3041 = vst.msk [vmem:[#allocation3 + $0x2c] sm:$0xf] %vm3029_vm7, %v2956_v49  ;;  %3863 = vrot.lane.b32.xlu0 %v3778_v8, %s9628_s18  ;;  %v3658_v8 = vld [vmem:[#allocation2 + $0xa4] sm:$0x1]  ;;  %v3452_v15 = vrot.slane %v3450_v4, 5  ;;  %v3462_v20 = vrot.slane %v3460_v52, 4 }
 0x229   : > { %3865 = vrot.lane.b32.xlu1 %v3781_v19, %s9628_s18  ;;  %v3100_v19 = vld [vmem:[#allocation2 + $0xb0] sm:$0x1]  ;;  %v3801_v11 = vrot.slane %v3658_v8, 5  ;;  %v3471_v8 = vshrl.u32 %v3107_v21, 16  ;;  %v3480_v18 = vshll.u32 %v3108_v10, 16 }
 0x22a   : > { %v2958_v31 = vpop.permute.xlu0 %2957  ;;  %v3418_v39 = vshll.u32 %v3100_v19, 16  ;;  %v3458_v19 = vrot.slane %v3456_v6, 5  ;;  %v3665_v4 = vld [vmem:[#allocation2 + $0xc0] sm:$0xe]  ;;  %v3667_v6 = vld [vmem:[#allocation2 + $0xc8] sm:$0x1] }
 0x22b   : > { %3042 = vst.msk [vmem:[#allocation3 + $0x30] sm:$0xf] %vm3029_vm7, %v2958_v31  ;;  %v2960_v26 = vpop.permute.xlu1 %2959  ;;  %v3439_v31 = vor.u32 %v3438_v24, %v10952_v22  ;;  %v3802_v50 = vsel %vm10094_vm13, %v3800_v36, %v3801_v11  ;;  %v3473_v11 = vrot.slane %v3471_v8, 4  ;;  %v3669_v52 = vld [vmem:[#allocation2 + $0xd0] sm:$0xf] }
 0x22c   : > { %3043 = vst.msk [vmem:[#allocation3 + $0x34] sm:$0xf] %vm3029_vm7, %v2960_v26  ;;  %3867 = vrot.lane.b32.xlu0 %v3785_v37, %s9628_s18  ;;  %v3415_v37 = vor.u32 %v3414_v9, %v10949_v16  ;;  %v3420_v38 = vrot.slane %v3418_v39, 5 }
 0x22d   : > { %3869 = vrot.lane.b32.xlu1 %v3788_v44, %s9628_s18  ;;  %v3442_v44 = vshll.u32 %v3103_v28, 16  ;;  %v3440_v14 = vrot.slane %v3439_v31, 4  ;;  %v3106_v28 = vld [vmem:[#allocation2 + $0xc8] sm:$0x1]  ;;  %v3482_v31 = vrot.slane %v3480_v18, 5 }
 0x22e   : > { %v2962_v47 = vpop.permute.xlu0 %2961  ;;  %v3466_v40 = vshll.u32 %v3106_v28, 16 }
 0x22f   : > { %3044 = vst.msk [vmem:[#allocation3 + $0x38] sm:$0xf] %vm3029_vm7, %v2962_v47  ;;  %v2964_v5 = vpop.permute.xlu1 %2963  ;;  %v3444_v58 = vrot.slane %v3442_v44, 5  ;;  %v3411_v47 = vsel %vm9830_vm10, %v3406_v25, %v10949_v16  ;;  %v3474_v16 = vshll.u32 %v3107_v21, 16  ;;  %v3109_v25 = vld [vmem:[#allocation2 + $0xd4] sm:$0x1] }
 0x230   : > { %3045 = vst.msk [vmem:[#allocation3 + $0x3c] sm:$0xf] %vm3029_vm7, %v2964_v5  ;;  %3534 = vrot.lane.b32.xlu0 %v3363_v41, %s9627_s15  ;;  %v3416_v41 = vrot.slane %v3415_v37, 4 }
 0x231   : > { %3536 = vrot.lane.b32.xlu1 %v3373_v2, %s9627_s15  ;;  %v3661_v2 = vld [vmem:[#allocation2 + $0xb0] sm:$0x1]  ;;  %v3445_v1 = vsel %vm9830_vm10, %v3440_v14, %v3444_v58  ;;  %v3476_v37 = vrot.slane %v3474_v16, 5  ;;  %v3490_v14 = vshll.u32 %v3109_v25, 16 }
 0x232   : > { %v2966_v55 = vpop.permute.xlu0 %2965  ;;  %v3421_v5 = vsel %vm9830_vm10, %v3416_v41, %v3420_v38  ;;  %v3808_v62 = vrot.slane %v3661_v2, 5 }
 0x233   : > { %3046 = vst.msk [vmem:[#allocation3 + $0x40] sm:$0xf] %vm3029_vm7, %v2966_v55  ;;  %v2968_v17 = vpop.permute.xlu1 %2967  ;;  %v3662_v55 = vld [vmem:[#allocation2 + $0xb4] sm:$0xe]  ;;  %v3477_v41 = vor.u32 %v3476_v37, %v3473_v11 }
 0x234   : > { %3047 = vst.msk [vmem:[#allocation3 + $0x44] sm:$0xf] %vm3029_vm7, %v2968_v17  ;;  %3538 = vrot.lane.b32.xlu0 %v3387_v61, %s9627_s15  ;;  %v3435_v61 = vsel %vm9830_vm10, %v3430_v57, %v10952_v22  ;;  %v3664_v17 = vld [vmem:[#allocation2 + $0xbc] sm:$0x1]  ;;  %v3484_v22 = vshrl.u32 %v3108_v10, 16  ;;  %v9052_v48 = vrot.slane %v3662_v55, 9 }
 0x235   : > { %3540 = vrot.lane.b32.xlu1 %v3397_v13, %s9627_s15  ;;  %v3449_v13 = vrot.slane %v3447_v3, 4  ;;  %v3492_v3 = vrot.slane %v3490_v14, 5  ;;  %v3670_v55 = vld [vmem:[#allocation2 + $0xd4] sm:$0x1] }
 0x236   : > { %v2970_v49 = vpop.permute.xlu0 %2969  ;;  %v3486_v44 = vrot.slane %v3484_v22, 4  ;;  %v3813_v46 = vsel %vm10094_vm13, %v9052_v48, %v3812_v12 }
 0x237   : > { %3048 = vst.msk [vmem:[#allocation3 + $0x48] sm:$0xf] %vm3029_vm7, %v2970_v49  ;;  %v2972_v30 = vpop.permute.xlu1 %2971  ;;  %v3815_v49 = vrot.slane %v3664_v17, 5  ;;  %v3453_v36 = vor.u32 %v3452_v15, %v3449_v13  ;;  %v3829_v17 = vrot.slane %v3670_v55, 5 }
 0x238   : > { %3049 = vst.msk [vmem:[#allocation3 + $0x4c] sm:$0xf] %vm3029_vm7, %v2972_v30  ;;  %3871 = vrot.lane.b32.xlu0 %v3792_v29, %s9628_s18  ;;  %v3806_v29 = vsel %vm10094_vm13, %v9051_v42, %v3805_v63  ;;  %v3463_v30 = vor.u32 %v3462_v20, %v3458_v19  ;;  %v3487_v57 = vor.u32 %v3486_v44, %v3482_v31  ;;  %v3478_v63 = vrot.slane %v3477_v41, 4 }
 0x239   : > { %3873 = vrot.lane.b32.xlu1 %v3795_v32, %s9628_s18  ;;  %v3809_v32 = vsel %vm10094_vm13, %v3807_v56, %v3808_v62  ;;  %v3822_v42 = vrot.slane %v3667_v6, 5  ;;  %v3668_v56 = vld [vmem:[#allocation2 + $0xcc] sm:$0xe]  ;;  %v3826_v62 = vrot.slane %v3669_v52, 5 }
 0x23a   : > { %v2974_v26 = vpop.permute.xlu0 %2973  ;;  %v3464_v53 = vrot.slane %v3463_v30, 4  ;;  %v3488_v43 = vrot.slane %v3487_v57, 4  ;;  %v3483_v21 = vsel %vm9830_vm10, %v3478_v63, %v3482_v31  ;;  %v9054_v15 = vrot.slane %v3668_v56, 9 }
 0x23b   : > { %3050 = vst.msk [vmem:[#allocation3 + $0x50] sm:$0xf] %vm3029_vm7, %v2974_v26  ;;  %v2976_v54 = vpop.permute.xlu1 %2975  ;;  %v3816_v26 = vsel %vm10094_vm13, %v3814_v34, %v3815_v49 }
 0x23c   : > { %3051 = vst.msk [vmem:[#allocation3 + $0x54] sm:$0xf] %vm3029_vm7, %v2976_v54  ;;  %3875 = vrot.lane.b32.xlu0 %v3799_v45, %s9628_s18  ;;  %v3468_v54 = vrot.slane %v3466_v40, 5  ;;  %v3827_v20 = vsel %vm10094_vm13, %v9054_v15, %v3826_v62 }
 0x23d   : > { %3877 = vrot.lane.b32.xlu1 %v3802_v50, %s9628_s18  ;;  %v3454_v50 = vrot.slane %v3453_v36, 4 }
 0x23e   : > { %v2978_v33 = vpop.permute.xlu0 %2977  ;;  %v3469_v2 = vsel %vm9830_vm10, %v3464_v53, %v3468_v54 }
 0x23f   : > { %3052 = vst.msk [vmem:[#allocation3 + $0x58] sm:$0xf] %vm3029_vm7, %v2978_v33  ;;  %v2980_v7 = vpop.permute.xlu1 %2979  ;;  %v3459_v60 = vsel %vm9830_vm10, %v3454_v50, %v3458_v19  ;;  %v3819_v33 = vrot.slane %v3666_v59, 5 }
 0x240   : > { %3053 = vst.msk [vmem:[#allocation3 + $0x5c] sm:$0xf] %vm3029_vm7, %v2980_v7  ;;  %3542 = vrot.lane.b32.xlu0 %v3411_v47, %s9627_s15  ;;  %v9053_v7 = vrot.slane %v3665_v4, 9 }
 0x241   : > { %3544 = vrot.lane.b32.xlu1 %v3421_v5, %s9627_s15  ;;  %v3821_v10 = vrot.slane %v3819_v33, 4 }
 0x242   : > { %v2982_v9 = vpop.permute.xlu0 %2981  ;;  %v3820_v13 = vsel %vm10094_vm13, %v9053_v7, %v3819_v33 }
 0x243   : > { %3054 = vst.msk [vmem:[#allocation3 + $0x60] sm:$0xf] %vm3029_vm7, %v2982_v9  ;;  %v2984_v24 = vpop.permute.xlu1 %2983  ;;  %v3823_v16 = vsel %vm10094_vm13, %v3821_v10, %v3822_v42  ;;  %v3828_v9 = vrot.slane %v3826_v62, 4 }
 0x244   : > { %3055 = vst.msk [vmem:[#allocation3 + $0x64] sm:$0xf] %vm3029_vm7, %v2984_v24  ;;  %3546 = vrot.lane.b32.xlu0 %v3435_v61, %s9627_s15 }
 0x245   : > { %3548 = vrot.lane.b32.xlu1 %v3445_v1, %s9627_s15  ;;  %v3493_v1 = vsel %vm9830_vm10, %v3488_v43, %v3492_v3  ;;  %v3830_v22 = vsel %vm10094_vm13, %v3828_v9, %v3829_v17 }
 0x246   : > { %v2986_v39 = vpop.permute.xlu0 %2985 }
 0x247   : > { %3056 = vst.msk [vmem:[#allocation3 + $0x68] sm:$0xf] %vm3029_vm7, %v2986_v39  ;;  %v2988_v45 = vpop.permute.xlu1 %2987 }
 0x248   : > { %3057 = vst.msk [vmem:[#allocation3 + $0x6c] sm:$0xf] %vm3029_vm7, %v2988_v45  ;;  %3879 = vrot.lane.b32.xlu0 %v3806_v29, %s9628_s18 }
 0x249   : > { %3881 = vrot.lane.b32.xlu1 %v3809_v32, %s9628_s18 }
 0x24a   : > { %v2990_v38 = vpop.permute.xlu0 %2989 }
 0x24b   : > { %3058 = vst.msk [vmem:[#allocation3 + $0x70] sm:$0xf] %vm3029_vm7, %v2990_v38  ;;  %v2992_v58 = vpop.permute.xlu1 %2991 }
 0x24c   : > { %3059 = vst.msk [vmem:[#allocation3 + $0x74] sm:$0xf] %vm3029_vm7, %v2992_v58  ;;  %3883 = vrot.lane.b32.xlu0 %v3813_v46, %s9628_s18 }
 0x24d   : > { %3885 = vrot.lane.b32.xlu1 %v3816_v26, %s9628_s18 }
 0x24e   : > { %v2994_v47 = vpop.permute.xlu0 %2993 }
 0x24f   : > { %3060 = vst.msk [vmem:[#allocation3 + $0x78] sm:$0xf] %vm3029_vm7, %v2994_v47  ;;  %v2996_v5 = vpop.permute.xlu1 %2995 }
 0x250   : > { %3061 = vst.msk [vmem:[#allocation3 + $0x7c] sm:$0xf] %vm3029_vm7, %v2996_v5  ;;  %3550 = vrot.lane.b32.xlu0 %v3459_v60, %s9627_s15  ;;  %vm6054_vm7 = vcmask 257216  }
 0x251   : > { %3552 = vrot.lane.b32.xlu1 %v3469_v2, %s9627_s15 }
 0x252   : > { %v3495_v61 = vpop.permute.xlu0 %3494 }
 0x253   : > { %3591 = vst.msk [vmem:[#allocation3] sm:$0xf] %vm3590_vm9, %v3495_v61  ;;  %v3497_v12 = vpop.permute.xlu1 %3496 }
 0x254   : > { %3592 = vst.msk [vmem:[#allocation3 + $0x4] sm:$0xf] %vm3590_vm9, %v3497_v12  ;;  %3554 = vrot.lane.b32.xlu0 %v3483_v21, %s9627_s15 }
 0x255   : > { %3556 = vrot.lane.b32.xlu1 %v3493_v1, %s9627_s15  ;;  %s9634_s15 = smov 56  }
 0x256   : > { %v3499_v8 = vpop.permute.xlu0 %3498 }
 0x257   : > { %3593 = vst.msk [vmem:[#allocation3 + $0x8] sm:$0xf] %vm3590_vm9, %v3499_v8  ;;  %v3501_v19 = vpop.permute.xlu1 %3500 }
 0x258   : > { %3594 = vst.msk [vmem:[#allocation3 + $0xc] sm:$0xf] %vm3590_vm9, %v3501_v19  ;;  %3887 = vrot.lane.b32.xlu0 %v3820_v13, %s9628_s18 }
 0x259   : > { %3889 = vrot.lane.b32.xlu1 %v3823_v16, %s9628_s18 }
 0x25a   : > { %v3832_v18 = vpop.permute.xlu0 %3831 }
 0x25b   : > { %3928 = vst.msk [vmem:[#allocation3] sm:$0xf] %vm3927_vm11, %v3832_v18  ;;  %v3834_v24 = vpop.permute.xlu1 %3833 }
 0x25c   : > { %3929 = vst.msk [vmem:[#allocation3 + $0x4] sm:$0xf] %vm3927_vm11, %v3834_v24  ;;  %3891 = vrot.lane.b32.xlu0 %v3827_v20, %s9628_s18 }
 0x25d   : > { %3893 = vrot.lane.b32.xlu1 %v3830_v22, %s9628_s18 }
 0x25e   : > { %v3836_v28 = vpop.permute.xlu0 %3835 }
 0x25f   : > { %3930 = vst.msk [vmem:[#allocation3 + $0x8] sm:$0xf] %vm3927_vm11, %v3836_v28  ;;  %v3838_v29 = vpop.permute.xlu1 %3837  ;;  %v4996_v28 = vld [vmem:[#allocation4] sm:$0xf] }
 0x260   : > { %3931 = vst.msk [vmem:[#allocation3 + $0xc] sm:$0xf] %vm3927_vm11, %v3838_v29 }
 0x262   : > { %v3503_v32 = vpop.permute.xlu0 %3502 }
 0x263   : > { %3595 = vst.msk [vmem:[#allocation3 + $0x10] sm:$0xf] %vm3590_vm9, %v3503_v32  ;;  %v3505_v48 = vpop.permute.xlu1 %3504  ;;  %v9541_v34 = vld [vmem:[#allocation3] sm:$0xff]   ;;  %v5045_v32 = vshrl.u32 %v4996_v28, 16 }
 0x264   : > { %3596 = vst.msk [vmem:[#allocation3 + $0x14] sm:$0xf] %vm3590_vm9, %v3505_v48  ;;  %9401 = vmatprep.mubr.msk.bf16.mxu0 %vm4094_vm12, %v9541_v34  ;;  %v5048_v48 = vshll.u32 %v4996_v28, 16 }
 0x266   : > { %v3507_v49 = vpop.permute.xlu0 %3506 }
 0x267   : > { %3597 = vst.msk [vmem:[#allocation3 + $0x18] sm:$0xf] %vm3590_vm9, %v3507_v49  ;;  %v3509_v36 = vpop.permute.xlu1 %3508  ;;  %v9542_v11 = vld [vmem:[#allocation3 + $0x8] sm:$0xff]   ;;  %v5047_v49 = vrot.slane %v5045_v32, 4 }
 0x268   : > { %3598 = vst.msk [vmem:[#allocation3 + $0x1c] sm:$0xf] %vm3590_vm9, %v3509_v36  ;;  %9402 = vmatmul.mubr.msk.bf16.vlgmr.msra.gmra.mxu0 %vm4094_vm12, %v9542_v11  ;;  %v5050_v36 = vrot.slane %v5048_v48, 5  ;;  %v4997_v11 = vld [vmem:[#allocation4 + $0x4] sm:$0xf] }
 0x26a   : > { %v3840_v37 = vpop.permute.xlu0 %3839 }
 0x26b   : > { %3932 = vst.msk [vmem:[#allocation3 + $0x10] sm:$0xf] %vm3927_vm11, %v3840_v37  ;;  %v3842_v39 = vpop.permute.xlu1 %3841 }
 0x26c   : > { %3933 = vst.msk [vmem:[#allocation3 + $0x14] sm:$0xf] %vm3927_vm11, %v3842_v39  ;;  %v5051_v39 = vor.u32 %v5050_v36, %v5047_v49  ;;  %v4831_v36 = vld [vmem:[#allocation4 + $0x20] sm:$0x1] }
 0x26e   : > { %v3844_v30 = vpop.permute.xlu0 %3843 }
 0x26f   : > { %3934 = vst.msk [vmem:[#allocation3 + $0x18] sm:$0xf] %vm3927_vm11, %v3844_v30  ;;  %v3846_v40 = vpop.permute.xlu1 %3845  ;;  %v5054_v30 = vshll.u32 %v4997_v11, 16 }
 0x270   : > { %3935 = vst.msk [vmem:[#allocation3 + $0x1c] sm:$0xf] %vm3927_vm11, %v3846_v40  ;;  %v5058_v40 = vshrl.u32 %v4997_v11, 16 }
 0x272   : > { %v3511_v31 = vpop.permute.xlu0 %3510 }
 0x273   : > { %3599 = vst.msk [vmem:[#allocation3 + $0x20] sm:$0xf] %vm3590_vm9, %v3511_v31  ;;  %v3513_v44 = vpop.permute.xlu1 %3512  ;;  %v9543_v45 = vld [vmem:[#allocation3 + $0x10] sm:$0xff]  }
 0x274   : > { %3600 = vst.msk [vmem:[#allocation3 + $0x24] sm:$0xf] %vm3590_vm9, %v3513_v44  ;;  %9405 = vmatprep.mubr.msk.bf16.mxu0 %vm4094_vm12, %v9543_v45  ;;  %v5052_v45 = vrot.slane %v5051_v39, 4 }
 0x276   : > { %v3515_v25 = vpop.permute.xlu0 %3514 }
 0x277   : > { %3601 = vst.msk [vmem:[#allocation3 + $0x28] sm:$0xf] %vm3590_vm9, %v3515_v25  ;;  %v3517_v46 = vpop.permute.xlu1 %3516  ;;  %v9544_v26 = vld [vmem:[#allocation3 + $0x18] sm:$0xff]   ;;  %v5056_v25 = vrot.slane %v5054_v30, 5 }
 0x278   : > { %3602 = vst.msk [vmem:[#allocation3 + $0x2c] sm:$0xf] %vm3590_vm9, %v3517_v46  ;;  %9406 = vmatmul.mubr.msk.bf16.gmra.mxu0 %vm4094_vm12, %v9544_v26  ;;  %v5060_v46 = vrot.slane %v5058_v40, 4  ;;  %v4998_v26 = vld [vmem:[#allocation4 + $0x8] sm:$0x1] }
 0x27a   : > { %v3848_v50 = vpop.permute.xlu0 %3847 }
 0x27b   : > { %3936 = vst.msk [vmem:[#allocation3 + $0x20] sm:$0xf] %vm3927_vm11, %v3848_v50  ;;  %v3850_v41 = vpop.permute.xlu1 %3849 }
 0x27c   : > { %3937 = vst.msk [vmem:[#allocation3 + $0x24] sm:$0xf] %vm3927_vm11, %v3850_v41  ;;  %v5057_v41 = vsel %vm9830_vm10, %v5052_v45, %v5056_v25 }
 0x27d   : > { %5428 = vrot.lane.b32.xlu0 %v5057_v41, %s9629_s19 }
 0x27e   : > { %v3852_v38 = vpop.permute.xlu0 %3851 }
 0x27f   : > { %3938 = vst.msk [vmem:[#allocation3 + $0x28] sm:$0xf] %vm3927_vm11, %v3852_v38  ;;  %v3854_v53 = vpop.permute.xlu1 %3853  ;;  %v5061_v38 = vor.u32 %v5060_v46, %v5056_v25 }
 0x280   : > { %3939 = vst.msk [vmem:[#allocation3 + $0x2c] sm:$0xf] %vm3927_vm11, %v3854_v53  ;;  %v5064_v53 = vshll.u32 %v4998_v26, 16  ;;  %v4824_v26 = vld [vmem:[#allocation4 + $0x14] sm:$0x1] }
 0x282   : > { %v3519_v54 = vpop.permute.xlu0 %3518 }
 0x283   : > { %3603 = vst.msk [vmem:[#allocation3 + $0x30] sm:$0xf] %vm3590_vm9, %v3519_v54  ;;  %v3521_v57 = vpop.permute.xlu1 %3520  ;;  %v9545_v14 = vld [vmem:[#allocation3 + $0x20] sm:$0xff]  }
 0x284   : > { %3604 = vst.msk [vmem:[#allocation3 + $0x34] sm:$0xf] %vm3590_vm9, %v3521_v57  ;;  %9409 = vmatprep.mubr.msk.bf16.mxu0 %vm4094_vm12, %v9545_v14  ;;  %v5062_v14 = vrot.slane %v5061_v38, 4 }
 0x286   : > { %v3523_v58 = vpop.permute.xlu0 %3522 }
 0x287   : > { %3605 = vst.msk [vmem:[#allocation3 + $0x38] sm:$0xf] %vm3590_vm9, %v3523_v58  ;;  %v3525_v59 = vpop.permute.xlu1 %3524  ;;  %v9546_v60 = vld [vmem:[#allocation3 + $0x28] sm:$0xff]   ;;  %v5066_v58 = vrot.slane %v5064_v53, 5 }
 0x288   : > { %3606 = vst.msk [vmem:[#allocation3 + $0x3c] sm:$0xf] %vm3590_vm9, %v3525_v59  ;;  %9410 = vmatmul.mubr.msk.bf16.gmra.mxu0 %vm4094_vm12, %v9546_v60 }
 0x289   : > { %v5067_v60 = vsel %vm9830_vm10, %v5062_v14, %v5066_v58 }
 0x28a   : > { %v3856_v63 = vpop.permute.xlu0 %3855  ;;  %5430 = vrot.lane.b32.xlu1 %v5067_v60, %s9629_s19 }
 0x28b   : > { %3940 = vst.msk [vmem:[#allocation3 + $0x30] sm:$0xf] %vm3927_vm11, %v3856_v63  ;;  %v3858_v47 = vpop.permute.xlu1 %3857 }
 0x28c   : > { %3941 = vst.msk [vmem:[#allocation3 + $0x34] sm:$0xf] %vm3927_vm11, %v3858_v47 }
 0x28e   : > { %v3860_v2 = vpop.permute.xlu0 %3859 }
 0x28f   : > { %3942 = vst.msk [vmem:[#allocation3 + $0x38] sm:$0xf] %vm3927_vm11, %v3860_v2  ;;  %v3862_v43 = vpop.permute.xlu1 %3861 }
 0x290   : > { %3943 = vst.msk [vmem:[#allocation3 + $0x3c] sm:$0xf] %vm3927_vm11, %v3862_v43 }
 0x292   : > { %v3527_v3 = vpop.permute.xlu0 %3526 }
 0x293   : > { %3607 = vst.msk [vmem:[#allocation3 + $0x40] sm:$0xf] %vm3590_vm9, %v3527_v3  ;;  %v3529_v4 = vpop.permute.xlu1 %3528  ;;  %v9547_v33 = vld [vmem:[#allocation3 + $0x30] sm:$0xff]  }
 0x294   : > { %3608 = vst.msk [vmem:[#allocation3 + $0x44] sm:$0xf] %vm3590_vm9, %v3529_v4  ;;  %9413 = vmatprep.mubr.msk.bf16.mxu0 %vm4094_vm12, %v9547_v33  ;;  %v11232_v4 = vld [vmem:[%s12644_s2] ss:$0 sm:$0xff] }
 0x296   : > { %v3531_v5 = vpop.permute.xlu0 %3530 }
 0x297   : > { %3609 = vst.msk [vmem:[#allocation3 + $0x48] sm:$0xf] %vm3590_vm9, %v3531_v5  ;;  %v3533_v6 = vpop.permute.xlu1 %3532  ;;  %v9548_v52 = vld [vmem:[#allocation3 + $0x38] sm:$0xff]  }
 0x298   : > { %3610 = vst.msk [vmem:[#allocation3 + $0x4c] sm:$0xf] %vm3590_vm9, %v3533_v6  ;;  %9414 = vmatmul.mubr.msk.bf16.gmra.mxu0 %vm4094_vm12, %v9548_v52 }
 0x29a   : > { %v3864_v21 = vpop.permute.xlu0 %3863 }
 0x29b   : > { %3944 = vst.msk [vmem:[#allocation3 + $0x40] sm:$0xf] %vm3927_vm11, %v3864_v21  ;;  %v3866_v7 = vpop.permute.xlu1 %3865 }
 0x29c   : > { %3945 = vst.msk [vmem:[#allocation3 + $0x44] sm:$0xf] %vm3927_vm11, %v3866_v7 }
 0x29e   : > { %v3868_v61 = vpop.permute.xlu0 %3867 }
 0x29f   : > { %3946 = vst.msk [vmem:[#allocation3 + $0x48] sm:$0xf] %vm3927_vm11, %v3868_v61  ;;  %v3870_v1 = vpop.permute.xlu1 %3869 }
 0x2a0   : > { %3947 = vst.msk [vmem:[#allocation3 + $0x4c] sm:$0xf] %vm3927_vm11, %v3870_v1 }
 0x2a2   : > { %v3535_v10 = vpop.permute.xlu0 %3534 }
 0x2a3   : > { %3611 = vst.msk [vmem:[#allocation3 + $0x50] sm:$0xf] %vm3590_vm9, %v3535_v10  ;;  %v3537_v42 = vpop.permute.xlu1 %3536  ;;  %v9549_v56 = vld [vmem:[#allocation3 + $0x40] sm:$0xff]  }
 0x2a4   : > { %3612 = vst.msk [vmem:[#allocation3 + $0x54] sm:$0xf] %vm3590_vm9, %v3537_v42  ;;  %9417 = vmatprep.mubr.msk.bf16.mxu1 %vm4094_vm12, %v9549_v56 }
 0x2a6   : > { %v3539_v62 = vpop.permute.xlu0 %3538 }
 0x2a7   : > { %3613 = vst.msk [vmem:[#allocation3 + $0x58] sm:$0xf] %vm3590_vm9, %v3539_v62  ;;  %v3541_v12 = vpop.permute.xlu1 %3540  ;;  %v9550_v55 = vld [vmem:[#allocation3 + $0x48] sm:$0xff]  }
 0x2a8   : > { %3614 = vst.msk [vmem:[#allocation3 + $0x5c] sm:$0xf] %vm3590_vm9, %v3541_v12  ;;  %9418 = vmatmul.mubr.msk.bf16.vlgmr.msra.gmra.mxu1 %vm4094_vm12, %v9550_v55 }
 0x2aa   : > { %v3872_v13 = vpop.permute.xlu0 %3871 }
 0x2ab   : > { %3948 = vst.msk [vmem:[#allocation3 + $0x50] sm:$0xf] %vm3927_vm11, %v3872_v13  ;;  %v3874_v15 = vpop.permute.xlu1 %3873 }
 0x2ac   : > { %3949 = vst.msk [vmem:[#allocation3 + $0x54] sm:$0xf] %vm3927_vm11, %v3874_v15 }
 0x2ae   : > { %v3876_v8 = vpop.permute.xlu0 %3875 }
 0x2af   : > { %3950 = vst.msk [vmem:[#allocation3 + $0x58] sm:$0xf] %vm3927_vm11, %v3876_v8  ;;  %v3878_v16 = vpop.permute.xlu1 %3877 }
 0x2b0   : > { %3951 = vst.msk [vmem:[#allocation3 + $0x5c] sm:$0xf] %vm3927_vm11, %v3878_v16 }
 0x2b2   : > { %v3543_v9 = vpop.permute.xlu0 %3542 }
 0x2b3   : > { %3615 = vst.msk [vmem:[#allocation3 + $0x60] sm:$0xf] %vm3590_vm9, %v3543_v9  ;;  %v3545_v17 = vpop.permute.xlu1 %3544  ;;  %v9551_v19 = vld [vmem:[#allocation3 + $0x50] sm:$0xff]  }
 0x2b4   : > { %3616 = vst.msk [vmem:[#allocation3 + $0x64] sm:$0xf] %vm3590_vm9, %v3545_v17  ;;  %9421 = vmatprep.mubr.msk.bf16.mxu1 %vm4094_vm12, %v9551_v19  ;;  %v4827_v17 = vld [vmem:[#allocation4 + $0x18] sm:$0xf] }
 0x2b6   : > { %v3547_v20 = vpop.permute.xlu0 %3546 }
 0x2b7   : > { %3617 = vst.msk [vmem:[#allocation3 + $0x68] sm:$0xf] %vm3590_vm9, %v3547_v20  ;;  %v3549_v18 = vpop.permute.xlu1 %3548  ;;  %v9552_v22 = vld [vmem:[#allocation3 + $0x58] sm:$0xff]  }
 0x2b8   : > { %3618 = vst.msk [vmem:[#allocation3 + $0x6c] sm:$0xf] %vm3590_vm9, %v3549_v18  ;;  %9422 = vmatmul.mubr.msk.bf16.gmra.mxu1 %vm4094_vm12, %v9552_v22 }
 0x2ba   : > { %v3880_v24 = vpop.permute.xlu0 %3879 }
 0x2bb   : > { %3952 = vst.msk [vmem:[#allocation3 + $0x60] sm:$0xf] %vm3927_vm11, %v3880_v24  ;;  %v3882_v0 = vpop.permute.xlu1 %3881 }
 0x2bc   : > { %3953 = vst.msk [vmem:[#allocation3 + $0x64] sm:$0xf] %vm3927_vm11, %v3882_v0  ;;  %v4818_v0 = vld [vmem:[#allocation4 + $0xc] sm:$0xf] }
 0x2be   : > { %v3884_v29 = vpop.permute.xlu0 %3883 }
 0x2bf   : > { %3954 = vst.msk [vmem:[#allocation3 + $0x68] sm:$0xf] %vm3927_vm11, %v3884_v29  ;;  %v3886_v34 = vpop.permute.xlu1 %3885 }
 0x2c0   : > { %3955 = vst.msk [vmem:[#allocation3 + $0x6c] sm:$0xf] %vm3927_vm11, %v3886_v34 }
 0x2c2   : > { %v3551_v37 = vpop.permute.xlu0 %3550 }
 0x2c3   : > { %3619 = vst.msk [vmem:[#allocation3 + $0x70] sm:$0xf] %vm3590_vm9, %v3551_v37  ;;  %v3553_v31 = vpop.permute.xlu1 %3552  ;;  %v9553_v44 = vld [vmem:[#allocation3 + $0x60] sm:$0xff]  }
 0x2c4   : > { %3620 = vst.msk [vmem:[#allocation3 + $0x74] sm:$0xf] %vm3590_vm9, %v3553_v31  ;;  %9425 = vmatprep.mubr.msk.bf16.mxu1 %vm4094_vm12, %v9553_v44 }
 0x2c6   : > { %v3555_v50 = vpop.permute.xlu0 %3554 }
 0x2c7   : > { %3621 = vst.msk [vmem:[#allocation3 + $0x78] sm:$0xf] %vm3590_vm9, %v3555_v50  ;;  %v3557_v54 = vpop.permute.xlu1 %3556  ;;  %v9554_v57 = vld [vmem:[#allocation3 + $0x68] sm:$0xff]  }
 0x2c8   : > { %3622 = vst.msk [vmem:[#allocation3 + $0x7c] sm:$0xf] %vm3590_vm9, %v3557_v54  ;;  %9426 = vmatmul.mubr.msk.bf16.gmra.mxu1 %vm4094_vm12, %v9554_v57  ;;  %vm6615_vm9 = vcmask 322816  }
 0x2ca   : > { %v3888_v59 = vpop.permute.xlu0 %3887 }
 0x2cb   : > { %3956 = vst.msk [vmem:[#allocation3 + $0x70] sm:$0xf] %vm3927_vm11, %v3888_v59  ;;  %v3890_v63 = vpop.permute.xlu1 %3889 }
 0x2cc   : > { %3957 = vst.msk [vmem:[#allocation3 + $0x74] sm:$0xf] %vm3927_vm11, %v3890_v63  ;;  %v4932_v63 = vld [vmem:[#allocation4] sm:$0xf] }
 0x2cd   : > { %4964 = vst.msk [vmem:[#allocation5] sm:$0xf] %vm4359_vm14, %v4932_v63 }
 0x2ce   : > { %v3892_v47 = vpop.permute.xlu0 %3891 }
 0x2cf   : > { %3958 = vst.msk [vmem:[#allocation3 + $0x78] sm:$0xf] %vm3927_vm11, %v3892_v47  ;;  %v3894_v2 = vpop.permute.xlu1 %3893 }
 0x2d0   : > { %3959 = vst.msk [vmem:[#allocation3 + $0x7c] sm:$0xf] %vm3927_vm11, %v3894_v2  ;;  %vm6952_vm11 = vcmask 388416  }
 0x2d3   : > { %v9555_v43 = vld [vmem:[#allocation3 + $0x70] sm:$0xff]  }
 0x2d4   : > { %9429 = vmatprep.mubr.msk.bf16.mxu1 %vm4094_vm12, %v9555_v43 }
 0x2d7   : > { %v9556_v3 = vld [vmem:[#allocation3 + $0x78] sm:$0xff]  }
 0x2d8   : > { %9430 = vmatmul.mubr.msk.bf16.gmra.mxu1 %vm4094_vm12, %v9556_v3  ;;  %vm7146_vm12 = vcmask 454016  }
 0x328   : > { %v9403_v33 = vpop.f32.mrf.mxu0 }
 0x329   : > { %v4193_v5 = vadd.f32 %v9403_v33, %v11232_v4  ;;  %v5429_v33 = vpop.permute.xlu0 %5428 }
 0x32a   : > { %v4184_v6 = vpop.f32.mrf.mxu0  ;;  %5525 = vst.msk [vmem:[#allocation5] sm:$0xf] %vm5524_vm1, %v5429_v33 }
 0x32b   : > { %v4313_v52 = vmax.f32 %v4193_v5, 0.0  ;;  %v4185_v21 = vadd.f32 %v11232_v4, %v4184_v6 }
 0x32c   : > { %v9404_v7 = vpop.f32.mrf.mxu0 }
 0x32d   : > { %v9279_v61 = vpack.c.bf16 %v4313_v52, %v4313_v52  ;;  %v4311_v1 = vmax.f32 %v4185_v21, 0.0  ;;  %v4196_v10 = vadd.f32 %v9404_v7, %v11232_v4 }
 0x32e   : > { %v4187_v42 = vpop.f32.mrf.mxu0 }
 0x32f   : > { %v4513_v56 = vshrl.u32 %v9279_v61, 16  ;;  %v9277_v62 = vpack.c.bf16 %v4311_v1, %v4311_v1  ;;  %v4314_v12 = vmax.f32 %v4196_v10, 0.0  ;;  %v4188_v55 = vadd.f32 %v11232_v4, %v4187_v42 }
 0x330   : > { %v4516_v15 = vshll.u32 %v9279_v61, 16 }
 0x331   : > { %v4515_v13 = vrot.slane %v4513_v56, 7  ;;  %v4496_v8 = vshrl.u32 %v9277_v62, 16  ;;  %v9280_v16 = vpack.c.bf16 %v4314_v12, %v4314_v12  ;;  %v4312_v19 = vmax.f32 %v4188_v55, 0.0 }
 0x332   : > { %v4499_v22 = vshll.u32 %v9277_v62, 16 }
 0x333   : > { %v4518_v20 = vor.u32 %v4516_v15, %v4515_v13  ;;  %v4498_v18 = vrot.slane %v4496_v8, 7  ;;  %v4521_v24 = vshrl.u32 %v9280_v16, 16  ;;  %v9278_v28 = vpack.c.bf16 %v4312_v19, %v4312_v19  ;;  %v4841_v19 = vld [vmem:[#allocation4 + $0x30] sm:$0xf] }
 0x334   : > { %v4524_v34 = vshll.u32 %v9280_v16, 16  ;;  %v4519_v37 = vrot.slane %v4515_v13, 4 }
 0x335   : > { %v4828_v29 = vsel %vm11240_vm0, %v4518_v20, %v4827_v17  ;;  %v4501_v32 = vor.u32 %v4499_v22, %v4498_v18  ;;  %v4523_v48 = vrot.slane %v4521_v24, 7  ;;  %v4504_v11 = vshrl.u32 %v9278_v28, 16 }
 0x336   : > { %4829 = vst [vmem:[#allocation4 + $0x18] sm:$0xf] %v4828_v29  ;;  %v4507_v44 = vshll.u32 %v9278_v28, 16  ;;  %v4502_v41 = vrot.slane %v4498_v18, 4 }
 0x337   : > { %v4819_v39 = vsel %vm11240_vm0, %v4501_v32, %v4818_v0  ;;  %v4526_v30 = vor.u32 %v4524_v34, %v4523_v48  ;;  %v4528_v40 = vrot.slane %v4523_v48, 4  ;;  %v4506_v31 = vrot.slane %v4504_v11, 7  ;;  %v4834_v32 = vld [vmem:[#allocation4 + $0x24] sm:$0xf] }
 0x338   : > { %4820 = vst [vmem:[#allocation4 + $0xc] sm:$0xf] %v4819_v39  ;;  %v9407_v45 = vpop.f32.mrf.mxu0 }
 0x339   : > { %v4527_v25 = vsel %vm9817_vm8, %v4519_v37, %v4526_v30  ;;  %v4832_v46 = vsel %vm11248_vm6, %v4528_v40, %v4831_v36  ;;  %v4209_v50 = vadd.f32 %v9407_v45, %v11232_v4  ;;  %v4509_v38 = vor.u32 %v4507_v44, %v4506_v31 }
 0x33a   : > { %4830 = vst.msk [vmem:[#allocation4 + $0x1c] sm:$0xf] %vm4359_vm14, %v4527_v25  ;;  %4833 = vst [vmem:[#allocation4 + $0x20] sm:$0x1] %v4832_v46  ;;  %v4511_v53 = vrot.slane %v4506_v31, 4  ;;  %v4200_v54 = vpop.f32.mrf.mxu0 }
 0x33b   : > { %v4317_v57 = vmax.f32 %v4209_v50, 0.0  ;;  %v4201_v14 = vadd.f32 %v11232_v4, %v4200_v54  ;;  %v4510_v58 = vsel %vm9817_vm8, %v4502_v41, %v4509_v38  ;;  %v4933_v25 = vld [vmem:[#allocation4 + $0x4] sm:$0xf]  ;;  %v5431_v54 = vpop.permute.xlu1 %5430 }
 0x33c   : > { %v4825_v59 = vsel %vm11248_vm6, %v4511_v53, %v4824_v26  ;;  %v9408_v60 = vpop.f32.mrf.mxu0  ;;  %4821 = vst.msk [vmem:[#allocation4 + $0x10] sm:$0xf] %vm4359_vm14, %v4510_v58  ;;  %v4845_v26 = vld [vmem:[#allocation4 + $0x38] sm:$0x1]  ;;  %4965 = vst.msk [vmem:[#allocation5 + $0x4] sm:$0xf] %vm4359_vm14, %v4933_v25 }
 0x33d   : > { %4826 = vst [vmem:[#allocation4 + $0x14] sm:$0x1] %v4825_v59  ;;  %v9283_v47 = vpack.c.bf16 %v4317_v57, %v4317_v57  ;;  %v4315_v2 = vmax.f32 %v4201_v14, 0.0  ;;  %v4212_v43 = vadd.f32 %v9408_v60, %v11232_v4  ;;  %v5002_v3 = vld [vmem:[#allocation4 + $0x18] sm:$0xf] }
 0x33e   : > { %v4936_v5 = vld [vmem:[#allocation4 + $0x18] sm:$0xf]  ;;  %v4203_v6 = vpop.f32.mrf.mxu0  ;;  %v5093_v52 = vshrl.u32 %v5002_v3, 16  ;;  %v5096_v21 = vshll.u32 %v5002_v3, 16  ;;  %5526 = vst.msk [vmem:[#allocation5 + $0x4] sm:$0xf] %vm5524_vm1, %v5431_v54 }
 0x33f   : > { %4968 = vst.msk [vmem:[#allocation5 + $0x10] sm:$0xf] %vm4359_vm14, %v4936_v5  ;;  %v4547_v7 = vshrl.u32 %v9283_v47, 16  ;;  %v4550_v61 = vshll.u32 %v9283_v47, 16  ;;  %v9281_v1 = vpack.c.bf16 %v4315_v2, %v4315_v2  ;;  %v4318_v10 = vmax.f32 %v4212_v43, 0.0 }
 0x340   : > { %v4999_v42 = vld [vmem:[#allocation4 + $0xc] sm:$0xf]  ;;  %v4204_v56 = vadd.f32 %v11232_v4, %v4203_v6  ;;  %v5095_v55 = vrot.slane %v5093_v52, 4  ;;  %v5098_v24 = vrot.slane %v5096_v21, 5  ;;  %v4855_v54 = vld [vmem:[#allocation4 + $0x48] sm:$0xf] }
 0x341   : > { %v5069_v62 = vshrl.u32 %v4999_v42, 16  ;;  %v5072_v12 = vshll.u32 %v4999_v42, 16  ;;  %v4934_v13 = vld [vmem:[#allocation4 + $0xc] sm:$0xf]  ;;  %v4549_v15 = vrot.slane %v4547_v7, 7  ;;  %v4530_v8 = vshrl.u32 %v9281_v1, 16 }
 0x342   : > { %v4533_v16 = vshll.u32 %v9281_v1, 16  ;;  %v9284_v17 = vpack.c.bf16 %v4318_v10, %v4318_v10  ;;  %4966 = vst.msk [vmem:[#allocation5 + $0x8] sm:$0xf] %vm4359_vm14, %v4934_v13  ;;  %v4316_v20 = vmax.f32 %v4204_v56, 0.0  ;;  %v5099_v30 = vor.u32 %v5098_v24, %v5095_v55  ;;  %v4937_v60 = vld [vmem:[#allocation4 + $0x1c] sm:$0xf] }
 0x343   : > { %v5071_v18 = vrot.slane %v5069_v62, 4  ;;  %v5074_v22 = vrot.slane %v5072_v12, 5  ;;  %v4552_v0 = vor.u32 %v4550_v61, %v4549_v15  ;;  %v4553_v28 = vrot.slane %v4549_v15, 4  ;;  %v5000_v11 = vld [vmem:[#allocation4 + $0x10] sm:$0xf] }
 0x344   : > { %v4532_v29 = vrot.slane %v4530_v8, 7  ;;  %v4555_v48 = vshrl.u32 %v9284_v17, 16  ;;  %v4558_v34 = vshll.u32 %v9284_v17, 16  ;;  %v9282_v36 = vpack.c.bf16 %v4316_v20, %v4316_v20  ;;  %v5001_v39 = vld [vmem:[#allocation4 + $0x14] sm:$0x1] }
 0x345   : > { %v5075_v37 = vor.u32 %v5074_v22, %v5071_v18  ;;  %v4842_v40 = vsel %vm11240_vm0, %v4552_v0, %v4841_v19  ;;  %v4935_v46 = vld [vmem:[#allocation4 + $0x10] sm:$0xf]  ;;  %v5078_v53 = vshll.u32 %v5000_v11, 16  ;;  %v5082_v59 = vshrl.u32 %v5000_v11, 16  ;;  %v5003_v3 = vld [vmem:[#allocation4 + $0x1c] sm:$0xf] }
 0x346   : > { %v4535_v31 = vor.u32 %v4533_v16, %v4532_v29  ;;  %v4536_v44 = vrot.slane %v4532_v29, 4  ;;  %v4557_v45 = vrot.slane %v4555_v48, 7  ;;  %4843 = vst [vmem:[#allocation4 + $0x30] sm:$0xf] %v4842_v40  ;;  %v4538_v50 = vshrl.u32 %v9282_v36, 16 }
 0x347   : > { %v4541_v41 = vshll.u32 %v9282_v36, 16  ;;  %v5076_v38 = vrot.slane %v5075_v37, 4  ;;  %4967 = vst.msk [vmem:[#allocation5 + $0xc] sm:$0xf] %vm4359_vm14, %v4935_v46  ;;  %v5080_v2 = vrot.slane %v5078_v53, 5  ;;  %v5088_v43 = vshll.u32 %v5001_v39, 16 }
 0x348   : > { %v4835_v57 = vsel %vm11240_vm0, %v4535_v31, %v4834_v32  ;;  %v4560_v14 = vor.u32 %v4558_v34, %v4557_v45  ;;  %v4562_v58 = vrot.slane %v4557_v45, 4  ;;  %v4540_v63 = vrot.slane %v4538_v50, 7  ;;  %v9411_v47 = vpop.f32.mrf.mxu0  ;;  %4969 = vst.msk [vmem:[#allocation5 + $0x14] sm:$0xf] %vm4359_vm14, %v4937_v60  ;;  %v4838_v52 = vld [vmem:[#allocation4 + $0x2c] sm:$0x1] }
 0x349   : > { %4836 = vst [vmem:[#allocation4 + $0x24] sm:$0xf] %v4835_v57  ;;  %v5100_v33 = vrot.slane %v5099_v30, 4  ;;  %v4225_v21 = vadd.f32 %v9411_v47, %v11232_v4  ;;  %v5084_v7 = vrot.slane %v5082_v59, 4  ;;  %v5004_v61 = vld [vmem:[#allocation4 + $0x20] sm:$0x1]  ;;  %v5081_v42 = vsel %vm9830_vm10, %v5076_v38, %v5080_v2 }
 0x34a   : > { %v4561_v5 = vsel %vm9817_vm8, %v4553_v28, %v4560_v14  ;;  %v4846_v6 = vsel %vm11248_vm6, %v4562_v58, %v4845_v26  ;;  %v4543_v1 = vor.u32 %v4541_v41, %v4540_v63  ;;  %v4545_v10 = vrot.slane %v4540_v63, 4  ;;  %v4216_v56 = vpop.f32.mrf.mxu0  ;;  %5432 = vrot.lane.b32.xlu0 %v5081_v42, %s9629_s19 }
 0x34b   : > { %4844 = vst.msk [vmem:[#allocation4 + $0x34] sm:$0xf] %vm4359_vm14, %v4561_v5  ;;  %4847 = vst [vmem:[#allocation4 + $0x38] sm:$0x1] %v4846_v6  ;;  %v5090_v62 = vrot.slane %v5088_v43, 5  ;;  %v4321_v12 = vmax.f32 %v4225_v21, 0.0  ;;  %v4217_v55 = vadd.f32 %v11232_v4, %v4216_v56  ;;  %v5085_v13 = vor.u32 %v5084_v7, %v5080_v2 }
 0x34c   : > { %v5102_v15 = vshll.u32 %v5003_v3, 16  ;;  %v4544_v8 = vsel %vm9817_vm8, %v4536_v44, %v4543_v1  ;;  %v4839_v16 = vsel %vm11248_vm6, %v4545_v10, %v4838_v52  ;;  %v9412_v17 = vpop.f32.mrf.mxu0  ;;  %v5106_v19 = vshrl.u32 %v5003_v3, 16  ;;  %v4848_v43 = vld [vmem:[#allocation4 + $0x3c] sm:$0xf]  ;;  %v4859_v10 = vld [vmem:[#allocation4 + $0x50] sm:$0x1] }
 0x34d   : > { %v5112_v20 = vshll.u32 %v5004_v61, 16  ;;  %4837 = vst.msk [vmem:[#allocation4 + $0x28] sm:$0xf] %vm4359_vm14, %v4544_v8  ;;  %4840 = vst [vmem:[#allocation4 + $0x2c] sm:$0x1] %v4839_v16  ;;  %v9287_v18 = vpack.c.bf16 %v4321_v12, %v4321_v12  ;;  %v4319_v22 = vmax.f32 %v4217_v55, 0.0  ;;  %v4228_v24 = vadd.f32 %v9412_v17, %v11232_v4 }
 0x34e   : > { %v5086_v0 = vrot.slane %v5085_v13, 4  ;;  %v11296_v28 = vld [vmem:[#allocation4 + $0x30] sm:$0xf]  ;;  %v5104_v29 = vrot.slane %v5102_v15, 5  ;;  %v4219_v32 = vpop.f32.mrf.mxu0  ;;  %v5108_v48 = vrot.slane %v5106_v19, 4 }
 0x34f   : > { %v5114_v34 = vrot.slane %v5112_v20, 5  ;;  %v5141_v36 = vshrl.u32 %v11296_v28, 16  ;;  %v4940_v11 = vld [vmem:[#allocation4 + $0x30] sm:$0xf]  ;;  %v4581_v37 = vshrl.u32 %v9287_v18, 16  ;;  %v4584_v39 = vshll.u32 %v9287_v18, 16 }
 0x350   : > { %v9285_v30 = vpack.c.bf16 %v4319_v22, %v4319_v22  ;;  %v4322_v40 = vmax.f32 %v4228_v24, 0.0  ;;  %v5005_v31 = vld [vmem:[#allocation4 + $0x24] sm:$0xf]  ;;  %4972 = vst.msk [vmem:[#allocation5 + $0x20] sm:$0xf] %vm4359_vm14, %v4940_v11  ;;  %v5091_v44 = vsel %vm9830_vm10, %v5086_v0, %v5090_v62  ;;  %v5105_v45 = vsel %vm9830_vm10, %v5100_v33, %v5104_v29 }
 0x351   : > { %v4220_v25 = vadd.f32 %v11232_v4, %v4219_v32  ;;  %v5109_v46 = vor.u32 %v5108_v48, %v5104_v29  ;;  %v4938_v26 = vld [vmem:[#allocation4 + $0x24] sm:$0xf]  ;;  %v4583_v50 = vrot.slane %v4581_v37, 7  ;;  %5434 = vrot.lane.b32.xlu1 %v5091_v44, %s9629_s19  ;;  %5436 = vrot.lane.b32.xlu0 %v5105_v45, %s9629_s19  ;;  %v5117_v58 = vshrl.u32 %v5005_v31, 16 }
 0x352   : > { %v4564_v41 = vshrl.u32 %v9285_v30, 16  ;;  %v4567_v38 = vshll.u32 %v9285_v30, 16  ;;  %v9288_v53 = vpack.c.bf16 %v4322_v40, %v4322_v40  ;;  %4970 = vst.msk [vmem:[#allocation5 + $0x18] sm:$0xf] %vm4359_vm14, %v4938_v26  ;;  %v5120_v59 = vshll.u32 %v5005_v31, 16 }
 0x353   : > { %v4320_v57 = vmax.f32 %v4220_v25, 0.0  ;;  %v5110_v14 = vrot.slane %v5109_v46, 4  ;;  %v4586_v60 = vor.u32 %v4584_v39, %v4583_v50  ;;  %v4587_v63 = vrot.slane %v4583_v50, 4  ;;  %v4941_v19 = vld [vmem:[#allocation4 + $0x34] sm:$0xf] }
 0x354   : > { %v4566_v47 = vrot.slane %v4564_v41, 7  ;;  %v4589_v2 = vshrl.u32 %v9288_v53, 16  ;;  %v4592_v3 = vshll.u32 %v9288_v53, 16  ;;  %v5006_v6 = vld [vmem:[#allocation4 + $0x28] sm:$0xf]  ;;  %v5119_v52 = vrot.slane %v5117_v58, 4 }
 0x355   : > { %v9286_v33 = vpack.c.bf16 %v4320_v57, %v4320_v57  ;;  %v5115_v5 = vsel %vm9830_vm10, %v5110_v14, %v5114_v34  ;;  %v4856_v21 = vsel %vm11240_vm0, %v4586_v60, %v4855_v54  ;;  %v5007_v42 = vld [vmem:[#allocation4 + $0x2c] sm:$0x1]  ;;  %v5122_v12 = vrot.slane %v5120_v59, 5  ;;  %v4939_v13 = vld [vmem:[#allocation4 + $0x28] sm:$0xf] }
 0x356   : > { %v4569_v7 = vor.u32 %v4567_v38, %v4566_v47  ;;  %v4570_v61 = vrot.slane %v4566_v47, 4  ;;  %v4591_v1 = vrot.slane %v4589_v2, 7  ;;  %5438 = vrot.lane.b32.xlu1 %v5115_v5, %s9629_s19  ;;  %4857 = vst [vmem:[#allocation4 + $0x48] sm:$0xf] %v4856_v21  ;;  %v5126_v55 = vshll.u32 %v5006_v6, 16 }
 0x357   : > { %v4572_v56 = vshrl.u32 %v9286_v33, 16  ;;  %v4575_v62 = vshll.u32 %v9286_v33, 16  ;;  %v5130_v17 = vshrl.u32 %v5006_v6, 16  ;;  %4971 = vst.msk [vmem:[#allocation5 + $0x1c] sm:$0xf] %vm4359_vm14, %v4939_v13  ;;  %v5123_v22 = vor.u32 %v5122_v12, %v5119_v52 }
 0x358   : > { %v4849_v15 = vsel %vm11240_vm0, %v4569_v7, %v4848_v43  ;;  %v4594_v8 = vor.u32 %v4592_v3, %v4591_v1  ;;  %v4596_v16 = vrot.slane %v4591_v1, 4  ;;  %v9415_v18 = vpop.f32.mrf.mxu0  ;;  %v5128_v24 = vrot.slane %v5126_v55, 5  ;;  %4973 = vst.msk [vmem:[#allocation5 + $0x24] sm:$0xf] %vm4359_vm14, %v4941_v19  ;;  %v4852_v48 = vld [vmem:[#allocation4 + $0x44] sm:$0x1] }
 0x359   : > { %4850 = vst [vmem:[#allocation4 + $0x3c] sm:$0xf] %v4849_v15  ;;  %v4574_v20 = vrot.slane %v4572_v56, 7  ;;  %v5136_v0 = vshll.u32 %v5007_v42, 16  ;;  %v4241_v34 = vadd.f32 %v9415_v18, %v11232_v4  ;;  %v5132_v11 = vrot.slane %v5130_v17, 4 }
 0x35a   : > { %v4595_v29 = vsel %vm9817_vm8, %v4587_v63, %v4594_v8  ;;  %v4860_v32 = vsel %vm11248_vm6, %v4596_v16, %v4859_v10  ;;  %v5124_v30 = vrot.slane %v5123_v22, 4  ;;  %v4232_v40 = vpop.f32.mrf.mxu0  ;;  %v5009_v46 = vld [vmem:[#allocation4 + $0x34] sm:$0xf]  ;;  %v5143_v26 = vrot.slane %v5141_v36, 4  ;;  %v5010_v50 = vld [vmem:[#allocation4 + $0x38] sm:$0x1] }
 0x35b   : > { %4858 = vst.msk [vmem:[#allocation4 + $0x4c] sm:$0xf] %vm4359_vm14, %v4595_v29  ;;  %4861 = vst [vmem:[#allocation4 + $0x50] sm:$0x1] %v4860_v32  ;;  %v4577_v37 = vor.u32 %v4575_v62, %v4574_v20  ;;  %v4579_v39 = vrot.slane %v4574_v20, 4  ;;  %v5138_v31 = vrot.slane %v5136_v0, 5  ;;  %v4233_v45 = vadd.f32 %v11232_v4, %v4232_v40 }
 0x35c   : > { %v4325_v44 = vmax.f32 %v4241_v34, 0.0  ;;  %v5133_v25 = vor.u32 %v5132_v11, %v5128_v24  ;;  %v5129_v53 = vsel %vm9830_vm10, %v5124_v30, %v5128_v24  ;;  %v9416_v54 = vpop.f32.mrf.mxu0  ;;  %v5144_v57 = vshll.u32 %v11296_v28, 16  ;;  %v4869_v12 = vld [vmem:[#allocation4 + $0x60] sm:$0xf]  ;;  %v4862_v22 = vld [vmem:[#allocation4 + $0x54] sm:$0xf] }
 0x35d   : > { %v4578_v41 = vsel %vm9817_vm8, %v4570_v61, %v4577_v37  ;;  %v4853_v38 = vsel %vm11248_vm6, %v4579_v39, %v4852_v48  ;;  %5440 = vrot.lane.b32.xlu0 %v5129_v53, %s9629_s19  ;;  %v4323_v36 = vmax.f32 %v4233_v45, 0.0  ;;  %v4244_v58 = vadd.f32 %v9416_v54, %v11232_v4  ;;  %v4944_v3 = vld [vmem:[#allocation4 + $0x48] sm:$0xf] }
 0x35e   : > { %4851 = vst.msk [vmem:[#allocation4 + $0x40] sm:$0xf] %vm4359_vm14, %v4578_v41  ;;  %4854 = vst [vmem:[#allocation4 + $0x44] sm:$0x1] %v4853_v38  ;;  %v9291_v14 = vpack.c.bf16 %v4325_v44, %v4325_v44  ;;  %v5134_v59 = vrot.slane %v5133_v25, 4  ;;  %v5146_v60 = vrot.slane %v5144_v57, 5  ;;  %v4235_v2 = vpop.f32.mrf.mxu0 }
 0x35f   : > { %v5150_v63 = vshll.u32 %v5009_v46, 16  ;;  %v5154_v47 = vshrl.u32 %v5009_v46, 16  ;;  %v5160_v43 = vshll.u32 %v5010_v50, 16  ;;  %v9289_v6 = vpack.c.bf16 %v4323_v36, %v4323_v36  ;;  %4976 = vst.msk [vmem:[#allocation5 + $0x30] sm:$0xf] %vm4359_vm14, %v4944_v3 }
 0x360   : > { %v4615_v33 = vshrl.u32 %v9291_v14, 16  ;;  %v4618_v5 = vshll.u32 %v9291_v14, 16  ;;  %v4326_v28 = vmax.f32 %v4244_v58, 0.0  ;;  %v5139_v52 = vsel %vm9830_vm10, %v5134_v59, %v5138_v31  ;;  %v4942_v1 = vld [vmem:[#allocation4 + $0x3c] sm:$0xf] }
 0x361   : > { %v5147_v21 = vor.u32 %v5146_v60, %v5143_v26  ;;  %v5152_v7 = vrot.slane %v5150_v63, 5  ;;  %v4236_v61 = vadd.f32 %v11232_v4, %v4235_v2  ;;  %v4598_v42 = vshrl.u32 %v9289_v6, 16  ;;  %5442 = vrot.lane.b32.xlu1 %v5139_v52, %s9629_s19  ;;  %4974 = vst.msk [vmem:[#allocation5 + $0x28] sm:$0xf] %vm4359_vm14, %v4942_v1  ;;  %v5011_v18 = vld [vmem:[#allocation4 + $0x3c] sm:$0xf] }
 0x362   : > { %v4617_v10 = vrot.slane %v4615_v33, 7  ;;  %v4601_v56 = vshll.u32 %v9289_v6, 16  ;;  %v9292_v62 = vpack.c.bf16 %v4326_v28, %v4326_v28  ;;  %v5156_v15 = vrot.slane %v5154_v47, 4  ;;  %v4873_v30 = vld [vmem:[#allocation4 + $0x68] sm:$0x1] }
 0x363   : > { %v5148_v55 = vrot.slane %v5147_v21, 4  ;;  %v4324_v13 = vmax.f32 %v4236_v61, 0.0  ;;  %v5162_v8 = vrot.slane %v5160_v43, 5  ;;  %v4600_v19 = vrot.slane %v4598_v42, 7  ;;  %v4945_v38 = vld [vmem:[#allocation4 + $0x4c] sm:$0xf] }
 0x364   : > { %v4620_v16 = vor.u32 %v4618_v5, %v4617_v10  ;;  %v4621_v17 = vrot.slane %v4617_v10, 4  ;;  %v4623_v20 = vshrl.u32 %v9292_v62, 16  ;;  %v4626_v24 = vshll.u32 %v9292_v62, 16  ;;  %4977 = vst.msk [vmem:[#allocation5 + $0x34] sm:$0xf] %vm4359_vm14, %v4945_v38 }
 0x365   : > { %v5153_v0 = vsel %vm9830_vm10, %v5148_v55, %v5152_v7  ;;  %v9290_v29 = vpack.c.bf16 %v4324_v13, %v4324_v13  ;;  %v5157_v32 = vor.u32 %v5156_v15, %v5152_v7  ;;  %v4603_v34 = vor.u32 %v4601_v56, %v4600_v19  ;;  %v5012_v39 = vld [vmem:[#allocation4 + $0x40] sm:$0xf]  ;;  %v5013_v58 = vld [vmem:[#allocation4 + $0x44] sm:$0x1]  ;;  %v4866_v63 = vld [vmem:[#allocation4 + $0x5c] sm:$0x1] }
 0x366   : > { %v4870_v48 = vsel %vm11240_vm0, %v4620_v16, %v4869_v12  ;;  %v4604_v11 = vrot.slane %v4600_v19, 4  ;;  %v4625_v37 = vrot.slane %v4623_v20, 7  ;;  %5444 = vrot.lane.b32.xlu0 %v5153_v0, %s9629_s19  ;;  %v5165_v45 = vshrl.u32 %v5011_v18, 16  ;;  %v4943_v41 = vld [vmem:[#allocation4 + $0x40] sm:$0xf] }
 0x367   : > { %4871 = vst [vmem:[#allocation4 + $0x60] sm:$0xf] %v4870_v48  ;;  %v4606_v40 = vshrl.u32 %v9290_v29, 16  ;;  %v4609_v31 = vshll.u32 %v9290_v29, 16  ;;  %v5158_v44 = vrot.slane %v5157_v32, 4  ;;  %v4863_v25 = vsel %vm11240_vm0, %v4603_v34, %v4862_v22 }
 0x368   : > { %v4628_v46 = vor.u32 %v4626_v24, %v4625_v37  ;;  %v4630_v26 = vrot.slane %v4625_v37, 4  ;;  %v5168_v50 = vshll.u32 %v5011_v18, 16  ;;  %4864 = vst [vmem:[#allocation4 + $0x54] sm:$0xf] %v4863_v25  ;;  %v9419_v57 = vpop.f32.mrf.mxu1  ;;  %v5167_v14 = vrot.slane %v5165_v45, 4 }
 0x369   : > { %v4608_v53 = vrot.slane %v4606_v40, 7  ;;  %v5163_v54 = vsel %vm9830_vm10, %v5158_v44, %v5162_v8  ;;  %v5174_v36 = vshll.u32 %v5012_v39, 16  ;;  %4975 = vst.msk [vmem:[#allocation5 + $0x2c] sm:$0xf] %vm4359_vm14, %v4943_v41  ;;  %v4257_v47 = vadd.f32 %v9419_v57, %v11232_v4  ;;  %v5014_v43 = vld [vmem:[#allocation4 + $0x48] sm:$0xf] }
 0x36a   : > { %v4629_v59 = vsel %vm9817_vm8, %v4621_v17, %v4628_v46  ;;  %v4874_v60 = vsel %vm11248_vm6, %v4630_v26, %v4873_v30  ;;  %5446 = vrot.lane.b32.xlu1 %v5163_v54, %s9629_s19  ;;  %v5170_v2 = vrot.slane %v5168_v50, 5  ;;  %v5178_v6 = vshrl.u32 %v5012_v39, 16  ;;  %v4248_v28 = vpop.f32.mrf.mxu1  ;;  %v5015_v8 = vld [vmem:[#allocation4 + $0x4c] sm:$0xf]  ;;  %v4883_v45 = vld [vmem:[#allocation4 + $0x78] sm:$0xf] }
 0x36b   : > { %4872 = vst.msk [vmem:[#allocation4 + $0x64] sm:$0xf] %vm4359_vm14, %v4629_v59  ;;  %4875 = vst [vmem:[#allocation4 + $0x68] sm:$0x1] %v4874_v60  ;;  %v4611_v3 = vor.u32 %v4609_v31, %v4608_v53  ;;  %v4613_v33 = vrot.slane %v4608_v53, 4  ;;  %v5176_v5 = vrot.slane %v5174_v36, 5  ;;  %v4249_v7 = vadd.f32 %v11232_v4, %v4248_v28 }
 0x36c   : > { %v4329_v52 = vmax.f32 %v4257_v47, 0.0  ;;  %v5171_v21 = vor.u32 %v5170_v2, %v5167_v14  ;;  %v5184_v61 = vshll.u32 %v5013_v58, 16  ;;  %v9420_v42 = vpop.f32.mrf.mxu1  ;;  %v5180_v56 = vrot.slane %v5178_v6, 4  ;;  %v4876_v25 = vld [vmem:[#allocation4 + $0x6c] sm:$0xf] }
 0x36d   : > { %v4612_v1 = vsel %vm9817_vm8, %v4604_v11, %v4611_v3  ;;  %v4867_v10 = vsel %vm11248_vm6, %v4613_v33, %v4866_v63  ;;  %v5189_v62 = vshrl.u32 %v5014_v43, 16  ;;  %v4327_v13 = vmax.f32 %v4249_v7, 0.0  ;;  %v5016_v14 = vld [vmem:[#allocation4 + $0x50] sm:$0x1] }
 0x36e   : > { %4865 = vst.msk [vmem:[#allocation4 + $0x58] sm:$0xf] %vm4359_vm14, %v4612_v1  ;;  %4868 = vst [vmem:[#allocation4 + $0x5c] sm:$0x1] %v4867_v10  ;;  %v9295_v12 = vpack.c.bf16 %v4329_v52, %v4329_v52  ;;  %v5172_v55 = vrot.slane %v5171_v21, 4  ;;  %v4260_v15 = vadd.f32 %v9420_v42, %v11232_v4  ;;  %v5181_v16 = vor.u32 %v5180_v56, %v5176_v5  ;;  %v4251_v37 = vpop.f32.mrf.mxu1 }
 0x36f   : > { %v5186_v17 = vrot.slane %v5184_v61, 5  ;;  %v5191_v19 = vrot.slane %v5189_v62, 4  ;;  %v5192_v20 = vshll.u32 %v5014_v43, 16  ;;  %v4948_v18 = vld [vmem:[#allocation4 + $0x60] sm:$0xf]  ;;  %v9293_v29 = vpack.c.bf16 %v4327_v13, %v4327_v13 }
 0x370   : > { %v4649_v22 = vshrl.u32 %v9295_v12, 16  ;;  %v4652_v24 = vshll.u32 %v9295_v12, 16  ;;  %v5177_v0 = vsel %vm9830_vm10, %v5172_v55, %v5176_v5  ;;  %4980 = vst.msk [vmem:[#allocation5 + $0x40] sm:$0xf] %vm4359_vm14, %v4948_v18  ;;  %v4330_v32 = vmax.f32 %v4260_v15, 0.0 }
 0x371   : > { %5448 = vrot.lane.b32.xlu0 %v5177_v0, %s9629_s19  ;;  %v5182_v48 = vrot.slane %v5181_v16, 4  ;;  %v5194_v34 = vrot.slane %v5192_v20, 5  ;;  %v5198_v11 = vshll.u32 %v5015_v8, 16  ;;  %v4946_v39 = vld [vmem:[#allocation4 + $0x54] sm:$0xf]  ;;  %v4632_v40 = vshrl.u32 %v9293_v29, 16 }
 0x372   : > { %v4651_v30 = vrot.slane %v4649_v22, 7  ;;  %v4635_v31 = vshll.u32 %v9293_v29, 16  ;;  %v5202_v44 = vshrl.u32 %v5015_v8, 16  ;;  %4978 = vst.msk [vmem:[#allocation5 + $0x38] sm:$0xf] %vm4359_vm14, %v4946_v39  ;;  %v9296_v46 = vpack.c.bf16 %v4330_v32, %v4330_v32 }
 0x373   : > { %v5187_v26 = vsel %vm9830_vm10, %v5182_v48, %v5186_v17  ;;  %v5195_v50 = vor.u32 %v5194_v34, %v5191_v19  ;;  %v5200_v41 = vrot.slane %v5198_v11, 5  ;;  %v11374_v54 = vrot.slane %v4632_v40, 7  ;;  %v4949_v36 = vld [vmem:[#allocation4 + $0x64] sm:$0xf]  ;;  %v5017_v47 = vld [vmem:[#allocation4 + $0x54] sm:$0xf] }
 0x374   : > { %v4654_v38 = vor.u32 %v4652_v24, %v4651_v30  ;;  %v4655_v53 = vrot.slane %v4651_v30, 4  ;;  %5450 = vrot.lane.b32.xlu1 %v5187_v26, %s9629_s19  ;;  %v4252_v57 = vadd.f32 %v11232_v4, %v4251_v37  ;;  %v4657_v58 = vshrl.u32 %v9296_v46, 16  ;;  %4981 = vst.msk [vmem:[#allocation5 + $0x44] sm:$0xf] %vm4359_vm14, %v4949_v36  ;;  %v4887_v61 = vld [vmem:[#allocation4 + $0x80] sm:$0x1] }
 0x375   : > { %v4660_v59 = vshll.u32 %v9296_v46, 16  ;;  %v5196_v60 = vrot.slane %v5195_v50, 4  ;;  %v5204_v63 = vrot.slane %v5202_v44, 4  ;;  %v4637_v43 = vor.u32 %v4635_v31, %v11374_v54  ;;  %v4947_v21 = vld [vmem:[#allocation4 + $0x58] sm:$0xf] }
 0x376   : > { %v4884_v2 = vsel %vm11240_vm0, %v4654_v38, %v4883_v45  ;;  %v4638_v3 = vrot.slane %v11374_v54, 4  ;;  %v4328_v33 = vmax.f32 %v4252_v57, 0.0  ;;  %v4659_v5 = vrot.slane %v4657_v58, 7  ;;  %v11388_v56 = vld [vmem:[#allocation4 + $0x60] sm:$0xf] }
 0x377   : > { %4885 = vst [vmem:[#allocation4 + $0x78] sm:$0xf] %v4884_v2  ;;  %v5201_v6 = vsel %vm9830_vm10, %v5196_v60, %v5200_v41  ;;  %v5205_v28 = vor.u32 %v5204_v63, %v5200_v41  ;;  %v5208_v52 = vshll.u32 %v5016_v14, 16  ;;  %v4877_v7 = vsel %vm11240_vm0, %v4637_v43, %v4876_v25  ;;  %4979 = vst.msk [vmem:[#allocation5 + $0x3c] sm:$0xf] %vm4359_vm14, %v4947_v21 }
 0x378   : > { %5452 = vrot.lane.b32.xlu0 %v5201_v6, %s9629_s19  ;;  %v9294_v1 = vpack.c.bf16 %v4328_v33, %v4328_v33  ;;  %v5213_v10 = vshrl.u32 %v5017_v47, 16  ;;  %v5216_v42 = vshll.u32 %v5017_v47, 16  ;;  %4878 = vst [vmem:[#allocation4 + $0x6c] sm:$0xf] %v4877_v7  ;;  %v4662_v62 = vor.u32 %v4660_v59, %v4659_v5  ;;  %v9423_v15 = vpop.f32.mrf.mxu1  ;;  %v5018_v8 = vld [vmem:[#allocation4 + $0x58] sm:$0xf] }
 0x379   : > { %v4664_v12 = vrot.slane %v4659_v5, 4  ;;  %v5206_v55 = vrot.slane %v5205_v28, 4  ;;  %v5210_v13 = vrot.slane %v5208_v52, 5  ;;  %v4273_v19 = vadd.f32 %v9423_v15, %v11232_v4  ;;  %v5019_v18 = vld [vmem:[#allocation4 + $0x5c] sm:$0x1] }
 0x37a   : > { %v4640_v16 = vshrl.u32 %v9294_v1, 16  ;;  %v4643_v17 = vshll.u32 %v9294_v1, 16  ;;  %v5215_v20 = vrot.slane %v5213_v10, 4  ;;  %v4663_v22 = vsel %vm9817_vm8, %v4655_v53, %v4662_v62  ;;  %v4264_v32 = vpop.f32.mrf.mxu1  ;;  %v4880_v39 = vld [vmem:[#allocation4 + $0x74] sm:$0x1] }
 0x37b   : > { %v4888_v24 = vsel %vm11248_vm6, %v4664_v12, %v4887_v61  ;;  %v5211_v0 = vsel %vm9830_vm10, %v5206_v55, %v5210_v13  ;;  %v5218_v29 = vrot.slane %v5216_v42, 5  ;;  %4886 = vst.msk [vmem:[#allocation4 + $0x7c] sm:$0xf] %vm4359_vm14, %v4663_v22  ;;  %v4333_v34 = vmax.f32 %v4273_v19, 0.0  ;;  %v5021_v43 = vld [vmem:[#allocation4 + $0x64] sm:$0xf] }
 0x37c   : > { %4889 = vst [vmem:[#allocation4 + $0x80] sm:$0x1] %v4888_v24  ;;  %v4642_v48 = vrot.slane %v4640_v16, 7  ;;  %5454 = vrot.lane.b32.xlu1 %v5211_v0, %s9629_s19  ;;  %v5222_v11 = vshll.u32 %v5018_v8, 16  ;;  %v5226_v37 = vshrl.u32 %v5018_v8, 16  ;;  %v4265_v40 = vadd.f32 %v11232_v4, %v4264_v32  ;;  %v9424_v31 = vpop.f32.mrf.mxu1 }
 0x37d   : > { %v5219_v30 = vor.u32 %v5218_v29, %v5215_v20  ;;  %v5232_v44 = vshll.u32 %v5019_v18, 16  ;;  %v5237_v45 = vshrl.u32 %v11388_v56, 16  ;;  %v9299_v26 = vpack.c.bf16 %v4333_v34, %v4333_v34  ;;  %v4897_v52 = vld [vmem:[#allocation4 + $0x90] sm:$0xf]  ;;  %v5022_v13 = vld [vmem:[#allocation4 + $0x68] sm:$0x1] }
 0x37e   : > { %v4645_v25 = vor.u32 %v4643_v17, %v4642_v48  ;;  %v4647_v46 = vrot.slane %v4642_v48, 4  ;;  %v5224_v50 = vrot.slane %v5222_v11, 5  ;;  %v4331_v38 = vmax.f32 %v4265_v40, 0.0  ;;  %v4952_v57 = vld [vmem:[#allocation4 + $0x78] sm:$0xf]  ;;  %v4267_v55 = vpop.f32.mrf.mxu1 }
 0x37f   : > { %v5220_v41 = vrot.slane %v5219_v30, 4  ;;  %v4276_v53 = vadd.f32 %v9424_v31, %v11232_v4  ;;  %v5228_v54 = vrot.slane %v5226_v37, 4  ;;  %v4683_v58 = vshrl.u32 %v9299_v26, 16  ;;  %4984 = vst.msk [vmem:[#allocation5 + $0x50] sm:$0xf] %vm4359_vm14, %v4952_v57 }
 0x380   : > { %v4646_v14 = vsel %vm9817_vm8, %v4638_v3, %v4645_v25  ;;  %v4881_v36 = vsel %vm11248_vm6, %v4647_v46, %v4880_v39  ;;  %v4686_v59 = vshll.u32 %v9299_v26, 16  ;;  %v9297_v63 = vpack.c.bf16 %v4331_v38, %v4331_v38  ;;  %v4950_v33 = vld [vmem:[#allocation4 + $0x6c] sm:$0xf]  ;;  %v4890_v20 = vld [vmem:[#allocation4 + $0x84] sm:$0xf] }
 0x381   : > { %4879 = vst.msk [vmem:[#allocation4 + $0x70] sm:$0xf] %vm4359_vm14, %v4646_v14  ;;  %4882 = vst [vmem:[#allocation4 + $0x74] sm:$0x1] %v4881_v36  ;;  %v5225_v60 = vsel %vm9830_vm10, %v5220_v41, %v5224_v50  ;;  %v4334_v47 = vmax.f32 %v4276_v53, 0.0  ;;  %v5229_v2 = vor.u32 %v5228_v54, %v5224_v50  ;;  %v4685_v5 = vrot.slane %v4683_v58, 7 }
 0x382   : > { %5456 = vrot.lane.b32.xlu0 %v5225_v60, %s9629_s19  ;;  %v5234_v3 = vrot.slane %v5232_v44, 5  ;;  %v5239_v6 = vrot.slane %v5237_v45, 4  ;;  %v5240_v28 = vshll.u32 %v11388_v56, 16  ;;  %4982 = vst.msk [vmem:[#allocation5 + $0x48] sm:$0xf] %vm4359_vm14, %v4950_v33  ;;  %v4666_v21 = vshrl.u32 %v9297_v63, 16 }
 0x383   : > { %v4669_v7 = vshll.u32 %v9297_v63, 16  ;;  %v9300_v61 = vpack.c.bf16 %v4334_v47, %v4334_v47  ;;  %v5230_v1 = vrot.slane %v5229_v2, 4  ;;  %v4688_v10 = vor.u32 %v4686_v59, %v4685_v5  ;;  %v5023_v17 = vld [vmem:[#allocation4 + $0x6c] sm:$0xf]  ;;  %v4953_v0 = vld [vmem:[#allocation4 + $0x7c] sm:$0xf] }
 0x384   : > { %v4689_v42 = vrot.slane %v4685_v5, 4  ;;  %v5242_v62 = vrot.slane %v5240_v28, 5  ;;  %v5246_v12 = vshll.u32 %v5021_v43, 16  ;;  %v11414_v15 = vrot.slane %v4666_v21, 7  ;;  %4985 = vst.msk [vmem:[#allocation5 + $0x54] sm:$0xf] %vm4359_vm14, %v4953_v0 }
 0x385   : > { %v4691_v8 = vshrl.u32 %v9300_v61, 16  ;;  %v4694_v16 = vshll.u32 %v9300_v61, 16  ;;  %v5235_v56 = vsel %vm9830_vm10, %v5230_v1, %v5234_v3  ;;  %v4898_v19 = vsel %vm11240_vm0, %v4688_v10, %v4897_v52  ;;  %v4901_v11 = vld [vmem:[#allocation4 + $0x98] sm:$0x1]  ;;  %v11432_v38 = vld [vmem:[%s12644_s2] ss:$0 sm:$0xff] }
 0x386   : > { %5458 = vrot.lane.b32.xlu1 %v5235_v56, %s9629_s19  ;;  %v5243_v18 = vor.u32 %v5242_v62, %v5239_v6  ;;  %v5248_v22 = vrot.slane %v5246_v12, 5  ;;  %v5250_v24 = vshrl.u32 %v5021_v43, 16  ;;  %4899 = vst [vmem:[#allocation4 + $0x90] sm:$0xf] %v4898_v19  ;;  %v4671_v29 = vor.u32 %v4669_v7, %v11414_v15 }
 0x387   : > { %v4672_v32 = vrot.slane %v11414_v15, 4  ;;  %v4693_v48 = vrot.slane %v4691_v8, 7  ;;  %v4268_v34 = vadd.f32 %v11232_v4, %v4267_v55  ;;  %v5256_v30 = vshll.u32 %v5022_v13, 16  ;;  %v4894_v55 = vld [vmem:[#allocation4 + $0x8c] sm:$0x1] }
 0x388   : > { %v5244_v37 = vrot.slane %v5243_v18, 4  ;;  %v5252_v39 = vrot.slane %v5250_v24, 4  ;;  %v5261_v40 = vshrl.u32 %v5023_v17, 16  ;;  %v4891_v31 = vsel %vm11240_vm0, %v4671_v29, %v4890_v20  ;;  %v9427_v46 = vpop.f32.mrf.mxu1  ;;  %v5024_v26 = vld [vmem:[#allocation4 + $0x70] sm:$0xf] }
 0x389   : > { %v4696_v44 = vor.u32 %v4694_v16, %v4693_v48  ;;  %v4698_v45 = vrot.slane %v4693_v48, 4  ;;  %v4332_v25 = vmax.f32 %v4268_v34, 0.0  ;;  %4892 = vst [vmem:[#allocation4 + $0x84] sm:$0xf] %v4891_v31  ;;  %v5258_v41 = vrot.slane %v5256_v30, 5 }
 0x38a   : > { %v5249_v50 = vsel %vm9830_vm10, %v5244_v37, %v5248_v22  ;;  %v5253_v4 = vor.u32 %v5252_v39, %v5248_v22  ;;  %v4289_v53 = vadd.f32 %v11432_v38, %v9427_v46  ;;  %v4951_v54 = vld [vmem:[#allocation4 + $0x70] sm:$0xf]  ;;  %v5263_v58 = vrot.slane %v5261_v40, 4  ;;  %v4280_v59 = vpop.f32.mrf.mxu1  ;;  %v5025_v28 = vld [vmem:[#allocation4 + $0x74] sm:$0x1] }
 0x38b   : > { %v4697_v57 = vsel %vm9817_vm8, %v4689_v42, %v4696_v44  ;;  %v4902_v14 = vsel %vm11248_vm6, %v4698_v45, %v4901_v11  ;;  %5460 = vrot.lane.b32.xlu0 %v5249_v50, %s9629_s19  ;;  %v9298_v36 = vpack.c.bf16 %v4332_v25, %v4332_v25  ;;  %4983 = vst.msk [vmem:[#allocation5 + $0x4c] sm:$0xf] %vm4359_vm14, %v4951_v54  ;;  %v5264_v47 = vshll.u32 %v5023_v17, 16  ;;  %v5026_v22 = vld [vmem:[#allocation4 + $0x78] sm:$0xf] }
 0x38c   : > { %4900 = vst.msk [vmem:[#allocation4 + $0x94] sm:$0xf] %vm4359_vm14, %v4697_v57  ;;  %4903 = vst [vmem:[#allocation4 + $0x98] sm:$0x1] %v4902_v14  ;;  %v5254_v60 = vrot.slane %v5253_v4, 4  ;;  %v4337_v63 = vmax.f32 %v4289_v53, 0.0  ;;  %v4281_v3 = vadd.f32 %v11432_v38, %v4280_v59  ;;  %v9428_v6 = vpop.f32.mrf.mxu1 }
 0x38d   : > { %v5270_v2 = vshll.u32 %v5024_v26, 16  ;;  %v4674_v43 = vshrl.u32 %v9298_v36, 16  ;;  %v4677_v33 = vshll.u32 %v9298_v36, 16  ;;  %v5274_v5 = vshrl.u32 %v5024_v26, 16  ;;  %v4956_v12 = vld [vmem:[#allocation4 + $0x90] sm:$0xf] }
 0x38e   : > { %v5259_v52 = vsel %vm9830_vm10, %v5254_v60, %v5258_v41  ;;  %v9303_v21 = vpack.c.bf16 %v4337_v63, %v4337_v63  ;;  %v5266_v7 = vrot.slane %v5264_v47, 5  ;;  %v4335_v10 = vmax.f32 %v4281_v3, 0.0  ;;  %4988 = vst.msk [vmem:[#allocation5 + $0x60] sm:$0xf] %vm4359_vm14, %v4956_v12  ;;  %v4911_v39 = vld [vmem:[#allocation4 + $0xa8] sm:$0xf] }
 0x38f   : > { %v5272_v61 = vrot.slane %v5270_v2, 5  ;;  %v4676_v1 = vrot.slane %v4674_v43, 7  ;;  %5462 = vrot.lane.b32.xlu1 %v5259_v52, %s9629_s19  ;;  %v4292_v42 = vadd.f32 %v11432_v38, %v9428_v6  ;;  %v5276_v62 = vrot.slane %v5274_v5, 4  ;;  %v5027_v31 = vld [vmem:[#allocation4 + $0x7c] sm:$0xf] }
 0x390   : > { %v4717_v13 = vshrl.u32 %v9303_v21, 16  ;;  %v4720_v8 = vshll.u32 %v9303_v21, 16  ;;  %v5267_v16 = vor.u32 %v5266_v7, %v5263_v58  ;;  %v5280_v56 = vshll.u32 %v5025_v28, 16  ;;  %v4954_v34 = vld [vmem:[#allocation4 + $0x84] sm:$0xf]  ;;  %v4283_v58 = vpop.f32.mrf.mxu1 }
 0x391   : > { %v4679_v17 = vor.u32 %v4677_v33, %v4676_v1  ;;  %v4681_v19 = vrot.slane %v4676_v1, 4  ;;  %v9301_v20 = vpack.c.bf16 %v4335_v10, %v4335_v10  ;;  %v4338_v18 = vmax.f32 %v4292_v42, 0.0  ;;  %4986 = vst.msk [vmem:[#allocation5 + $0x58] sm:$0xf] %vm4359_vm14, %v4954_v34  ;;  %v4904_v25 = vld [vmem:[#allocation4 + $0x9c] sm:$0xf] }
 0x392   : > { %v4719_v24 = vrot.slane %v4717_v13, 7  ;;  %v5268_v0 = vrot.slane %v5267_v16, 4  ;;  %v5277_v29 = vor.u32 %v5276_v62, %v5272_v61  ;;  %v5282_v48 = vrot.slane %v5280_v56, 5  ;;  %v5029_v59 = vld [vmem:[#allocation4 + $0x84] sm:$0xf] }
 0x393   : > { %v4680_v11 = vsel %vm9817_vm8, %v4672_v32, %v4679_v17  ;;  %v4895_v37 = vsel %vm11248_vm6, %v4681_v19, %v4894_v55  ;;  %v4700_v30 = vshrl.u32 %v9301_v20, 16  ;;  %v4703_v40 = vshll.u32 %v9301_v20, 16  ;;  %v5028_v32 = vld [vmem:[#allocation4 + $0x80] sm:$0x1]  ;;  %v4957_v53 = vld [vmem:[#allocation4 + $0x94] sm:$0xf] }
 0x394   : > { %4893 = vst.msk [vmem:[#allocation4 + $0x88] sm:$0xf] %vm4359_vm14, %v4680_v11  ;;  %4896 = vst [vmem:[#allocation4 + $0x8c] sm:$0x1] %v4895_v37  ;;  %v4722_v44 = vor.u32 %v4720_v8, %v4719_v24  ;;  %v4723_v45 = vrot.slane %v4719_v24, 4  ;;  %v5273_v15 = vsel %vm9830_vm10, %v5268_v0, %v5272_v61  ;;  %v9304_v46 = vpack.c.bf16 %v4338_v18, %v4338_v18 }
 0x395   : > { %5464 = vrot.lane.b32.xlu0 %v5273_v15, %s9629_s19  ;;  %v11459_v26 = vrot.slane %v4700_v30, 7  ;;  %v5278_v50 = vrot.slane %v5277_v29, 4  ;;  %v5285_v4 = vshrl.u32 %v5026_v22, 16  ;;  %v5288_v41 = vshll.u32 %v5026_v22, 16  ;;  %4989 = vst.msk [vmem:[#allocation5 + $0x64] sm:$0xf] %vm4359_vm14, %v4957_v53 }
 0x396   : > { %v4912_v54 = vsel %vm11240_vm0, %v4722_v44, %v4911_v39  ;;  %v4725_v57 = vshrl.u32 %v9304_v46, 16  ;;  %v4728_v14 = vshll.u32 %v9304_v46, 16  ;;  %v5294_v36 = vshll.u32 %v5027_v31, 16  ;;  %v4915_v28 = vld [vmem:[#allocation4 + $0xb0] sm:$0x1] }
 0x397   : > { %4913 = vst [vmem:[#allocation4 + $0xa8] sm:$0xf] %v4912_v54  ;;  %v4705_v60 = vor.u32 %v4703_v40, %v11459_v26  ;;  %v4706_v63 = vrot.slane %v11459_v26, 4  ;;  %v5283_v47 = vsel %vm9830_vm10, %v5278_v50, %v5282_v48  ;;  %v5287_v2 = vrot.slane %v5285_v4, 4 }
 0x398   : > { %v4727_v43 = vrot.slane %v4725_v57, 7  ;;  %5466 = vrot.lane.b32.xlu1 %v5283_v47, %s9629_s19  ;;  %v5290_v33 = vrot.slane %v5288_v41, 5  ;;  %v5296_v5 = vrot.slane %v5294_v36, 5  ;;  %v5298_v3 = vshrl.u32 %v5027_v31, 16  ;;  %v9431_v7 = vpop.f32.mrf.mxu1 }
 0x399   : > { %v4905_v6 = vsel %vm11240_vm0, %v4705_v60, %v4904_v25  ;;  %v4284_v52 = vadd.f32 %v11432_v38, %v4283_v58  ;;  %v5304_v21 = vshll.u32 %v5028_v32, 16  ;;  %v5309_v61 = vshrl.u32 %v5029_v59, 16 }
 0x39a   : > { %4906 = vst [vmem:[#allocation4 + $0x9c] sm:$0xf] %v4905_v6  ;;  %v4730_v1 = vor.u32 %v4728_v14, %v4727_v43  ;;  %v4732_v10 = vrot.slane %v4727_v43, 4  ;;  %v5291_v42 = vor.u32 %v5290_v33, %v5287_v2  ;;  %v5300_v62 = vrot.slane %v5298_v3, 4  ;;  %v4296_v56 = vpop.f32.mrf.mxu1  ;;  %v4908_v14 = vld [vmem:[#allocation4 + $0xa4] sm:$0x1] }
 0x39b   : > { %v4336_v12 = vmax.f32 %v4284_v52, 0.0  ;;  %v5306_v55 = vrot.slane %v5304_v21, 5  ;;  %v4305_v13 = vadd.f32 %v11432_v38, %v9431_v7  ;;  %v5030_v8 = vld [vmem:[#allocation4 + $0x88] sm:$0xf]  ;;  %v5311_v16 = vrot.slane %v5309_v61, 4 }
 0x39c   : > { %v4731_v17 = vsel %vm9817_vm8, %v4723_v45, %v4730_v1  ;;  %v4916_v19 = vsel %vm11248_vm6, %v4732_v10, %v4915_v28  ;;  %v5292_v20 = vrot.slane %v5291_v42, 4  ;;  %v5301_v18 = vor.u32 %v5300_v62, %v5296_v5  ;;  %v9432_v48 = vpop.f32.mrf.mxu1  ;;  %v5031_v30 = vld [vmem:[#allocation4 + $0x8c] sm:$0x1]  ;;  %v4955_v15 = vld [vmem:[#allocation4 + $0x88] sm:$0xf] }
 0x39d   : > { %4914 = vst.msk [vmem:[#allocation4 + $0xac] sm:$0xf] %vm4359_vm14, %v4731_v17  ;;  %4917 = vst [vmem:[#allocation4 + $0xb0] sm:$0x1] %v4916_v19  ;;  %v9302_v22 = vpack.c.bf16 %v4336_v12, %v4336_v12  ;;  %v4341_v24 = vmax.f32 %v4305_v13, 0.0  ;;  %v5312_v0 = vshll.u32 %v5029_v59, 16  ;;  %v4297_v39 = vadd.f32 %v11432_v38, %v4296_v56 }
 0x39e   : > { %v5318_v29 = vshll.u32 %v5030_v8, 16  ;;  %v5297_v34 = vsel %vm9830_vm10, %v5292_v20, %v5296_v5  ;;  %v5302_v11 = vrot.slane %v5301_v18, 4  ;;  %v5322_v37 = vshrl.u32 %v5030_v8, 16  ;;  %4987 = vst.msk [vmem:[#allocation5 + $0x5c] sm:$0xf] %vm4359_vm14, %v4955_v15 }
 0x39f   : > { %5468 = vrot.lane.b32.xlu0 %v5297_v34, %s9629_s19  ;;  %v4708_v40 = vshrl.u32 %v9302_v22, 16  ;;  %v4711_v31 = vshll.u32 %v9302_v22, 16  ;;  %v9307_v44 = vpack.c.bf16 %v4341_v24, %v4341_v24  ;;  %v5314_v45 = vrot.slane %v5312_v0, 5  ;;  %v4960_v4 = vld [vmem:[#allocation4 + $0xa8] sm:$0xf]  ;;  %v4299_v0 = vpop.f32.mrf.mxu1 }
 0x3a0   : > { %v5307_v25 = vsel %vm9830_vm10, %v5302_v11, %v5306_v55  ;;  %v5320_v46 = vrot.slane %v5318_v29, 5  ;;  %v4339_v32 = vmax.f32 %v4297_v39, 0.0  ;;  %v4308_v50 = vadd.f32 %v11432_v38, %v9432_v48  ;;  %4992 = vst.msk [vmem:[#allocation5 + $0x70] sm:$0xf] %vm4359_vm14, %v4960_v4  ;;  %v4925_v3 = vld [vmem:[#allocation4 + $0xc0] sm:$0xf] }
 0x3a1   : > { %v4710_v41 = vrot.slane %v4708_v40, 7  ;;  %5470 = vrot.lane.b32.xlu1 %v5307_v25, %s9629_s19  ;;  %v4751_v53 = vshrl.u32 %v9307_v44, 16  ;;  %v4754_v54 = vshll.u32 %v9307_v44, 16  ;;  %v5315_v57 = vor.u32 %v5314_v45, %v5311_v16  ;;  %v4958_v5 = vld [vmem:[#allocation4 + $0x9c] sm:$0xf] }
 0x3a2   : > { %v9305_v36 = vpack.c.bf16 %v4339_v32, %v4339_v32  ;;  %v4342_v58 = vmax.f32 %v4308_v50, 0.0  ;;  %v5324_v59 = vrot.slane %v5322_v37, 4  ;;  %v5328_v60 = vshll.u32 %v5031_v30, 16  ;;  %v5032_v21 = vld [vmem:[#allocation4 + $0x90] sm:$0xf] }
 0x3a3   : > { %v4713_v47 = vor.u32 %v4711_v31, %v4710_v41  ;;  %v4715_v2 = vrot.slane %v4710_v41, 4  ;;  %v4753_v43 = vrot.slane %v4751_v53, 7  ;;  %v5316_v33 = vrot.slane %v5315_v57, 4  ;;  %4990 = vst.msk [vmem:[#allocation5 + $0x68] sm:$0xf] %vm4359_vm14, %v4958_v5 }
 0x3a4   : > { %v4734_v6 = vshrl.u32 %v9305_v36, 16  ;;  %v9308_v28 = vpack.c.bf16 %v4342_v58, %v4342_v58  ;;  %v5325_v52 = vor.u32 %v5324_v59, %v5320_v46  ;;  %v4737_v10 = vshll.u32 %v9305_v36, 16  ;;  %v4918_v42 = vld [vmem:[#allocation4 + $0xb4] sm:$0xf]  ;;  %v4961_v8 = vld [vmem:[#allocation4 + $0xac] sm:$0xf] }
 0x3a5   : > { %v4714_v7 = vsel %vm9817_vm8, %v4706_v63, %v4713_v47  ;;  %v4909_v61 = vsel %vm11248_vm6, %v4715_v2, %v4908_v14  ;;  %v4756_v1 = vor.u32 %v4754_v54, %v4753_v43  ;;  %v5033_v62 = vld [vmem:[#allocation4 + $0x94] sm:$0xf]  ;;  %v4757_v12 = vrot.slane %v4753_v43, 4  ;;  %v4929_v16 = vld [vmem:[#allocation4 + $0xc8] sm:$0x1] }
 0x3a6   : > { %4907 = vst.msk [vmem:[#allocation4 + $0xa0] sm:$0xf] %vm4359_vm14, %v4714_v7  ;;  %4910 = vst [vmem:[#allocation4 + $0xa4] sm:$0x1] %v4909_v61  ;;  %v5321_v55 = vsel %vm9830_vm10, %v5316_v33, %v5320_v46  ;;  %v11498_v13 = vrot.slane %v4734_v6, 7  ;;  %v4759_v26 = vshrl.u32 %v9308_v28, 16  ;;  %v4300_v15 = vadd.f32 %v11432_v38, %v4299_v0 }
 0x3a7   : > { %v4926_v63 = vsel %vm11240_vm0, %v4756_v1, %v4925_v3  ;;  %5472 = vrot.lane.b32.xlu0 %v5321_v55, %s9629_s19  ;;  %v5326_v56 = vrot.slane %v5325_v52, 4  ;;  %v5330_v17 = vrot.slane %v5328_v60, 5  ;;  %v5333_v19 = vshrl.u32 %v5032_v21, 16  ;;  %4993 = vst.msk [vmem:[#allocation5 + $0x74] sm:$0xf] %vm4359_vm14, %v4961_v8 }
 0x3a8   : > { %4927 = vst [vmem:[#allocation4 + $0xc0] sm:$0xf] %v4926_v63  ;;  %v4739_v20 = vor.u32 %v4737_v10, %v11498_v13  ;;  %v4761_v18 = vrot.slane %v4759_v26, 7  ;;  %v4762_v22 = vshll.u32 %v9308_v28, 16  ;;  %v5336_v24 = vshll.u32 %v5032_v21, 16 }
 0x3a9   : > { %v5034_v29 = vld [vmem:[#allocation4 + $0x98] sm:$0x1]  ;;  %v5331_v48 = vsel %vm9830_vm10, %v5326_v56, %v5330_v17  ;;  %v5335_v34 = vrot.slane %v5333_v19, 4  ;;  %v5342_v11 = vshll.u32 %v5033_v62, 16  ;;  %v5346_v37 = vshrl.u32 %v5033_v62, 16 }
 0x3aa   : > { %v5035_v39 = vld [vmem:[#allocation4 + $0x9c] sm:$0xf]  ;;  %v4919_v30 = vsel %vm11240_vm0, %v4739_v20, %v4918_v42  ;;  %v4764_v40 = vor.u32 %v4762_v22, %v4761_v18  ;;  %v4766_v31 = vrot.slane %v4761_v18, 4  ;;  %5474 = vrot.lane.b32.xlu1 %v5331_v48, %s9629_s19  ;;  %v5338_v44 = vrot.slane %v5336_v24, 5  ;;  %v5038_v41 = vld [vmem:[#allocation4 + $0xa8] sm:$0xf] }
 0x3ab   : > { %4920 = vst [vmem:[#allocation4 + $0xb4] sm:$0xf] %v4919_v30  ;;  %v5344_v45 = vrot.slane %v5342_v11, 5  ;;  %v5348_v25 = vrot.slane %v5346_v37, 4  ;;  %v5352_v46 = vshll.u32 %v5034_v29, 16  ;;  %v5357_v9 = vshrl.u32 %v5035_v39, 16 }
 0x3ac   : > { %v4765_v32 = vsel %vm9817_vm8, %v4757_v12, %v4764_v40  ;;  %v4930_v50 = vsel %vm11248_vm6, %v4766_v31, %v4929_v16  ;;  %v5339_v4 = vor.u32 %v5338_v44, %v5335_v34  ;;  %v4340_v53 = vmax.f32 %v4300_v15, 0.0  ;;  %v5039_v52 = vld [vmem:[#allocation4 + $0xac] sm:$0xf]  ;;  %v4922_v12 = vld [vmem:[#allocation4 + $0xbc] sm:$0x1] }
 0x3ad   : > { %4928 = vst.msk [vmem:[#allocation4 + $0xc4] sm:$0xf] %vm4359_vm14, %v4765_v32  ;;  %4931 = vst [vmem:[#allocation4 + $0xc8] sm:$0x1] %v4930_v50  ;;  %v5349_v54 = vor.u32 %v5348_v25, %v5344_v45  ;;  %v5354_v57 = vrot.slane %v5352_v46, 5  ;;  %v5360_v36 = vshll.u32 %v5035_v39, 16 }
 0x3ae   : > { %v5036_v14 = vld [vmem:[#allocation4 + $0xa0] sm:$0xf]  ;;  %v5340_v38 = vrot.slane %v5339_v4, 4  ;;  %v5359_v58 = vrot.slane %v5357_v9, 4  ;;  %v5037_v47 = vld [vmem:[#allocation4 + $0xa4] sm:$0x1]  ;;  %v9306_v2 = vpack.c.bf16 %v4340_v53, %v4340_v53 }
 0x3af   : > { %v5366_v59 = vshll.u32 %v5036_v14, 16  ;;  %v5370_v60 = vshrl.u32 %v5036_v14, 16  ;;  %v5350_v43 = vrot.slane %v5349_v54, 4  ;;  %v5362_v33 = vrot.slane %v5360_v36, 5  ;;  %v4959_v42 = vld [vmem:[#allocation4 + $0xa0] sm:$0xf] }
 0x3b0   : > { %v5376_v5 = vshll.u32 %v5037_v47, 16  ;;  %v5345_v3 = vsel %vm9830_vm10, %v5340_v38, %v5344_v45  ;;  %v5381_v21 = vshrl.u32 %v5038_v41, 16  ;;  %v4740_v7 = vrot.slane %v11498_v13, 4  ;;  %4991 = vst.msk [vmem:[#allocation5 + $0x6c] sm:$0xf] %vm4359_vm14, %v4959_v42 }
 0x3b1   : > { %v5368_v6 = vrot.slane %v5366_v59, 5  ;;  %v5372_v28 = vrot.slane %v5370_v60, 4  ;;  %5476 = vrot.lane.b32.xlu0 %v5345_v3, %s9629_s19  ;;  %v4742_v61 = vshrl.u32 %v9306_v2, 16  ;;  %v5355_v1 = vsel %vm9830_vm10, %v5350_v43, %v5354_v57  ;;  %v5040_v19 = vld [vmem:[#allocation4 + $0xb0] sm:$0x1] }
 0x3b2   : > { %v5363_v10 = vor.u32 %v5362_v33, %v5359_v58  ;;  %v4745_v62 = vshll.u32 %v9306_v2, 16  ;;  %5478 = vrot.lane.b32.xlu1 %v5355_v1, %s9629_s19  ;;  %v5383_v26 = vrot.slane %v5381_v21, 4  ;;  %v5384_v8 = vshll.u32 %v5038_v41, 16  ;;  %v5041_v63 = vld [vmem:[#allocation4 + $0xb4] sm:$0xf] }
 0x3b3   : > { %v5373_v55 = vor.u32 %v5372_v28, %v5368_v6  ;;  %v4744_v16 = vrot.slane %v4742_v61, 7  ;;  %v5390_v56 = vshll.u32 %v5039_v52, 16  ;;  %v5394_v17 = vshrl.u32 %v5039_v52, 16  ;;  %v4962_v0 = vld [vmem:[#allocation4 + $0xb4] sm:$0xf] }
 0x3b4   : > { %v5364_v13 = vrot.slane %v5363_v10, 4  ;;  %v5378_v18 = vrot.slane %v5376_v5, 5  ;;  %v5386_v22 = vrot.slane %v5384_v8, 5  ;;  %v5405_v24 = vshrl.u32 %v5041_v63, 16  ;;  %4994 = vst.msk [vmem:[#allocation5 + $0x78] sm:$0xf] %vm4359_vm14, %v4962_v0 }
 0x3b5   : > { %v5374_v20 = vrot.slane %v5373_v55, 4  ;;  %v4747_v29 = vor.u32 %v4745_v62, %v4744_v16  ;;  %v4749_v48 = vrot.slane %v4744_v16, 4  ;;  %v5392_v11 = vrot.slane %v5390_v56, 5  ;;  %v5557_v53 = vld [vmem:[#allocation4] sm:$0xe] }
 0x3b6   : > { %v5369_v34 = vsel %vm9830_vm10, %v5364_v13, %v5368_v6  ;;  %v5387_v39 = vor.u32 %v5386_v22, %v5383_v26  ;;  %v5396_v30 = vrot.slane %v5394_v17, 4  ;;  %v5400_v40 = vshll.u32 %v5040_v19, 16  ;;  %v5558_v14 = vld [vmem:[#allocation4 + $0x4] sm:$0xf]  ;;  %v5559_v5 = vld [vmem:[#allocation4 + $0x8] sm:$0x1] }
 0x3b7   : > { %5480 = vrot.lane.b32.xlu0 %v5369_v34, %s9629_s19  ;;  %v5379_v37 = vsel %vm9830_vm10, %v5374_v20, %v5378_v18  ;;  %v4748_v31 = vsel %vm9817_vm8, %v4740_v7, %v4747_v29  ;;  %v4923_v44 = vsel %vm11248_vm6, %v4749_v48, %v4922_v12  ;;  %v5408_v45 = vshll.u32 %v5041_v63, 16  ;;  %v5561_v7 = vld [vmem:[#allocation4 + $0x10] sm:$0xf]  ;;  %v5560_v62 = vld [vmem:[#allocation4 + $0xc] sm:$0xe] }
 0x3b8   : > { %5482 = vrot.lane.b32.xlu1 %v5379_v37, %s9629_s19  ;;  %4921 = vst.msk [vmem:[#allocation4 + $0xb8] sm:$0xf] %vm4359_vm14, %v4748_v31  ;;  %4924 = vst [vmem:[#allocation4 + $0xbc] sm:$0x1] %v4923_v44  ;;  %v5388_v15 = vrot.slane %v5387_v39, 4  ;;  %v5397_v25 = vor.u32 %v5396_v30, %v5392_v11  ;;  %v5407_v46 = vrot.slane %v5405_v24, 4 }
 0x3b9   : > { %v5410_v32 = vrot.slane %v5408_v45, 5  ;;  %v5402_v9 = vrot.slane %v5400_v40, 5  ;;  %v9122_v59 = vrot.slane %v5557_v53, 9  ;;  %v5655_v33 = vrot.slane %v5558_v14, 5  ;;  %v5564_v8 = vld [vmem:[#allocation4 + $0x1c] sm:$0xf] }
 0x3ba   : > { %v5393_v50 = vsel %vm9830_vm10, %v5388_v15, %v5392_v11  ;;  %v5398_v4 = vrot.slane %v5397_v25, 4  ;;  %v5658_v21 = vrot.slane %v5559_v5, 5  ;;  %v5662_v55 = vrot.slane %v5561_v7, 5  ;;  %v5562_v13 = vld [vmem:[#allocation4 + $0x14] sm:$0x1] }
 0x3bb   : > { %5484 = vrot.lane.b32.xlu0 %v5393_v50, %s9629_s19  ;;  %v5411_v49 = vor.u32 %v5410_v32, %v5407_v46  ;;  %v5656_v10 = vsel %vm10094_vm13, %v9122_v59, %v5655_v33  ;;  %v5657_v42 = vrot.slane %v5655_v33, 4  ;;  %v9123_v16 = vrot.slane %v5560_v62, 9  ;;  %v5563_v56 = vld [vmem:[#allocation4 + $0x18] sm:$0xe]  ;;  %v5567_v18 = vld [vmem:[#allocation4 + $0x28] sm:$0xf] }
 0x3bc   : > { %v5403_v23 = vsel %vm9830_vm10, %v5398_v4, %v5402_v9  ;;  %v5433_v41 = vpop.permute.xlu0 %5432  ;;  %v5664_v19 = vrot.slane %v5662_v55, 4  ;;  %v5669_v20 = vrot.slane %v5564_v8, 5  ;;  %v5665_v22 = vrot.slane %v5562_v13, 5  ;;  %v5565_v0 = vld [vmem:[#allocation4 + $0x20] sm:$0x1] }
 0x3bd   : > { %5486 = vrot.lane.b32.xlu1 %v5403_v23, %s9629_s19  ;;  %5527 = vst.msk [vmem:[#allocation5 + $0x8] sm:$0xf] %vm5524_vm1, %v5433_v41  ;;  %v5412_v36 = vrot.slane %v5411_v49, 4  ;;  %v5659_v63 = vsel %vm10094_vm13, %v5657_v42, %v5658_v21  ;;  %v5663_v17 = vsel %vm10094_vm13, %v9123_v16, %v5662_v55  ;;  %v9124_v24 = vrot.slane %v5563_v56, 9  ;;  %v5566_v29 = vld [vmem:[#allocation4 + $0x24] sm:$0xe] }
 0x3be   : > { %v5666_v48 = vsel %vm10094_vm13, %v5664_v19, %v5665_v22  ;;  %v5671_v11 = vrot.slane %v5669_v20, 4  ;;  %v5676_v37 = vrot.slane %v5567_v18, 5  ;;  %v5570_v30 = vld [vmem:[#allocation4 + $0x34] sm:$0xf]  ;;  %v5672_v40 = vrot.slane %v5565_v0, 5 }
 0x3bf   : > { %v5042_v54 = vld [vmem:[#allocation4 + $0xb8] sm:$0xf]  ;;  %v5043_v57 = vld [vmem:[#allocation4 + $0xbc] sm:$0x1]  ;;  %v5670_v34 = vsel %vm10094_vm13, %v9124_v24, %v5669_v20  ;;  %v9125_v31 = vrot.slane %v5566_v29, 9  ;;  %v5683_v32 = vrot.slane %v5570_v30, 5 }
 0x3c0   : > { %v5414_v38 = vshll.u32 %v5042_v54, 16  ;;  %v5418_v58 = vshrl.u32 %v5042_v54, 16  ;;  %v4963_v60 = vld [vmem:[#allocation4 + $0xb8] sm:$0xf]  ;;  %v5424_v43 = vshll.u32 %v5043_v57, 16  ;;  %v5673_v15 = vsel %vm10094_vm13, %v5671_v11, %v5672_v40 }
 0x3c1   : > { %4995 = vst.msk [vmem:[#allocation5 + $0x7c] sm:$0xf] %vm4359_vm14, %v4963_v60  ;;  %v5568_v44 = vld [vmem:[#allocation4 + $0x2c] sm:$0x1]  ;;  %v5569_v45 = vld [vmem:[#allocation4 + $0x30] sm:$0xe]  ;;  %v5677_v25 = vsel %vm10094_vm13, %v9125_v31, %v5676_v37 }
 0x3c2   : > { %v5416_v47 = vrot.slane %v5414_v38, 5  ;;  %v5420_v2 = vrot.slane %v5418_v58, 4  ;;  %v5426_v1 = vrot.slane %v5424_v43, 5  ;;  %v5678_v46 = vrot.slane %v5676_v37, 4  ;;  %v5573_v4 = vld [vmem:[#allocation4 + $0x40] sm:$0xf] }
 0x3c3   : > { %v5435_v28 = vpop.permute.xlu1 %5434  ;;  %v5437_v52 = vpop.permute.xlu0 %5436  ;;  %v5679_v9 = vrot.slane %v5568_v44, 5  ;;  %v9126_v23 = vrot.slane %v5569_v45, 9  ;;  %v5571_v49 = vld [vmem:[#allocation4 + $0x38] sm:$0x1]  ;;  %v5572_v41 = vld [vmem:[#allocation4 + $0x3c] sm:$0xe] }
 0x3c4   : > { %v5417_v3 = vsel %vm9830_vm10, %v5412_v36, %v5416_v47  ;;  %v5421_v6 = vor.u32 %v5420_v2, %v5416_v47  ;;  %5528 = vst.msk [vmem:[#allocation5 + $0xc] sm:$0xf] %vm5524_vm1, %v5435_v28  ;;  %5529 = vst.msk [vmem:[#allocation5 + $0x10] sm:$0xf] %vm5524_vm1, %v5437_v52  ;;  %v5685_v14 = vrot.slane %v5683_v32, 4  ;;  %v5690_v36 = vrot.slane %v5573_v4, 5 }
 0x3c5   : > { %5488 = vrot.lane.b32.xlu0 %v5417_v3, %s9629_s19  ;;  %v5680_v53 = vsel %vm10094_vm13, %v5678_v46, %v5679_v9  ;;  %v5684_v54 = vsel %vm10094_vm13, %v9126_v23, %v5683_v32  ;;  %v5576_v38 = vld [vmem:[#allocation4 + $0x4c] sm:$0xf]  ;;  %v5686_v58 = vrot.slane %v5571_v49, 5  ;;  %v9127_v59 = vrot.slane %v5572_v41, 9  ;;  %v5574_v60 = vld [vmem:[#allocation4 + $0x44] sm:$0x1] }
 0x3c6   : > { %v5422_v61 = vrot.slane %v5421_v6, 4  ;;  %v5575_v47 = vld [vmem:[#allocation4 + $0x48] sm:$0xe]  ;;  %v5692_v5 = vrot.slane %v5690_v36, 4  ;;  %v5697_v3 = vrot.slane %v5576_v38, 5  ;;  %v5693_v28 = vrot.slane %v5574_v60, 5 }
 0x3c7   : > { %v5687_v2 = vsel %vm10094_vm13, %v5685_v14, %v5686_v58  ;;  %v5691_v43 = vsel %vm10094_vm13, %v9127_v59, %v5690_v36  ;;  %v5579_v6 = vld [vmem:[#allocation4 + $0x58] sm:$0xf]  ;;  %v9128_v52 = vrot.slane %v5575_v47, 9  ;;  %v5577_v21 = vld [vmem:[#allocation4 + $0x50] sm:$0x1]  ;;  %vm5861_vm8 = vcmask 191616  }
 0x3c8   : > { %v5427_v12 = vsel %vm9830_vm10, %v5422_v61, %v5426_v1  ;;  %v5439_v26 = vpop.permute.xlu1 %5438  ;;  %v5578_v7 = vld [vmem:[#allocation4 + $0x54] sm:$0xe]  ;;  %v5694_v61 = vsel %vm10094_vm13, %v5692_v5, %v5693_v28  ;;  %v5704_v42 = vrot.slane %v5579_v6, 5  ;;  %v5582_v62 = vld [vmem:[#allocation4 + $0x64] sm:$0xf]  ;;  %vm8044_vm0 = vcmask 585216  }
 0x3c9   : > { %5490 = vrot.lane.b32.xlu1 %v5427_v12, %s9629_s19  ;;  %5765 = vrot.lane.b32.xlu0 %v5656_v10, %s9630_s27  ;;  %5530 = vst.msk [vmem:[#allocation5 + $0x14] sm:$0xf] %vm5524_vm1, %v5439_v26  ;;  %v5698_v1 = vsel %vm10094_vm13, %v9128_v52, %v5697_v3  ;;  %v5699_v10 = vrot.slane %v5697_v3, 4  ;;  %v5700_v12 = vrot.slane %v5577_v21, 5  ;;  %v9129_v55 = vrot.slane %v5578_v7, 9 }
 0x3ca   : > { %v5580_v8 = vld [vmem:[#allocation4 + $0x5c] sm:$0x1]  ;;  %v5706_v56 = vrot.slane %v5704_v42, 4  ;;  %v5585_v19 = vld [vmem:[#allocation4 + $0x70] sm:$0xf]  ;;  %vm8232_vm6 = vcmask 588800  }
 0x3cb   : > { %v5701_v16 = vsel %vm10094_vm13, %v5699_v10, %v5700_v12  ;;  %v5705_v13 = vsel %vm10094_vm13, %v9129_v55, %v5704_v42  ;;  %v5707_v20 = vrot.slane %v5580_v8, 5  ;;  %v5583_v24 = vld [vmem:[#allocation4 + $0x68] sm:$0x1]  ;;  %v5584_v0 = vld [vmem:[#allocation4 + $0x6c] sm:$0xe]  ;;  %v5718_v11 = vrot.slane %v5585_v19, 5 }
 0x3cc   : > { %v5588_v37 = vld [vmem:[#allocation4 + $0x7c] sm:$0xf]  ;;  %v5714_v30 = vrot.slane %v5583_v24, 5  ;;  %v9131_v40 = vrot.slane %v5584_v0, 9  ;;  %v5586_v31 = vld [vmem:[#allocation4 + $0x74] sm:$0x1] }
 0x3cd   : > { %5767 = vrot.lane.b32.xlu1 %v5659_v63, %s9630_s27  ;;  %5769 = vrot.lane.b32.xlu0 %v5663_v17, %s9630_s27  ;;  %v5581_v63 = vld [vmem:[#allocation4 + $0x60] sm:$0xe]  ;;  %v5711_v17 = vrot.slane %v5582_v62, 5  ;;  %v5708_v29 = vsel %vm10094_vm13, %v5706_v56, %v5707_v20  ;;  %v5587_v44 = vld [vmem:[#allocation4 + $0x78] sm:$0xe]  ;;  %v5725_v46 = vrot.slane %v5588_v37, 5 }
 0x3ce   : > { %v9130_v18 = vrot.slane %v5581_v63, 9  ;;  %v5591_v32 = vld [vmem:[#allocation4 + $0x88] sm:$0xf]  ;;  %v5721_v4 = vrot.slane %v5586_v31, 5  ;;  %v9132_v9 = vrot.slane %v5587_v44, 9 }
 0x3cf   : > { %v5441_v39 = vpop.permute.xlu0 %5440  ;;  %v5589_v23 = vld [vmem:[#allocation4 + $0x80] sm:$0x1]  ;;  %v5590_v49 = vld [vmem:[#allocation4 + $0x84] sm:$0xe]  ;;  %v5594_v14 = vld [vmem:[#allocation4 + $0x94] sm:$0xf] }
 0x3d0   : > { %5531 = vst.msk [vmem:[#allocation5 + $0x18] sm:$0xf] %vm5524_vm1, %v5441_v39  ;;  %v5728_v36 = vrot.slane %v5589_v23, 5  ;;  %v9133_v38 = vrot.slane %v5590_v49, 9  ;;  %v5592_v58 = vld [vmem:[#allocation4 + $0x8c] sm:$0x1] }
 0x3d1   : > { %5771 = vrot.lane.b32.xlu1 %v5666_v48, %s9630_s27  ;;  %5773 = vrot.lane.b32.xlu0 %v5670_v34, %s9630_s27  ;;  %v5712_v48 = vsel %vm10094_vm13, %v9130_v18, %v5711_v17  ;;  %v5713_v34 = vrot.slane %v5711_v17, 4  ;;  %v5593_v59 = vld [vmem:[#allocation4 + $0x90] sm:$0xe]  ;;  %v5597_v5 = vld [vmem:[#allocation4 + $0xa0] sm:$0xf]  ;;  %v5735_v3 = vrot.slane %v5592_v58, 5 }
 0x3d2   : > { %v9134_v6 = vrot.slane %v5593_v59, 9  ;;  %v5595_v28 = vld [vmem:[#allocation4 + $0x98] sm:$0x1]  ;;  %v5596_v52 = vld [vmem:[#allocation4 + $0x9c] sm:$0xe]  ;;  %v5746_v10 = vrot.slane %v5597_v5, 5 }
 0x3d3   : > { %v5443_v50 = vpop.permute.xlu1 %5442  ;;  %v5715_v45 = vsel %vm10094_vm13, %v5713_v34, %v5714_v30  ;;  %v5600_v42 = vld [vmem:[#allocation4 + $0xac] sm:$0xf]  ;;  %v5742_v62 = vrot.slane %v5595_v28, 5  ;;  %v9135_v12 = vrot.slane %v5596_v52, 9  ;;  %v5598_v55 = vld [vmem:[#allocation4 + $0xa4] sm:$0x1] }
 0x3d4   : > { %5532 = vst.msk [vmem:[#allocation5 + $0x1c] sm:$0xf] %vm5524_vm1, %v5443_v50  ;;  %v5603_v17 = vld [vmem:[#allocation4 + $0xb8] sm:$0xf]  ;;  %v5749_v19 = vrot.slane %v5598_v55, 5 }
 0x3d5   : > { %5775 = vrot.lane.b32.xlu1 %v5673_v15, %s9630_s27  ;;  %5777 = vrot.lane.b32.xlu0 %v5677_v25, %s9630_s27  ;;  %v5719_v15 = vsel %vm10094_vm13, %v9131_v40, %v5718_v11  ;;  %v5720_v25 = vrot.slane %v5718_v11, 4  ;;  %v5747_v63 = vsel %vm10094_vm13, %v9135_v12, %v5746_v10  ;;  %v5601_v18 = vld [vmem:[#allocation4 + $0xb0] sm:$0x1]  ;;  %v5904_v58 = vld [vmem:[#allocation4 + $0x48] sm:$0xf] }
 0x3d6   : > { %v5756_v11 = vrot.slane %v5601_v18, 5  ;;  %v5905_v59 = vld [vmem:[#allocation4 + $0x4c] sm:$0xf]  ;;  %v6088_v52 = vld [vmem:[#allocation4 + $0x10] sm:$0xf] }
 0x3d7   : > { %v5722_v41 = vsel %vm10094_vm13, %v5720_v25, %v5721_v4  ;;  %v5894_v25 = vld [vmem:[#allocation4 + $0xc] sm:$0xf]  ;;  %v5897_v4 = vld [vmem:[#allocation4 + $0x1c] sm:$0xf]  ;;  %v6149_v12 = vshrl.u32 %v6088_v52, 16 }
 0x3d8   : > { %v5445_v57 = vpop.permute.xlu0 %5444  ;;  %v6087_v5 = vld [vmem:[#allocation4 + $0xc] sm:$0xf] }
 0x3d9   : > { %5779 = vrot.lane.b32.xlu1 %v5680_v53, %s9630_s27  ;;  %5781 = vrot.lane.b32.xlu0 %v5684_v54, %s9630_s27  ;;  %5533 = vst.msk [vmem:[#allocation5 + $0x20] sm:$0xf] %vm5524_vm1, %v5445_v57  ;;  %v5726_v53 = vsel %vm10094_vm13, %v9132_v9, %v5725_v46  ;;  %v5727_v54 = vrot.slane %v5725_v46, 4  ;;  %v5732_v57 = vrot.slane %v5591_v32, 5  ;;  %v5895_v32 = vld [vmem:[#allocation4 + $0x10] sm:$0xf] }
 0x3da   : > { %v5898_v9 = vld [vmem:[#allocation4 + $0x24] sm:$0xf]  ;;  %v5910_v28 = vld [vmem:[#allocation4 + $0x6c] sm:$0xf] }
 0x3db   : > { %v5729_v60 = vsel %vm10094_vm13, %v5727_v54, %v5728_v36  ;;  %v5733_v47 = vsel %vm10094_vm13, %v9133_v38, %v5732_v57  ;;  %v5901_v54 = vld [vmem:[#allocation4 + $0x34] sm:$0xf]  ;;  %v5903_v38 = vld [vmem:[#allocation4 + $0x40] sm:$0xf] }
 0x3dc   : > { %v5447_v33 = vpop.permute.xlu1 %5446 }
 0x3dd   : > { %5783 = vrot.lane.b32.xlu1 %v5687_v2, %s9630_s27  ;;  %5785 = vrot.lane.b32.xlu0 %v5691_v43, %s9630_s27  ;;  %5534 = vst.msk [vmem:[#allocation5 + $0x24] sm:$0xf] %vm5524_vm1, %v5447_v33  ;;  %v5734_v43 = vrot.slane %v5732_v57, 4  ;;  %v5739_v33 = vrot.slane %v5594_v14, 5  ;;  %v5902_v57 = vld [vmem:[#allocation4 + $0x3c] sm:$0xf] }
 0x3df   : > { %v5736_v21 = vsel %vm10094_vm13, %v5734_v43, %v5735_v3  ;;  %v5740_v7 = vsel %vm10094_vm13, %v9134_v6, %v5739_v33  ;;  %v5907_v43 = vld [vmem:[#allocation4 + $0x58] sm:$0xf]  ;;  %v5909_v6 = vld [vmem:[#allocation4 + $0x64] sm:$0xf] }
 0x3e1   : > { %5787 = vrot.lane.b32.xlu1 %v5694_v61, %s9630_s27  ;;  %5789 = vrot.lane.b32.xlu0 %v5698_v1, %s9630_s27  ;;  %v5741_v1 = vrot.slane %v5739_v33, 4  ;;  %v5908_v33 = vld [vmem:[#allocation4 + $0x60] sm:$0xf] }
 0x3e3   : > { %v5449_v26 = vpop.permute.xlu0 %5448  ;;  %v5743_v8 = vsel %vm10094_vm13, %v5741_v1, %v5742_v62  ;;  %v6145_v1 = vshll.u32 %v6088_v52, 16  ;;  %v5912_v62 = vld [vmem:[#allocation4 + $0x78] sm:$0xf]  ;;  %v7180_v52 = vld [vmem:[#allocation4 + $0x1c] sm:$0xf] }
 0x3e4   : > { %5535 = vst.msk [vmem:[#allocation5 + $0x28] sm:$0xf] %vm5524_vm1, %v5449_v26  ;;  %v5599_v26 = vld [vmem:[#allocation4 + $0xa8] sm:$0xe] }
 0x3e5   : > { %5791 = vrot.lane.b32.xlu1 %v5701_v16, %s9630_s27  ;;  %5793 = vrot.lane.b32.xlu0 %v5705_v13, %s9630_s27  ;;  %v5748_v16 = vrot.slane %v5746_v10, 4  ;;  %v5753_v13 = vrot.slane %v5600_v42, 5  ;;  %v9136_v20 = vrot.slane %v5599_v26, 9  ;;  %v6090_v10 = vld [vmem:[#allocation4 + $0x18] sm:$0xf] }
 0x3e6   : > { %v5451_v22 = vpop.permute.xlu1 %5450  ;;  %v5911_v42 = vld [vmem:[#allocation4 + $0x70] sm:$0xf]  ;;  %v6091_v26 = vld [vmem:[#allocation4 + $0x1c] sm:$0xf]  ;;  %v6163_v18 = vshll.u32 %v6090_v10, 16 }
 0x3e7   : > { %5536 = vst.msk [vmem:[#allocation5 + $0x2c] sm:$0xf] %vm5524_vm1, %v5451_v22  ;;  %v5602_v22 = vld [vmem:[#allocation4 + $0xb4] sm:$0xe]  ;;  %v5750_v24 = vsel %vm10094_vm13, %v5748_v16, %v5749_v19  ;;  %v5754_v0 = vsel %vm10094_vm13, %v9136_v20, %v5753_v13  ;;  %v5914_v19 = vld [vmem:[#allocation4 + $0x84] sm:$0xf] }
 0x3e8   : > { %v9137_v37 = vrot.slane %v5602_v22, 9  ;;  %v6151_v20 = vrot.slane %v6149_v12, 4  ;;  %v6169_v22 = vshll.u32 %v6091_v26, 16 }
 0x3e9   : > { %5795 = vrot.lane.b32.xlu1 %v5708_v29, %s9630_s27  ;;  %5797 = vrot.lane.b32.xlu0 %v5712_v48, %s9630_s27  ;;  %v5755_v29 = vrot.slane %v5753_v13, 4  ;;  %v5760_v48 = vrot.slane %v5603_v17, 5  ;;  %v6160_v17 = vshrl.u32 %v6090_v10, 16 }
 0x3ea   : > { %v5453_v39 = vpop.permute.xlu0 %5452 }
 0x3eb   : > { %5537 = vst.msk [vmem:[#allocation5 + $0x30] sm:$0xf] %vm5524_vm1, %v5453_v39  ;;  %v5604_v39 = vld [vmem:[#allocation4 + $0xbc] sm:$0x1]  ;;  %v5757_v30 = vsel %vm10094_vm13, %v5755_v29, %v5756_v11  ;;  %v5761_v40 = vsel %vm10094_vm13, %v9137_v37, %v5760_v48  ;;  %v5762_v31 = vrot.slane %v5760_v48, 4 }
 0x3ec   : > { %v5763_v44 = vrot.slane %v5604_v39, 5  ;;  %v6089_v48 = vld [vmem:[#allocation4 + $0x14] sm:$0x1]  ;;  %v5915_v11 = vld [vmem:[#allocation4 + $0x88] sm:$0xf]  ;;  %v6165_v39 = vrot.slane %v6163_v18, 5 }
 0x3ed   : > { %5799 = vrot.lane.b32.xlu1 %v5715_v45, %s9630_s27  ;;  %5801 = vrot.lane.b32.xlu0 %v5719_v15, %s9630_s27 }
 0x3ee   : > { %v5455_v50 = vpop.permute.xlu1 %5454  ;;  %v5764_v15 = vsel %vm10094_vm13, %v5762_v31, %v5763_v44  ;;  %v6155_v31 = vshll.u32 %v6089_v48, 16 }
 0x3ef   : > { %5538 = vst.msk [vmem:[#allocation5 + $0x34] sm:$0xf] %vm5524_vm1, %v5455_v50  ;;  %v5896_v50 = vld [vmem:[#allocation4 + $0x18] sm:$0xf] }
 0x3f1   : > { %5803 = vrot.lane.b32.xlu1 %v5722_v41, %s9630_s27  ;;  %5805 = vrot.lane.b32.xlu0 %v5726_v53, %s9630_s27  ;;  %v5899_v41 = vld [vmem:[#allocation4 + $0x28] sm:$0xf]  ;;  %v5900_v53 = vld [vmem:[#allocation4 + $0x30] sm:$0xf] }
 0x3f4   : > { %v5457_v2 = vpop.permute.xlu0 %5456 }
 0x3f5   : > { %5807 = vrot.lane.b32.xlu1 %v5729_v60, %s9630_s27  ;;  %5809 = vrot.lane.b32.xlu0 %v5733_v47, %s9630_s27  ;;  %5539 = vst.msk [vmem:[#allocation5 + $0x38] sm:$0xf] %vm5524_vm1, %v5457_v2  ;;  %v5906_v60 = vld [vmem:[#allocation4 + $0x54] sm:$0xf] }
 0x3f8   : > { %v5459_v61 = vpop.permute.xlu1 %5458 }
 0x3f9   : > { %5811 = vrot.lane.b32.xlu1 %v5736_v21, %s9630_s27  ;;  %5813 = vrot.lane.b32.xlu0 %v5740_v7, %s9630_s27  ;;  %5540 = vst.msk [vmem:[#allocation5 + $0x3c] sm:$0xf] %vm5524_vm1, %v5459_v61  ;;  %v6136_v7 = vshrl.u32 %v6087_v5, 16  ;;  %v6139_v61 = vshll.u32 %v6087_v5, 16  ;;  %v7179_v5 = vld [vmem:[#allocation4 + $0x18] sm:$0xf] }
 0x3fa   : > { %v7228_v10 = vshrl.u32 %v7179_v5, 16 }
 0x3fb   : > { %v6138_v16 = vrot.slane %v6136_v7, 4  ;;  %v6141_v13 = vrot.slane %v6139_v61, 5 }
 0x3fc   : > { %v7230_v18 = vrot.slane %v7228_v10, 4 }
 0x3fd   : > { %v5461_v56 = vpop.permute.xlu0 %5460  ;;  %5815 = vrot.lane.b32.xlu1 %v5743_v8, %s9630_s27  ;;  %5817 = vrot.lane.b32.xlu0 %v5747_v63, %s9630_s27  ;;  %v5913_v63 = vld [vmem:[#allocation4 + $0x7c] sm:$0xf]  ;;  %v6142_v29 = vor.u32 %v6141_v13, %v6138_v16 }
 0x3fe   : > { %5541 = vst.msk [vmem:[#allocation5 + $0x40] sm:$0xf] %vm5524_vm1, %v5461_v56  ;;  %v6147_v56 = vrot.slane %v6145_v1, 5  ;;  %v6653_v1 = vld [vmem:[#allocation4 + $0x20] sm:$0x1] }
 0x400   : > { %v6152_v37 = vor.u32 %v6151_v20, %v6147_v56 }
 0x401   : > { %v5463_v34 = vpop.permute.xlu1 %5462  ;;  %5819 = vrot.lane.b32.xlu1 %v5750_v24, %s9630_s27  ;;  %5821 = vrot.lane.b32.xlu0 %v5754_v0, %s9630_s27  ;;  %v6173_v24 = vshrl.u32 %v6091_v26, 16  ;;  %v5916_v0 = vld [vmem:[#allocation4 + $0x90] sm:$0xf]  ;;  %v7237_v26 = vshll.u32 %v7180_v52, 16 }
 0x402   : > { %5542 = vst.msk [vmem:[#allocation5 + $0x44] sm:$0xf] %vm5524_vm1, %v5463_v34  ;;  %v6162_v34 = vrot.slane %v6160_v17, 4  ;;  %v7182_v17 = vld [vmem:[#allocation4 + $0x24] sm:$0xf] }
 0x403   : > { %v11727_v48 = vrot.slane %v7237_v26, 5 }
 0x405   : > { %5823 = vrot.lane.b32.xlu1 %v5757_v30, %s9630_s27  ;;  %5825 = vrot.lane.b32.xlu0 %v5761_v40, %s9630_s27  ;;  %v6171_v30 = vrot.slane %v6169_v22, 5  ;;  %v6175_v40 = vrot.slane %v6173_v24, 4 }
 0x407   : > { %v5465_v45 = vpop.permute.xlu0 %5464 }
 0x408   : > { %5543 = vst.msk [vmem:[#allocation5 + $0x48] sm:$0xf] %vm5524_vm1, %v5465_v45  ;;  %v6092_v45 = vld [vmem:[#allocation4 + $0x20] sm:$0x1] }
 0x409   : > { %5827 = vrot.lane.b32.xlu1 %v5764_v15, %s9630_s27  ;;  %5958 = vrot.lane.b32.xlu0 %v5894_v25, %s9628_s18  ;;  %v6649_v15 = vld [vmem:[#allocation4 + $0x10] sm:$0xf]  ;;  %v5917_v25 = vld [vmem:[#allocation4 + $0x94] sm:$0xf] }
 0x40a   : > { %v5467_v46 = vpop.permute.xlu1 %5466 }
 0x40b   : > { %5544 = vst.msk [vmem:[#allocation5 + $0x4c] sm:$0xf] %vm5524_vm1, %v5467_v46  ;;  %v5918_v46 = vld [vmem:[#allocation4 + $0x9c] sm:$0xf] }
 0x40d   : > { %5960 = vrot.lane.b32.xlu1 %v5895_v32, %s9628_s18  ;;  %5962 = vrot.lane.b32.xlu0 %v5896_v50, %s9628_s18  ;;  %v6143_v32 = vrot.slane %v6142_v29, 4  ;;  %v6153_v50 = vrot.slane %v6152_v37, 4  ;;  %v7255_v37 = vshll.u32 %v7182_v17, 16 }
 0x411   : > { %v5469_v23 = vpop.permute.xlu0 %5468  ;;  %5964 = vrot.lane.b32.xlu1 %v5897_v4, %s9628_s18  ;;  %5966 = vrot.lane.b32.xlu0 %v5898_v9, %s9628_s18  ;;  %v6166_v4 = vor.u32 %v6165_v39, %v6162_v34  ;;  %v6176_v9 = vor.u32 %v6175_v40, %v6171_v30  ;;  %v9557_v40 = vld [vmem:[%s12645_s3 + $0x20] ss:$0 sps:$4 sm:$0xff]  }
 0x412   : > { %5545 = vst.msk [vmem:[#allocation5 + $0x50] sm:$0xf] %vm5524_vm1, %v5469_v23  ;;  %v6157_v23 = vrot.slane %v6155_v31, 5  ;;  %9513 = vmatprep.subr.msk.bf16.mxu1 %vm8281_vm2, %v9557_v40 }
 0x413   : > { %v5471_v49 = vpop.permute.xlu1 %5470 }
 0x414   : > { %5546 = vst.msk [vmem:[#allocation5 + $0x54] sm:$0xf] %vm5524_vm1, %v5471_v49  ;;  %v6179_v49 = vshll.u32 %v6092_v45, 16  ;;  %v6986_v45 = vld [vmem:[#allocation4 + $0x18] sm:$0xf] }
 0x415   : > { %5968 = vrot.lane.b32.xlu1 %v5899_v41, %s9628_s18  ;;  %5970 = vrot.lane.b32.xlu0 %v5900_v53, %s9628_s18 }
 0x419   : > { %v5473_v14 = vpop.permute.xlu0 %5472  ;;  %5972 = vrot.lane.b32.xlu1 %v5901_v54, %s9628_s18  ;;  %5974 = vrot.lane.b32.xlu0 %v5902_v57, %s9628_s18  ;;  %v6746_v54 = vrot.slane %v6649_v15, 5  ;;  %v6148_v57 = vsel %vm9830_vm10, %v6143_v32, %v6147_v56  ;;  %v6756_v56 = vrot.slane %v6653_v1, 5  ;;  %v8283_v32 = vsel %vm8281_vm2, %v9557_v40, 0 }
 0x41a   : > { %5547 = vst.msk [vmem:[#allocation5 + $0x58] sm:$0xf] %vm5524_vm1, %v5473_v14  ;;  %v6158_v14 = vsel %vm9830_vm10, %v6153_v50, %v6157_v23  ;;  %v6987_v50 = vld [vmem:[#allocation4 + $0x1c] sm:$0xf]  ;;  %9434 = vmatpush3.bf16.msra.mxu1 %v8283_v32 }
 0x41c   : > { %v5475_v36 = vpop.permute.xlu1 %5474 }
 0x41d   : > { %5548 = vst.msk [vmem:[#allocation5 + $0x5c] sm:$0xf] %vm5524_vm1, %v5475_v36  ;;  %5976 = vrot.lane.b32.xlu1 %v5903_v38, %s9628_s18  ;;  %5978 = vrot.lane.b32.xlu0 %v5904_v58, %s9628_s18  ;;  %v6167_v36 = vrot.slane %v6166_v4, 4  ;;  %v6177_v38 = vrot.slane %v6176_v9, 4  ;;  %v6652_v58 = vld [vmem:[#allocation4 + $0x1c] sm:$0xf] }
 0x41e   : > { %v7257_v9 = vrot.slane %v7255_v37, 5 }
 0x421   : > { %5980 = vrot.lane.b32.xlu1 %v5905_v59, %s9628_s18  ;;  %5982 = vrot.lane.b32.xlu0 %v5906_v60, %s9628_s18  ;;  %v6181_v59 = vrot.slane %v6179_v49, 5  ;;  %v6648_v60 = vld [vmem:[#allocation4 + $0xc] sm:$0xe] }
 0x422   : > { %v9138_v7 = vrot.slane %v6648_v60, 9 }
 0x423   : > { %v5477_v47 = vpop.permute.xlu0 %5476 }
 0x424   : > { %5549 = vst.msk [vmem:[#allocation5 + $0x60] sm:$0xf] %vm5524_vm1, %v5477_v47  ;;  %v5479_v2 = vpop.permute.xlu1 %5478 }
 0x425   : > { %5550 = vst.msk [vmem:[#allocation5 + $0x64] sm:$0xf] %vm5524_vm1, %v5479_v2  ;;  %5984 = vrot.lane.b32.xlu1 %v5907_v43, %s9628_s18  ;;  %5986 = vrot.lane.b32.xlu0 %v5908_v33, %s9628_s18  ;;  %v6650_v43 = vld [vmem:[#allocation4 + $0x14] sm:$0x1]  ;;  %v6753_v33 = vrot.slane %v6652_v58, 5 }
 0x426   : > { %v6749_v61 = vrot.slane %v6650_v43, 5  ;;  %v6093_v58 = vld [vmem:[#allocation4 + $0x24] sm:$0xf] }
 0x427   : > { %v6755_v12 = vrot.slane %v6753_v33, 4 }
 0x429   : > { %v5481_v3 = vpop.permute.xlu0 %5480  ;;  %5988 = vrot.lane.b32.xlu1 %v5909_v6, %s9628_s18  ;;  %5990 = vrot.lane.b32.xlu0 %v5910_v28, %s9628_s18  ;;  %v6182_v6 = vsel %vm9830_vm10, %v6177_v38, %v6181_v59  ;;  %v6748_v28 = vrot.slane %v6746_v54, 4  ;;  %v6988_v38 = vld [vmem:[#allocation4 + $0x24] sm:$0xf]  ;;  %v6989_v59 = vld [vmem:[#allocation4 + $0x28] sm:$0xf] }
 0x42a   : > { %5551 = vst.msk [vmem:[#allocation5 + $0x68] sm:$0xf] %vm5524_vm1, %v5481_v3  ;;  %v5483_v21 = vpop.permute.xlu1 %5482  ;;  %v6172_v3 = vsel %vm9830_vm10, %v6167_v36, %v6171_v30 }
 0x42b   : > { %5552 = vst.msk [vmem:[#allocation5 + $0x6c] sm:$0xf] %vm5524_vm1, %v5483_v21  ;;  %v6651_v21 = vld [vmem:[#allocation4 + $0x18] sm:$0xe]  ;;  %v6750_v16 = vsel %vm10094_vm13, %v6748_v28, %v6749_v61  ;;  %v6187_v61 = vshll.u32 %v6093_v58, 16 }
 0x42c   : > { %v9139_v13 = vrot.slane %v6651_v21, 9  ;;  %v9559_v28 = vld [vmem:[%s12645_s3 + $0x10] sm:$0xff]   ;;  %v11757_v21 = vld [vmem:[#allocation4 + $0x28] sm:$0xf] }
 0x42d   : > { %v5485_v55 = vpop.permute.xlu0 %5484  ;;  %5992 = vrot.lane.b32.xlu1 %v5911_v42, %s9628_s18  ;;  %5994 = vrot.lane.b32.xlu0 %v5912_v62, %s9628_s18 }
 0x42e   : > { %5553 = vst.msk [vmem:[#allocation5 + $0x70] sm:$0xf] %vm5524_vm1, %v5485_v55  ;;  %v7231_v55 = vshll.u32 %v7179_v5, 16  ;;  %v6754_v20 = vsel %vm10094_vm13, %v9139_v13, %v6753_v33  ;;  %v6094_v33 = vld [vmem:[#allocation4 + $0x28] sm:$0xf] }
 0x42f   : > { %v5487_v8 = vpop.permute.xlu1 %5486  ;;  %v6097_v13 = vld [vmem:[#allocation4 + $0x34] sm:$0xf] }
 0x430   : > { %5554 = vst.msk [vmem:[#allocation5 + $0x74] sm:$0xf] %vm5524_vm1, %v5487_v8  ;;  %v7241_v8 = vshrl.u32 %v7180_v52, 16  ;;  %v7233_v29 = vrot.slane %v7231_v55, 5  ;;  %v6096_v55 = vld [vmem:[#allocation4 + $0x30] sm:$0xf] }
 0x431   : > { %5996 = vrot.lane.b32.xlu1 %v5913_v63, %s9628_s18  ;;  %5998 = vrot.lane.b32.xlu0 %v5914_v19, %s9628_s18  ;;  %v6747_v63 = vsel %vm10094_vm13, %v9138_v7, %v6746_v54  ;;  %v7183_v19 = vld [vmem:[#allocation4 + $0x28] sm:$0xf]  ;;  %v7184_v54 = vld [vmem:[#allocation4 + $0x2c] sm:$0x1]  ;;  %v6184_v7 = vshrl.u32 %v6093_v58, 16 }
 0x432   : > { %v7243_v34 = vrot.slane %v7241_v8, 4  ;;  %v7261_v39 = vshll.u32 %v7183_v19, 16  ;;  %v7265_v30 = vshrl.u32 %v7183_v19, 16  ;;  %v7234_v15 = vor.u32 %v7233_v29, %v7230_v18  ;;  %v9560_v18 = vld [vmem:[%s12645_s3 + $0x8] sm:$0xff]  }
 0x433   : > { %v7271_v5 = vshll.u32 %v7184_v54, 16  ;;  %v6208_v29 = vshrl.u32 %v6096_v55, 16 }
 0x434   : > { %v11739_v23 = vrot.slane %v7261_v39, 5  ;;  %v7267_v49 = vrot.slane %v7265_v30, 4  ;;  %v7235_v60 = vrot.slane %v7234_v15, 4  ;;  %v6211_v39 = vshll.u32 %v6096_v55, 16 }
 0x435   : > { %6000 = vrot.lane.b32.xlu1 %v5915_v11, %s9628_s18  ;;  %6002 = vrot.lane.b32.xlu0 %v5916_v0, %s9628_s18  ;;  %v6757_v0 = vsel %vm10094_vm13, %v6755_v12, %v6756_v56  ;;  %v7252_v11 = vshrl.u32 %v7182_v17, 16  ;;  %v6197_v12 = vshrl.u32 %v6094_v33, 16  ;;  %v7273_v56 = vrot.slane %v7271_v5, 5 }
 0x436   : > { %v7268_v43 = vor.u32 %v7267_v49, %v11739_v23  ;;  %v7240_v26 = vsel %vm9830_vm10, %v7235_v60, %v11727_v48  ;;  %v6217_v30 = vshll.u32 %v6097_v13, 16  ;;  %v9580_v60 = vld [vmem:[%s9804_s29 + $0x4] sm:$0xf] }
 0x437   : > { %v5489_v44 = vpop.permute.xlu0 %5488  ;;  %v7254_v4 = vrot.slane %v7252_v11, 4  ;;  %v6199_v37 = vrot.slane %v6197_v12, 4  ;;  %v6655_v12 = vld [vmem:[#allocation4 + $0x28] sm:$0xf] }
 0x438   : > { %5555 = vst.msk [vmem:[#allocation5 + $0x78] sm:$0xf] %vm5524_vm1, %v5489_v44 }
 0x439   : > { %6004 = vrot.lane.b32.xlu1 %v5917_v25, %s9628_s18  ;;  %6006 = vrot.lane.b32.xlu0 %v5918_v46, %s9628_s18  ;;  %v7181_v25 = vld [vmem:[#allocation4 + $0x20] sm:$0x1]  ;;  %v7244_v46 = vor.u32 %v7243_v34, %v11727_v48 }
 0x43b   : > { %v5491_v41 = vpop.permute.xlu1 %5490  ;;  %v5766_v53 = vpop.permute.xlu0 %5765 }
 0x43c   : > { %5556 = vst.msk [vmem:[#allocation5 + $0x7c] sm:$0xf] %vm5524_vm1, %v5491_v41  ;;  %v9558_v41 = vld [vmem:[%s12645_s3 + $0x18] sm:$0xff]  }
 0x43d   : > { %5862 = vst.msk [vmem:[#allocation5] sm:$0xf] %vm5861_vm8, %v5766_v53  ;;  %6519 = vrot.lane.b32.xlu1 %v6148_v57, %s9631_s28  ;;  %6521 = vrot.lane.b32.xlu0 %v6158_v14, %s9631_s28  ;;  %v7247_v53 = vshll.u32 %v7181_v25, 16  ;;  %v11746_v57 = vld [vmem:[#allocation4 + $0x1c] sm:$0xf] }
 0x43e   : > { %9435 = vmatprep.subr.bf16.mxu1 %v9558_v41  ;;  %v7743_v25 = vld [vmem:[#allocation4 + $0x24] sm:$0xe] }
 0x43f   : > { %v5768_v47 = vpop.permute.xlu1 %5767  ;;  %v5770_v2 = vpop.permute.xlu0 %5769  ;;  %9436 = vmatpush3.bf16.msra.mxu1 %v9558_v41  ;;  %v7249_v52 = vrot.slane %v7247_v53, 5  ;;  %v6095_v53 = vld [vmem:[#allocation4 + $0x2c] sm:$0x1] }
 0x440   : > { %5863 = vst.msk [vmem:[#allocation5 + $0x4] sm:$0xf] %vm5861_vm8, %v5768_v47  ;;  %5864 = vst.msk [vmem:[#allocation5 + $0x8] sm:$0xf] %vm5861_vm8, %v5770_v2  ;;  %v7245_v47 = vrot.slane %v7244_v46, 4  ;;  %v7258_v2 = vor.u32 %v7257_v9, %v7254_v4  ;;  %9437 = vmatprep.subr.bf16.mxu1 %v9559_v28  ;;  %v6210_v9 = vrot.slane %v6208_v29, 4 }
 0x441   : > { %6523 = vrot.lane.b32.xlu1 %v6172_v3, %s9631_s28  ;;  %6525 = vrot.lane.b32.xlu0 %v6182_v6, %s9631_s28  ;;  %v7740_v3 = vld [vmem:[#allocation4 + $0x18] sm:$0xe]  ;;  %v7838_v6 = vrot.slane %v11746_v57, 5  ;;  %v7745_v46 = vld [vmem:[#allocation4 + $0x2c] sm:$0x1]  ;;  %v6213_v57 = vrot.slane %v6211_v39, 5 }
 0x442   : > { %v7250_v8 = vsel %vm9830_vm10, %v7245_v47, %v7249_v52  ;;  %v9154_v17 = vrot.slane %v7740_v3, 9  ;;  %v6098_v52 = vld [vmem:[#allocation4 + $0x38] sm:$0x1]  ;;  %v7185_v39 = vld [vmem:[#allocation4 + $0x30] sm:$0xf] }
 0x443   : > { %v5772_v42 = vpop.permute.xlu1 %5771  ;;  %v5774_v62 = vpop.permute.xlu0 %5773  ;;  %9438 = vmatpush3.bf16.msra.mxu1 %v9559_v28  ;;  %v7840_v19 = vrot.slane %v7838_v6, 4 }
 0x444   : > { %5865 = vst.msk [vmem:[#allocation5 + $0xc] sm:$0xf] %vm5861_vm8, %v5772_v42  ;;  %5866 = vst.msk [vmem:[#allocation5 + $0x10] sm:$0xf] %vm5861_vm8, %v5774_v62  ;;  %v7742_v42 = vld [vmem:[#allocation4 + $0x20] sm:$0x1]  ;;  %9439 = vmatprep.subr.bf16.mxu1 %v9560_v18 }
 0x445   : > { %6856 = vrot.lane.b32.xlu1 %v6747_v63, %s9632_s30  ;;  %6858 = vrot.lane.b32.xlu0 %v6750_v16, %s9632_s30  ;;  %v6193_v62 = vshll.u32 %v6094_v33, 16  ;;  %v7259_v63 = vrot.slane %v7258_v2, 4  ;;  %v7269_v16 = vrot.slane %v7268_v43, 4  ;;  %v9155_v2 = vrot.slane %v7743_v25, 9 }
 0x446   : > { %v6203_v33 = vshll.u32 %v6095_v53, 16 }
 0x447   : > { %v5776_v22 = vpop.permute.xlu1 %5775  ;;  %v5778_v24 = vpop.permute.xlu0 %5777  ;;  %v11776_v11 = vrot.slane %v6193_v62, 5  ;;  %v7264_v40 = vsel %vm9830_vm10, %v7259_v63, %v11739_v23  ;;  %9440 = vmatpush3.bf16.msra.mxu1 %v9560_v18  ;;  %v8446_v23 = vld [vmem:[%s12647_s5] sm:$0x3] }
 0x448   : > { %5867 = vst.msk [vmem:[#allocation5 + $0x14] sm:$0xf] %vm5861_vm8, %v5776_v22  ;;  %5868 = vst.msk [vmem:[#allocation5 + $0x18] sm:$0xf] %vm5861_vm8, %v5778_v24  ;;  %v7841_v22 = vrot.slane %v7742_v42, 5  ;;  %v11772_v24 = vrot.slane %v6184_v7, 4  ;;  %v6214_v42 = vor.u32 %v6213_v57, %v6210_v9 }
 0x449   : > { %6860 = vrot.lane.b32.xlu1 %v6754_v20, %s9632_s30  ;;  %6862 = vrot.lane.b32.xlu0 %v6757_v0, %s9632_s30  ;;  %v7845_v20 = vrot.slane %v11757_v21, 5  ;;  %v11774_v0 = vrot.slane %v6187_v61, 5  ;;  %v6200_v54 = vor.u32 %v6199_v37, %v11776_v11  ;;  %v9581_v21 = vld [vmem:[%s9804_s29 + $0x8] sm:$0xf]  ;;  %v9582_v7 = vld [vmem:[%s9804_s29 + $0xc] sm:$0xf] }
 0x44a   : > { %v7842_v15 = vsel %vm10094_vm13, %v7840_v19, %v7841_v22  ;;  %v9210_v61 = vcombine.low %v9581_v21, %v9582_v7  ;;  %v6205_v55 = vrot.slane %v6203_v33, 5  ;;  %v6654_v22 = vld [vmem:[#allocation4 + $0x24] sm:$0xe]  ;;  %v7189_v9 = vld [vmem:[#allocation4 + $0x40] sm:$0xf] }
 0x44b   : > { %v5780_v31 = vpop.permute.xlu1 %5779  ;;  %v5782_v44 = vpop.permute.xlu0 %5781  ;;  %v7847_v32 = vrot.slane %v7845_v20, 4  ;;  %v6190_v4 = vor.u32 %v11774_v0, %v11772_v24  ;;  %v6656_v24 = vld [vmem:[#allocation4 + $0x2c] sm:$0x1] }
 0x44c   : > { %5869 = vst.msk [vmem:[#allocation5 + $0x1c] sm:$0xf] %vm5861_vm8, %v5780_v31  ;;  %5870 = vst.msk [vmem:[#allocation5 + $0x20] sm:$0xf] %vm5861_vm8, %v5782_v44  ;;  %v7274_v31 = vsel %vm9830_vm10, %v7269_v16, %v7273_v56  ;;  %v6221_v44 = vshrl.u32 %v6097_v13, 16  ;;  %v6760_v16 = vrot.slane %v6655_v12, 5 }
 0x44d   : > { %7050 = vrot.lane.b32.xlu1 %v6986_v45, %s9633_s10  ;;  %7052 = vrot.lane.b32.xlu0 %v6987_v50, %s9633_s10  ;;  %v7839_v45 = vsel %vm10094_vm13, %v9154_v17, %v7838_v6  ;;  %v9561_v50 = vld [vmem:[%s12645_s3] sm:$0xff]   ;;  %v7846_v6 = vsel %vm10094_vm13, %v9155_v2, %v7845_v20  ;;  %v6215_v17 = vrot.slane %v6214_v42, 4  ;;  %v6658_v20 = vld [vmem:[#allocation4 + $0x34] sm:$0xf]  ;;  %v7190_v12 = vld [vmem:[#allocation4 + $0x44] sm:$0x1] }
 0x44e   : > { %9441 = vmatprep.subr.bf16.mxu1 %v9561_v50  ;;  %v6767_v37 = vrot.slane %v6658_v20, 5 }
 0x44f   : > { %v5784_v14 = vpop.permute.xlu1 %5783  ;;  %v5786_v36 = vpop.permute.xlu0 %5785  ;;  %9442 = vmatpush3.bf16.msra.mxu1 %v9561_v50  ;;  %v7276_v50 = vshrl.u32 %v7185_v39, 16 }
 0x450   : > { %5871 = vst.msk [vmem:[#allocation5 + $0x24] sm:$0xf] %vm5861_vm8, %v5784_v14  ;;  %5872 = vst.msk [vmem:[#allocation5 + $0x28] sm:$0xf] %vm5861_vm8, %v5786_v36  ;;  %v11800_v14 = vrot.slane %v6217_v30, 5  ;;  %v8585_v36 = vsel %vm8583_vm3, 4294967295, %v9626_v27 }
 0x451   : > { %7054 = vrot.lane.b32.xlu1 %v6988_v38, %s9633_s10  ;;  %7056 = vrot.lane.b32.xlu0 %v6989_v59, %s9633_s10  ;;  %v6223_v38 = vrot.slane %v6221_v44, 4  ;;  %v8586_v58 = vsel %vm8584_vm4, %v8585_v36, 0  ;;  %v9579_v59 = vld [vmem:[%s9804_s29] sm:$0xf]  ;;  %v7848_v27 = vrot.slane %v7745_v46, 5  ;;  %v9140_v30 = vrot.slane %v6654_v22, 9 }
 0x452   : > { %v9209_v47 = vcombine.low %v9579_v59, %v9580_v60  ;;  %v8588_v43 = vand.u32 %v8586_v58, %v8446_v23  ;;  %v6657_v44 = vld [vmem:[#allocation4 + $0x30] sm:$0xe]  ;;  %v6769_v23 = vrot.slane %v6767_v37, 4  ;;  %v7313_v58 = vshrl.u32 %v7189_v9, 16  ;;  %v6099_v22 = vld [vmem:[#allocation4 + $0x3c] sm:$0xf] }
 0x453   : > { %v5788_v1 = vpop.permute.xlu1 %5787  ;;  %v5790_v10 = vpop.permute.xlu0 %5789  ;;  %v7849_v28 = vsel %vm10094_vm13, %v7847_v32, %v7848_v27  ;;  %v6224_v62 = vor.u32 %v6223_v38, %v11800_v14  ;;  %v6761_v46 = vsel %vm10094_vm13, %v9140_v30, %v6760_v16  ;;  %v7309_v38 = vshll.u32 %v7189_v9, 16 }
 0x454   : > { %5873 = vst.msk [vmem:[#allocation5 + $0x2c] sm:$0xf] %vm5861_vm8, %v5788_v1  ;;  %5874 = vst.msk [vmem:[#allocation5 + $0x30] sm:$0xf] %vm5861_vm8, %v5790_v10  ;;  %9477 = vmatprep.mubr.msk.bf16.mxu0 %vm8534_vm5, %v9209_v47  ;;  %9475 = vmatprep.subr.bf16.mxu0 %v8588_v43  ;;  %v6191_v1 = vrot.slane %v6190_v4, 4  ;;  %v6201_v10 = vrot.slane %v6200_v54, 4 }
 0x455   : > { %7611 = vrot.lane.b32.xlu1 %v7240_v26, %s9634_s15  ;;  %7613 = vrot.lane.b32.xlu0 %v7250_v8, %s9634_s15  ;;  %v6227_v26 = vshll.u32 %v6098_v52, 16  ;;  %v6225_v19 = vrot.slane %v6224_v62, 4  ;;  %v7188_v4 = vld [vmem:[#allocation4 + $0x3c] sm:$0xf]  ;;  %v9141_v54 = vrot.slane %v6657_v44, 9  ;;  %v7278_v2 = vrot.slane %v7276_v50, 4 }
 0x456   : > { %9476 = vmatpush3.bf16.msra.mxu0 %v8588_v43  ;;  %v6196_v13 = vsel %vm9830_vm10, %v6191_v1, %v11776_v11  ;;  %v6206_v56 = vsel %vm9830_vm10, %v6201_v10, %v6205_v55  ;;  %v7303_v36 = vshll.u32 %v7188_v4, 16  ;;  %v7315_v52 = vrot.slane %v7313_v58, 4  ;;  %v6990_v1 = vld [vmem:[#allocation4 + $0x30] sm:$0xf]  ;;  %v6991_v10 = vld [vmem:[#allocation4 + $0x34] sm:$0xf] }
 0x457   : > { %v5792_v48 = vpop.permute.xlu1 %5791  ;;  %v5794_v34 = vpop.permute.xlu0 %5793  ;;  %v6229_v18 = vrot.slane %v6227_v26, 5  ;;  %v6768_v47 = vsel %vm10094_vm13, %v9141_v54, %v6767_v37  ;;  %v7748_v37 = vld [vmem:[#allocation4 + $0x38] sm:$0x1]  ;;  %v6232_v44 = vshrl.u32 %v6099_v22, 16  ;;  %v6102_v50 = vld [vmem:[#allocation4 + $0x48] sm:$0xf] }
 0x458   : > { %5875 = vst.msk [vmem:[#allocation5 + $0x34] sm:$0xf] %vm5861_vm8, %v5792_v48  ;;  %5876 = vst.msk [vmem:[#allocation5 + $0x38] sm:$0xf] %vm5861_vm8, %v5794_v34  ;;  %v6762_v48 = vrot.slane %v6760_v16, 4  ;;  %v6220_v34 = vsel %vm9830_vm10, %v6215_v17, %v11800_v14  ;;  %v7300_v14 = vshrl.u32 %v7188_v4, 16 }
 0x459   : > { %7615 = vrot.lane.b32.xlu1 %v7264_v40, %s9634_s15  ;;  %7617 = vrot.lane.b32.xlu0 %v7274_v31, %s9634_s15  ;;  %v6230_v11 = vsel %vm9830_vm10, %v6225_v19, %v6229_v18  ;;  %v6763_v40 = vrot.slane %v6656_v24, 5  ;;  %v7186_v31 = vld [vmem:[#allocation4 + $0x34] sm:$0xf]  ;;  %v7319_v17 = vshll.u32 %v7190_v12, 16  ;;  %v6993_v19 = vld [vmem:[#allocation4 + $0x40] sm:$0xf] }
 0x45a   : > { %9478 = vmatmul.mubr.msk.bf16.vlgmr.msra.gmra.mxu0 %vm8534_vm5, %v9210_v61  ;;  %v7289_v53 = vshrl.u32 %v7186_v31, 16  ;;  %v7187_v61 = vld [vmem:[#allocation4 + $0x38] sm:$0x1]  ;;  %v7746_v24 = vld [vmem:[#allocation4 + $0x30] sm:$0xe]  ;;  %v6256_v58 = vshrl.u32 %v6102_v50, 16 }
 0x45b   : > { %v5796_v49 = vpop.permute.xlu1 %5795  ;;  %v5798_v41 = vpop.permute.xlu0 %5797  ;;  %v6764_v32 = vsel %vm10094_vm13, %v6762_v48, %v6763_v40  ;;  %v7295_v55 = vshll.u32 %v7187_v61, 16  ;;  %v7321_v40 = vrot.slane %v7319_v17, 5  ;;  %v9156_v4 = vrot.slane %v7746_v24, 9  ;;  %v9583_v12 = vld [vmem:[%s9804_s29 + $0x10] sm:$0xf] }
 0x45c   : > { %5877 = vst.msk [vmem:[#allocation5 + $0x3c] sm:$0xf] %vm5861_vm8, %v5796_v49  ;;  %5878 = vst.msk [vmem:[#allocation5 + $0x40] sm:$0xf] %vm5861_vm8, %v5798_v41  ;;  %v7279_v49 = vshll.u32 %v7185_v39, 16  ;;  %v7285_v41 = vshll.u32 %v7186_v31, 16 }
 0x45d   : > { %7948 = vrot.lane.b32.xlu1 %v7839_v45, %s9635_s23  ;;  %7950 = vrot.lane.b32.xlu0 %v7842_v15, %s9635_s23  ;;  %v6659_v45 = vld [vmem:[#allocation4 + $0x38] sm:$0x1]  ;;  %v7297_v48 = vrot.slane %v7295_v55, 5  ;;  %v11867_v31 = vld [vmem:[#allocation4 + $0x40] sm:$0xf]  ;;  %v6258_v61 = vrot.slane %v6256_v58, 4 }
 0x45e   : > { %v6770_v57 = vrot.slane %v6659_v45, 5  ;;  %v7281_v43 = vrot.slane %v7279_v49, 5  ;;  %v7287_v33 = vrot.slane %v7285_v41, 5  ;;  %v6235_v45 = vshll.u32 %v6099_v22, 16  ;;  %v9584_v55 = vld [vmem:[%s9804_s29 + $0x14] sm:$0xf] }
 0x45f   : > { %v5800_v5 = vpop.permute.xlu1 %5799  ;;  %v5802_v3 = vpop.permute.xlu0 %5801  ;;  %v7859_v54 = vrot.slane %v11867_v31, 5  ;;  %v6104_v24 = vld [vmem:[#allocation4 + $0x50] sm:$0x1]  ;;  %v6663_v58 = vld [vmem:[#allocation4 + $0x48] sm:$0xe] }
 0x460   : > { %5879 = vst.msk [vmem:[#allocation5 + $0x44] sm:$0xf] %vm5861_vm8, %v5800_v5  ;;  %5880 = vst.msk [vmem:[#allocation5 + $0x48] sm:$0xf] %vm5861_vm8, %v5802_v3  ;;  %v6771_v27 = vsel %vm10094_vm13, %v6769_v23, %v6770_v57  ;;  %v7291_v5 = vrot.slane %v7289_v53, 4  ;;  %v7302_v3 = vrot.slane %v7300_v14, 4  ;;  %v7282_v42 = vor.u32 %v7281_v43, %v7278_v2 }
 0x461   : > { %7952 = vrot.lane.b32.xlu1 %v7846_v6, %s9635_s23  ;;  %7954 = vrot.lane.b32.xlu0 %v7849_v28, %s9635_s23  ;;  %v7305_v6 = vrot.slane %v7303_v36, 5  ;;  %v11856_v28 = vrot.slane %v7309_v38, 5  ;;  %v6103_v23 = vld [vmem:[#allocation4 + $0x4c] sm:$0xf]  ;;  %v7855_v53 = vrot.slane %v7748_v37, 5  ;;  %v6234_v36 = vrot.slane %v6232_v44, 4 }
 0x462   : > { %v7292_v62 = vor.u32 %v7291_v5, %v7287_v33  ;;  %v7283_v20 = vrot.slane %v7282_v42, 4  ;;  %v6237_v38 = vrot.slane %v6235_v45, 5  ;;  %v6265_v2 = vshll.u32 %v6103_v23, 16  ;;  %v7749_v5 = vld [vmem:[#allocation4 + $0x3c] sm:$0xe] }
 0x463   : > { %v5804_v8 = vpop.permute.xlu1 %5803  ;;  %v5806_v63 = vpop.permute.xlu0 %5805  ;;  %v7306_v26 = vor.u32 %v7305_v6, %v7302_v3  ;;  %v7751_v3 = vld [vmem:[#allocation4 + $0x44] sm:$0x1] }
 0x464   : > { %5881 = vst.msk [vmem:[#allocation5 + $0x4c] sm:$0xf] %vm5861_vm8, %v5804_v8  ;;  %5882 = vst.msk [vmem:[#allocation5 + $0x50] sm:$0xf] %vm5861_vm8, %v5806_v63  ;;  %v7316_v8 = vor.u32 %v7315_v52, %v11856_v28  ;;  %v7747_v63 = vld [vmem:[#allocation4 + $0x34] sm:$0xf] }
 0x465   : > { %6527 = vrot.lane.b32.xlu1 %v6196_v13, %s9631_s28  ;;  %6529 = vrot.lane.b32.xlu0 %v6206_v56, %s9631_s28  ;;  %v6992_v56 = vld [vmem:[#allocation4 + $0x3c] sm:$0xf]  ;;  %v7293_v18 = vrot.slane %v7292_v62, 4  ;;  %v7861_v52 = vrot.slane %v7859_v54, 4  ;;  %v6267_v42 = vrot.slane %v6265_v2, 5 }
 0x467   : > { %v5808_v0 = vpop.permute.xlu1 %5807  ;;  %v5810_v29 = vpop.permute.xlu0 %5809 }
 0x468   : > { %5883 = vst.msk [vmem:[#allocation5 + $0x54] sm:$0xf] %vm5861_vm8, %v5808_v0  ;;  %5884 = vst.msk [vmem:[#allocation5 + $0x58] sm:$0xf] %vm5861_vm8, %v5810_v29  ;;  %v7852_v0 = vrot.slane %v7747_v63, 5  ;;  %v7862_v63 = vrot.slane %v7751_v3, 5 }
 0x469   : > { %6531 = vrot.lane.b32.xlu1 %v6220_v34, %s9631_s28  ;;  %6533 = vrot.lane.b32.xlu0 %v6230_v11, %s9631_s28  ;;  %v6100_v29 = vld [vmem:[#allocation4 + $0x40] sm:$0xf]  ;;  %v7307_v34 = vrot.slane %v7306_v26, 4  ;;  %v7317_v11 = vrot.slane %v7316_v8, 4  ;;  %v9211_v26 = vcombine.low %v9583_v12, %v9584_v55  ;;  %v9157_v8 = vrot.slane %v7749_v5, 9 }
 0x46a   : > { %v7854_v9 = vrot.slane %v7852_v0, 4  ;;  %v7853_v43 = vsel %vm10094_vm13, %v9156_v4, %v7852_v0  ;;  %v7863_v22 = vsel %vm10094_vm13, %v7861_v52, %v7862_v63  ;;  %v6662_v4 = vld [vmem:[#allocation4 + $0x44] sm:$0x1]  ;;  %v7195_v52 = vld [vmem:[#allocation4 + $0x58] sm:$0xf] }
 0x46b   : > { %v5812_v15 = vpop.permute.xlu1 %5811  ;;  %v5814_v25 = vpop.permute.xlu0 %5813  ;;  %v7312_v49 = vsel %vm9830_vm10, %v7307_v34, %v11856_v28  ;;  %v7322_v41 = vsel %vm9830_vm10, %v7317_v11, %v7321_v40  ;;  %9481 = vmatprep.mubr.msk.bf16.mxu0 %vm8534_vm5, %v9211_v26  ;;  %v6661_v11 = vld [vmem:[#allocation4 + $0x40] sm:$0xf]  ;;  %v7357_v55 = vshll.u32 %v7195_v52, 16  ;;  %v7361_v26 = vshrl.u32 %v7195_v52, 16 }
 0x46c   : > { %5885 = vst.msk [vmem:[#allocation5 + $0x5c] sm:$0xf] %vm5861_vm8, %v5812_v15  ;;  %5886 = vst.msk [vmem:[#allocation5 + $0x60] sm:$0xf] %vm5861_vm8, %v5814_v25  ;;  %v7288_v15 = vsel %vm9830_vm10, %v7283_v20, %v7287_v33  ;;  %v7298_v25 = vsel %vm9830_vm10, %v7293_v18, %v7297_v48  ;;  %v7856_v33 = vsel %vm10094_vm13, %v7854_v9, %v7855_v53  ;;  %v6774_v31 = vrot.slane %v6661_v11, 5 }
 0x46d   : > { %6864 = vrot.lane.b32.xlu1 %v6761_v46, %s9632_s30  ;;  %6866 = vrot.lane.b32.xlu0 %v6764_v32, %s9632_s30  ;;  %v6241_v46 = vshll.u32 %v6100_v29, 16  ;;  %v6245_v32 = vshrl.u32 %v6100_v29, 16  ;;  %v7860_v18 = vsel %vm10094_vm13, %v9157_v8, %v7859_v54 }
 0x46f   : > { %v5816_v59 = vpop.permute.xlu1 %5815  ;;  %v5818_v60 = vpop.permute.xlu0 %5817 }
 0x470   : > { %5887 = vst.msk [vmem:[#allocation5 + $0x64] sm:$0xf] %vm5861_vm8, %v5816_v59  ;;  %5888 = vst.msk [vmem:[#allocation5 + $0x68] sm:$0xf] %vm5861_vm8, %v5818_v60  ;;  %v6259_v59 = vshll.u32 %v6102_v50, 16  ;;  %v6243_v60 = vrot.slane %v6241_v46, 5 }
 0x471   : > { %6868 = vrot.lane.b32.xlu1 %v6768_v47, %s9632_s30  ;;  %6870 = vrot.lane.b32.xlu0 %v6771_v27, %s9632_s30  ;;  %v6247_v47 = vrot.slane %v6245_v32, 4  ;;  %v6269_v27 = vshrl.u32 %v6103_v23, 16  ;;  %v6664_v46 = vld [vmem:[#allocation4 + $0x4c] sm:$0xf]  ;;  %v6660_v50 = vld [vmem:[#allocation4 + $0x3c] sm:$0xe] }
 0x472   : > { %v6781_v54 = vrot.slane %v6664_v46, 5 }
 0x473   : > { %v5820_v21 = vpop.permute.xlu1 %5819  ;;  %v5822_v7 = vpop.permute.xlu0 %5821  ;;  %v6271_v62 = vrot.slane %v6269_v27, 4  ;;  %v6665_v27 = vld [vmem:[#allocation4 + $0x50] sm:$0x1] }
 0x474   : > { %5889 = vst.msk [vmem:[#allocation5 + $0x6c] sm:$0xf] %vm5861_vm8, %v5820_v21  ;;  %5890 = vst.msk [vmem:[#allocation5 + $0x70] sm:$0xf] %vm5861_vm8, %v5822_v7  ;;  %v6238_v21 = vor.u32 %v6237_v38, %v6234_v36  ;;  %v6101_v7 = vld [vmem:[#allocation4 + $0x44] sm:$0x1] }
 0x475   : > { %7058 = vrot.lane.b32.xlu1 %v6990_v1, %s9633_s10  ;;  %7060 = vrot.lane.b32.xlu0 %v6991_v10, %s9633_s10  ;;  %v6261_v1 = vrot.slane %v6259_v59, 5  ;;  %v6248_v10 = vor.u32 %v6247_v47, %v6243_v60  ;;  %v6272_v34 = vor.u32 %v6271_v62, %v6267_v42  ;;  %v6777_v36 = vrot.slane %v6662_v4, 5  ;;  %v7192_v38 = vld [vmem:[#allocation4 + $0x4c] sm:$0xf]  ;;  %v7752_v4 = vld [vmem:[#allocation4 + $0x48] sm:$0xe] }
 0x476   : > { %v6239_v0 = vrot.slane %v6238_v21, 4  ;;  %v6783_v5 = vrot.slane %v6781_v54, 4  ;;  %v9143_v21 = vrot.slane %v6663_v58, 9 }
 0x477   : > { %v5824_v16 = vpop.permute.xlu1 %5823  ;;  %v5826_v13 = vpop.permute.xlu0 %5825  ;;  %v6249_v29 = vrot.slane %v6248_v10, 4  ;;  %v6262_v48 = vor.u32 %v6261_v1, %v6258_v61 }
 0x478   : > { %5891 = vst.msk [vmem:[#allocation5 + $0x74] sm:$0xf] %vm5861_vm8, %v5824_v16  ;;  %5892 = vst.msk [vmem:[#allocation5 + $0x78] sm:$0xf] %vm5861_vm8, %v5826_v13  ;;  %v6251_v16 = vshll.u32 %v6101_v7, 16  ;;  %v6244_v44 = vsel %vm9830_vm10, %v6239_v0, %v6243_v60  ;;  %v6784_v7 = vrot.slane %v6665_v27, 5  ;;  %v6782_v62 = vsel %vm10094_vm13, %v9143_v21, %v6781_v54 }
 0x479   : > { %7062 = vrot.lane.b32.xlu1 %v6992_v56, %s9633_s10  ;;  %7064 = vrot.lane.b32.xlu0 %v6993_v19, %s9633_s10  ;;  %v9585_v13 = vld [vmem:[%s9804_s29 + $0x18] sm:$0xf]  ;;  %v9586_v56 = vld [vmem:[%s9804_s29 + $0x1c] sm:$0xf]  ;;  %v6994_v0 = vld [vmem:[#allocation4 + $0x48] sm:$0xf] }
 0x47a   : > { %v9212_v17 = vcombine.low %v9585_v13, %v9586_v56  ;;  %v6253_v37 = vrot.slane %v6251_v16, 5  ;;  %v6785_v8 = vsel %vm10094_vm13, %v6783_v5, %v6784_v7  ;;  %v6108_v27 = vld [vmem:[#allocation4 + $0x60] sm:$0xf] }
 0x47b   : > { %v5828_v39 = vpop.permute.xlu1 %5827  ;;  %v5959_v30 = vpop.permute.xlu0 %5958 }
 0x47c   : > { %5893 = vst.msk [vmem:[#allocation5 + $0x7c] sm:$0xf] %vm5861_vm8, %v5828_v39  ;;  %9482 = vmatmul.mubr.msk.bf16.gmra.mxu0 %vm8534_vm5, %v9212_v17  ;;  %v6275_v39 = vshll.u32 %v6104_v24, 16  ;;  %v6254_v45 = vsel %vm9830_vm10, %v6249_v29, %v6253_v37  ;;  %v7363_v24 = vrot.slane %v7361_v26, 4  ;;  %v6995_v29 = vld [vmem:[#allocation4 + $0x4c] sm:$0xf] }
 0x47d   : > { %6055 = vst.msk [vmem:[#allocation5] sm:$0xf] %vm6054_vm7, %v5959_v30  ;;  %7619 = vrot.lane.b32.xlu1 %v7288_v15, %s9634_s15  ;;  %7621 = vrot.lane.b32.xlu0 %v7298_v25, %s9634_s15  ;;  %v6263_v15 = vrot.slane %v6262_v48, 4  ;;  %v6273_v25 = vrot.slane %v6272_v34, 4 }
 0x47e   : > { %v6277_v32 = vrot.slane %v6275_v39, 5  ;;  %v7196_v39 = vld [vmem:[#allocation4 + $0x5c] sm:$0x1] }
 0x47f   : > { %v5961_v57 = vpop.permute.xlu1 %5960  ;;  %v5963_v14 = vpop.permute.xlu0 %5962 }
 0x480   : > { %6056 = vst.msk [vmem:[#allocation5 + $0x4] sm:$0xf] %vm6054_vm7, %v5961_v57  ;;  %6057 = vst.msk [vmem:[#allocation5 + $0x8] sm:$0xf] %vm6054_vm7, %v5963_v14  ;;  %v6278_v53 = vsel %vm9830_vm10, %v6273_v25, %v6277_v32  ;;  %v7191_v57 = vld [vmem:[#allocation4 + $0x48] sm:$0xf] }
 0x481   : > { %7623 = vrot.lane.b32.xlu1 %v7312_v49, %s9634_s15  ;;  %7625 = vrot.lane.b32.xlu0 %v7322_v41, %s9634_s15  ;;  %v6776_v49 = vrot.slane %v6774_v31, 4  ;;  %v6268_v41 = vsel %vm9830_vm10, %v6263_v15, %v6267_v42  ;;  %v9142_v14 = vrot.slane %v6660_v50, 9  ;;  %v7327_v3 = vshll.u32 %v7191_v57, 16  ;;  %v6996_v15 = vld [vmem:[#allocation4 + $0x54] sm:$0xf] }
 0x482   : > { %v6997_v25 = vld [vmem:[#allocation4 + $0x58] sm:$0xf]  ;;  %v7367_v50 = vshll.u32 %v7196_v39, 16 }
 0x483   : > { %v5965_v6 = vpop.permute.xlu1 %5964  ;;  %v5967_v28 = vpop.permute.xlu0 %5966  ;;  %v6775_v47 = vsel %vm10094_vm13, %v9142_v14, %v6774_v31  ;;  %v6778_v2 = vsel %vm10094_vm13, %v6776_v49, %v6777_v36  ;;  %v7329_v63 = vrot.slane %v7327_v3, 5  ;;  %v6109_v3 = vld [vmem:[#allocation4 + $0x64] sm:$0xf] }
 0x484   : > { %6058 = vst.msk [vmem:[#allocation5 + $0xc] sm:$0xf] %vm6054_vm7, %v5965_v6  ;;  %6059 = vst.msk [vmem:[#allocation5 + $0x10] sm:$0xf] %vm6054_vm7, %v5967_v28  ;;  %v7333_v6 = vshll.u32 %v7192_v38, 16  ;;  %v7337_v28 = vshrl.u32 %v7192_v38, 16 }
 0x485   : > { %7956 = vrot.lane.b32.xlu1 %v7853_v43, %s9635_s23  ;;  %7958 = vrot.lane.b32.xlu0 %v7856_v33, %s9635_s23  ;;  %v7324_v43 = vshrl.u32 %v7191_v57, 16  ;;  %v7194_v33 = vld [vmem:[#allocation4 + $0x54] sm:$0xf]  ;;  %v11952_v38 = vld [vmem:[#allocation4 + $0x58] sm:$0xf]  ;;  %v6313_v26 = vshll.u32 %v6109_v3, 16 }
 0x486   : > { %v7348_v61 = vshrl.u32 %v7194_v33, 16  ;;  %v7351_v1 = vshll.u32 %v7194_v33, 16  ;;  %v7335_v16 = vrot.slane %v7333_v6, 5  ;;  %v7339_v13 = vrot.slane %v7337_v28, 4 }
 0x487   : > { %v5969_v19 = vpop.permute.xlu1 %5968  ;;  %v5971_v20 = vpop.permute.xlu0 %5970  ;;  %v7326_v12 = vrot.slane %v7324_v43, 4  ;;  %v7369_v43 = vrot.slane %v7367_v50, 5  ;;  %v9158_v33 = vrot.slane %v7752_v4, 9  ;;  %v7873_v52 = vrot.slane %v11952_v38, 5  ;;  %v6110_v4 = vld [vmem:[#allocation4 + $0x68] sm:$0x1] }
 0x488   : > { %6060 = vst.msk [vmem:[#allocation5 + $0x14] sm:$0xf] %vm6054_vm7, %v5969_v19  ;;  %6061 = vst.msk [vmem:[#allocation5 + $0x18] sm:$0xf] %vm6054_vm7, %v5971_v20  ;;  %v7350_v56 = vrot.slane %v7348_v61, 4  ;;  %v7353_v17 = vrot.slane %v7351_v1, 5  ;;  %v7340_v34 = vor.u32 %v7339_v13, %v7335_v16 }
 0x489   : > { %7960 = vrot.lane.b32.xlu1 %v7860_v18, %s9635_s23  ;;  %7962 = vrot.lane.b32.xlu0 %v7863_v22, %s9635_s23  ;;  %v7193_v18 = vld [vmem:[#allocation4 + $0x50] sm:$0x1]  ;;  %v11941_v22 = vrot.slane %v7357_v55, 5  ;;  %v7330_v48 = vor.u32 %v7329_v63, %v7326_v12  ;;  %v7755_v13 = vld [vmem:[#allocation4 + $0x54] sm:$0xe] }
 0x48a   : > { %v7343_v11 = vshll.u32 %v7193_v18, 16  ;;  %v7354_v37 = vor.u32 %v7353_v17, %v7350_v56  ;;  %v7341_v32 = vrot.slane %v7340_v34, 4  ;;  %v7757_v56 = vld [vmem:[#allocation4 + $0x5c] sm:$0x1] }
 0x48b   : > { %v5973_v30 = vpop.permute.xlu1 %5972  ;;  %v5975_v40 = vpop.permute.xlu0 %5974  ;;  %v7364_v31 = vor.u32 %v7363_v24, %v11941_v22  ;;  %v7331_v46 = vrot.slane %v7330_v48, 4  ;;  %v6315_v48 = vrot.slane %v6313_v26, 5 }
 0x48c   : > { %6062 = vst.msk [vmem:[#allocation5 + $0x1c] sm:$0xf] %vm6054_vm7, %v5973_v30  ;;  %6063 = vst.msk [vmem:[#allocation5 + $0x20] sm:$0xf] %vm6054_vm7, %v5975_v40  ;;  %v7355_v49 = vrot.slane %v7354_v37, 4 }
 0x48d   : > { %6535 = vrot.lane.b32.xlu1 %v6244_v44, %s9631_s28  ;;  %6537 = vrot.lane.b32.xlu0 %v6254_v45, %s9631_s28  ;;  %v7753_v44 = vld [vmem:[#allocation4 + $0x4c] sm:$0xf]  ;;  %v6105_v45 = vld [vmem:[#allocation4 + $0x54] sm:$0xf]  ;;  %v7365_v36 = vrot.slane %v7364_v31, 4 }
 0x48e   : > { %v6280_v54 = vshrl.u32 %v6105_v45, 16  ;;  %v6283_v58 = vshll.u32 %v6105_v45, 16  ;;  %v7360_v6 = vsel %vm9830_vm10, %v7355_v49, %v11941_v22  ;;  %v6107_v22 = vld [vmem:[#allocation4 + $0x5c] sm:$0x1]  ;;  %v9588_v37 = vld [vmem:[%s9804_s29 + $0x24] sm:$0xf] }
 0x48f   : > { %v5977_v9 = vpop.permute.xlu1 %5976  ;;  %v5979_v23 = vpop.permute.xlu0 %5978  ;;  %v7370_v1 = vsel %vm9830_vm10, %v7365_v36, %v7369_v43  ;;  %v6299_v31 = vshll.u32 %v6107_v22, 16  ;;  %v9590_v45 = vld [vmem:[%s9804_s29 + $0x2c] sm:$0xf] }
 0x490   : > { %6064 = vst.msk [vmem:[#allocation5 + $0x24] sm:$0xf] %vm6054_vm7, %v5977_v9  ;;  %6065 = vst.msk [vmem:[#allocation5 + $0x28] sm:$0xf] %vm6054_vm7, %v5979_v23  ;;  %v6106_v9 = vld [vmem:[#allocation4 + $0x58] sm:$0xf] }
 0x491   : > { %6539 = vrot.lane.b32.xlu1 %v6268_v41, %s9631_s28  ;;  %6541 = vrot.lane.b32.xlu0 %v6278_v53, %s9631_s28  ;;  %v7345_v23 = vrot.slane %v7343_v11, 5  ;;  %v7866_v41 = vrot.slane %v7753_v44, 5  ;;  %v7754_v53 = vld [vmem:[#allocation4 + $0x50] sm:$0x1]  ;;  %v6282_v21 = vrot.slane %v6280_v54, 4  ;;  %v6301_v54 = vrot.slane %v6299_v31, 5 }
 0x492   : > { %v7869_v5 = vrot.slane %v7754_v53, 5  ;;  %v9587_v11 = vld [vmem:[%s9804_s29 + $0x20] sm:$0xf]  ;;  %v9589_v44 = vld [vmem:[%s9804_s29 + $0x28] sm:$0xf] }
 0x493   : > { %v5981_v59 = vpop.permute.xlu1 %5980  ;;  %v5983_v60 = vpop.permute.xlu0 %5982  ;;  %v7868_v28 = vrot.slane %v7866_v41, 4  ;;  %v7867_v63 = vsel %vm10094_vm13, %v9158_v33, %v7866_v41  ;;  %v9213_v39 = vcombine.low %v9587_v11, %v9588_v37  ;;  %v6667_v53 = vld [vmem:[#allocation4 + $0x58] sm:$0xf]  ;;  %v6666_v43 = vld [vmem:[#allocation4 + $0x54] sm:$0xe] }
 0x494   : > { %6066 = vst.msk [vmem:[#allocation5 + $0x2c] sm:$0xf] %vm6054_vm7, %v5981_v59  ;;  %6067 = vst.msk [vmem:[#allocation5 + $0x30] sm:$0xf] %vm6054_vm7, %v5983_v60  ;;  %v7336_v59 = vsel %vm9830_vm10, %v7331_v46, %v7335_v16  ;;  %v7346_v60 = vsel %vm9830_vm10, %v7341_v32, %v7345_v23  ;;  %v6788_v38 = vrot.slane %v6667_v53, 5 }
 0x495   : > { %6872 = vrot.lane.b32.xlu1 %v6775_v47, %s9632_s30  ;;  %6874 = vrot.lane.b32.xlu0 %v6778_v2, %s9632_s30  ;;  %v6289_v47 = vshll.u32 %v6106_v9, 16  ;;  %v6293_v2 = vshrl.u32 %v6106_v9, 16  ;;  %v7870_v16 = vsel %vm10094_vm13, %v7868_v28, %v7869_v5  ;;  %v6668_v33 = vld [vmem:[#allocation4 + $0x5c] sm:$0x1] }
 0x496   : > { %9485 = vmatprep.mubr.msk.bf16.mxu0 %vm8534_vm5, %v9213_v39 }
 0x497   : > { %v5985_v10 = vpop.permute.xlu1 %5984  ;;  %v5987_v42 = vpop.permute.xlu0 %5986  ;;  %v6291_v12 = vrot.slane %v6289_v47, 5  ;;  %v6295_v55 = vrot.slane %v6293_v2, 4  ;;  %v6670_v2 = vld [vmem:[#allocation4 + $0x64] sm:$0xf] }
 0x498   : > { %6068 = vst.msk [vmem:[#allocation5 + $0x34] sm:$0xf] %vm6054_vm7, %v5985_v10  ;;  %6069 = vst.msk [vmem:[#allocation5 + $0x38] sm:$0xf] %vm6054_vm7, %v5987_v42  ;;  %v6285_v10 = vrot.slane %v6283_v58, 5  ;;  %v6304_v42 = vshrl.u32 %v6108_v27, 16 }
 0x499   : > { %6876 = vrot.lane.b32.xlu1 %v6782_v62, %s9632_s30  ;;  %6878 = vrot.lane.b32.xlu0 %v6785_v8, %s9632_s30  ;;  %v6307_v62 = vshll.u32 %v6108_v27, 16  ;;  %v6317_v8 = vshrl.u32 %v6109_v3, 16 }
 0x49a   : > { %v6286_v18 = vor.u32 %v6285_v10, %v6282_v21  ;;  %v6306_v24 = vrot.slane %v6304_v42, 4  ;;  %v6795_v21 = vrot.slane %v6670_v2, 5  ;;  %v7198_v10 = vld [vmem:[#allocation4 + $0x64] sm:$0xf]  ;;  %v6669_v42 = vld [vmem:[#allocation4 + $0x60] sm:$0xe] }
 0x49b   : > { %v5989_v19 = vpop.permute.xlu1 %5988  ;;  %v5991_v20 = vpop.permute.xlu0 %5990  ;;  %v6319_v34 = vrot.slane %v6317_v8, 4  ;;  %v6671_v8 = vld [vmem:[#allocation4 + $0x68] sm:$0x1] }
 0x49c   : > { %6070 = vst.msk [vmem:[#allocation5 + $0x3c] sm:$0xf] %vm6054_vm7, %v5989_v19  ;;  %6071 = vst.msk [vmem:[#allocation5 + $0x40] sm:$0xf] %vm6054_vm7, %v5991_v20  ;;  %v7875_v20 = vrot.slane %v7873_v52, 4  ;;  %v6287_v9 = vrot.slane %v6286_v18, 4 }
 0x49d   : > { %7066 = vrot.lane.b32.xlu1 %v6994_v0, %s9633_s10  ;;  %7068 = vrot.lane.b32.xlu0 %v6995_v29, %s9633_s10  ;;  %v6309_v0 = vrot.slane %v6307_v62, 5  ;;  %v6296_v29 = vor.u32 %v6295_v55, %v6291_v12  ;;  %v6320_v41 = vor.u32 %v6319_v34, %v6315_v48  ;;  %v9145_v18 = vrot.slane %v6669_v42, 9 }
 0x49e   : > { %v6292_v58 = vsel %vm9830_vm10, %v6287_v9, %v6291_v12  ;;  %v6798_v22 = vrot.slane %v6671_v8, 5  ;;  %v6998_v9 = vld [vmem:[#allocation4 + $0x60] sm:$0xf]  ;;  %v6114_v8 = vld [vmem:[#allocation4 + $0x78] sm:$0xf] }
 0x49f   : > { %v5993_v30 = vpop.permute.xlu1 %5992  ;;  %v5995_v40 = vpop.permute.xlu0 %5994  ;;  %v6297_v23 = vrot.slane %v6296_v29, 4  ;;  %v6310_v49 = vor.u32 %v6309_v0, %v6306_v24  ;;  %v6321_v47 = vrot.slane %v6320_v41, 4  ;;  %v6796_v34 = vsel %vm10094_vm13, %v9145_v18, %v6795_v21 }
 0x4a0   : > { %6072 = vst.msk [vmem:[#allocation5 + $0x44] sm:$0xf] %vm6054_vm7, %v5993_v30  ;;  %6073 = vst.msk [vmem:[#allocation5 + $0x48] sm:$0xf] %vm6054_vm7, %v5995_v40  ;;  %v9159_v30 = vrot.slane %v7755_v13, 9  ;;  %v7876_v40 = vrot.slane %v7757_v56, 5 }
 0x4a1   : > { %7070 = vrot.lane.b32.xlu1 %v6996_v15, %s9633_s10  ;;  %7072 = vrot.lane.b32.xlu0 %v6997_v25, %s9633_s10  ;;  %v9214_v15 = vcombine.low %v9589_v44, %v9590_v45  ;;  %v6797_v13 = vrot.slane %v6795_v21, 4 }
 0x4a2   : > { %v7874_v32 = vsel %vm10094_vm13, %v9159_v30, %v7873_v52  ;;  %v7877_v50 = vsel %vm10094_vm13, %v7875_v20, %v7876_v40  ;;  %v7201_v20 = vld [vmem:[#allocation4 + $0x70] sm:$0xf] }
 0x4a3   : > { %v5997_v57 = vpop.permute.xlu1 %5996  ;;  %v5999_v14 = vpop.permute.xlu0 %5998  ;;  %9486 = vmatmul.mubr.msk.bf16.gmra.mxu0 %vm8534_vm5, %v9214_v15  ;;  %v7405_v37 = vshll.u32 %v7201_v20, 16  ;;  %v7409_v39 = vshrl.u32 %v7201_v20, 16  ;;  %v6799_v30 = vsel %vm10094_vm13, %v6797_v13, %v6798_v22 }
 0x4a4   : > { %6074 = vst.msk [vmem:[#allocation5 + $0x4c] sm:$0xf] %vm6054_vm7, %v5997_v57  ;;  %6075 = vst.msk [vmem:[#allocation5 + $0x50] sm:$0xf] %vm6054_vm7, %v5999_v14  ;;  %v6323_v57 = vshll.u32 %v6110_v4, 16 }
 0x4a5   : > { %7627 = vrot.lane.b32.xlu1 %v7336_v59, %s9634_s15  ;;  %7629 = vrot.lane.b32.xlu0 %v7346_v60, %s9634_s15  ;;  %v6302_v59 = vsel %vm9830_vm10, %v6297_v23, %v6301_v54  ;;  %v6311_v60 = vrot.slane %v6310_v49, 4  ;;  %v7411_v4 = vrot.slane %v7409_v39, 4  ;;  %v6999_v23 = vld [vmem:[#allocation4 + $0x64] sm:$0xf] }
 0x4a6   : > { %v6325_v27 = vrot.slane %v6323_v57, 5  ;;  %v7202_v57 = vld [vmem:[#allocation4 + $0x74] sm:$0x1] }
 0x4a7   : > { %v6001_v7 = vpop.permute.xlu1 %6000  ;;  %v6003_v61 = vpop.permute.xlu0 %6002  ;;  %v6316_v28 = vsel %vm9830_vm10, %v6311_v60, %v6315_v48  ;;  %v7000_v60 = vld [vmem:[#allocation4 + $0x6c] sm:$0xf] }
 0x4a8   : > { %6076 = vst.msk [vmem:[#allocation5 + $0x54] sm:$0xf] %vm6054_vm7, %v6001_v7  ;;  %6077 = vst.msk [vmem:[#allocation5 + $0x58] sm:$0xf] %vm6054_vm7, %v6003_v61  ;;  %v6326_v52 = vsel %vm9830_vm10, %v6321_v47, %v6325_v27  ;;  %v7197_v7 = vld [vmem:[#allocation4 + $0x60] sm:$0xf] }
 0x4a9   : > { %7631 = vrot.lane.b32.xlu1 %v7360_v6, %s9634_s15  ;;  %7633 = vrot.lane.b32.xlu0 %v7370_v1, %s9634_s15  ;;  %v6790_v6 = vrot.slane %v6788_v38, 4  ;;  %v9144_v61 = vrot.slane %v6666_v43, 9  ;;  %v6791_v1 = vrot.slane %v6668_v33, 5  ;;  %v7375_v56 = vshll.u32 %v7197_v7, 16  ;;  %v7001_v47 = vld [vmem:[#allocation4 + $0x70] sm:$0xf] }
 0x4aa   : > { %v7415_v43 = vshll.u32 %v7202_v57, 16  ;;  %v7758_v33 = vld [vmem:[#allocation4 + $0x60] sm:$0xe] }
 0x4ab   : > { %v6005_v17 = vpop.permute.xlu1 %6004  ;;  %v6007_v19 = vpop.permute.xlu0 %6006  ;;  %v6789_v55 = vsel %vm10094_vm13, %v9144_v61, %v6788_v38  ;;  %v6792_v26 = vsel %vm10094_vm13, %v6790_v6, %v6791_v1  ;;  %v7377_v40 = vrot.slane %v7375_v56, 5  ;;  %v6115_v56 = vld [vmem:[#allocation4 + $0x7c] sm:$0xf] }
 0x4ac   : > { %6078 = vst.msk [vmem:[#allocation5 + $0x5c] sm:$0xf] %vm6054_vm7, %v6005_v17  ;;  %6079 = vst.msk [vmem:[#allocation5 + $0x60] sm:$0xf] %vm6054_vm7, %v6007_v19  ;;  %v7381_v17 = vshll.u32 %v7198_v10, 16  ;;  %v7385_v19 = vshrl.u32 %v7198_v10, 16 }
 0x4ad   : > { %7964 = vrot.lane.b32.xlu1 %v7867_v63, %s9635_s23  ;;  %7966 = vrot.lane.b32.xlu0 %v7870_v16, %s9635_s23  ;;  %v7372_v63 = vshrl.u32 %v7197_v7, 16  ;;  %v7200_v16 = vld [vmem:[#allocation4 + $0x6c] sm:$0xf]  ;;  %v12037_v10 = vld [vmem:[#allocation4 + $0x70] sm:$0xf]  ;;  %v6361_v39 = vshll.u32 %v6115_v56, 16 }
 0x4ae   : > { %v7396_v24 = vshrl.u32 %v7200_v16, 16  ;;  %v7399_v0 = vshll.u32 %v7200_v16, 16  ;;  %v7383_v31 = vrot.slane %v7381_v17, 5  ;;  %v7387_v44 = vrot.slane %v7385_v19, 4 }
 0x4af   : > { %v6520_v25 = vpop.permute.xlu1 %6519  ;;  %v6522_v46 = vpop.permute.xlu0 %6521  ;;  %v7374_v11 = vrot.slane %v7372_v63, 4  ;;  %v7417_v63 = vrot.slane %v7415_v43, 5  ;;  %v9160_v16 = vrot.slane %v7758_v33, 9  ;;  %v7887_v20 = vrot.slane %v12037_v10, 5 }
 0x4b0   : > { %6616 = vst.msk [vmem:[#allocation5] sm:$0xf] %vm6615_vm9, %v6520_v25  ;;  %6617 = vst.msk [vmem:[#allocation5 + $0x4] sm:$0xf] %vm6615_vm9, %v6522_v46  ;;  %v7398_v45 = vrot.slane %v7396_v24, 4  ;;  %v7401_v15 = vrot.slane %v7399_v0, 5  ;;  %v7388_v41 = vor.u32 %v7387_v44, %v7383_v31 }
 0x4b1   : > { %7968 = vrot.lane.b32.xlu1 %v7874_v32, %s9635_s23  ;;  %7970 = vrot.lane.b32.xlu0 %v7877_v50, %s9635_s23  ;;  %v7199_v32 = vld [vmem:[#allocation4 + $0x68] sm:$0x1]  ;;  %v12026_v50 = vrot.slane %v7405_v37, 5  ;;  %v7378_v49 = vor.u32 %v7377_v40, %v7374_v11  ;;  %v7761_v44 = vld [vmem:[#allocation4 + $0x6c] sm:$0xe] }
 0x4b2   : > { %v7391_v53 = vshll.u32 %v7199_v32, 16  ;;  %v7402_v54 = vor.u32 %v7401_v15, %v7398_v45  ;;  %v7389_v27 = vrot.slane %v7388_v41, 4  ;;  %v7763_v45 = vld [vmem:[#allocation4 + $0x74] sm:$0x1] }
 0x4b3   : > { %v6524_v14 = vpop.permute.xlu1 %6523  ;;  %v6526_v36 = vpop.permute.xlu0 %6525  ;;  %v7412_v38 = vor.u32 %v7411_v4, %v12026_v50  ;;  %v7379_v2 = vrot.slane %v7378_v49, 4  ;;  %v6363_v49 = vrot.slane %v6361_v39, 5 }
 0x4b4   : > { %6618 = vst.msk [vmem:[#allocation5 + $0x8] sm:$0xf] %vm6615_vm9, %v6524_v14  ;;  %6619 = vst.msk [vmem:[#allocation5 + $0xc] sm:$0xf] %vm6615_vm9, %v6526_v36  ;;  %v7403_v6 = vrot.slane %v7402_v54, 4 }
 0x4b5   : > { %6543 = vrot.lane.b32.xlu1 %v6292_v58, %s9631_s28  ;;  %6545 = vrot.lane.b32.xlu0 %v6302_v59, %s9631_s28  ;;  %v7759_v58 = vld [vmem:[#allocation4 + $0x64] sm:$0xf]  ;;  %v6111_v59 = vld [vmem:[#allocation4 + $0x6c] sm:$0xf]  ;;  %v7413_v1 = vrot.slane %v7412_v38, 4 }
 0x4b6   : > { %v6328_v21 = vshrl.u32 %v6111_v59, 16  ;;  %v6331_v42 = vshll.u32 %v6111_v59, 16  ;;  %v7408_v17 = vsel %vm9830_vm10, %v7403_v6, %v12026_v50  ;;  %v6113_v50 = vld [vmem:[#allocation4 + $0x74] sm:$0x1]  ;;  %v9592_v54 = vld [vmem:[%s9804_s29 + $0x34] sm:$0xf] }
 0x4b7   : > { %v6857_v5 = vpop.permute.xlu1 %6856  ;;  %v6859_v3 = vpop.permute.xlu0 %6858  ;;  %v7418_v0 = vsel %vm9830_vm10, %v7413_v1, %v7417_v63  ;;  %v6347_v38 = vshll.u32 %v6113_v50, 16  ;;  %v9593_v59 = vld [vmem:[%s9804_s29 + $0x38] sm:$0xf]  ;;  %v6676_v63 = vld [vmem:[#allocation4 + $0x7c] sm:$0xf] }
 0x4b8   : > { %6953 = vst.msk [vmem:[#allocation5] sm:$0xf] %vm6952_vm11, %v6857_v5  ;;  %6954 = vst.msk [vmem:[#allocation5 + $0x4] sm:$0xf] %vm6952_vm11, %v6859_v3  ;;  %v6112_v5 = vld [vmem:[#allocation4 + $0x70] sm:$0xf] }
 0x4b9   : > { %6547 = vrot.lane.b32.xlu1 %v6316_v28, %s9631_s28  ;;  %6549 = vrot.lane.b32.xlu0 %v6326_v52, %s9631_s28  ;;  %v7393_v3 = vrot.slane %v7391_v53, 5  ;;  %v7880_v28 = vrot.slane %v7759_v58, 5  ;;  %v7760_v52 = vld [vmem:[#allocation4 + $0x68] sm:$0x1]  ;;  %v6330_v18 = vrot.slane %v6328_v21, 4 }
 0x4ba   : > { %v7883_v13 = vrot.slane %v7760_v52, 5  ;;  %v9591_v53 = vld [vmem:[%s9804_s29 + $0x30] sm:$0xf]  ;;  %v6116_v58 = vld [vmem:[#allocation4 + $0x80] sm:$0x1] }
 0x4bb   : > { %v6861_v62 = vpop.permute.xlu1 %6860  ;;  %v6863_v12 = vpop.permute.xlu0 %6862  ;;  %v7882_v19 = vrot.slane %v7880_v28, 4  ;;  %v7881_v40 = vsel %vm10094_vm13, %v9160_v16, %v7880_v28  ;;  %v9215_v57 = vcombine.low %v9591_v53, %v9592_v54  ;;  %v6673_v21 = vld [vmem:[#allocation4 + $0x70] sm:$0xf] }
 0x4bc   : > { %6955 = vst.msk [vmem:[#allocation5 + $0x8] sm:$0xf] %vm6952_vm11, %v6861_v62  ;;  %6956 = vst.msk [vmem:[#allocation5 + $0xc] sm:$0xf] %vm6952_vm11, %v6863_v12  ;;  %v7384_v62 = vsel %vm9830_vm10, %v7379_v2, %v7383_v31  ;;  %v7394_v12 = vsel %vm9830_vm10, %v7389_v27, %v7393_v3 }
 0x4bd   : > { %6880 = vrot.lane.b32.xlu1 %v6789_v55, %s9632_s30  ;;  %6882 = vrot.lane.b32.xlu0 %v6792_v26, %s9632_s30  ;;  %v6337_v55 = vshll.u32 %v6112_v5, 16  ;;  %v6341_v26 = vshrl.u32 %v6112_v5, 16  ;;  %v7884_v31 = vsel %vm10094_vm13, %v7882_v19, %v7883_v13  ;;  %v6672_v13 = vld [vmem:[#allocation4 + $0x6c] sm:$0xe]  ;;  %v6674_v19 = vld [vmem:[#allocation4 + $0x74] sm:$0x1] }
 0x4be   : > { %9489 = vmatprep.mubr.msk.bf16.mxu0 %vm8534_vm5, %v9215_v57 }
 0x4bf   : > { %v7051_v29 = vpop.permute.xlu1 %7050  ;;  %v7053_v48 = vpop.permute.xlu0 %7052  ;;  %v12055_v11 = vrot.slane %v6337_v55, 5  ;;  %v6343_v37 = vrot.slane %v6341_v26, 4 }
 0x4c0   : > { %7147 = vst.msk [vmem:[#allocation5] sm:$0xf] %vm7146_vm12, %v7051_v29  ;;  %7148 = vst.msk [vmem:[#allocation5 + $0x4] sm:$0xf] %vm7146_vm12, %v7053_v48  ;;  %v6333_v29 = vrot.slane %v6331_v42, 5  ;;  %v6352_v48 = vshrl.u32 %v6114_v8, 16 }
 0x4c1   : > { %6884 = vrot.lane.b32.xlu1 %v6796_v34, %s9632_s30  ;;  %6886 = vrot.lane.b32.xlu0 %v6799_v30, %s9632_s30  ;;  %v6355_v34 = vshll.u32 %v6114_v8, 16  ;;  %v6365_v30 = vshrl.u32 %v6115_v56, 16 }
 0x4c2   : > { %v6334_v32 = vor.u32 %v6333_v29, %v6330_v18  ;;  %v6354_v4 = vrot.slane %v6352_v48, 4  ;;  %v9146_v29 = vrot.slane %v6672_v13, 9  ;;  %v7204_v48 = vld [vmem:[#allocation4 + $0x7c] sm:$0xf]  ;;  %v6117_v13 = vld [vmem:[#allocation4 + $0x84] sm:$0xf] }
 0x4c3   : > { %v7055_v25 = vpop.permute.xlu1 %7054  ;;  %v7057_v46 = vpop.permute.xlu0 %7056  ;;  %v6367_v41 = vrot.slane %v6365_v30, 4  ;;  %v7433_v50 = vshrl.u32 %v7204_v48, 16 }
 0x4c4   : > { %7149 = vst.msk [vmem:[#allocation5 + $0x8] sm:$0xf] %vm7146_vm12, %v7055_v25  ;;  %7150 = vst.msk [vmem:[#allocation5 + $0xc] sm:$0xf] %vm7146_vm12, %v7057_v46  ;;  %v7889_v46 = vrot.slane %v7887_v20, 4  ;;  %v6335_v3 = vrot.slane %v6334_v32, 4 }
 0x4c5   : > { %7074 = vrot.lane.b32.xlu1 %v6998_v9, %s9633_s10  ;;  %7076 = vrot.lane.b32.xlu0 %v6999_v23, %s9633_s10  ;;  %v6357_v9 = vrot.slane %v6355_v34, 5  ;;  %v6344_v23 = vor.u32 %v6343_v37, %v12055_v11  ;;  %v6368_v52 = vor.u32 %v6367_v41, %v6363_v49  ;;  %v6805_v34 = vrot.slane %v6674_v19, 5  ;;  %v6677_v37 = vld [vmem:[#allocation4 + $0x80] sm:$0x1] }
 0x4c6   : > { %v7429_v32 = vshll.u32 %v7204_v48, 16 }
 0x4c7   : > { %v7612_v14 = vpop.permute.xlu1 %7611  ;;  %v7614_v36 = vpop.permute.xlu0 %7613  ;;  %v6345_v6 = vrot.slane %v6344_v23, 4  ;;  %v6358_v28 = vor.u32 %v6357_v9, %v6354_v4  ;;  %v6369_v8 = vrot.slane %v6368_v52, 4  ;;  %v6812_v9 = vrot.slane %v6677_v37, 5  ;;  %v7003_v52 = vld [vmem:[#allocation4 + $0x7c] sm:$0xf] }
 0x4c8   : > { %7708 = vst.msk [vmem:[#allocation5] sm:$0xf] %vm7707_vm15, %v7612_v14  ;;  %7709 = vst.msk [vmem:[#allocation5 + $0x4] sm:$0xf] %vm7707_vm15, %v7614_v36  ;;  %v9161_v14 = vrot.slane %v7761_v44, 9  ;;  %v7890_v36 = vrot.slane %v7763_v45, 5 }
 0x4c9   : > { %7078 = vrot.lane.b32.xlu1 %v7000_v60, %s9633_s10  ;;  %7080 = vrot.lane.b32.xlu0 %v7001_v47, %s9633_s10  ;;  %v9594_v60 = vld [vmem:[%s9804_s29 + $0x3c] sm:$0xf]  ;;  %v6359_v26 = vrot.slane %v6358_v28, 4  ;;  %v7002_v28 = vld [vmem:[#allocation4 + $0x78] sm:$0xf]  ;;  %v6379_v37 = vshll.u32 %v6117_v13, 16 }
 0x4ca   : > { %v9216_v47 = vcombine.low %v9593_v59, %v9594_v60  ;;  %v7888_v43 = vsel %vm10094_vm13, %v9161_v14, %v7887_v20  ;;  %v7891_v33 = vsel %vm10094_vm13, %v7889_v46, %v7890_v36  ;;  %v7206_v45 = vld [vmem:[#allocation4 + $0x84] sm:$0xf]  ;;  %v7431_v59 = vrot.slane %v7429_v32, 5 }
 0x4cb   : > { %v7616_v7 = vpop.permute.xlu1 %7615  ;;  %v7618_v61 = vpop.permute.xlu0 %7617  ;;  %v6364_v20 = vsel %vm9830_vm10, %v6359_v26, %v6363_v49  ;;  %v7444_v23 = vshrl.u32 %v7206_v45, 16  ;;  %v7447_v49 = vshll.u32 %v7206_v45, 16  ;;  %v7435_v60 = vrot.slane %v7433_v50, 4  ;;  %v7765_v26 = vld [vmem:[#allocation4 + $0x7c] sm:$0xf] }
 0x4cc   : > { %7710 = vst.msk [vmem:[#allocation5 + $0x8] sm:$0xf] %vm7707_vm15, %v7616_v7  ;;  %7711 = vst.msk [vmem:[#allocation5 + $0xc] sm:$0xf] %vm7707_vm15, %v7618_v61  ;;  %9490 = vmatmul.mubr.msk.bf16.gmra.mxu0 %vm8534_vm5, %v9216_v47  ;;  %v6349_v7 = vrot.slane %v6347_v38, 5  ;;  %v6371_v61 = vshll.u32 %v6116_v58, 16 }
 0x4cd   : > { %7635 = vrot.lane.b32.xlu1 %v7384_v62, %s9634_s15  ;;  %7637 = vrot.lane.b32.xlu0 %v7394_v12, %s9634_s15  ;;  %v6802_v62 = vrot.slane %v6673_v21, 5  ;;  %v6340_v12 = vsel %vm9830_vm10, %v6335_v3, %v12055_v11  ;;  %v6675_v11 = vld [vmem:[#allocation4 + $0x78] sm:$0xe]  ;;  %v7446_v47 = vrot.slane %v7444_v23, 4  ;;  %v7436_v21 = vor.u32 %v7435_v60, %v7431_v59  ;;  %v7767_v60 = vld [vmem:[#allocation4 + $0x84] sm:$0xe] }
 0x4ce   : > { %v6350_v55 = vsel %vm9830_vm10, %v6345_v6, %v6349_v7  ;;  %v6373_v16 = vrot.slane %v6371_v61, 5  ;;  %v9147_v4 = vrot.slane %v6675_v11, 9  ;;  %v7205_v6 = vld [vmem:[#allocation4 + $0x80] sm:$0x1]  ;;  %v7208_v7 = vld [vmem:[#allocation4 + $0x8c] sm:$0x1] }
 0x4cf   : > { %v7949_v22 = vpop.permute.xlu1 %7948  ;;  %v7951_v24 = vpop.permute.xlu0 %7950  ;;  %v7439_v61 = vshll.u32 %v7205_v6, 16  ;;  %v6376_v11 = vshrl.u32 %v6117_v13, 16  ;;  %v9597_v13 = vld [vmem:[%s9804_s29 + $0x48] sm:$0xf] }
 0x4d0   : > { %8045 = vst.msk [vmem:[#allocation5] sm:$0xf] %vm8044_vm0, %v7949_v22  ;;  %8046 = vst.msk [vmem:[#allocation5 + $0x4] sm:$0xf] %vm8044_vm0, %v7951_v24  ;;  %v6374_v18 = vsel %vm9830_vm10, %v6369_v8, %v6373_v16  ;;  %v6804_v22 = vrot.slane %v6802_v62, 4  ;;  %v6809_v24 = vrot.slane %v6676_v63, 5 }
 0x4d1   : > { %7639 = vrot.lane.b32.xlu1 %v7408_v17, %s9634_s15  ;;  %7641 = vrot.lane.b32.xlu0 %v7418_v0, %s9634_s15  ;;  %v7203_v0 = vld [vmem:[#allocation4 + $0x78] sm:$0xf]  ;;  %v7005_v8 = vld [vmem:[#allocation4 + $0x88] sm:$0xf]  ;;  %v7437_v63 = vrot.slane %v7436_v21, 4  ;;  %v7463_v16 = vshll.u32 %v7208_v7, 16 }
 0x4d2   : > { %v7423_v44 = vshll.u32 %v7203_v0, 16  ;;  %v6811_v46 = vrot.slane %v6809_v24, 4  ;;  %v6810_v38 = vsel %vm10094_vm13, %v9147_v4, %v6809_v24  ;;  %v7441_v19 = vrot.slane %v7439_v61, 5  ;;  %v7766_v24 = vld [vmem:[#allocation4 + $0x80] sm:$0x1] }
 0x4d3   : > { %v7953_v15 = vpop.permute.xlu1 %7952  ;;  %v7955_v25 = vpop.permute.xlu0 %7954  ;;  %v9595_v7 = vld [vmem:[%s9804_s29 + $0x40] sm:$0xf]  ;;  %v9596_v61 = vld [vmem:[%s9804_s29 + $0x44] sm:$0xf] }
 0x4d4   : > { %8047 = vst.msk [vmem:[#allocation5 + $0x8] sm:$0xf] %vm8044_vm0, %v7953_v15  ;;  %8048 = vst.msk [vmem:[#allocation5 + $0xc] sm:$0xf] %vm8044_vm0, %v7955_v25  ;;  %v7207_v15 = vld [vmem:[#allocation4 + $0x88] sm:$0xf]  ;;  %v6806_v25 = vsel %vm10094_vm13, %v6804_v22, %v6805_v34  ;;  %v6813_v58 = vsel %vm10094_vm13, %v6811_v46, %v6812_v9 }
 0x4d5   : > { %7972 = vrot.lane.b32.xlu1 %v7881_v40, %s9635_s23  ;;  %7974 = vrot.lane.b32.xlu0 %v7884_v31, %s9635_s23  ;;  %v6803_v40 = vsel %vm10094_vm13, %v9146_v29, %v6802_v62  ;;  %v7420_v31 = vshrl.u32 %v7203_v0, 16  ;;  %v7453_v41 = vshll.u32 %v7207_v15, 16  ;;  %v7457_v53 = vshrl.u32 %v7207_v15, 16  ;;  %v12130_v34 = vld [vmem:[#allocation4 + $0x88] sm:$0xf] }
 0x4d6   : > { %v7425_v36 = vrot.slane %v7423_v44, 5  ;;  %v7894_v22 = vrot.slane %v7765_v26, 5  ;;  %v6120_v44 = vld [vmem:[#allocation4 + $0x90] sm:$0xf]  ;;  %v7897_v15 = vrot.slane %v7766_v24, 5  ;;  %v7901_v4 = vrot.slane %v12130_v34, 5 }
 0x4d7   : > { %v6528_v2 = vpop.permute.xlu1 %6527  ;;  %v6530_v27 = vpop.permute.xlu0 %6529  ;;  %v9562_v5 = vld [vmem:[#allocation5] sm:$0xff]   ;;  %v7422_v14 = vrot.slane %v7420_v31, 4  ;;  %v6679_v24 = vld [vmem:[#allocation4 + $0x88] sm:$0xf] }
 0x4d8   : > { %6620 = vst.msk [vmem:[#allocation5 + $0x10] sm:$0xf] %vm6615_vm9, %v6528_v2  ;;  %6621 = vst.msk [vmem:[#allocation5 + $0x14] sm:$0xf] %vm6615_vm9, %v6530_v27  ;;  %9443 = vmatprep.mubr.msk.bf16.mxu1 %vm8232_vm6, %v9562_v5  ;;  %v7449_v2 = vrot.slane %v7447_v49, 5  ;;  %v12117_v27 = vrot.slane %v7453_v41, 5 }
 0x4d9   : > { %7976 = vrot.lane.b32.xlu1 %v7888_v43, %s9635_s23  ;;  %7978 = vrot.lane.b32.xlu0 %v7891_v33, %s9635_s23  ;;  %v7459_v43 = vrot.slane %v7457_v53, 4  ;;  %v7426_v3 = vor.u32 %v7425_v36, %v7422_v14  ;;  %v7896_v50 = vrot.slane %v7894_v22, 4  ;;  %v6378_v49 = vrot.slane %v6376_v11, 4 }
 0x4da   : > { %v6381_v41 = vrot.slane %v6379_v37, 5  ;;  %v6400_v53 = vshrl.u32 %v6120_v44, 16 }
 0x4db   : > { %v6532_v1 = vpop.permute.xlu1 %6531  ;;  %v6534_v10 = vpop.permute.xlu0 %6533  ;;  %v9563_v42 = vld [vmem:[#allocation5 + $0x8] sm:$0xff]  }
 0x4dc   : > { %6622 = vst.msk [vmem:[#allocation5 + $0x18] sm:$0xf] %vm6615_vm9, %v6532_v1  ;;  %6623 = vst.msk [vmem:[#allocation5 + $0x1c] sm:$0xf] %vm6615_vm9, %v6534_v10  ;;  %9444 = vmatmul.mubr.msk.bf16.vlgmr.msra.gmra.mxu1 %vm8232_vm6, %v9563_v42  ;;  %v7450_v1 = vor.u32 %v7449_v2, %v7446_v47  ;;  %v7460_v10 = vor.u32 %v7459_v43, %v12117_v27  ;;  %v7769_v47 = vld [vmem:[#allocation4 + $0x8c] sm:$0x1] }
 0x4dd   : > { %6551 = vrot.lane.b32.xlu1 %v6340_v12, %s9631_s28  ;;  %6553 = vrot.lane.b32.xlu0 %v6350_v55, %s9631_s28  ;;  %v7004_v12 = vld [vmem:[#allocation4 + $0x84] sm:$0xf]  ;;  %v7427_v55 = vrot.slane %v7426_v3, 4  ;;  %v7903_v43 = vrot.slane %v7901_v4, 4  ;;  %v6402_v3 = vrot.slane %v6400_v53, 4 }
 0x4de   : > { %v6681_v53 = vld [vmem:[#allocation4 + $0x90] sm:$0xe] }
 0x4df   : > { %v6865_v56 = vpop.permute.xlu1 %6864  ;;  %v6867_v17 = vpop.permute.xlu0 %6866  ;;  %v7432_v48 = vsel %vm9830_vm10, %v7427_v55, %v7431_v59  ;;  %v7898_v59 = vsel %vm10094_vm13, %v7896_v50, %v7897_v15  ;;  %v6678_v15 = vld [vmem:[#allocation4 + $0x84] sm:$0xe] }
 0x4e0   : > { %6957 = vst.msk [vmem:[#allocation5 + $0x10] sm:$0xf] %vm6952_vm11, %v6865_v56  ;;  %6958 = vst.msk [vmem:[#allocation5 + $0x14] sm:$0xf] %vm6952_vm11, %v6867_v17  ;;  %v7764_v56 = vld [vmem:[#allocation4 + $0x78] sm:$0xe] }
 0x4e1   : > { %6555 = vrot.lane.b32.xlu1 %v6364_v20, %s9631_s28  ;;  %6557 = vrot.lane.b32.xlu0 %v6374_v18, %s9631_s28  ;;  %v6118_v17 = vld [vmem:[#allocation4 + $0x88] sm:$0xf]  ;;  %v7451_v20 = vrot.slane %v7450_v1, 4  ;;  %v7461_v18 = vrot.slane %v7460_v10, 4  ;;  %v9162_v45 = vrot.slane %v7764_v56, 9  ;;  %v9217_v1 = vcombine.low %v9595_v7, %v9596_v61 }
 0x4e2   : > { %v6389_v31 = vshrl.u32 %v6118_v17, 16  ;;  %v9163_v10 = vrot.slane %v7767_v60, 9  ;;  %v9598_v56 = vld [vmem:[%s9804_s29 + $0x4c] sm:$0xf] }
 0x4e3   : > { %v6869_v39 = vpop.permute.xlu1 %6868  ;;  %v6871_v30 = vpop.permute.xlu0 %6870  ;;  %v7456_v46 = vsel %vm9830_vm10, %v7451_v20, %v12117_v27  ;;  %9493 = vmatprep.mubr.msk.bf16.mxu0 %vm8534_vm5, %v9217_v1 }
 0x4e4   : > { %6959 = vst.msk [vmem:[#allocation5 + $0x18] sm:$0xf] %vm6952_vm11, %v6869_v39  ;;  %6960 = vst.msk [vmem:[#allocation5 + $0x1c] sm:$0xf] %vm6952_vm11, %v6871_v30  ;;  %v7442_v39 = vsel %vm9830_vm10, %v7437_v63, %v7441_v19  ;;  %v7465_v30 = vrot.slane %v7463_v16, 5  ;;  %v6391_v14 = vrot.slane %v6389_v31, 4 }
 0x4e5   : > { %6888 = vrot.lane.b32.xlu1 %v6803_v40, %s9632_s30  ;;  %6890 = vrot.lane.b32.xlu0 %v6806_v25, %s9632_s30  ;;  %v6385_v40 = vshll.u32 %v6118_v17, 16  ;;  %v6121_v25 = vld [vmem:[#allocation4 + $0x94] sm:$0xf]  ;;  %v9218_v17 = vcombine.low %v9597_v13, %v9598_v56  ;;  %v6816_v31 = vrot.slane %v6679_v24, 5  ;;  %v7211_v56 = vld [vmem:[#allocation4 + $0x98] sm:$0x1] }
 0x4e6   : > { %v7466_v32 = vsel %vm9830_vm10, %v7461_v18, %v7465_v30  ;;  %v6409_v36 = vshll.u32 %v6121_v25, 16 }
 0x4e7   : > { %v7059_v54 = vpop.permute.xlu1 %7058  ;;  %v7061_v57 = vpop.permute.xlu0 %7060  ;;  %9494 = vmatmul.mubr.msk.bf16.gmra.mxu0 %vm8534_vm5, %v9218_v17 }
 0x4e8   : > { %7151 = vst.msk [vmem:[#allocation5 + $0x10] sm:$0xf] %vm7146_vm12, %v7059_v54  ;;  %7152 = vst.msk [vmem:[#allocation5 + $0x14] sm:$0xf] %vm7146_vm12, %v7061_v57  ;;  %v6403_v54 = vshll.u32 %v6120_v44, 16  ;;  %v12146_v57 = vrot.slane %v6385_v40, 5 }
 0x4e9   : > { %6892 = vrot.lane.b32.xlu1 %v6810_v38, %s9632_s30  ;;  %6894 = vrot.lane.b32.xlu0 %v6813_v58, %s9632_s30  ;;  %v6413_v38 = vshrl.u32 %v6121_v25, 16  ;;  %v7895_v58 = vsel %vm10094_vm13, %v9162_v45, %v7894_v22  ;;  %v6682_v44 = vld [vmem:[#allocation4 + $0x94] sm:$0xf] }
 0x4ea   : > { %v6405_v6 = vrot.slane %v6403_v54, 5  ;;  %v6823_v50 = vrot.slane %v6682_v44, 5  ;;  %v9148_v54 = vrot.slane %v6678_v15, 9  ;;  %v7771_v44 = vld [vmem:[#allocation4 + $0x94] sm:$0xf] }
 0x4eb   : > { %v7063_v33 = vpop.permute.xlu1 %7062  ;;  %v7065_v5 = vpop.permute.xlu0 %7064  ;;  %v6415_v21 = vrot.slane %v6413_v38, 4 }
 0x4ec   : > { %7153 = vst.msk [vmem:[#allocation5 + $0x18] sm:$0xf] %vm7146_vm12, %v7063_v33  ;;  %7154 = vst.msk [vmem:[#allocation5 + $0x1c] sm:$0xf] %vm7146_vm12, %v7065_v5  ;;  %v6382_v33 = vor.u32 %v6381_v41, %v6378_v49  ;;  %v6119_v5 = vld [vmem:[#allocation4 + $0x8c] sm:$0x1]  ;;  %v6406_v18 = vor.u32 %v6405_v6, %v6402_v3 }
 0x4ed   : > { %7082 = vrot.lane.b32.xlu1 %v7002_v28, %s9633_s10  ;;  %7084 = vrot.lane.b32.xlu0 %v7003_v52, %s9633_s10  ;;  %v6392_v28 = vor.u32 %v6391_v14, %v12146_v57  ;;  %v6411_v52 = vrot.slane %v6409_v36, 5  ;;  %v6818_v49 = vrot.slane %v6816_v31, 4  ;;  %v7210_v41 = vld [vmem:[#allocation4 + $0x94] sm:$0xf]  ;;  %v6683_v14 = vld [vmem:[#allocation4 + $0x98] sm:$0x1] }
 0x4ee   : > { %v6383_v16 = vrot.slane %v6382_v33, 4  ;;  %v6407_v30 = vrot.slane %v6406_v18, 4  ;;  %v9149_v33 = vrot.slane %v6681_v53, 9  ;;  %v7212_v3 = vld [vmem:[#allocation4 + $0x9c] sm:$0xf] }
 0x4ef   : > { %v7620_v42 = vpop.permute.xlu1 %7619  ;;  %v7622_v62 = vpop.permute.xlu0 %7621  ;;  %v6393_v20 = vrot.slane %v6392_v28, 4  ;;  %v6416_v22 = vor.u32 %v6415_v21, %v6411_v52  ;;  %v7213_v6 = vld [vmem:[#allocation4 + $0xa0] sm:$0xf] }
 0x4f0   : > { %7712 = vst.msk [vmem:[#allocation5 + $0x10] sm:$0xf] %vm7707_vm15, %v7620_v42  ;;  %7713 = vst.msk [vmem:[#allocation5 + $0x14] sm:$0xf] %vm7707_vm15, %v7622_v62  ;;  %v7904_v42 = vrot.slane %v7769_v47, 5  ;;  %v6395_v62 = vshll.u32 %v6119_v5, 16  ;;  %v6388_v11 = vsel %vm9830_vm10, %v6383_v16, %v12146_v57  ;;  %v6824_v28 = vsel %vm10094_vm13, %v9149_v33, %v6823_v50 }
 0x4f1   : > { %7086 = vrot.lane.b32.xlu1 %v7004_v12, %s9633_s10  ;;  %7088 = vrot.lane.b32.xlu0 %v7005_v8, %s9633_s10  ;;  %v6122_v12 = vld [vmem:[#allocation4 + $0x98] sm:$0x1]  ;;  %v7902_v8 = vsel %vm10094_vm13, %v9163_v10, %v7901_v4  ;;  %v6417_v40 = vrot.slane %v6416_v22, 4  ;;  %v7209_v4 = vld [vmem:[#allocation4 + $0x90] sm:$0xf]  ;;  %v7477_v47 = vshll.u32 %v7210_v41, 16 }
 0x4f2   : > { %v7905_v19 = vsel %vm10094_vm13, %v7903_v43, %v7904_v42  ;;  %v7468_v36 = vshrl.u32 %v7209_v4, 16  ;;  %v7471_v60 = vshll.u32 %v7209_v4, 16  ;;  %v6826_v5 = vrot.slane %v6683_v14, 5  ;;  %v7006_v16 = vld [vmem:[#allocation4 + $0x90] sm:$0xf] }
 0x4f3   : > { %v7624_v0 = vpop.permute.xlu1 %7623  ;;  %v7626_v29 = vpop.permute.xlu0 %7625  ;;  %v7479_v10 = vrot.slane %v7477_v47, 5 }
 0x4f4   : > { %7714 = vst.msk [vmem:[#allocation5 + $0x18] sm:$0xf] %vm7707_vm15, %v7624_v0  ;;  %7715 = vst.msk [vmem:[#allocation5 + $0x1c] sm:$0xf] %vm7707_vm15, %v7626_v29  ;;  %v6397_v0 = vrot.slane %v6395_v62, 5  ;;  %v6419_v29 = vshll.u32 %v6122_v12, 16 }
 0x4f5   : > { %7643 = vrot.lane.b32.xlu1 %v7432_v48, %s9634_s15  ;;  %7645 = vrot.lane.b32.xlu0 %v7442_v39, %s9634_s15  ;;  %v7473_v1 = vrot.slane %v7471_v60, 5  ;;  %v7492_v62 = vshrl.u32 %v7212_v3, 16  ;;  %v7495_v12 = vshll.u32 %v7212_v3, 16  ;;  %v7773_v3 = vld [vmem:[#allocation4 + $0x9c] sm:$0xe] }
 0x4f6   : > { %v6398_v39 = vsel %vm9830_vm10, %v6393_v20, %v6397_v0  ;;  %v6421_v45 = vrot.slane %v6419_v29, 5  ;;  %v7487_v0 = vshll.u32 %v7211_v56, 16 }
 0x4f7   : > { %v7957_v9 = vpop.permute.xlu1 %7956  ;;  %v7959_v23 = vpop.permute.xlu0 %7958  ;;  %v7494_v20 = vrot.slane %v7492_v62, 4  ;;  %v7497_v18 = vrot.slane %v7495_v12, 5  ;;  %v6127_v12 = vld [vmem:[#allocation4 + $0xac] sm:$0xf] }
 0x4f8   : > { %8049 = vst.msk [vmem:[#allocation5 + $0x10] sm:$0xf] %vm8044_vm0, %v7957_v9  ;;  %8050 = vst.msk [vmem:[#allocation5 + $0x14] sm:$0xf] %vm8044_vm0, %v7959_v23  ;;  %v6412_v9 = vsel %vm9830_vm10, %v6407_v30, %v6411_v52  ;;  %v6422_v23 = vsel %vm9830_vm10, %v6417_v40, %v6421_v45  ;;  %v7470_v52 = vrot.slane %v7468_v36, 4  ;;  %v7489_v45 = vrot.slane %v7487_v0, 5 }
 0x4f9   : > { %7647 = vrot.lane.b32.xlu1 %v7456_v46, %s9634_s15  ;;  %7649 = vrot.lane.b32.xlu0 %v7466_v32, %s9634_s15  ;;  %v6680_v32 = vld [vmem:[#allocation4 + $0x8c] sm:$0x1]  ;;  %v7498_v40 = vor.u32 %v7497_v18, %v7494_v20 }
 0x4fa   : > { %v6819_v57 = vrot.slane %v6680_v32, 5  ;;  %v7474_v13 = vor.u32 %v7473_v1, %v7470_v52  ;;  %v7908_v32 = vrot.slane %v7771_v44, 5  ;;  %v9600_v44 = vld [vmem:[%s9804_s29 + $0x54] sm:$0xf] }
 0x4fb   : > { %v7961_v2 = vpop.permute.xlu1 %7960  ;;  %v7963_v27 = vpop.permute.xlu0 %7962 }
 0x4fc   : > { %8051 = vst.msk [vmem:[#allocation5 + $0x18] sm:$0xf] %vm8044_vm0, %v7961_v2  ;;  %8052 = vst.msk [vmem:[#allocation5 + $0x1c] sm:$0xf] %vm8044_vm0, %v7963_v27  ;;  %v7481_v2 = vshrl.u32 %v7210_v41, 16  ;;  %v6817_v27 = vsel %vm10094_vm13, %v9148_v54, %v6816_v31  ;;  %v6820_v43 = vsel %vm10094_vm13, %v6818_v49, %v6819_v57 }
 0x4fd   : > { %7980 = vrot.lane.b32.xlu1 %v7895_v58, %s9635_s23  ;;  %7982 = vrot.lane.b32.xlu0 %v7898_v59, %s9635_s23  ;;  %v6825_v59 = vrot.slane %v6823_v50, 4  ;;  %v7774_v49 = vld [vmem:[#allocation4 + $0xa0] sm:$0xf]  ;;  %v6123_v41 = vld [vmem:[#allocation4 + $0x9c] sm:$0xf] }
 0x4fe   : > { %v7483_v42 = vrot.slane %v7481_v2, 4  ;;  %v7770_v54 = vld [vmem:[#allocation4 + $0x90] sm:$0xe]  ;;  %v7772_v57 = vld [vmem:[#allocation4 + $0x98] sm:$0x1]  ;;  %v6424_v2 = vshrl.u32 %v6123_v41, 16 }
 0x4ff   : > { %v6536_v55 = vpop.permute.xlu1 %6535  ;;  %v6538_v26 = vpop.permute.xlu0 %6537  ;;  %v9564_v63 = vld [vmem:[#allocation5 + $0x10] sm:$0xff]   ;;  %v6827_v61 = vsel %vm10094_vm13, %v6825_v59, %v6826_v5  ;;  %v6124_v59 = vld [vmem:[#allocation4 + $0xa0] sm:$0xf]  ;;  %v7911_v33 = vrot.slane %v7772_v57, 5 }
 0x500   : > { %6624 = vst.msk [vmem:[#allocation5 + $0x20] sm:$0xf] %vm6615_vm9, %v6536_v55  ;;  %6625 = vst.msk [vmem:[#allocation5 + $0x24] sm:$0xf] %vm6615_vm9, %v6538_v26  ;;  %9447 = vmatprep.mubr.msk.bf16.mxu1 %vm8232_vm6, %v9564_v63  ;;  %v7501_v55 = vshll.u32 %v7213_v6, 16  ;;  %v7505_v26 = vshrl.u32 %v7213_v6, 16  ;;  %v7484_v17 = vor.u32 %v7483_v42, %v7479_v10 }
 0x501   : > { %7984 = vrot.lane.b32.xlu1 %v7902_v8, %s9635_s23  ;;  %7986 = vrot.lane.b32.xlu0 %v7905_v19, %s9635_s23  ;;  %v7007_v19 = vld [vmem:[#allocation4 + $0x94] sm:$0xf]  ;;  %v6126_v5 = vld [vmem:[#allocation4 + $0xa8] sm:$0xf]  ;;  %v7775_v6 = vld [vmem:[#allocation4 + $0xa4] sm:$0x1] }
 0x502   : > { %v7503_v22 = vrot.slane %v7501_v55, 5  ;;  %v7507_v24 = vrot.slane %v7505_v26, 4  ;;  %v7485_v30 = vrot.slane %v7484_v17, 4  ;;  %v6437_v52 = vshrl.u32 %v6124_v59, 16  ;;  %v5921_v57 = vld [vmem:[#allocation4 + $0xac] sm:$0xf] }
 0x503   : > { %v6540_v48 = vpop.permute.xlu1 %6539  ;;  %v6542_v34 = vpop.permute.xlu0 %6541  ;;  %v9565_v37 = vld [vmem:[#allocation5 + $0x18] sm:$0xff]   ;;  %v6426_v42 = vrot.slane %v6424_v2, 4  ;;  %v6448_v55 = vshrl.u32 %v6126_v5, 16  ;;  %v6451_v26 = vshll.u32 %v6126_v5, 16 }
 0x504   : > { %6626 = vst.msk [vmem:[#allocation5 + $0x28] sm:$0xf] %vm6615_vm9, %v6540_v48  ;;  %6627 = vst.msk [vmem:[#allocation5 + $0x2c] sm:$0xf] %vm6615_vm9, %v6542_v34  ;;  %9448 = vmatmul.mubr.msk.bf16.gmra.mxu1 %vm8232_vm6, %v9565_v37  ;;  %v7008_v34 = vld [vmem:[#allocation4 + $0x9c] sm:$0xf]  ;;  %v7508_v31 = vor.u32 %v7507_v24, %v7503_v22  ;;  %v7490_v4 = vsel %vm9830_vm10, %v7485_v30, %v7489_v45 }
 0x505   : > { %6559 = vrot.lane.b32.xlu1 %v6388_v11, %s9631_s28  ;;  %6561 = vrot.lane.b32.xlu0 %v6398_v39, %s9631_s28  ;;  %v7214_v11 = vld [vmem:[#allocation4 + $0xa4] sm:$0x1]  ;;  %v7009_v37 = vld [vmem:[#allocation4 + $0xa0] sm:$0xf]  ;;  %v7475_v39 = vrot.slane %v7474_v13, 4  ;;  %v6439_v13 = vrot.slane %v6437_v52, 4 }
 0x506   : > { %v7511_v15 = vshll.u32 %v7214_v11, 16  ;;  %v6450_v0 = vrot.slane %v6448_v55, 4  ;;  %v6125_v11 = vld [vmem:[#allocation4 + $0xa4] sm:$0x1]  ;;  %v7215_v52 = vld [vmem:[#allocation4 + $0xa8] sm:$0xf] }
 0x507   : > { %v6873_v25 = vpop.permute.xlu1 %6872  ;;  %v6875_v46 = vpop.permute.xlu0 %6874  ;;  %v7480_v50 = vsel %vm9830_vm10, %v7475_v39, %v7479_v10  ;;  %v7519_v55 = vshll.u32 %v7215_v52, 16 }
 0x508   : > { %6961 = vst.msk [vmem:[#allocation5 + $0x20] sm:$0xf] %vm6952_vm11, %v6873_v25  ;;  %6962 = vst.msk [vmem:[#allocation5 + $0x24] sm:$0xf] %vm6952_vm11, %v6875_v46  ;;  %v7513_v53 = vrot.slane %v7511_v15, 5 }
 0x509   : > { %6563 = vrot.lane.b32.xlu1 %v6412_v9, %s9631_s28  ;;  %6565 = vrot.lane.b32.xlu0 %v6422_v23, %s9631_s28  ;;  %v7499_v9 = vrot.slane %v7498_v40, 4  ;;  %v7509_v23 = vrot.slane %v7508_v31, 4  ;;  %v9599_v31 = vld [vmem:[%s9804_s29 + $0x50] sm:$0xf]  ;;  %v9601_v15 = vld [vmem:[%s9804_s29 + $0x58] sm:$0xf] }
 0x50a   : > { %v9219_v45 = vcombine.low %v9599_v31, %v9600_v44 }
 0x50b   : > { %v6877_v38 = vpop.permute.xlu1 %6876  ;;  %v6879_v58 = vpop.permute.xlu0 %6878  ;;  %v7504_v60 = vsel %vm9830_vm10, %v7499_v9, %v7503_v22  ;;  %v7514_v47 = vsel %vm9830_vm10, %v7509_v23, %v7513_v53  ;;  %v6457_v22 = vshll.u32 %v6127_v12, 16 }
 0x50c   : > { %6963 = vst.msk [vmem:[#allocation5 + $0x28] sm:$0xf] %vm6952_vm11, %v6877_v38  ;;  %6964 = vst.msk [vmem:[#allocation5 + $0x2c] sm:$0xf] %vm6952_vm11, %v6879_v58  ;;  %v7910_v38 = vrot.slane %v7908_v32, 4  ;;  %v7915_v58 = vrot.slane %v7774_v49, 5  ;;  %9497 = vmatprep.mubr.msk.bf16.mxu0 %vm8534_vm5, %v9219_v45 }
 0x50d   : > { %6896 = vrot.lane.b32.xlu1 %v6817_v27, %s9632_s30  ;;  %6898 = vrot.lane.b32.xlu0 %v6820_v43, %s9632_s30  ;;  %v6427_v27 = vshll.u32 %v6123_v41, 16  ;;  %v9164_v43 = vrot.slane %v7770_v54, 9  ;;  %v6459_v9 = vrot.slane %v6457_v22, 5  ;;  %v6443_v49 = vshll.u32 %v6125_v11, 16  ;;  %v6128_v54 = vld [vmem:[#allocation4 + $0xb0] sm:$0x1] }
 0x50e   : > { %v7912_v1 = vsel %vm10094_vm13, %v7910_v38, %v7911_v33  ;;  %v7917_v10 = vrot.slane %v7915_v58, 4  ;;  %v6688_v33 = vld [vmem:[#allocation4 + $0xac] sm:$0xf] }
 0x50f   : > { %v7067_v21 = vpop.permute.xlu1 %7066  ;;  %v7069_v7 = vpop.permute.xlu0 %7068  ;;  %v6429_v62 = vrot.slane %v6427_v27, 5 }
 0x510   : > { %7155 = vst.msk [vmem:[#allocation5 + $0x20] sm:$0xf] %vm7146_vm12, %v7067_v21  ;;  %7156 = vst.msk [vmem:[#allocation5 + $0x24] sm:$0xf] %vm7146_vm12, %v7069_v7 }
 0x511   : > { %6900 = vrot.lane.b32.xlu1 %v6824_v28, %s9632_s30  ;;  %6902 = vrot.lane.b32.xlu0 %v6827_v61, %s9632_s30  ;;  %v6433_v28 = vshll.u32 %v6124_v59, 16  ;;  %v7909_v61 = vsel %vm10094_vm13, %v9164_v43, %v7908_v32  ;;  %v6430_v24 = vor.u32 %v6429_v62, %v6426_v42  ;;  %v5920_v32 = vld [vmem:[#allocation4 + $0xa8] sm:$0xf]  ;;  %v6685_v59 = vld [vmem:[#allocation4 + $0xa0] sm:$0xf] }
 0x512   : > { %v6684_v43 = vld [vmem:[#allocation4 + $0x9c] sm:$0xe]  ;;  %v6686_v42 = vld [vmem:[#allocation4 + $0xa4] sm:$0x1]  ;;  %v6687_v62 = vld [vmem:[#allocation4 + $0xa8] sm:$0xe] }
 0x513   : > { %v7071_v8 = vpop.permute.xlu1 %7070  ;;  %v7073_v63 = vpop.permute.xlu0 %7072 }
 0x514   : > { %7157 = vst.msk [vmem:[#allocation5 + $0x28] sm:$0xf] %vm7146_vm12, %v7071_v8  ;;  %7158 = vst.msk [vmem:[#allocation5 + $0x2c] sm:$0xf] %vm7146_vm12, %v7073_v63  ;;  %v9165_v8 = vrot.slane %v7773_v3, 9  ;;  %v7918_v63 = vrot.slane %v7775_v6, 5 }
 0x515   : > { %7090 = vrot.lane.b32.xlu1 %v7006_v16, %s9633_s10  ;;  %7092 = vrot.lane.b32.xlu0 %v7007_v19, %s9633_s10  ;;  %v6435_v16 = vrot.slane %v6433_v28, 5  ;;  %v6830_v28 = vrot.slane %v6685_v59, 5 }
 0x516   : > { %v7916_v19 = vsel %vm10094_vm13, %v9165_v8, %v7915_v58  ;;  %v7919_v20 = vsel %vm10094_vm13, %v7917_v10, %v7918_v63 }
 0x517   : > { %v7628_v29 = vpop.permute.xlu1 %7627  ;;  %v7630_v48 = vpop.permute.xlu0 %7629  ;;  %v6440_v40 = vor.u32 %v6439_v13, %v6435_v16  ;;  %v6832_v63 = vrot.slane %v6830_v28, 4  ;;  %v7218_v13 = vld [vmem:[#allocation4 + $0xb4] sm:$0xf] }
 0x518   : > { %7716 = vst.msk [vmem:[#allocation5 + $0x20] sm:$0xf] %vm7707_vm15, %v7628_v29  ;;  %7717 = vst.msk [vmem:[#allocation5 + $0x24] sm:$0xf] %vm7707_vm15, %v7630_v48  ;;  %v6453_v29 = vrot.slane %v6451_v26, 5  ;;  %v6461_v48 = vshrl.u32 %v6127_v12, 16 }
 0x519   : > { %7094 = vrot.lane.b32.xlu1 %v7008_v34, %s9633_s10  ;;  %7096 = vrot.lane.b32.xlu0 %v7009_v37, %s9633_s10  ;;  %v5919_v34 = vld [vmem:[#allocation4 + $0xa0] sm:$0xf]  ;;  %v7516_v12 = vshrl.u32 %v7215_v52, 16 }
 0x51a   : > { %v6463_v23 = vrot.slane %v6461_v48, 4 }
 0x51b   : > { %v7632_v25 = vpop.permute.xlu1 %7631  ;;  %v7634_v46 = vpop.permute.xlu0 %7633 }
 0x51c   : > { %7718 = vst.msk [vmem:[#allocation5 + $0x28] sm:$0xf] %vm7707_vm15, %v7632_v25  ;;  %7719 = vst.msk [vmem:[#allocation5 + $0x2c] sm:$0xf] %vm7707_vm15, %v7634_v46  ;;  %v9602_v25 = vld [vmem:[%s9804_s29 + $0x5c] sm:$0xf]  ;;  %v6464_v58 = vor.u32 %v6463_v23, %v6459_v9 }
 0x51d   : > { %7651 = vrot.lane.b32.xlu1 %v7480_v50, %s9634_s15  ;;  %7653 = vrot.lane.b32.xlu0 %v7490_v4, %s9634_s15  ;;  %v9220_v46 = vcombine.low %v9601_v15, %v9602_v25  ;;  %v6431_v50 = vrot.slane %v6430_v24, 4  ;;  %v6454_v4 = vor.u32 %v6453_v29, %v6450_v0  ;;  %v7518_v24 = vrot.slane %v7516_v12, 4 }
 0x51e   : > { %v6465_v6 = vrot.slane %v6464_v58, 4  ;;  %v7521_v0 = vrot.slane %v7519_v55, 5 }
 0x51f   : > { %v7965_v14 = vpop.permute.xlu1 %7964  ;;  %v7967_v36 = vpop.permute.xlu0 %7966  ;;  %9498 = vmatmul.mubr.msk.bf16.gmra.mxu0 %vm8534_vm5, %v9220_v46  ;;  %v6455_v38 = vrot.slane %v6454_v4, 4 }
 0x520   : > { %8053 = vst.msk [vmem:[#allocation5 + $0x20] sm:$0xf] %vm8044_vm0, %v7965_v14  ;;  %8054 = vst.msk [vmem:[#allocation5 + $0x24] sm:$0xf] %vm8044_vm0, %v7967_v36  ;;  %v6436_v14 = vsel %vm9830_vm10, %v6431_v50, %v6435_v16  ;;  %v6441_v36 = vrot.slane %v6440_v40, 4  ;;  %v7522_v15 = vor.u32 %v7521_v0, %v7518_v24 }
 0x521   : > { %7655 = vrot.lane.b32.xlu1 %v7504_v60, %s9634_s15  ;;  %7657 = vrot.lane.b32.xlu0 %v7514_v47, %s9634_s15  ;;  %v6445_v60 = vrot.slane %v6443_v49, 5  ;;  %v6467_v47 = vshll.u32 %v6128_v54, 16  ;;  %v6460_v3 = vsel %vm9830_vm10, %v6455_v38, %v6459_v9  ;;  %v7216_v16 = vld [vmem:[#allocation4 + $0xac] sm:$0xf]  ;;  %v7219_v40 = vld [vmem:[#allocation4 + $0xb8] sm:$0xf] }
 0x522   : > { %v7525_v29 = vshll.u32 %v7216_v16, 16  ;;  %v7529_v48 = vshrl.u32 %v7216_v16, 16  ;;  %v7549_v9 = vshll.u32 %v7219_v40, 16  ;;  %v7553_v23 = vshrl.u32 %v7219_v40, 16  ;;  %v7217_v54 = vld [vmem:[#allocation4 + $0xb0] sm:$0x1] }
 0x523   : > { %v7969_v21 = vpop.permute.xlu1 %7968  ;;  %v7971_v7 = vpop.permute.xlu0 %7970  ;;  %v6446_v5 = vsel %vm9830_vm10, %v6441_v36, %v6445_v60  ;;  %v7535_v60 = vshll.u32 %v7217_v54, 16  ;;  %v7779_v16 = vld [vmem:[#allocation4 + $0xb4] sm:$0xe]  ;;  %v6133_v54 = vld [vmem:[#allocation4 + $0xc4] sm:$0xf] }
 0x524   : > { %8055 = vst.msk [vmem:[#allocation5 + $0x28] sm:$0xf] %vm8044_vm0, %v7969_v21  ;;  %8056 = vst.msk [vmem:[#allocation5 + $0x2c] sm:$0xf] %vm8044_vm0, %v7971_v7  ;;  %v6469_v21 = vrot.slane %v6467_v47, 5  ;;  %v9150_v7 = vrot.slane %v6684_v43, 9 }
 0x525   : > { %7988 = vrot.lane.b32.xlu1 %v7909_v61, %s9635_s23  ;;  %7990 = vrot.lane.b32.xlu0 %v7912_v1, %s9635_s23  ;;  %v6837_v61 = vrot.slane %v6688_v33, 5  ;;  %v7527_v25 = vrot.slane %v7525_v29, 5  ;;  %v7531_v46 = vrot.slane %v7529_v48, 4  ;;  %v7551_v58 = vrot.slane %v7549_v9, 5  ;;  %v7013_v43 = vld [vmem:[#allocation4 + $0xb8] sm:$0xf] }
 0x526   : > { %v6470_v26 = vsel %vm9830_vm10, %v6465_v6, %v6469_v21  ;;  %v6831_v8 = vsel %vm10094_vm13, %v9150_v7, %v6830_v28  ;;  %v7555_v59 = vrot.slane %v7553_v23, 4  ;;  %v7777_v28 = vld [vmem:[#allocation4 + $0xac] sm:$0xf]  ;;  %v7537_v52 = vrot.slane %v7535_v60, 5  ;;  %v7776_v7 = vld [vmem:[#allocation4 + $0xa8] sm:$0xe] }
 0x527   : > { %v6544_v56 = vpop.permute.xlu1 %6543  ;;  %v6546_v17 = vpop.permute.xlu0 %6545  ;;  %v9566_v18 = vld [vmem:[#allocation5 + $0x20] sm:$0xff]   ;;  %v7532_v36 = vor.u32 %v7531_v46, %v7527_v25  ;;  %v9603_v23 = vld [vmem:[%s9804_s29 + $0x60] sm:$0xf] }
 0x528   : > { %6628 = vst.msk [vmem:[#allocation5 + $0x30] sm:$0xf] %vm6615_vm9, %v6544_v56  ;;  %6629 = vst.msk [vmem:[#allocation5 + $0x34] sm:$0xf] %vm6615_vm9, %v6546_v17  ;;  %9451 = vmatprep.mubr.msk.bf16.mxu1 %vm8232_vm6, %v9566_v18  ;;  %v6833_v56 = vrot.slane %v6686_v42, 5  ;;  %v9151_v17 = vrot.slane %v6687_v62, 9  ;;  %v7556_v6 = vor.u32 %v7555_v59, %v7551_v58 }
 0x529   : > { %7992 = vrot.lane.b32.xlu1 %v7916_v19, %s9635_s23  ;;  %7994 = vrot.lane.b32.xlu0 %v7919_v20, %s9635_s23  ;;  %v6689_v19 = vld [vmem:[#allocation4 + $0xb0] sm:$0x1]  ;;  %v6839_v20 = vrot.slane %v6837_v61, 4  ;;  %v7780_v42 = vld [vmem:[#allocation4 + $0xb8] sm:$0xf] }
 0x52a   : > { %v6838_v11 = vsel %vm10094_vm13, %v9151_v17, %v6837_v61  ;;  %v6129_v62 = vld [vmem:[#allocation4 + $0xb4] sm:$0xf]  ;;  %v6130_v17 = vld [vmem:[#allocation4 + $0xb8] sm:$0xf] }
 0x52b   : > { %v6548_v37 = vpop.permute.xlu1 %6547  ;;  %v6550_v39 = vpop.permute.xlu0 %6549  ;;  %v9567_v30 = vld [vmem:[#allocation5 + $0x28] sm:$0xff]  }
 0x52c   : > { %6630 = vst.msk [vmem:[#allocation5 + $0x38] sm:$0xf] %vm6615_vm9, %v6548_v37  ;;  %6631 = vst.msk [vmem:[#allocation5 + $0x3c] sm:$0xf] %vm6615_vm9, %v6550_v39  ;;  %9452 = vmatmul.mubr.msk.bf16.gmra.mxu1 %vm8232_vm6, %v9567_v30  ;;  %v7540_v37 = vshrl.u32 %v7218_v13, 16  ;;  %v7543_v39 = vshll.u32 %v7218_v13, 16 }
 0x52d   : > { %6008 = vrot.lane.b32.xlu1 %v5919_v34, %s9628_s18  ;;  %6010 = vrot.lane.b32.xlu0 %v5920_v32, %s9628_s18  ;;  %v6834_v34 = vsel %vm10094_vm13, %v6832_v63, %v6833_v56  ;;  %v6840_v30 = vrot.slane %v6689_v19, 5  ;;  %v7010_v32 = vld [vmem:[#allocation4 + $0xa8] sm:$0xf]  ;;  %v7778_v63 = vld [vmem:[#allocation4 + $0xb0] sm:$0x1]  ;;  %v7929_v56 = vrot.slane %v7780_v42, 5 }
 0x52e   : > { %v7542_v50 = vrot.slane %v7540_v37, 4  ;;  %v7545_v4 = vrot.slane %v7543_v39, 5  ;;  %v6472_v19 = vshrl.u32 %v6129_v62, 16  ;;  %v6132_v37 = vld [vmem:[#allocation4 + $0xc0] sm:$0xf] }
 0x52f   : > { %v6881_v41 = vpop.permute.xlu1 %6880  ;;  %v6883_v53 = vpop.permute.xlu0 %6882  ;;  %v6841_v45 = vsel %vm10094_vm13, %v6839_v20, %v6840_v30  ;;  %v6475_v20 = vshll.u32 %v6129_v62, 16  ;;  %v7781_v39 = vld [vmem:[#allocation4 + $0xbc] sm:$0x1]  ;;  %v7931_v30 = vrot.slane %v7929_v56, 4  ;;  %v6499_v9 = vshll.u32 %v6132_v37, 16 }
 0x530   : > { %6965 = vst.msk [vmem:[#allocation5 + $0x30] sm:$0xf] %vm6952_vm11, %v6881_v41  ;;  %6966 = vst.msk [vmem:[#allocation5 + $0x34] sm:$0xf] %vm6952_vm11, %v6883_v53  ;;  %v7523_v53 = vrot.slane %v7522_v15, 4  ;;  %v7546_v38 = vor.u32 %v7545_v4, %v7542_v50  ;;  %v6474_v40 = vrot.slane %v6472_v19, 4 }
 0x531   : > { %6012 = vrot.lane.b32.xlu1 %v5921_v57, %s9628_s18  ;;  %6567 = vrot.lane.b32.xlu0 %v6436_v14, %s9631_s28  ;;  %v7011_v57 = vld [vmem:[#allocation4 + $0xac] sm:$0xf]  ;;  %v7012_v14 = vld [vmem:[#allocation4 + $0xb4] sm:$0xf]  ;;  %v6496_v4 = vshrl.u32 %v6132_v37, 16 }
 0x532   : > { %v7528_v33 = vsel %vm9830_vm10, %v7523_v53, %v7527_v25  ;;  %v7932_v53 = vrot.slane %v7781_v39, 5  ;;  %v6691_v19 = vld [vmem:[#allocation4 + $0xb8] sm:$0xf]  ;;  %v6694_v37 = vld [vmem:[#allocation4 + $0xc4] sm:$0xf] }
 0x533   : > { %v6885_v2 = vpop.permute.xlu1 %6884  ;;  %v6887_v27 = vpop.permute.xlu0 %6886  ;;  %v7221_v39 = vld [vmem:[#allocation4 + $0xc0] sm:$0xf] }
 0x534   : > { %6967 = vst.msk [vmem:[#allocation5 + $0x38] sm:$0xf] %vm6952_vm11, %v6885_v2  ;;  %6968 = vst.msk [vmem:[#allocation5 + $0x3c] sm:$0xf] %vm6952_vm11, %v6887_v27  ;;  %v7220_v27 = vld [vmem:[#allocation4 + $0xbc] sm:$0x1]  ;;  %v7933_v59 = vsel %vm10094_vm13, %v7931_v30, %v7932_v53 }
 0x535   : > { %6569 = vrot.lane.b32.xlu1 %v6446_v5, %s9631_s28  ;;  %6571 = vrot.lane.b32.xlu0 %v6460_v3, %s9631_s28  ;;  %v7533_v5 = vrot.slane %v7532_v36, 4  ;;  %v7547_v3 = vrot.slane %v7546_v38, 4  ;;  %v7559_v21 = vshll.u32 %v7220_v27, 16  ;;  %v5922_v27 = vld [vmem:[#allocation4 + $0xb4] sm:$0xf] }
 0x536   : > { %v7222_v53 = vld [vmem:[#allocation4 + $0xc4] sm:$0xf] }
 0x537   : > { %v7075_v1 = vpop.permute.xlu1 %7074  ;;  %v7077_v10 = vpop.permute.xlu0 %7076  ;;  %v7538_v12 = vsel %vm9830_vm10, %v7533_v5, %v7537_v52  ;;  %v7552_v55 = vsel %vm9830_vm10, %v7547_v3, %v7551_v58  ;;  %v7561_v13 = vrot.slane %v7559_v21, 5  ;;  %v6505_v5 = vshll.u32 %v6133_v54, 16  ;;  %v6131_v21 = vld [vmem:[#allocation4 + $0xbc] sm:$0x1] }
 0x538   : > { %7159 = vst.msk [vmem:[#allocation5 + $0x30] sm:$0xf] %vm7146_vm12, %v7075_v1  ;;  %7160 = vst.msk [vmem:[#allocation5 + $0x34] sm:$0xf] %vm7146_vm12, %v7077_v10  ;;  %v7922_v10 = vrot.slane %v7777_v28, 5  ;;  %v6509_v3 = vshrl.u32 %v6133_v54, 16 }
 0x539   : > { %6573 = vrot.lane.b32.xlu1 %v6470_v26, %s9631_s28  ;;  %6904 = vrot.lane.b32.xlu0 %v6831_v8, %s9632_s30  ;;  %v7557_v26 = vrot.slane %v7556_v6, 4  ;;  %v9166_v8 = vrot.slane %v7776_v7, 9  ;;  %v5923_v7 = vld [vmem:[#allocation4 + $0xb8] sm:$0xf]  ;;  %v6507_v42 = vrot.slane %v6505_v5, 5 }
 0x53a   : > { %v7924_v0 = vrot.slane %v7922_v10, 4  ;;  %v6511_v62 = vrot.slane %v6509_v3, 4  ;;  %v6695_v54 = vld [vmem:[#allocation4 + $0xc8] sm:$0x1] }
 0x53b   : > { %v7079_v18 = vpop.permute.xlu1 %7078  ;;  %v7081_v22 = vpop.permute.xlu0 %7080  ;;  %v7562_v29 = vsel %vm9830_vm10, %v7557_v26, %v7561_v13  ;;  %v7923_v48 = vsel %vm10094_vm13, %v9166_v8, %v7922_v10  ;;  %v6134_v8 = vld [vmem:[#allocation4 + $0xc8] sm:$0x1]  ;;  %v6854_v5 = vrot.slane %v6695_v54, 5  ;;  %v9609_v54 = vld [vmem:[%s9804_s29 + $0x78] sm:$0xf] }
 0x53c   : > { %7161 = vst.msk [vmem:[#allocation5 + $0x38] sm:$0xf] %vm7146_vm12, %v7079_v18  ;;  %7162 = vst.msk [vmem:[#allocation5 + $0x3c] sm:$0xf] %vm7146_vm12, %v7081_v22 }
 0x53d   : > { %6906 = vrot.lane.b32.xlu1 %v6834_v34, %s9632_s30  ;;  %6908 = vrot.lane.b32.xlu0 %v6838_v11, %s9632_s30  ;;  %v7925_v34 = vrot.slane %v7778_v63, 5  ;;  %v9167_v11 = vrot.slane %v7779_v16, 9  ;;  %v5925_v63 = vld [vmem:[#allocation4 + $0xc4] sm:$0xf] }
 0x53f   : > { %v7636_v31 = vpop.permute.xlu1 %7635  ;;  %v7638_v44 = vpop.permute.xlu0 %7637  ;;  %v7926_v25 = vsel %vm10094_vm13, %v7924_v0, %v7925_v34  ;;  %v7930_v50 = vsel %vm10094_vm13, %v9167_v11, %v7929_v56  ;;  %v6690_v0 = vld [vmem:[#allocation4 + $0xb4] sm:$0xe] }
 0x540   : > { %7720 = vst.msk [vmem:[#allocation5 + $0x30] sm:$0xf] %vm7707_vm15, %v7636_v31  ;;  %7721 = vst.msk [vmem:[#allocation5 + $0x34] sm:$0xf] %vm7707_vm15, %v7638_v44  ;;  %v6477_v31 = vrot.slane %v6475_v20, 5  ;;  %v6481_v44 = vshll.u32 %v6130_v17, 16 }
 0x541   : > { %6910 = vrot.lane.b32.xlu1 %v6841_v45, %s9632_s30  ;;  %7098 = vrot.lane.b32.xlu0 %v7010_v32, %s9633_s10  ;;  %v6485_v32 = vshrl.u32 %v6130_v17, 16  ;;  %v6512_v17 = vor.u32 %v6511_v62, %v6507_v42 }
 0x542   : > { %v6478_v60 = vor.u32 %v6477_v31, %v6474_v40  ;;  %v9152_v40 = vrot.slane %v6690_v0, 9  ;;  %v6692_v31 = vld [vmem:[#allocation4 + $0xbc] sm:$0x1] }
 0x543   : > { %v7640_v49 = vpop.permute.xlu1 %7639  ;;  %v7642_v41 = vpop.permute.xlu0 %7641  ;;  %v6513_v11 = vrot.slane %v6512_v17, 4  ;;  %v7015_v17 = vld [vmem:[#allocation4 + $0xc4] sm:$0xf] }
 0x544   : > { %7722 = vst.msk [vmem:[#allocation5 + $0x38] sm:$0xf] %vm7707_vm15, %v7640_v49  ;;  %7723 = vst.msk [vmem:[#allocation5 + $0x3c] sm:$0xf] %vm7707_vm15, %v7642_v41  ;;  %v9604_v49 = vld [vmem:[%s9804_s29 + $0x64] sm:$0xf] }
 0x545   : > { %7100 = vrot.lane.b32.xlu1 %v7011_v57, %s9633_s10  ;;  %7102 = vrot.lane.b32.xlu0 %v7012_v14, %s9633_s10  ;;  %v9221_v41 = vcombine.low %v9603_v23, %v9604_v49  ;;  %v9605_v57 = vld [vmem:[%s9804_s29 + $0x68] sm:$0xf]  ;;  %v9606_v14 = vld [vmem:[%s9804_s29 + $0x6c] sm:$0xf]  ;;  %v6479_v52 = vrot.slane %v6478_v60, 4  ;;  %v7567_v23 = vshll.u32 %v7221_v39, 16 }
 0x546   : > { %v9222_v36 = vcombine.low %v9605_v57, %v9606_v14  ;;  %v6847_v49 = vrot.slane %v6692_v31, 5  ;;  %v7783_v31 = vld [vmem:[#allocation4 + $0xc4] sm:$0xf] }
 0x547   : > { %v7973_v47 = vpop.permute.xlu1 %7972  ;;  %v7975_v2 = vpop.permute.xlu0 %7974  ;;  %9501 = vmatprep.mubr.msk.bf16.mxu0 %vm8534_vm5, %v9221_v41 }
 0x548   : > { %8057 = vst.msk [vmem:[#allocation5 + $0x30] sm:$0xf] %vm8044_vm0, %v7973_v47  ;;  %8058 = vst.msk [vmem:[#allocation5 + $0x34] sm:$0xf] %vm8044_vm0, %v7975_v2  ;;  %v6483_v47 = vrot.slane %v6481_v44, 5  ;;  %v6487_v2 = vrot.slane %v6485_v32, 4  ;;  %9502 = vmatmul.mubr.msk.bf16.gmra.mxu0 %vm8534_vm5, %v9222_v36 }
 0x549   : > { %7104 = vrot.lane.b32.xlu1 %v7013_v43, %s9633_s10  ;;  %7659 = vrot.lane.b32.xlu0 %v7528_v33, %s9634_s15  ;;  %v6498_v43 = vrot.slane %v6496_v4, 4  ;;  %v6501_v33 = vrot.slane %v6499_v9, 5  ;;  %v6693_v44 = vld [vmem:[#allocation4 + $0xc0] sm:$0xe]  ;;  %v7224_v32 = vld [vmem:[#allocation4 + $0xcc] sm:$0xf] }
 0x54a   : > { %v6484_v16 = vsel %vm9830_vm10, %v6479_v52, %v6483_v47  ;;  %v7564_v9 = vshrl.u32 %v7221_v39, 16  ;;  %v9153_v41 = vrot.slane %v6693_v44, 9  ;;  %v7588_v57 = vshrl.u32 %v7224_v32, 16 }
 0x54b   : > { %v7977_v61 = vpop.permute.xlu1 %7976  ;;  %v7979_v1 = vpop.permute.xlu0 %7978  ;;  %v6502_v10 = vor.u32 %v6501_v33, %v6498_v43  ;;  %v7591_v14 = vshll.u32 %v7224_v32, 16  ;;  %v7573_v43 = vshll.u32 %v7222_v53, 16  ;;  %v7577_v33 = vshrl.u32 %v7222_v53, 16 }
 0x54c   : > { %8059 = vst.msk [vmem:[#allocation5 + $0x38] sm:$0xf] %vm8044_vm0, %v7977_v61  ;;  %8060 = vst.msk [vmem:[#allocation5 + $0x3c] sm:$0xf] %vm8044_vm0, %v7979_v1  ;;  %v5924_v61 = vld [vmem:[#allocation4 + $0xc0] sm:$0xf]  ;;  %v6488_v1 = vor.u32 %v6487_v2, %v6483_v47 }
 0x54d   : > { %7661 = vrot.lane.b32.xlu1 %v7538_v12, %s9634_s15  ;;  %7663 = vrot.lane.b32.xlu0 %v7552_v55, %s9634_s15  ;;  %v6491_v12 = vshll.u32 %v6131_v21, 16  ;;  %v6503_v56 = vrot.slane %v6502_v10, 4  ;;  %v7225_v47 = vld [vmem:[#allocation4 + $0xd0] sm:$0xf]  ;;  %v7566_v2 = vrot.slane %v7564_v9, 4  ;;  %v7590_v3 = vrot.slane %v7588_v57, 4 }
 0x54e   : > { %v6489_v13 = vrot.slane %v6488_v1, 4  ;;  %v7601_v52 = vshrl.u32 %v7225_v47, 16  ;;  %v7014_v1 = vld [vmem:[#allocation4 + $0xc0] sm:$0xf]  ;;  %v7579_v62 = vrot.slane %v7577_v33, 4 }
 0x54f   : > { %v6552_v18 = vpop.permute.xlu1 %6551  ;;  %v6554_v22 = vpop.permute.xlu0 %6553  ;;  %v9568_v24 = vld [vmem:[#allocation5 + $0x30] sm:$0xff]   ;;  %v6493_v20 = vrot.slane %v6491_v12, 5  ;;  %v6508_v34 = vsel %vm9830_vm10, %v6503_v56, %v6507_v42  ;;  %v7575_v42 = vrot.slane %v7573_v43, 5  ;;  %v7226_v56 = vld [vmem:[#allocation4 + $0xd4] sm:$0x1] }
 0x550   : > { %6632 = vst.msk [vmem:[#allocation5 + $0x40] sm:$0xf] %vm6615_vm9, %v6552_v18  ;;  %6633 = vst.msk [vmem:[#allocation5 + $0x44] sm:$0xf] %vm6615_vm9, %v6554_v22  ;;  %9455 = vmatprep.mubr.msk.bf16.mxu1 %vm8232_vm6, %v9568_v24  ;;  %v6515_v18 = vshll.u32 %v6134_v8, 16 }
 0x551   : > { %7665 = vrot.lane.b32.xlu1 %v7562_v29, %s9634_s15  ;;  %7996 = vrot.lane.b32.xlu0 %v7923_v48, %s9635_s23  ;;  %v6844_v29 = vrot.slane %v6691_v19, 5  ;;  %v6494_v48 = vsel %vm9830_vm10, %v6489_v13, %v6493_v20  ;;  %v7016_v12 = vld [vmem:[#allocation4 + $0xcc] sm:$0xf]  ;;  %v7580_v20 = vor.u32 %v7579_v62, %v7575_v42  ;;  %v9610_v57 = vld [vmem:[%s9804_s29 + $0x7c] sm:$0xf] }
 0x552   : > { %v6517_v30 = vrot.slane %v6515_v18, 5 }
 0x553   : > { %v6556_v45 = vpop.permute.xlu1 %6555  ;;  %v6558_v15 = vpop.permute.xlu0 %6557  ;;  %v9569_v46 = vld [vmem:[#allocation5 + $0x38] sm:$0xff]   ;;  %v6845_v4 = vsel %vm10094_vm13, %v9152_v40, %v6844_v29  ;;  %v7581_v39 = vrot.slane %v7580_v20, 4  ;;  %v7782_v40 = vld [vmem:[#allocation4 + $0xc0] sm:$0xe] }
 0x554   : > { %6634 = vst.msk [vmem:[#allocation5 + $0x48] sm:$0xf] %vm6615_vm9, %v6556_v45  ;;  %6635 = vst.msk [vmem:[#allocation5 + $0x4c] sm:$0xf] %vm6615_vm9, %v6558_v15  ;;  %9456 = vmatmul.mubr.msk.bf16.gmra.mxu1 %vm8232_vm6, %v9569_v46  ;;  %v6851_v46 = vrot.slane %v6694_v37, 5 }
 0x555   : > { %7998 = vrot.lane.b32.xlu1 %v7926_v25, %s9635_s23  ;;  %8000 = vrot.lane.b32.xlu0 %v7930_v50, %s9635_s23  ;;  %v6846_v25 = vrot.slane %v6844_v29, 4  ;;  %v6518_v50 = vsel %vm9830_vm10, %v6513_v11, %v6517_v30  ;;  %v7607_v29 = vshll.u32 %v7226_v56, 16 }
 0x556   : > { %v6853_v60 = vrot.slane %v6851_v46, 4 }
 0x557   : > { %v6889_v38 = vpop.permute.xlu1 %6888  ;;  %v6891_v58 = vpop.permute.xlu0 %6890 }
 0x558   : > { %6969 = vst.msk [vmem:[#allocation5 + $0x40] sm:$0xf] %vm6952_vm11, %v6889_v38  ;;  %6970 = vst.msk [vmem:[#allocation5 + $0x44] sm:$0xf] %vm6952_vm11, %v6891_v58  ;;  %v6848_v58 = vsel %vm10094_vm13, %v6846_v25, %v6847_v49  ;;  %v7786_v25 = vld [vmem:[#allocation4 + $0xd0] sm:$0xf] }
 0x559   : > { %8002 = vrot.lane.b32.xlu1 %v7933_v59, %s9635_s23  ;;  %6014 = vrot.lane.b32.xlu0 %v5922_v27, %s9628_s18  ;;  %v6852_v59 = vsel %vm10094_vm13, %v9153_v41, %v6851_v46  ;;  %v7569_v27 = vrot.slane %v7567_v23, 5  ;;  %v7785_v46 = vld [vmem:[#allocation4 + $0xcc] sm:$0xe]  ;;  %v7936_v23 = vrot.slane %v7783_v31, 5  ;;  %v9607_v49 = vld [vmem:[%s9804_s29 + $0x70] sm:$0xf] }
 0x55a   : > { %v9608_v41 = vld [vmem:[%s9804_s29 + $0x74] sm:$0xf] }
 0x55b   : > { %v6893_v6 = vpop.permute.xlu1 %6892  ;;  %v6895_v28 = vpop.permute.xlu0 %6894  ;;  %v7570_v10 = vor.u32 %v7569_v27, %v7566_v2  ;;  %v9223_v53 = vcombine.low %v9607_v49, %v9608_v41  ;;  %v7784_v2 = vld [vmem:[#allocation4 + $0xc8] sm:$0x1]  ;;  %v7787_v27 = vld [vmem:[#allocation4 + $0xd4] sm:$0x1]  ;;  %v7938_v35 = vrot.slane %v7936_v23, 4 }
 0x55c   : > { %6971 = vst.msk [vmem:[#allocation5 + $0x48] sm:$0xf] %vm6952_vm11, %v6893_v6  ;;  %6972 = vst.msk [vmem:[#allocation5 + $0x4c] sm:$0xf] %vm6952_vm11, %v6895_v28  ;;  %v7593_v6 = vrot.slane %v7591_v14, 5  ;;  %v7597_v28 = vshll.u32 %v7225_v47, 16  ;;  %v9224_v14 = vcombine.low %v9609_v54, %v9610_v57 }
 0x55d   : > { %6016 = vrot.lane.b32.xlu1 %v5923_v7, %s9628_s18  ;;  %6018 = vrot.lane.b32.xlu0 %v5924_v61, %s9628_s18  ;;  %v6855_v61 = vsel %vm10094_vm13, %v6853_v60, %v6854_v5  ;;  %v7571_v19 = vrot.slane %v7570_v10, 4  ;;  %v7939_v33 = vrot.slane %v7784_v2, 5 }
 0x55e   : > { %v7599_v8 = vrot.slane %v7597_v28, 5  ;;  %9505 = vmatprep.mubr.msk.bf16.mxu0 %vm8534_vm5, %v9223_v53 }
 0x55f   : > { %v7083_v55 = vpop.permute.xlu1 %7082  ;;  %v7085_v26 = vpop.permute.xlu0 %7084  ;;  %v7576_v37 = vsel %vm9830_vm10, %v7571_v19, %v7575_v42  ;;  %9506 = vmatmul.mubr.msk.bf16.gmra.mxu0 %vm8534_vm5, %v9224_v14  ;;  %v12449_v19 = vld [vmem:[%s12646_s4] ss:$0 sm:$0xff] }
 0x560   : > { %7163 = vst.msk [vmem:[#allocation5 + $0x40] sm:$0xf] %vm7146_vm12, %v7083_v55  ;;  %7164 = vst.msk [vmem:[#allocation5 + $0x44] sm:$0xf] %vm7146_vm12, %v7085_v26  ;;  %v7223_v55 = vld [vmem:[#allocation4 + $0xc8] sm:$0x1]  ;;  %v7594_v26 = vor.u32 %v7593_v6, %v7590_v3 }
 0x561   : > { %6020 = vrot.lane.b32.xlu1 %v5925_v63, %s9628_s18  ;;  %6575 = vrot.lane.b32.xlu0 %v6484_v16, %s9631_s28  ;;  %v7603_v63 = vrot.slane %v7601_v52, 4  ;;  %v7583_v18 = vshll.u32 %v7223_v55, 16  ;;  %v7946_v3 = vrot.slane %v7787_v27, 5 }
 0x563   : > { %v7087_v22 = vpop.permute.xlu1 %7086  ;;  %v7089_v24 = vpop.permute.xlu0 %7088  ;;  %v7604_v0 = vor.u32 %v7603_v63, %v7599_v8  ;;  %v7585_v30 = vrot.slane %v7583_v18, 5 }
 0x564   : > { %7165 = vst.msk [vmem:[#allocation5 + $0x48] sm:$0xf] %vm7146_vm12, %v7087_v22  ;;  %7166 = vst.msk [vmem:[#allocation5 + $0x4c] sm:$0xf] %vm7146_vm12, %v7089_v24  ;;  %v7017_v22 = vld [vmem:[#allocation4 + $0xd0] sm:$0xf] }
 0x565   : > { %6577 = vrot.lane.b32.xlu1 %v6494_v48, %s9631_s28  ;;  %6579 = vrot.lane.b32.xlu0 %v6508_v34, %s9631_s28  ;;  %v7595_v24 = vrot.slane %v7594_v26, 4  ;;  %v7586_v9 = vsel %vm9830_vm10, %v7581_v39, %v7585_v30  ;;  %v9479_v26 = vpop.f32.mrf.mxu0 }
 0x567   : > { %v7644_v45 = vpop.permute.xlu1 %7643  ;;  %v7646_v15 = vpop.permute.xlu0 %7645  ;;  %v7600_v44 = vsel %vm9830_vm10, %v7595_v24, %v7599_v8 }
 0x568   : > { %7724 = vst.msk [vmem:[#allocation5 + $0x40] sm:$0xf] %vm7707_vm15, %v7644_v45  ;;  %7725 = vst.msk [vmem:[#allocation5 + $0x44] sm:$0xf] %vm7707_vm15, %v7646_v15  ;;  %v7605_v45 = vrot.slane %v7604_v0, 4  ;;  %v7609_v15 = vrot.slane %v7607_v29, 5 }
 0x569   : > { %6581 = vrot.lane.b32.xlu1 %v6518_v50, %s9631_s28  ;;  %6912 = vrot.lane.b32.xlu0 %v6845_v4, %s9632_s30 }
 0x56b   : > { %v7648_v36 = vpop.permute.xlu1 %7647  ;;  %v7650_v38 = vpop.permute.xlu0 %7649 }
 0x56c   : > { %7726 = vst.msk [vmem:[#allocation5 + $0x48] sm:$0xf] %vm7707_vm15, %v7648_v36  ;;  %7727 = vst.msk [vmem:[#allocation5 + $0x4c] sm:$0xf] %vm7707_vm15, %v7650_v38  ;;  %v7610_v36 = vsel %vm9830_vm10, %v7605_v45, %v7609_v15  ;;  %v9168_v38 = vrot.slane %v7782_v40, 9 }
 0x56d   : > { %6914 = vrot.lane.b32.xlu1 %v6848_v58, %s9632_s30  ;;  %6916 = vrot.lane.b32.xlu0 %v6852_v59, %s9632_s30  ;;  %v7943_v58 = vrot.slane %v7786_v25, 5  ;;  %v9169_v59 = vrot.slane %v7785_v46, 9 }
 0x56e   : > { %v7937_v43 = vsel %vm10094_vm13, %v9168_v38, %v7936_v23 }
 0x56f   : > { %v7981_v21 = vpop.permute.xlu1 %7980  ;;  %v7983_v7 = vpop.permute.xlu0 %7982  ;;  %v7945_v5 = vrot.slane %v7943_v58, 4  ;;  %v7944_v6 = vsel %vm10094_vm13, %v9169_v59, %v7943_v58 }
 0x570   : > { %8061 = vst.msk [vmem:[#allocation5 + $0x40] sm:$0xf] %vm8044_vm0, %v7981_v21  ;;  %8062 = vst.msk [vmem:[#allocation5 + $0x44] sm:$0xf] %vm8044_vm0, %v7983_v7  ;;  %v7940_v21 = vsel %vm10094_vm13, %v7938_v35, %v7939_v33 }
 0x571   : > { %6918 = vrot.lane.b32.xlu1 %v6855_v61, %s9632_s30  ;;  %7106 = vrot.lane.b32.xlu0 %v7014_v1, %s9633_s10  ;;  %v7947_v7 = vsel %vm10094_vm13, %v7945_v5, %v7946_v3 }
 0x573   : > { %v7985_v16 = vpop.permute.xlu1 %7984  ;;  %v7987_v13 = vpop.permute.xlu0 %7986 }
 0x574   : > { %8063 = vst.msk [vmem:[#allocation5 + $0x48] sm:$0xf] %vm8044_vm0, %v7985_v16  ;;  %8064 = vst.msk [vmem:[#allocation5 + $0x4c] sm:$0xf] %vm8044_vm0, %v7987_v13  ;;  %v8624_v16 = vpop.f32.mrf.mxu0  ;;  %v12442_v13 = vld [vmem:[%s12648_s6] ss:$0 sm:$0xff] }
 0x575   : > { %7108 = vrot.lane.b32.xlu1 %v7015_v17, %s9633_s10  ;;  %7110 = vrot.lane.b32.xlu0 %v7016_v12, %s9633_s10  ;;  %v8633_v18 = vadd.f32 %v9479_v26, %v12442_v13 }
 0x576   : > { %v9480_v20 = vpop.f32.mrf.mxu0 }
 0x577   : > { %v6560_v48 = vpop.permute.xlu1 %6559  ;;  %v6562_v34 = vpop.permute.xlu0 %6561  ;;  %v9570_v11 = vld [vmem:[#allocation5 + $0x40] sm:$0xff]   ;;  %v8636_v40 = vadd.f32 %v9480_v20, %v12442_v13 }
 0x578   : > { %6636 = vst.msk [vmem:[#allocation5 + $0x50] sm:$0xf] %vm6615_vm9, %v6560_v48  ;;  %6637 = vst.msk [vmem:[#allocation5 + $0x54] sm:$0xf] %vm6615_vm9, %v6562_v34  ;;  %9459 = vmatprep.mubr.msk.bf16.mxu1 %vm8232_vm6, %v9570_v11  ;;  %v8625_v48 = vadd.f32 %v12442_v13, %v8624_v16 }
 0x579   : > { %7112 = vrot.lane.b32.xlu1 %v7017_v22, %s9633_s10  ;;  %7667 = vrot.lane.b32.xlu0 %v7576_v37, %s9634_s15  ;;  %v8627_v37 = vpop.f32.mrf.mxu0 }
 0x57b   : > { %v6564_v32 = vpop.permute.xlu1 %6563  ;;  %v6566_v50 = vpop.permute.xlu0 %6565  ;;  %v9571_v4 = vld [vmem:[#allocation5 + $0x48] sm:$0xff]  }
 0x57c   : > { %6638 = vst.msk [vmem:[#allocation5 + $0x58] sm:$0xf] %vm6615_vm9, %v6564_v32  ;;  %6639 = vst.msk [vmem:[#allocation5 + $0x5c] sm:$0xf] %vm6615_vm9, %v6566_v50  ;;  %9460 = vmatmul.mubr.msk.bf16.gmra.mxu1 %vm8232_vm6, %v9571_v4  ;;  %v8628_v32 = vadd.f32 %v12442_v13, %v8627_v37  ;;  %v9483_v33 = vpop.f32.mrf.mxu0 }
 0x57d   : > { %7669 = vrot.lane.b32.xlu1 %v7586_v9, %s9634_s15  ;;  %7671 = vrot.lane.b32.xlu0 %v7600_v44, %s9634_s15 }
 0x57f   : > { %v6897_v60 = vpop.permute.xlu1 %6896  ;;  %v6899_v47 = vpop.permute.xlu0 %6898 }
 0x580   : > { %6973 = vst.msk [vmem:[#allocation5 + $0x50] sm:$0xf] %vm6952_vm11, %v6897_v60  ;;  %6974 = vst.msk [vmem:[#allocation5 + $0x54] sm:$0xf] %vm6952_vm11, %v6899_v47 }
 0x581   : > { %7673 = vrot.lane.b32.xlu1 %v7610_v36, %s9634_s15  ;;  %8004 = vrot.lane.b32.xlu0 %v7937_v43, %s9635_s23 }
 0x583   : > { %v6901_v28 = vpop.permute.xlu1 %6900  ;;  %v6903_v52 = vpop.permute.xlu0 %6902 }
 0x584   : > { %6975 = vst.msk [vmem:[#allocation5 + $0x58] sm:$0xf] %vm6952_vm11, %v6901_v28  ;;  %6976 = vst.msk [vmem:[#allocation5 + $0x5c] sm:$0xf] %vm6952_vm11, %v6903_v52 }
 0x585   : > { %8006 = vrot.lane.b32.xlu1 %v7940_v21, %s9635_s23  ;;  %8008 = vrot.lane.b32.xlu0 %v7944_v6, %s9635_s23  ;;  %v8640_v6 = vpop.f32.mrf.mxu0 }
 0x587   : > { %v7091_v61 = vpop.permute.xlu1 %7090  ;;  %v7093_v1 = vpop.permute.xlu0 %7092 }
 0x588   : > { %7167 = vst.msk [vmem:[#allocation5 + $0x50] sm:$0xf] %vm7146_vm12, %v7091_v61  ;;  %7168 = vst.msk [vmem:[#allocation5 + $0x54] sm:$0xf] %vm7146_vm12, %v7093_v1  ;;  %v9484_v21 = vpop.f32.mrf.mxu0 }
 0x589   : > { %8010 = vrot.lane.b32.xlu1 %v7947_v7, %s9635_s23  ;;  %v8649_v7 = vadd.f32 %v9483_v33, %v12442_v13 }
 0x58b   : > { %v7095_v10 = vpop.permute.xlu1 %7094  ;;  %v7097_v42 = vpop.permute.xlu0 %7096 }
 0x58c   : > { %7169 = vst.msk [vmem:[#allocation5 + $0x58] sm:$0xf] %vm7146_vm12, %v7095_v10  ;;  %7170 = vst.msk [vmem:[#allocation5 + $0x5c] sm:$0xf] %vm7146_vm12, %v7097_v42 }
 0x58f   : > { %v7652_v62 = vpop.permute.xlu1 %7651  ;;  %v7654_v12 = vpop.permute.xlu0 %7653 }
 0x590   : > { %7728 = vst.msk [vmem:[#allocation5 + $0x50] sm:$0xf] %vm7707_vm15, %v7652_v62  ;;  %7729 = vst.msk [vmem:[#allocation5 + $0x54] sm:$0xf] %vm7707_vm15, %v7654_v12  ;;  %v8641_v62 = vadd.f32 %v12442_v13, %v8640_v6 }
 0x593   : > { %v7656_v51 = vpop.permute.xlu1 %7655  ;;  %v7658_v55 = vpop.permute.xlu0 %7657 }
 0x594   : > { %7730 = vst.msk [vmem:[#allocation5 + $0x58] sm:$0xf] %vm7707_vm15, %v7656_v51  ;;  %7731 = vst.msk [vmem:[#allocation5 + $0x5c] sm:$0xf] %vm7707_vm15, %v7658_v55  ;;  %v8643_v51 = vpop.f32.mrf.mxu0 }
 0x597   : > { %v7989_v8 = vpop.permute.xlu1 %7988  ;;  %v7991_v63 = vpop.permute.xlu0 %7990 }
 0x598   : > { %8065 = vst.msk [vmem:[#allocation5 + $0x50] sm:$0xf] %vm8044_vm0, %v7989_v8  ;;  %8066 = vst.msk [vmem:[#allocation5 + $0x54] sm:$0xf] %vm8044_vm0, %v7991_v63  ;;  %v8652_v8 = vadd.f32 %v9484_v21, %v12442_v13 }
 0x59b   : > { %v7993_v56 = vpop.permute.xlu1 %7992  ;;  %v7995_v17 = vpop.permute.xlu0 %7994 }
 0x59c   : > { %8067 = vst.msk [vmem:[#allocation5 + $0x58] sm:$0xf] %vm8044_vm0, %v7993_v56  ;;  %8068 = vst.msk [vmem:[#allocation5 + $0x5c] sm:$0xf] %vm8044_vm0, %v7995_v17  ;;  %v9445_v22 = vpop.f32.mrf.mxu1 }
 0x59d   : > { %v8328_v24 = vadd.f32 %v9445_v22, %v12449_v19  ;;  %v8644_v22 = vadd.f32 %v12442_v13, %v8643_v51 }
 0x59e   : > { %v8319_v11 = vpop.f32.mrf.mxu1 }
 0x59f   : > { %v6009_v0 = vpop.permute.xlu1 %6008  ;;  %v6011_v29 = vpop.permute.xlu0 %6010  ;;  %v9572_v34 = vld [vmem:[#allocation5 + $0x50] sm:$0xff]   ;;  %v8753_v39 = vadd.f32 %v8633_v18, %v8328_v24  ;;  %v8320_v30 = vadd.f32 %v12449_v19, %v8319_v11 }
 0x5a0   : > { %6080 = vst.msk [vmem:[#allocation5 + $0x64] sm:$0xf] %vm6054_vm7, %v6009_v0  ;;  %6081 = vst.msk [vmem:[#allocation5 + $0x68] sm:$0xf] %vm6054_vm7, %v6011_v29  ;;  %9463 = vmatprep.mubr.msk.bf16.mxu1 %vm8232_vm6, %v9572_v34  ;;  %v9446_v31 = vpop.f32.mrf.mxu1 }
 0x5a1   : > { %v9311_v44 = vpack.c.bf16 %v8753_v39, %v8753_v39  ;;  %v8751_v45 = vadd.f32 %v8625_v48, %v8320_v30  ;;  %v8331_v15 = vadd.f32 %v9446_v31, %v12449_v19 }
 0x5a2   : > { %v8322_v4 = vpop.f32.mrf.mxu1 }
 0x5a3   : > { %v6013_v25 = vpop.permute.xlu1 %6012  ;;  %v6568_v46 = vpop.permute.xlu0 %6567  ;;  %v9573_v50 = vld [vmem:[#allocation5 + $0x58] sm:$0xff]   ;;  %8913 = vst.msk [vmem:[%s12464_s9 + $0x8] sm:$0xf] %vm4359_vm14, %v9311_v44  ;;  %v9309_v9 = vpack.c.bf16 %v8751_v45, %v8751_v45  ;;  %v8754_v23 = vadd.f32 %v8636_v40, %v8331_v15  ;;  %v8323_v49 = vadd.f32 %v12449_v19, %v8322_v4 }
 0x5a4   : > { %6082 = vst.msk [vmem:[#allocation5 + $0x6c] sm:$0xf] %vm6054_vm7, %v6013_v25  ;;  %9464 = vmatmul.mubr.msk.bf16.gmra.mxu1 %vm8232_vm6, %v9573_v50 }
 0x5a5   : > { %6640 = vst.msk [vmem:[#allocation5 + $0x60] sm:$0xf] %vm6615_vm9, %v6568_v46  ;;  %v9312_v41 = vpack.c.bf16 %v8754_v23, %v8754_v23  ;;  %v8752_v53 = vadd.f32 %v8628_v32, %v8323_v49  ;;  %v9487_v49 = vpop.f32.mrf.mxu0 }
 0x5a6   : > { %8911 = vst.msk [vmem:[%s12464_s9] sm:$0xf] %vm4359_vm14, %v9309_v9 }
 0x5a7   : > { %v6570_v54 = vpop.permute.xlu1 %6569  ;;  %v6572_v57 = vpop.permute.xlu0 %6571  ;;  %8914 = vst.msk [vmem:[%s12464_s9 + $0xc] sm:$0xf] %vm4359_vm14, %v9312_v41  ;;  %v9310_v14 = vpack.c.bf16 %v8752_v53, %v8752_v53 }
 0x5a8   : > { %6641 = vst.msk [vmem:[#allocation5 + $0x64] sm:$0xf] %vm6615_vm9, %v6570_v54  ;;  %6642 = vst.msk [vmem:[#allocation5 + $0x68] sm:$0xf] %vm6615_vm9, %v6572_v57  ;;  %v8656_v54 = vpop.f32.mrf.mxu0 }
 0x5a9   : > { %8912 = vst.msk [vmem:[%s12464_s9 + $0x4] sm:$0xf] %vm4359_vm14, %v9310_v14 }
 0x5ab   : > { %v6574_v36 = vpop.permute.xlu1 %6573  ;;  %v6905_v38 = vpop.permute.xlu0 %6904 }
 0x5ac   : > { %6643 = vst.msk [vmem:[#allocation5 + $0x6c] sm:$0xf] %vm6615_vm9, %v6574_v36  ;;  %v9488_v36 = vpop.f32.mrf.mxu0 }
 0x5ad   : > { %6977 = vst.msk [vmem:[#allocation5 + $0x60] sm:$0xf] %vm6952_vm11, %v6905_v38  ;;  %v8665_v38 = vadd.f32 %v9487_v49, %v12442_v13 }
 0x5af   : > { %v6907_v58 = vpop.permute.xlu1 %6906  ;;  %v6909_v59 = vpop.permute.xlu0 %6908 }
 0x5b0   : > { %6978 = vst.msk [vmem:[#allocation5 + $0x64] sm:$0xf] %vm6952_vm11, %v6907_v58  ;;  %6979 = vst.msk [vmem:[#allocation5 + $0x68] sm:$0xf] %vm6952_vm11, %v6909_v59 }
 0x5b3   : > { %v6911_v60 = vpop.permute.xlu1 %6910  ;;  %v7099_v47 = vpop.permute.xlu0 %7098 }
 0x5b4   : > { %6980 = vst.msk [vmem:[#allocation5 + $0x6c] sm:$0xf] %vm6952_vm11, %v6911_v60 }
 0x5b5   : > { %7171 = vst.msk [vmem:[#allocation5 + $0x60] sm:$0xf] %vm7146_vm12, %v7099_v47 }
 0x5b7   : > { %v7101_v2 = vpop.permute.xlu1 %7100  ;;  %v7103_v27 = vpop.permute.xlu0 %7102 }
 0x5b8   : > { %7172 = vst.msk [vmem:[#allocation5 + $0x64] sm:$0xf] %vm7146_vm12, %v7101_v2  ;;  %7173 = vst.msk [vmem:[#allocation5 + $0x68] sm:$0xf] %vm7146_vm12, %v7103_v27  ;;  %v8657_v2 = vadd.f32 %v12442_v13, %v8656_v54 }
 0x5bb   : > { %v7105_v43 = vpop.permute.xlu1 %7104  ;;  %v7660_v35 = vpop.permute.xlu0 %7659 }
 0x5bc   : > { %7174 = vst.msk [vmem:[#allocation5 + $0x6c] sm:$0xf] %vm7146_vm12, %v7105_v43  ;;  %v8659_v43 = vpop.f32.mrf.mxu0 }
 0x5bd   : > { %7732 = vst.msk [vmem:[#allocation5 + $0x60] sm:$0xf] %vm7707_vm15, %v7660_v35 }
 0x5bf   : > { %v7662_v5 = vpop.permute.xlu1 %7661  ;;  %v7664_v3 = vpop.permute.xlu0 %7663 }
 0x5c0   : > { %7733 = vst.msk [vmem:[#allocation5 + $0x64] sm:$0xf] %vm7707_vm15, %v7662_v5  ;;  %7734 = vst.msk [vmem:[#allocation5 + $0x68] sm:$0xf] %vm7707_vm15, %v7664_v3  ;;  %v8668_v5 = vadd.f32 %v9488_v36, %v12442_v13 }
 0x5c3   : > { %v7666_v28 = vpop.permute.xlu1 %7665  ;;  %v7997_v52 = vpop.permute.xlu0 %7996 }
 0x5c4   : > { %7735 = vst.msk [vmem:[#allocation5 + $0x6c] sm:$0xf] %vm7707_vm15, %v7666_v28  ;;  %v9449_v61 = vpop.f32.mrf.mxu1 }
 0x5c5   : > { %8069 = vst.msk [vmem:[#allocation5 + $0x60] sm:$0xf] %vm8044_vm0, %v7997_v52  ;;  %v8344_v1 = vadd.f32 %v9449_v61, %v12449_v19  ;;  %v8660_v61 = vadd.f32 %v12442_v13, %v8659_v43 }
 0x5c6   : > { %v8335_v12 = vpop.f32.mrf.mxu1 }
 0x5c7   : > { %v7999_v10 = vpop.permute.xlu1 %7998  ;;  %v8001_v42 = vpop.permute.xlu0 %8000  ;;  %v8757_v55 = vadd.f32 %v8649_v7, %v8344_v1  ;;  %v8336_v26 = vadd.f32 %v12449_v19, %v8335_v12 }
 0x5c8   : > { %8070 = vst.msk [vmem:[#allocation5 + $0x64] sm:$0xf] %vm8044_vm0, %v7999_v10  ;;  %8071 = vst.msk [vmem:[#allocation5 + $0x68] sm:$0xf] %vm8044_vm0, %v8001_v42  ;;  %v9450_v63 = vpop.f32.mrf.mxu1 }
 0x5c9   : > { %v9315_v16 = vpack.c.bf16 %v8757_v55, %v8757_v55  ;;  %v8755_v56 = vadd.f32 %v8641_v62, %v8336_v26  ;;  %v8347_v17 = vadd.f32 %v9450_v63, %v12449_v19 }
 0x5ca   : > { %v8338_v24 = vpop.f32.mrf.mxu1 }
 0x5cb   : > { %v8003_v20 = vpop.permute.xlu1 %8002  ;;  %v6015_v18 = vpop.permute.xlu0 %6014  ;;  %8917 = vst.msk [vmem:[%s12464_s9 + $0x18] sm:$0xf] %vm4359_vm14, %v9315_v16  ;;  %v9313_v0 = vpack.c.bf16 %v8755_v56, %v8755_v56  ;;  %v8758_v29 = vadd.f32 %v8652_v8, %v8347_v17  ;;  %v8339_v48 = vadd.f32 %v12449_v19, %v8338_v24 }
 0x5cc   : > { %8072 = vst.msk [vmem:[#allocation5 + $0x6c] sm:$0xf] %vm8044_vm0, %v8003_v20  ;;  %v9491_v17 = vpop.f32.mrf.mxu0 }
 0x5cd   : > { %6083 = vst.msk [vmem:[#allocation5 + $0x70] sm:$0xf] %vm6054_vm7, %v6015_v18  ;;  %v9316_v34 = vpack.c.bf16 %v8758_v29, %v8758_v29  ;;  %v8756_v11 = vadd.f32 %v8644_v22, %v8339_v48  ;;  %v8681_v22 = vadd.f32 %v9491_v17, %v12442_v13 }
 0x5ce   : > { %8915 = vst.msk [vmem:[%s12464_s9 + $0x10] sm:$0xf] %vm4359_vm14, %v9313_v0  ;;  %v8672_v20 = vpop.f32.mrf.mxu0 }
 0x5cf   : > { %v6017_v37 = vpop.permute.xlu1 %6016  ;;  %v6019_v39 = vpop.permute.xlu0 %6018  ;;  %v9574_v30 = vld [vmem:[#allocation5 + $0x60] sm:$0xff]   ;;  %8918 = vst.msk [vmem:[%s12464_s9 + $0x1c] sm:$0xf] %vm4359_vm14, %v9316_v34  ;;  %v9314_v40 = vpack.c.bf16 %v8756_v11, %v8756_v11  ;;  %v8673_v29 = vadd.f32 %v12442_v13, %v8672_v20 }
 0x5d0   : > { %6084 = vst.msk [vmem:[#allocation5 + $0x74] sm:$0xf] %vm6054_vm7, %v6017_v37  ;;  %6085 = vst.msk [vmem:[#allocation5 + $0x78] sm:$0xf] %vm6054_vm7, %v6019_v39  ;;  %9467 = vmatprep.mubr.msk.bf16.mxu1 %vm8232_vm6, %v9574_v30  ;;  %v9492_v18 = vpop.f32.mrf.mxu0 }
 0x5d1   : > { %8916 = vst.msk [vmem:[%s12464_s9 + $0x14] sm:$0xf] %vm4359_vm14, %v9314_v40  ;;  %v8684_v39 = vadd.f32 %v9492_v18, %v12442_v13 }
 0x5d2   : > { %v8675_v34 = vpop.f32.mrf.mxu0 }
 0x5d3   : > { %v6021_v31 = vpop.permute.xlu1 %6020  ;;  %v6576_v44 = vpop.permute.xlu0 %6575  ;;  %v9575_v45 = vld [vmem:[#allocation5 + $0x68] sm:$0xff]  }
 0x5d4   : > { %6086 = vst.msk [vmem:[#allocation5 + $0x7c] sm:$0xf] %vm6054_vm7, %v6021_v31  ;;  %9468 = vmatmul.mubr.msk.bf16.gmra.mxu1 %vm8232_vm6, %v9575_v45  ;;  %v8676_v45 = vadd.f32 %v12442_v13, %v8675_v34 }
 0x5d5   : > { %6644 = vst.msk [vmem:[#allocation5 + $0x70] sm:$0xf] %vm6615_vm9, %v6576_v44 }
 0x5d7   : > { %v6578_v15 = vpop.permute.xlu1 %6577  ;;  %v6580_v25 = vpop.permute.xlu0 %6579 }
 0x5d8   : > { %6645 = vst.msk [vmem:[#allocation5 + $0x74] sm:$0xf] %vm6615_vm9, %v6578_v15  ;;  %6646 = vst.msk [vmem:[#allocation5 + $0x78] sm:$0xf] %vm6615_vm9, %v6580_v25 }
 0x5db   : > { %v6582_v46 = vpop.permute.xlu1 %6581  ;;  %v6913_v32 = vpop.permute.xlu0 %6912 }
 0x5dc   : > { %6647 = vst.msk [vmem:[#allocation5 + $0x7c] sm:$0xf] %vm6615_vm9, %v6582_v46 }
 0x5dd   : > { %6981 = vst.msk [vmem:[#allocation5 + $0x70] sm:$0xf] %vm6952_vm11, %v6913_v32 }
 0x5df   : > { %v6915_v50 = vpop.permute.xlu1 %6914  ;;  %v6917_v4 = vpop.permute.xlu0 %6916 }
 0x5e0   : > { %6982 = vst.msk [vmem:[#allocation5 + $0x74] sm:$0xf] %vm6952_vm11, %v6915_v50  ;;  %6983 = vst.msk [vmem:[#allocation5 + $0x78] sm:$0xf] %vm6952_vm11, %v6917_v4 }
 0x5e3   : > { %v6919_v9 = vpop.permute.xlu1 %6918  ;;  %v7107_v23 = vpop.permute.xlu0 %7106 }
 0x5e4   : > { %6984 = vst.msk [vmem:[#allocation5 + $0x7c] sm:$0xf] %vm6952_vm11, %v6919_v9 }
 0x5e5   : > { %7175 = vst.msk [vmem:[#allocation5 + $0x70] sm:$0xf] %vm7146_vm12, %v7107_v23  ;;  %v9495_v23 = vpop.f32.mrf.mxu0 }
 0x5e7   : > { %v7109_v41 = vpop.permute.xlu1 %7108  ;;  %v7111_v53 = vpop.permute.xlu0 %7110 }
 0x5e8   : > { %7176 = vst.msk [vmem:[#allocation5 + $0x74] sm:$0xf] %vm7146_vm12, %v7109_v41  ;;  %7177 = vst.msk [vmem:[#allocation5 + $0x78] sm:$0xf] %vm7146_vm12, %v7111_v53  ;;  %v8688_v49 = vpop.f32.mrf.mxu0  ;;  %v8697_v53 = vadd.f32 %v9495_v23, %v12442_v13 }
 0x5ea   : > { %v9496_v41 = vpop.f32.mrf.mxu0 }
 0x5eb   : > { %v7113_v57 = vpop.permute.xlu1 %7112  ;;  %v7668_v14 = vpop.permute.xlu0 %7667 }
 0x5ec   : > { %7178 = vst.msk [vmem:[#allocation5 + $0x7c] sm:$0xf] %vm7146_vm12, %v7113_v57  ;;  %v9453_v58 = vpop.f32.mrf.mxu1 }
 0x5ed   : > { %7736 = vst.msk [vmem:[#allocation5 + $0x70] sm:$0xf] %vm7707_vm15, %v7668_v14  ;;  %v8360_v59 = vadd.f32 %v9453_v58, %v12449_v19  ;;  %v8689_v14 = vadd.f32 %v12442_v13, %v8688_v49 }
 0x5ee   : > { %v8351_v27 = vpop.f32.mrf.mxu1 }
 0x5ef   : > { %v7670_v60 = vpop.permute.xlu1 %7669  ;;  %v7672_v47 = vpop.permute.xlu0 %7671  ;;  %v8761_v35 = vadd.f32 %v8665_v38, %v8360_v59  ;;  %v8352_v33 = vadd.f32 %v12449_v19, %v8351_v27 }
 0x5f0   : > { %7737 = vst.msk [vmem:[#allocation5 + $0x74] sm:$0xf] %vm7707_vm15, %v7670_v60  ;;  %7738 = vst.msk [vmem:[#allocation5 + $0x78] sm:$0xf] %vm7707_vm15, %v7672_v47  ;;  %v9454_v3 = vpop.f32.mrf.mxu1  ;;  %v8691_v38 = vpop.f32.mrf.mxu0  ;;  %v8700_v60 = vadd.f32 %v9496_v41, %v12442_v13 }
 0x5f1   : > { %v9319_v6 = vpack.c.bf16 %v8761_v35, %v8761_v35  ;;  %v8759_v28 = vadd.f32 %v8657_v2, %v8352_v33  ;;  %v8363_v52 = vadd.f32 %v9454_v3, %v12449_v19  ;;  %v8692_v35 = vadd.f32 %v12442_v13, %v8691_v38 }
 0x5f2   : > { %v8354_v1 = vpop.f32.mrf.mxu1 }
 0x5f3   : > { %v7674_v21 = vpop.permute.xlu1 %7673  ;;  %v8005_v7 = vpop.permute.xlu0 %8004  ;;  %8921 = vst.msk [vmem:[%s12464_s9 + $0x28] sm:$0xf] %vm4359_vm14, %v9319_v6  ;;  %v9317_v10 = vpack.c.bf16 %v8759_v28, %v8759_v28  ;;  %v8762_v42 = vadd.f32 %v8668_v5, %v8363_v52  ;;  %v8355_v62 = vadd.f32 %v12449_v19, %v8354_v1 }
 0x5f4   : > { %7739 = vst.msk [vmem:[#allocation5 + $0x7c] sm:$0xf] %vm7707_vm15, %v7674_v21 }
 0x5f5   : > { %8073 = vst.msk [vmem:[#allocation5 + $0x70] sm:$0xf] %vm8044_vm0, %v8005_v7  ;;  %v9320_v12 = vpack.c.bf16 %v8762_v42, %v8762_v42  ;;  %v8760_v51 = vadd.f32 %v8660_v61, %v8355_v62  ;;  %v9499_v7 = vpop.f32.mrf.mxu0 }
 0x5f6   : > { %8919 = vst.msk [vmem:[%s12464_s9 + $0x20] sm:$0xf] %vm4359_vm14, %v9317_v10  ;;  %v8713_v10 = vadd.f32 %v9499_v7, %v12442_v13 }
 0x5f7   : > { %v8007_v55 = vpop.permute.xlu1 %8006  ;;  %v8009_v26 = vpop.permute.xlu0 %8008  ;;  %8922 = vst.msk [vmem:[%s12464_s9 + $0x2c] sm:$0xf] %vm4359_vm14, %v9320_v12  ;;  %v9318_v8 = vpack.c.bf16 %v8760_v51, %v8760_v51 }
 0x5f8   : > { %8074 = vst.msk [vmem:[#allocation5 + $0x74] sm:$0xf] %vm8044_vm0, %v8007_v55  ;;  %8075 = vst.msk [vmem:[#allocation5 + $0x78] sm:$0xf] %vm8044_vm0, %v8009_v26  ;;  %v8704_v61 = vpop.f32.mrf.mxu0 }
 0x5f9   : > { %8920 = vst.msk [vmem:[%s12464_s9 + $0x24] sm:$0xf] %vm4359_vm14, %v9318_v8  ;;  %v8705_v12 = vadd.f32 %v12442_v13, %v8704_v61 }
 0x5fa   : > { %v9500_v1 = vpop.f32.mrf.mxu0 }
 0x5fb   : > { %v8011_v63 = vpop.permute.xlu1 %8010 }
 0x5fc   : > { %8076 = vst.msk [vmem:[#allocation5 + $0x7c] sm:$0xf] %vm8044_vm0, %v8011_v63  ;;  %v8707_v55 = vpop.f32.mrf.mxu0  ;;  %v8716_v63 = vadd.f32 %v9500_v1, %v12442_v13 }
 0x5fd   : > { %v8708_v18 = vadd.f32 %v12442_v13, %v8707_v55 }
 0x5ff   : > { %v9576_v16 = vld [vmem:[#allocation5 + $0x70] sm:$0xff]  }
 0x600   : > { %9471 = vmatprep.mubr.msk.bf16.mxu1 %vm8232_vm6, %v9576_v16 }
 0x603   : > { %v9577_v56 = vld [vmem:[#allocation5 + $0x78] sm:$0xff]  }
 0x604   : > { %9472 = vmatmul.mubr.msk.bf16.gmra.mxu1 %vm8232_vm6, %v9577_v56 }
 0x614   : > { %v9457_v24 = vpop.f32.mrf.mxu1 }
 0x615   : > { %v8376_v0 = vadd.f32 %v9457_v24, %v12449_v19 }
 0x616   : > { %v8367_v48 = vpop.f32.mrf.mxu1 }
 0x617   : > { %v8765_v11 = vadd.f32 %v8681_v22, %v8376_v0  ;;  %v8368_v37 = vadd.f32 %v12449_v19, %v8367_v48 }
 0x618   : > { %v9458_v30 = vpop.f32.mrf.mxu1 }
 0x619   : > { %v9323_v40 = vpack.c.bf16 %v8765_v11, %v8765_v11  ;;  %v8763_v31 = vadd.f32 %v8673_v29, %v8368_v37  ;;  %v8379_v44 = vadd.f32 %v9458_v30, %v12449_v19  ;;  %v9503_v37 = vpop.f32.mrf.mxu0 }
 0x61a   : > { %v8370_v15 = vpop.f32.mrf.mxu1 }
 0x61b   : > { %8925 = vst.msk [vmem:[%s12464_s9 + $0x38] sm:$0xf] %vm4359_vm14, %v9323_v40  ;;  %v9321_v25 = vpack.c.bf16 %v8763_v31, %v8763_v31  ;;  %v8766_v46 = vadd.f32 %v8684_v39, %v8379_v44  ;;  %v8371_v32 = vadd.f32 %v12449_v19, %v8370_v15  ;;  %v8720_v39 = vpop.f32.mrf.mxu0  ;;  %v8729_v40 = vadd.f32 %v9503_v37, %v12442_v13 }
 0x61d   : > { %8923 = vst.msk [vmem:[%s12464_s9 + $0x30] sm:$0xf] %vm4359_vm14, %v9321_v25  ;;  %v9324_v50 = vpack.c.bf16 %v8766_v46, %v8766_v46  ;;  %v8764_v4 = vadd.f32 %v8676_v45, %v8371_v32  ;;  %v9504_v30 = vpop.f32.mrf.mxu0  ;;  %v8721_v45 = vadd.f32 %v12442_v13, %v8720_v39 }
 0x61f   : > { %8926 = vst.msk [vmem:[%s12464_s9 + $0x3c] sm:$0xf] %vm4359_vm14, %v9324_v50  ;;  %v9322_v9 = vpack.c.bf16 %v8764_v4, %v8764_v4  ;;  %v8723_v25 = vpop.f32.mrf.mxu0  ;;  %v8732_v50 = vadd.f32 %v9504_v30, %v12442_v13 }
 0x620   : > { %v8724_v41 = vadd.f32 %v12442_v13, %v8723_v25 }
 0x621   : > { %8924 = vst.msk [vmem:[%s12464_s9 + $0x34] sm:$0xf] %vm4359_vm14, %v9322_v9 }
 0x63c   : > { %v9461_v54 = vpop.f32.mrf.mxu1 }
 0x63d   : > { %v8392_v57 = vadd.f32 %v9461_v54, %v12449_v19 }
 0x63e   : > { %v8383_v36 = vpop.f32.mrf.mxu1 }
 0x63f   : > { %v8769_v58 = vadd.f32 %v8697_v53, %v8392_v57  ;;  %v8384_v59 = vadd.f32 %v12449_v19, %v8383_v36 }
 0x640   : > { %v9462_v47 = vpop.f32.mrf.mxu1 }
 0x641   : > { %v9327_v2 = vpack.c.bf16 %v8769_v58, %v8769_v58  ;;  %v8767_v27 = vadd.f32 %v8689_v14, %v8384_v59  ;;  %v8395_v43 = vadd.f32 %v9462_v47, %v12449_v19  ;;  %v9507_v59 = vpop.f32.mrf.mxu0 }
 0x642   : > { %v8386_v33 = vpop.f32.mrf.mxu1  ;;  %v8745_v47 = vadd.f32 %v9507_v59, %v12442_v13 }
 0x643   : > { %8929 = vst.msk [vmem:[%s12464_s9 + $0x48] sm:$0xf] %vm4359_vm14, %v9327_v2  ;;  %v9325_v5 = vpack.c.bf16 %v8767_v27, %v8767_v27  ;;  %v8770_v3 = vadd.f32 %v8700_v60, %v8395_v43  ;;  %v8387_v6 = vadd.f32 %v12449_v19, %v8386_v33  ;;  %v8736_v60 = vpop.f32.mrf.mxu0 }
 0x644   : > { %v8737_v33 = vadd.f32 %v12442_v13, %v8736_v60 }
 0x645   : > { %8927 = vst.msk [vmem:[%s12464_s9 + $0x40] sm:$0xf] %vm4359_vm14, %v9325_v5  ;;  %v9328_v28 = vpack.c.bf16 %v8770_v3, %v8770_v3  ;;  %v8768_v52 = vadd.f32 %v8692_v35, %v8387_v6  ;;  %v9508_v2 = vpop.f32.mrf.mxu0 }
 0x647   : > { %8930 = vst.msk [vmem:[%s12464_s9 + $0x4c] sm:$0xf] %vm4359_vm14, %v9328_v28  ;;  %v9326_v21 = vpack.c.bf16 %v8768_v52, %v8768_v52  ;;  %v8739_v6 = vpop.f32.mrf.mxu0  ;;  %v8748_v52 = vadd.f32 %v9508_v2, %v12442_v13 }
 0x649   : > { %8928 = vst.msk [vmem:[%s12464_s9 + $0x44] sm:$0xf] %vm4359_vm14, %v9326_v21 }
 0x664   : > { %v9465_v42 = vpop.f32.mrf.mxu1 }
 0x665   : > { %v8408_v62 = vadd.f32 %v9465_v42, %v12449_v19 }
 0x666   : > { %v8399_v51 = vpop.f32.mrf.mxu1 }
 0x667   : > { %v8773_v26 = vadd.f32 %v8713_v10, %v8408_v62  ;;  %v8400_v8 = vadd.f32 %v12449_v19, %v8399_v51  ;;  %v8740_v10 = vadd.f32 %v12442_v13, %v8739_v6 }
 0x668   : > { %v9466_v16 = vpop.f32.mrf.mxu1 }
 0x669   : > { %v9331_v56 = vpack.c.bf16 %v8773_v26, %v8773_v26  ;;  %v8771_v17 = vadd.f32 %v8705_v12, %v8400_v8  ;;  %v8411_v20 = vadd.f32 %v9466_v16, %v12449_v19 }
 0x66a   : > { %v8402_v22 = vpop.f32.mrf.mxu1 }
 0x66b   : > { %8933 = vst.msk [vmem:[%s12464_s9 + $0x58] sm:$0xf] %vm4359_vm14, %v9331_v56  ;;  %v9329_v24 = vpack.c.bf16 %v8771_v17, %v8771_v17  ;;  %v8774_v0 = vadd.f32 %v8716_v63, %v8411_v20  ;;  %v8403_v29 = vadd.f32 %v12449_v19, %v8402_v22 }
 0x66d   : > { %8931 = vst.msk [vmem:[%s12464_s9 + $0x50] sm:$0xf] %vm4359_vm14, %v9329_v24  ;;  %v9332_v48 = vpack.c.bf16 %v8774_v0, %v8774_v0  ;;  %v8772_v34 = vadd.f32 %v8708_v18, %v8403_v29 }
 0x66f   : > { %8934 = vst.msk [vmem:[%s12464_s9 + $0x5c] sm:$0xf] %vm4359_vm14, %v9332_v48  ;;  %v9330_v11 = vpack.c.bf16 %v8772_v34, %v8772_v34 }
 0x671   : > { %8932 = vst.msk [vmem:[%s12464_s9 + $0x54] sm:$0xf] %vm4359_vm14, %v9330_v11 }
 0x694   : > { %v9469_v31 = vpop.f32.mrf.mxu1 }
 0x695   : > { %v8424_v44 = vadd.f32 %v9469_v31, %v12449_v19 }
 0x696   : > { %v8415_v15 = vpop.f32.mrf.mxu1 }
 0x697   : > { %v8777_v46 = vadd.f32 %v8729_v40, %v8424_v44  ;;  %v8416_v32 = vadd.f32 %v12449_v19, %v8415_v15 }
 0x698   : > { %v9470_v4 = vpop.f32.mrf.mxu1 }
 0x699   : > { %v9335_v9 = vpack.c.bf16 %v8777_v46, %v8777_v46  ;;  %v8775_v23 = vadd.f32 %v8721_v45, %v8416_v32  ;;  %v8427_v49 = vadd.f32 %v9470_v4, %v12449_v19 }
 0x69a   : > { %v8418_v53 = vpop.f32.mrf.mxu1 }
 0x69b   : > { %8937 = vst.msk [vmem:[%s12464_s9 + $0x68] sm:$0xf] %vm4359_vm14, %v9335_v9  ;;  %v9333_v54 = vpack.c.bf16 %v8775_v23, %v8775_v23  ;;  %v8778_v57 = vadd.f32 %v8732_v50, %v8427_v49  ;;  %v8419_v14 = vadd.f32 %v12449_v19, %v8418_v53 }
 0x69d   : > { %8935 = vst.msk [vmem:[%s12464_s9 + $0x60] sm:$0xf] %vm4359_vm14, %v9333_v54  ;;  %v9336_v36 = vpack.c.bf16 %v8778_v57, %v8778_v57  ;;  %v8776_v38 = vadd.f32 %v8724_v41, %v8419_v14 }
 0x69f   : > { %8938 = vst.msk [vmem:[%s12464_s9 + $0x6c] sm:$0xf] %vm4359_vm14, %v9336_v36  ;;  %v9334_v58 = vpack.c.bf16 %v8776_v38, %v8776_v38 }
 0x6a1   : > { %8936 = vst.msk [vmem:[%s12464_s9 + $0x64] sm:$0xf] %vm4359_vm14, %v9334_v58 }
 0x6c4   : > { %v9473_v27 = vpop.f32.mrf.mxu1 }
 0x6c5   : > { %v8440_v43 = vadd.f32 %v9473_v27, %v12449_v19 }
 0x6c6   : > { %v8431_v35 = vpop.f32.mrf.mxu1 }
 0x6c7   : > { %v8781_v5 = vadd.f32 %v8745_v47, %v8440_v43  ;;  %v8432_v3 = vadd.f32 %v12449_v19, %v8431_v35 }
 0x6c8   : > { %v9474_v28 = vpop.f32.mrf.mxu1 }
 0x6c9   : > { %v9339_v21 = vpack.c.bf16 %v8781_v5, %v8781_v5  ;;  %v8779_v7 = vadd.f32 %v8737_v33, %v8432_v3  ;;  %v8443_v61 = vadd.f32 %v9474_v28, %v12449_v19 }
 0x6ca   : > { %v8434_v1 = vpop.f32.mrf.mxu1 }
 0x6cb   : > { %8941 = vst.msk [vmem:[%s12464_s9 + $0x78] sm:$0xf] %vm4359_vm14, %v9339_v21  ;;  %v9337_v42 = vpack.c.bf16 %v8779_v7, %v8779_v7  ;;  %v8782_v62 = vadd.f32 %v8748_v52, %v8443_v61  ;;  %v8435_v12 = vadd.f32 %v12449_v19, %v8434_v1 }
 0x6cd   : > { %8939 = vst.msk [vmem:[%s12464_s9 + $0x70] sm:$0xf] %vm4359_vm14, %v9337_v42  ;;  %v9340_v51 = vpack.c.bf16 %v8782_v62, %v8782_v62  ;;  %v8780_v55 = vadd.f32 %v8740_v10, %v8435_v12 }
 0x6cf   : > { %8942 = vst.msk [vmem:[%s12464_s9 + $0x7c] sm:$0xf] %vm4359_vm14, %v9340_v51  ;;  %v9338_v26 = vpack.c.bf16 %v8780_v55, %v8780_v55 }
 0x6d1   : > { %8940 = vst.msk [vmem:[%s12464_s9 + $0x74] sm:$0xf] %vm4359_vm14, %v9338_v26 }
 0x6d2 PF: > { %s17_s24 = sadd.s32 1, %s9617_s24  }
 0x6d3   : > { %p14_p4 = scmp.ge.s32.totalorder %s17_s24, 4  }
 0x6d5   :  { %16 = sbr.rel (!%p14_p4) target bundleno = 1 (0x1), region = 82 }

</bundles_post_ra>
